<compile_context>
chip_gen: v5e
topology: v5e:2x2
jax: 0.10.0
libtpu: 0.0.40
codegen_flags: <defaults>
</compile_context>

<pallas_src>
import jax
import jax.numpy as jnp
from jax.experimental import pallas as pl
from jax.experimental.pallas import tpu as pltpu

BN_EPS = 1e-5
IN_FEATURES = 28 * 28
HIDDEN = (1200, 600, 300, 150)
OUT_FEATURES = 10
_DIMS = (IN_FEATURES,) + HIDDEN + (OUT_FEATURES,)


def _round_up(v, mult=128):
    return ((v + mult - 1) // mult) * mult


_PADDED_DIMS = tuple(_round_up(d) for d in _DIMS)          # (896, 1280, 640, 384, 256, 128)
_VMEM_LIMIT = 48 * 1024 * 1024                             # < v7x 64 MiB physical VMEM


# ------------------------------ Pallas kernel ------------------------------ #

def _ffnn_fused_kernel(x_ref,
                       w1_ref, w2_ref, w3_ref, w4_ref, w5_ref,
                       g1_ref, bt1_ref, g2_ref, bt2_ref,
                       g3_ref, bt3_ref, g4_ref, bt4_ref,
                       b5_ref, o_ref):
    """Whole FFNN forward in one invocation.

    All weights are VMEM-resident; activations stay in-register (f32) across layers.
    Each matmul casts the f32 activation to the weight dtype (bf16 weights -> bf16 MXU
    with f32 accumulation); BN/ReLU epilogue math is kept in f32 on every generation.
    """

    def linear_bn_relu(h, w_ref, g_ref, bt_ref):
        # fc bias omitted: a bias added right before training-mode BatchNorm cancels
        # exactly with the batch mean, so dropping it is mathematically identical.
        z = jnp.dot(h.astype(w_ref.dtype), w_ref[...],
                    preferred_element_type=jnp.float32)           # (M, N) f32
        m = z.shape[0]
        mean = jnp.sum(z, axis=0, keepdims=True) / m
        var = jnp.sum((z - mean) ** 2, axis=0, keepdims=True) / m  # biased variance
        y = (z - mean) * jax.lax.rsqrt(var + BN_EPS) * g_ref[...] + bt_ref[...]
        return jnp.maximum(y, 0.0)

    h = x_ref[...].astype(jnp.float32)
    h = linear_bn_relu(h, w1_ref, g1_ref, bt1_ref)
    # TODO(synk): training-mode isotropic noise (out += N(0, 0.5)) not implemented here.
    h = linear_bn_relu(h, w2_ref, g2_ref, bt2_ref)
    h = linear_bn_relu(h, w3_ref, g3_ref, bt3_ref)
    h = linear_bn_relu(h, w4_ref, g4_ref, bt4_ref)

    z5 = jnp.dot(h.astype(w5_ref.dtype), w5_ref[...],
                 preferred_element_type=jnp.float32) + b5_ref[...]
    o_ref[...] = z5.astype(o_ref.dtype)


# ------------------------------ Params helpers ------------------------------ #

def init_ffnn_params(key):
    """nn.Linear-style init; BN gamma/beta slightly randomized so the test is non-trivial."""
    params = {}
    keys = jax.random.split(key, 5)
    for i in range(5):
        cin, cout = _DIMS[i], _DIMS[i + 1]
        kw, kb, kg, kbt = jax.random.split(keys[i], 4)
        bound = cin ** -0.5
        params[f"fc{i+1}_w"] = jax.random.uniform(
            kw, (cin, cout), jnp.float32, -bound, bound)
        params[f"fc{i+1}_b"] = jax.random.uniform(
            kb, (cout,), jnp.float32, -bound, bound)
        if i < 4:
            params[f"bn{i+1}_g"] = 1.0 + 0.1 * jax.random.normal(kg, (cout,), jnp.float32)
            params[f"bn{i+1}_b"] = 0.1 * jax.random.normal(kbt, (cout,), jnp.float32)
    return params


def pad_ffnn_params(params, weight_dtype=jnp.float32):
    """Zero-pad feature dims to multiples of 128 once; drop redundant pre-BN fc biases."""
    padded = {}
    for i in range(5):
        cin, cout = _DIMS[i], _DIMS[i + 1]
        kp, npad = _PADDED_DIMS[i], _PADDED_DIMS[i + 1]
        padded[f"fc{i+1}_w"] = jnp.pad(
            params[f"fc{i+1}_w"], ((0, kp - cin), (0, npad - cout))).astype(weight_dtype)
        if i < 4:
            # fc1..fc4 biases intentionally omitted (cancel with the BN batch mean).
            padded[f"bn{i+1}_g"] = jnp.pad(
                params[f"bn{i+1}_g"], (0, npad - cout),
                constant_values=1.0).reshape(1, npad).astype(jnp.float32)
            padded[f"bn{i+1}_b"] = jnp.pad(
                params[f"bn{i+1}_b"], (0, npad - cout)).reshape(1, npad).astype(jnp.float32)
        else:
            padded["fc5_b"] = jnp.pad(
                params["fc5_b"], (0, npad - cout)).reshape(1, npad).astype(jnp.float32)
    return padded


def _vmem_estimate_bytes(m, weight_dtype):
    wsize = jnp.dtype(weight_dtype).itemsize
    weights = sum(_PADDED_DIMS[i] * _PADDED_DIMS[i + 1] for i in range(5)) * wsize
    vectors = (2 * sum(_PADDED_DIMS[i + 1] for i in range(4)) + _PADDED_DIMS[5]) * 4
    x_bytes = m * _PADDED_DIMS[0] * 4
    act_bytes = 4 * m * max(_PADDED_DIMS) * 4      # a few live f32 activation temporaries
    out_bytes = m * _PADDED_DIMS[5] * 4
    return weights + vectors + x_bytes + act_bytes + out_bytes


# ------------------------------- FFNN forward ------------------------------ #

def ffnn_forward(x, padded_params, weight_dtype=jnp.float32):
    """FFNN.forward (training-mode BN, noise omitted).  x: (B, 1, 28, 28) or (B, 784)."""
    m = x.shape[0]
    flat = x.reshape(m, -1).astype(jnp.float32)                 # X.view(X.size(0), -1)
    assert flat.shape[1] == IN_FEATURES, flat.shape
    flat = jnp.pad(flat, ((0, 0), (0, _PADDED_DIMS[0] - IN_FEATURES)))

    est = _vmem_estimate_bytes(m, weight_dtype)
    # TODO(synk): large batches need an M-tiled, two-pass-BN kernel; guard instead of spilling.
    assert est <= _VMEM_LIMIT - 8 * 1024 * 1024, (
        f"batch {m}: ~{est / 2**20:.1f} MiB working set exceeds the single-call VMEM budget")

    args = (flat,
            padded_params["fc1_w"], padded_params["fc2_w"], padded_params["fc3_w"],
            padded_params["fc4_w"], padded_params["fc5_w"],
            padded_params["bn1_g"], padded_params["bn1_b"],
            padded_params["bn2_g"], padded_params["bn2_b"],
            padded_params["bn3_g"], padded_params["bn3_b"],
            padded_params["bn4_g"], padded_params["bn4_b"],
            padded_params["fc5_b"])

    vmem = pl.BlockSpec(memory_space=pltpu.MemorySpace.VMEM)
    wsize = jnp.dtype(weight_dtype).itemsize
    wparams = sum(_PADDED_DIMS[i] * _PADDED_DIMS[i + 1] for i in range(5))
    out = pl.pallas_call(
        _ffnn_fused_kernel,
        out_shape=jax.ShapeDtypeStruct((m, _PADDED_DIMS[5]), jnp.float32),
        in_specs=[vmem] * len(args),
        out_specs=vmem,
        compiler_params=pltpu.CompilerParams(vmem_limit_bytes=_VMEM_LIMIT),
        cost_estimate=pl.CostEstimate(
            flops=2 * m * wparams,
            transcendentals=sum(_PADDED_DIMS[i + 1] for i in range(4)),
            bytes_accessed=wparams * wsize
            + m * (_PADDED_DIMS[0] + _PADDED_DIMS[5]) * 4),
    )(*args)
    return out[:, :OUT_FEATURES]


# ----------------------------- pure-JAX reference --------------------------- #

def _ffnn_ref(x, params):
    out = x.reshape(x.shape[0], -1)
    for i in range(1, 5):
        z = out @ params[f"fc{i}_w"] + params[f"fc{i}_b"]
        mean = jnp.mean(z, axis=0, keepdims=True)
        var = jnp.mean((z - mean) ** 2, axis=0, keepdims=True)
        out = jnp.maximum(
            (z - mean) * jax.lax.rsqrt(var + BN_EPS) * params[f"bn{i}_g"]
            + params[f"bn{i}_b"], 0.0)
    return out @ params["fc5_w"] + params["fc5_b"]


# ----------------------------------- main ----------------------------------- #

if __name__ == "__main__":
    key = jax.random.PRNGKey(0)
    kx, kp = jax.random.split(key)

    B = 8                                              # multiple of 8 for sublane alignment
    x = jax.random.normal(kx, (B, 1, 28, 28), jnp.float32)     # MNIST-shaped input

    params = init_ffnn_params(kp)
    ref = _ffnn_ref(x, params)

    # f32 weights: tight correctness check against the pure-JAX reference.
    padded_f32 = pad_ffnn_params(params, jnp.float32)
    out = jax.block_until_ready(ffnn_forward(x, padded_f32, weight_dtype=jnp.float32))
    assert out.shape == (B, OUT_FEATURES), out.shape
    assert jnp.allclose(out, ref, rtol=2e-3, atol=2e-3), float(jnp.max(jnp.abs(out - ref)))

    # bf16 weights (default recommended on v6e/v7x): halves weight HBM/VMEM traffic,
    # f32 accumulation + f32 BN epilogue -> loose-tolerance check vs the f32 reference.
    padded_bf16 = pad_ffnn_params(params, jnp.bfloat16)
    out_bf16 = jax.block_until_ready(ffnn_forward(x, padded_bf16, weight_dtype=jnp.bfloat16))
    assert out_bf16.shape == (B, OUT_FEATURES)
    assert bool(jnp.all(jnp.isfinite(out_bf16)))
    assert jnp.allclose(out_bf16, ref, rtol=0.1, atol=0.35), float(
        jnp.max(jnp.abs(out_bf16 - ref)))

    print("KERNEL_OK")
</pallas_src>

<mosaic_0001>
module attributes {stable_mosaic.version = 11 : i64} {
  func.func @_ffnn_fused_kernel(%arg0: memref<8x896xf32, #tpu.memory_space<vmem>>, %arg1: memref<896x1280xf32, #tpu.memory_space<vmem>>, %arg2: memref<1280x640xf32, #tpu.memory_space<vmem>>, %arg3: memref<640x384xf32, #tpu.memory_space<vmem>>, %arg4: memref<384x256xf32, #tpu.memory_space<vmem>>, %arg5: memref<256x128xf32, #tpu.memory_space<vmem>>, %arg6: memref<1x1280xf32, #tpu.memory_space<vmem>>, %arg7: memref<1x1280xf32, #tpu.memory_space<vmem>>, %arg8: memref<1x640xf32, #tpu.memory_space<vmem>>, %arg9: memref<1x640xf32, #tpu.memory_space<vmem>>, %arg10: memref<1x384xf32, #tpu.memory_space<vmem>>, %arg11: memref<1x384xf32, #tpu.memory_space<vmem>>, %arg12: memref<1x256xf32, #tpu.memory_space<vmem>>, %arg13: memref<1x256xf32, #tpu.memory_space<vmem>>, %arg14: memref<1x128xf32, #tpu.memory_space<vmem>>, %arg15: memref<8x128xf32, #tpu.memory_space<vmem>>) attributes {dimension_semantics = [], scalar_prefetch = 0 : i64, scratch_operands = 0 : i64, tpu.core_type = #tpu.core_type<tc>} {
    %c0 = arith.constant 0 : index
    %c0_0 = arith.constant 0 : index
    %0 = vector.load %arg0[%c0, %c0_0] : memref<8x896xf32, #tpu.memory_space<vmem>>, vector<8x896xf32>
    %c0_1 = arith.constant 0 : index
    %c0_2 = arith.constant 0 : index
    %1 = vector.load %arg1[%c0_1, %c0_2] : memref<896x1280xf32, #tpu.memory_space<vmem>>, vector<896x1280xf32>
    %cst = arith.constant dense<0.000000e+00> : vector<8x1280xf32>
    %2 = tpu.matmul %0, %1, %cst {dimension_numbers = #tpu.dot_dimension_numbers<[1], [0], [0], [1], [0, 0, 1, 1], [], []>} : vector<8x896xf32>, vector<896x1280xf32>, vector<8x1280xf32> -> vector<8x1280xf32>
    %cst_3 = arith.constant dense<0.000000e+00> : vector<1280xf32>
    %3 = vector.multi_reduction <add>, %2, %cst_3 [0] : vector<8x1280xf32> to vector<1280xf32>
    %4 = vector.shape_cast %3 : vector<1280xf32> to vector<1x1280xf32>
    %cst_4 = arith.constant 8.000000e+00 : f32
    %5 = vector.broadcast %cst_4 : f32 to vector<1x1280xf32>
    %6 = arith.divf %4, %5 : vector<1x1280xf32>
    %7 = vector.broadcast %6 : vector<1x1280xf32> to vector<8x1280xf32>
    %8 = arith.subf %2, %7 : vector<8x1280xf32>
    %9 = arith.mulf %8, %8 : vector<8x1280xf32>
    %cst_5 = arith.constant dense<0.000000e+00> : vector<1280xf32>
    %10 = vector.multi_reduction <add>, %9, %cst_5 [0] : vector<8x1280xf32> to vector<1280xf32>
    %11 = vector.shape_cast %10 : vector<1280xf32> to vector<1x1280xf32>
    %cst_6 = arith.constant 8.000000e+00 : f32
    %12 = vector.broadcast %cst_6 : f32 to vector<1x1280xf32>
    %13 = arith.divf %11, %12 : vector<1x1280xf32>
    %14 = vector.broadcast %6 : vector<1x1280xf32> to vector<8x1280xf32>
    %15 = arith.subf %2, %14 : vector<8x1280xf32>
    %cst_7 = arith.constant 9.99999974E-6 : f32
    %16 = vector.broadcast %cst_7 : f32 to vector<1x1280xf32>
    %17 = arith.addf %13, %16 : vector<1x1280xf32>
    %18 = math.rsqrt %17 : vector<1x1280xf32>
    %19 = vector.broadcast %18 : vector<1x1280xf32> to vector<8x1280xf32>
    %20 = arith.mulf %15, %19 : vector<8x1280xf32>
    %c0_8 = arith.constant 0 : index
    %c0_9 = arith.constant 0 : index
    %21 = vector.load %arg6[%c0_8, %c0_9] : memref<1x1280xf32, #tpu.memory_space<vmem>>, vector<1x1280xf32>
    %22 = vector.broadcast %21 : vector<1x1280xf32> to vector<8x1280xf32>
    %23 = arith.mulf %20, %22 : vector<8x1280xf32>
    %c0_10 = arith.constant 0 : index
    %c0_11 = arith.constant 0 : index
    %24 = vector.load %arg7[%c0_10, %c0_11] : memref<1x1280xf32, #tpu.memory_space<vmem>>, vector<1x1280xf32>
    %25 = vector.broadcast %24 : vector<1x1280xf32> to vector<8x1280xf32>
    %26 = arith.addf %23, %25 : vector<8x1280xf32>
    %cst_12 = arith.constant 0.000000e+00 : f32
    %27 = vector.broadcast %cst_12 : f32 to vector<8x1280xf32>
    %28 = arith.maximumf %26, %27 : vector<8x1280xf32>
    %c0_13 = arith.constant 0 : index
    %c0_14 = arith.constant 0 : index
    %29 = vector.load %arg2[%c0_13, %c0_14] : memref<1280x640xf32, #tpu.memory_space<vmem>>, vector<1280x640xf32>
    %cst_15 = arith.constant dense<0.000000e+00> : vector<8x640xf32>
    %30 = tpu.matmul %28, %29, %cst_15 {dimension_numbers = #tpu.dot_dimension_numbers<[1], [0], [0], [1], [0, 0, 1, 1], [], []>} : vector<8x1280xf32>, vector<1280x640xf32>, vector<8x640xf32> -> vector<8x640xf32>
    %cst_16 = arith.constant dense<0.000000e+00> : vector<640xf32>
    %31 = vector.multi_reduction <add>, %30, %cst_16 [0] : vector<8x640xf32> to vector<640xf32>
    %32 = vector.shape_cast %31 : vector<640xf32> to vector<1x640xf32>
    %cst_17 = arith.constant 8.000000e+00 : f32
    %33 = vector.broadcast %cst_17 : f32 to vector<1x640xf32>
    %34 = arith.divf %32, %33 : vector<1x640xf32>
    %35 = vector.broadcast %34 : vector<1x640xf32> to vector<8x640xf32>
    %36 = arith.subf %30, %35 : vector<8x640xf32>
    %37 = arith.mulf %36, %36 : vector<8x640xf32>
    %cst_18 = arith.constant dense<0.000000e+00> : vector<640xf32>
    %38 = vector.multi_reduction <add>, %37, %cst_18 [0] : vector<8x640xf32> to vector<640xf32>
    %39 = vector.shape_cast %38 : vector<640xf32> to vector<1x640xf32>
    %cst_19 = arith.constant 8.000000e+00 : f32
    %40 = vector.broadcast %cst_19 : f32 to vector<1x640xf32>
    %41 = arith.divf %39, %40 : vector<1x640xf32>
    %42 = vector.broadcast %34 : vector<1x640xf32> to vector<8x640xf32>
    %43 = arith.subf %30, %42 : vector<8x640xf32>
    %cst_20 = arith.constant 9.99999974E-6 : f32
    %44 = vector.broadcast %cst_20 : f32 to vector<1x640xf32>
    %45 = arith.addf %41, %44 : vector<1x640xf32>
    %46 = math.rsqrt %45 : vector<1x640xf32>
    %47 = vector.broadcast %46 : vector<1x640xf32> to vector<8x640xf32>
    %48 = arith.mulf %43, %47 : vector<8x640xf32>
    %c0_21 = arith.constant 0 : index
    %c0_22 = arith.constant 0 : index
    %49 = vector.load %arg8[%c0_21, %c0_22] : memref<1x640xf32, #tpu.memory_space<vmem>>, vector<1x640xf32>
    %50 = vector.broadcast %49 : vector<1x640xf32> to vector<8x640xf32>
    %51 = arith.mulf %48, %50 : vector<8x640xf32>
    %c0_23 = arith.constant 0 : index
    %c0_24 = arith.constant 0 : index
    %52 = vector.load %arg9[%c0_23, %c0_24] : memref<1x640xf32, #tpu.memory_space<vmem>>, vector<1x640xf32>
    %53 = vector.broadcast %52 : vector<1x640xf32> to vector<8x640xf32>
    %54 = arith.addf %51, %53 : vector<8x640xf32>
    %cst_25 = arith.constant 0.000000e+00 : f32
    %55 = vector.broadcast %cst_25 : f32 to vector<8x640xf32>
    %56 = arith.maximumf %54, %55 : vector<8x640xf32>
    %c0_26 = arith.constant 0 : index
    %c0_27 = arith.constant 0 : index
    %57 = vector.load %arg3[%c0_26, %c0_27] : memref<640x384xf32, #tpu.memory_space<vmem>>, vector<640x384xf32>
    %cst_28 = arith.constant dense<0.000000e+00> : vector<8x384xf32>
    %58 = tpu.matmul %56, %57, %cst_28 {dimension_numbers = #tpu.dot_dimension_numbers<[1], [0], [0], [1], [0, 0, 1, 1], [], []>} : vector<8x640xf32>, vector<640x384xf32>, vector<8x384xf32> -> vector<8x384xf32>
    %cst_29 = arith.constant dense<0.000000e+00> : vector<384xf32>
    %59 = vector.multi_reduction <add>, %58, %cst_29 [0] : vector<8x384xf32> to vector<384xf32>
    %60 = vector.shape_cast %59 : vector<384xf32> to vector<1x384xf32>
    %cst_30 = arith.constant 8.000000e+00 : f32
    %61 = vector.broadcast %cst_30 : f32 to vector<1x384xf32>
    %62 = arith.divf %60, %61 : vector<1x384xf32>
    %63 = vector.broadcast %62 : vector<1x384xf32> to vector<8x384xf32>
    %64 = arith.subf %58, %63 : vector<8x384xf32>
    %65 = arith.mulf %64, %64 : vector<8x384xf32>
    %cst_31 = arith.constant dense<0.000000e+00> : vector<384xf32>
    %66 = vector.multi_reduction <add>, %65, %cst_31 [0] : vector<8x384xf32> to vector<384xf32>
    %67 = vector.shape_cast %66 : vector<384xf32> to vector<1x384xf32>
    %cst_32 = arith.constant 8.000000e+00 : f32
    %68 = vector.broadcast %cst_32 : f32 to vector<1x384xf32>
    %69 = arith.divf %67, %68 : vector<1x384xf32>
    %70 = vector.broadcast %62 : vector<1x384xf32> to vector<8x384xf32>
    %71 = arith.subf %58, %70 : vector<8x384xf32>
    %cst_33 = arith.constant 9.99999974E-6 : f32
    %72 = vector.broadcast %cst_33 : f32 to vector<1x384xf32>
    %73 = arith.addf %69, %72 : vector<1x384xf32>
    %74 = math.rsqrt %73 : vector<1x384xf32>
    %75 = vector.broadcast %74 : vector<1x384xf32> to vector<8x384xf32>
    %76 = arith.mulf %71, %75 : vector<8x384xf32>
    %c0_34 = arith.constant 0 : index
    %c0_35 = arith.constant 0 : index
    %77 = vector.load %arg10[%c0_34, %c0_35] : memref<1x384xf32, #tpu.memory_space<vmem>>, vector<1x384xf32>
    %78 = vector.broadcast %77 : vector<1x384xf32> to vector<8x384xf32>
    %79 = arith.mulf %76, %78 : vector<8x384xf32>
    %c0_36 = arith.constant 0 : index
    %c0_37 = arith.constant 0 : index
    %80 = vector.load %arg11[%c0_36, %c0_37] : memref<1x384xf32, #tpu.memory_space<vmem>>, vector<1x384xf32>
    %81 = vector.broadcast %80 : vector<1x384xf32> to vector<8x384xf32>
    %82 = arith.addf %79, %81 : vector<8x384xf32>
    %cst_38 = arith.constant 0.000000e+00 : f32
    %83 = vector.broadcast %cst_38 : f32 to vector<8x384xf32>
    %84 = arith.maximumf %82, %83 : vector<8x384xf32>
    %c0_39 = arith.constant 0 : index
    %c0_40 = arith.constant 0 : index
    %85 = vector.load %arg4[%c0_39, %c0_40] : memref<384x256xf32, #tpu.memory_space<vmem>>, vector<384x256xf32>
    %cst_41 = arith.constant dense<0.000000e+00> : vector<8x256xf32>
    %86 = tpu.matmul %84, %85, %cst_41 {dimension_numbers = #tpu.dot_dimension_numbers<[1], [0], [0], [1], [0, 0, 1, 1], [], []>} : vector<8x384xf32>, vector<384x256xf32>, vector<8x256xf32> -> vector<8x256xf32>
    %cst_42 = arith.constant dense<0.000000e+00> : vector<256xf32>
    %87 = vector.multi_reduction <add>, %86, %cst_42 [0] : vector<8x256xf32> to vector<256xf32>
    %88 = vector.shape_cast %87 : vector<256xf32> to vector<1x256xf32>
    %cst_43 = arith.constant 8.000000e+00 : f32
    %89 = vector.broadcast %cst_43 : f32 to vector<1x256xf32>
    %90 = arith.divf %88, %89 : vector<1x256xf32>
    %91 = vector.broadcast %90 : vector<1x256xf32> to vector<8x256xf32>
    %92 = arith.subf %86, %91 : vector<8x256xf32>
    %93 = arith.mulf %92, %92 : vector<8x256xf32>
    %cst_44 = arith.constant dense<0.000000e+00> : vector<256xf32>
    %94 = vector.multi_reduction <add>, %93, %cst_44 [0] : vector<8x256xf32> to vector<256xf32>
    %95 = vector.shape_cast %94 : vector<256xf32> to vector<1x256xf32>
    %cst_45 = arith.constant 8.000000e+00 : f32
    %96 = vector.broadcast %cst_45 : f32 to vector<1x256xf32>
    %97 = arith.divf %95, %96 : vector<1x256xf32>
    %98 = vector.broadcast %90 : vector<1x256xf32> to vector<8x256xf32>
    %99 = arith.subf %86, %98 : vector<8x256xf32>
    %cst_46 = arith.constant 9.99999974E-6 : f32
    %100 = vector.broadcast %cst_46 : f32 to vector<1x256xf32>
    %101 = arith.addf %97, %100 : vector<1x256xf32>
    %102 = math.rsqrt %101 : vector<1x256xf32>
    %103 = vector.broadcast %102 : vector<1x256xf32> to vector<8x256xf32>
    %104 = arith.mulf %99, %103 : vector<8x256xf32>
    %c0_47 = arith.constant 0 : index
    %c0_48 = arith.constant 0 : index
    %105 = vector.load %arg12[%c0_47, %c0_48] : memref<1x256xf32, #tpu.memory_space<vmem>>, vector<1x256xf32>
    %106 = vector.broadcast %105 : vector<1x256xf32> to vector<8x256xf32>
    %107 = arith.mulf %104, %106 : vector<8x256xf32>
    %c0_49 = arith.constant 0 : index
    %c0_50 = arith.constant 0 : index
    %108 = vector.load %arg13[%c0_49, %c0_50] : memref<1x256xf32, #tpu.memory_space<vmem>>, vector<1x256xf32>
    %109 = vector.broadcast %108 : vector<1x256xf32> to vector<8x256xf32>
    %110 = arith.addf %107, %109 : vector<8x256xf32>
    %cst_51 = arith.constant 0.000000e+00 : f32
    %111 = vector.broadcast %cst_51 : f32 to vector<8x256xf32>
    %112 = arith.maximumf %110, %111 : vector<8x256xf32>
    %c0_52 = arith.constant 0 : index
    %c0_53 = arith.constant 0 : index
    %113 = vector.load %arg5[%c0_52, %c0_53] : memref<256x128xf32, #tpu.memory_space<vmem>>, vector<256x128xf32>
    %cst_54 = arith.constant dense<0.000000e+00> : vector<8x128xf32>
    %114 = tpu.matmul %112, %113, %cst_54 {dimension_numbers = #tpu.dot_dimension_numbers<[1], [0], [0], [1], [0, 0, 1, 1], [], []>} : vector<8x256xf32>, vector<256x128xf32>, vector<8x128xf32> -> vector<8x128xf32>
    %c0_55 = arith.constant 0 : index
    %c0_56 = arith.constant 0 : index
    %115 = vector.load %arg14[%c0_55, %c0_56] : memref<1x128xf32, #tpu.memory_space<vmem>>, vector<1x128xf32>
    %116 = vector.broadcast %115 : vector<1x128xf32> to vector<8x128xf32>
    %117 = arith.addf %114, %116 : vector<8x128xf32>
    %c0_57 = arith.constant 0 : index
    %c0_58 = arith.constant 0 : index
    %118 = vector.load %arg15[%c0_57, %c0_58] : memref<8x128xf32, #tpu.memory_space<vmem>>, vector<8x128xf32>
    tpu.vector_store %arg15[%c0_57, %c0_58], %117 {strides = array<i32>} : memref<8x128xf32, #tpu.memory_space<vmem>>, vector<8x128xf32>,
    return
  }
}

</mosaic_0001>

<bundles_post_ra>
// kernel: tpu_custom_call.1
= control target key start
LH: loop header
LB: loop body
LE: loop exit
PB: predicated region body
PF: predicated region fallthrough
CT: control target
= control target key end

     0   :  { %20 = vsyncpa [#allocation3], 0  ;;  %s7612_s0 = inlined_call_operand.hbm [shape: f32[8,896], index: 0, kind: input, shape index: {}]   ;;  %s7613_s1 = inlined_call_operand.hbm [shape: f32[896,1280], index: 1, kind: input, shape index: {}]   ;;  %s7614_s2 = inlined_call_operand.hbm [shape: f32[1280,640], index: 2, kind: input, shape index: {}]   ;;  %s7615_s3 = inlined_call_operand.hbm [shape: f32[640,384], index: 3, kind: input, shape index: {}]   ;;  %s7616_s4 = inlined_call_operand.hbm [shape: f32[384,256], index: 4, kind: input, shape index: {}]   ;;  %s7617_s5 = inlined_call_operand.hbm [shape: f32[256,128], index: 5, kind: input, shape index: {}]   ;;  %s7618_s6 = inlined_call_operand.hbm [shape: f32[1,1280], index: 6, kind: input, shape index: {}]   ;;  %s7619_s7 = inlined_call_operand.hbm [shape: f32[1,1280], index: 7, kind: input, shape index: {}]   ;;  %s7620_s8 = inlined_call_operand.hbm [shape: f32[1,640], index: 8, kind: input, shape index: {}]   ;;  %s7621_s9 = inlined_call_operand.hbm [shape: f32[1,640], index: 9, kind: input, shape index: {}]   ;;  %s7622_s10 = inlined_call_operand.hbm [shape: f32[1,384], index: 10, kind: input, shape index: {}]   ;;  %s7623_s11 = inlined_call_operand.hbm [shape: f32[1,384], index: 11, kind: input, shape index: {}]   ;;  %s7624_s12 = inlined_call_operand.hbm [shape: f32[1,256], index: 12, kind: input, shape index: {}]   ;;  %s7625_s13 = inlined_call_operand.hbm [shape: f32[1,256], index: 13, kind: input, shape index: {}]   ;;  %s7626_s14 = inlined_call_operand.hbm [shape: f32[1,128], index: 14, kind: input, shape index: {}]   ;;  %s7627_s15 = inlined_call_operand.hbm [shape: f32[8,128], index: 15, kind: output, shape index: {}]  }
   0x1   :  { %21 = vsyncpa [#allocation6], 0 }
   0x2   :  { %22 = vsyncpa [#allocation9], 0 }
   0x3   :  { %23 = vsyncpa [#allocation12], 0 }
   0x4   :  { %24 = vsyncpa [#allocation15], 0 }
   0x5   :  { %25 = vsyncpa [#allocation18], 0 }
   0x6   :  { %26 = vsyncpa [#allocation21], 0 }
   0x7   :  { %27 = vsyncpa [#allocation24], 0  ;;  %s44_s20 = sshll.u32 %s7613_s1, 4  ;;  %s45_s20 = int_to_ptr.hbm [resolvable:$true] %s44_s20 }
   0x8   :  { %28 = vsyncpa [#allocation4], 0  ;;  %s6670_s21 = smov [#allocation5]   ;;  %s70_s25 = sshll.u32 %s7615_s3, 4  ;;  %s71_s25 = int_to_ptr.hbm [resolvable:$true] %s70_s25 }
   0x9   :  { %s46_s22 = sshll.u32 %s6670_s21, 4  ;;  %s6671_s26 = smov 1280   ;;  %s47_s22 = int_to_ptr.vmem [resolvable:$true] %s46_s22 }
   0xa   :  { %s6672_s27 = smov 80   ;;  %s6673_s28 = smov [#allocation8]  }
   0xb   :  { %52 = dma.hbm_to_vmem [thread:$0]  %s45_s20, 143360, %s47_s22, [#allocation6], %s6671_s26, %s6671_s26, %s6672_s27  }
   0xc   :  { %s72_s29 = sshll.u32 %s6673_s28, 4  ;;  %s6674_s30 = smov 384   ;;  %s73_s29 = int_to_ptr.vmem [resolvable:$true] %s72_s29 }
   0xd   :  { %s6675_s16 = smov 24   ;;  %s96_s18 = sshll.u32 %s7617_s5, 4  ;;  %s97_s18 = int_to_ptr.hbm [resolvable:$true] %s96_s18 }
   0xe   :  { %78 = dma.hbm_to_vmem [thread:$0]  %s71_s25, 30720, %s73_s29, [#allocation9], %s6674_s30, %s6674_s30, %s6675_s16  }
   0xf   :  { %s6676_s19 = smov [#allocation11]   ;;  %s121_s24 = sshll.u32 %s7619_s7, 4  ;;  %s122_s24 = int_to_ptr.hbm [resolvable:$true] %s121_s24 }
  0x10   :  { %s98_s21 = sshll.u32 %s6676_s19, 4  ;;  %s6677_s20 = smov 128   ;;  %s99_s21 = int_to_ptr.vmem [resolvable:$true] %s98_s21 }
  0x11   :  { %s6678_s22 = smov 8   ;;  %s6679_s26 = smov [#allocation14]  }
  0x12   :  { %104 = dma.hbm_to_vmem [thread:$0]  %s97_s18, 4096, %s99_s21, [#allocation12], %s6677_s20, %s6677_s20, %s6678_s22  }
  0x13   :  { %s123_s27 = sshll.u32 %s6679_s26, 4  ;;  %s143_s29 = sshll.u32 %s7621_s9, 4  ;;  %s124_s27 = int_to_ptr.vmem [resolvable:$true] %s123_s27  ;;  %s144_s29 = int_to_ptr.hbm [resolvable:$true] %s143_s29 }
  0x14   :  { %126 = dma.hbm_to_vmem [thread:$0]  %s122_s24, 160, %s124_s27, [#allocation15]  }
  0x15   :  { %s165_s16 = sshll.u32 %s7623_s11, 4  ;;  %s6680_s1 = smov [#allocation17]   ;;  %s166_s16 = int_to_ptr.hbm [resolvable:$true] %s165_s16 }
  0x16   :  { %s145_s17 = sshll.u32 %s6680_s1, 4  ;;  %s6681_s7 = smov [#allocation20]   ;;  %s146_s17 = int_to_ptr.vmem [resolvable:$true] %s145_s17 }
  0x17   :  { %148 = dma.hbm_to_vmem [thread:$0]  %s144_s29, 80, %s146_s17, [#allocation18]  }
  0x18   :  { %s167_s18 = sshll.u32 %s6681_s7, 4  ;;  %s187_s23 = sshll.u32 %s7625_s13, 4  ;;  %s168_s18 = int_to_ptr.vmem [resolvable:$true] %s167_s18  ;;  %s188_s23 = int_to_ptr.hbm [resolvable:$true] %s187_s23 }
  0x19   :  { %170 = dma.hbm_to_vmem [thread:$0]  %s166_s16, 48, %s168_s18, [#allocation21]  }
  0x1a   :  { %s34_s24 = sshll.u32 %s7612_s0, 4  ;;  %s6682_s20 = smov [#allocation23]   ;;  %s35_s24 = int_to_ptr.hbm [resolvable:$true] %s34_s24 }
  0x1b   :  { %s189_s11 = sshll.u32 %s6682_s20, 4  ;;  %s6683_s22 = smov [#allocation2]   ;;  %s190_s11 = int_to_ptr.vmem [resolvable:$true] %s189_s11 }
  0x1c   :  { %192 = dma.hbm_to_vmem [thread:$0]  %s188_s23, 32, %s190_s11, [#allocation24]  }
  0x1d   :  { %s36_s26 = sshll.u32 %s6683_s22, 4  ;;  %s57_s25 = sshll.u32 %s7614_s2, 4  ;;  %s37_s26 = int_to_ptr.vmem [resolvable:$true] %s36_s26  ;;  %s58_s25 = int_to_ptr.hbm [resolvable:$true] %s57_s25 }
  0x1e   :  { %39 = dma.hbm_to_vmem [thread:$0]  %s35_s24, 896, %s37_s26, [#allocation3]  }
  0x1f   :  { %s6684_s13 = smov [#allocation7]   ;;  %s83_s0 = sshll.u32 %s7616_s4, 4  ;;  %s84_s0 = int_to_ptr.hbm [resolvable:$true] %s83_s0 }
  0x20   :  { %s59_s29 = sshll.u32 %s6684_s13, 4  ;;  %s6685_s16 = smov 640   ;;  %s60_s29 = int_to_ptr.vmem [resolvable:$true] %s59_s29 }
  0x21   :  { %s6686_s1 = smov 40   ;;  %s6687_s17 = smov [#allocation10]  }
  0x22   :  { %65 = dma.hbm_to_vmem [thread:$0]  %s58_s25, 102400, %s60_s29, [#allocation6], %s6685_s16, %s6685_s16, %s6686_s1  }
  0x23   :  { %s85_s7 = sshll.u32 %s6687_s17, 4  ;;  %s6688_s18 = smov 256   ;;  %s86_s7 = int_to_ptr.vmem [resolvable:$true] %s85_s7 }
  0x24   :  { %s6689_s19 = smov 16   ;;  %s110_s23 = sshll.u32 %s7618_s6, 4  ;;  %s111_s23 = int_to_ptr.hbm [resolvable:$true] %s110_s23 }
  0x25   :  { %91 = dma.hbm_to_vmem [thread:$0]  %s84_s0, 12288, %s86_s7, [#allocation9], %s6688_s18, %s6688_s18, %s6689_s19  }
  0x26   :  { %s6690_s9 = smov [#allocation13]   ;;  %s132_s20 = sshll.u32 %s7620_s8, 4  ;;  %s133_s20 = int_to_ptr.hbm [resolvable:$true] %s132_s20 }
  0x27   :  { %s112_s3 = sshll.u32 %s6690_s9, 4  ;;  %s6691_s11 = smov [#allocation16]   ;;  %s113_s3 = int_to_ptr.vmem [resolvable:$true] %s112_s3 }
  0x28   :  { %115 = dma.hbm_to_vmem [thread:$0]  %s111_s23, 160, %s113_s3, [#allocation12]  }
  0x29   :  { %s134_s22 = sshll.u32 %s6691_s11, 4  ;;  %s154_s28 = sshll.u32 %s7622_s10, 4  ;;  %s135_s22 = int_to_ptr.vmem [resolvable:$true] %s134_s22  ;;  %s155_s28 = int_to_ptr.hbm [resolvable:$true] %s154_s28 }
  0x2a   :  { %137 = dma.hbm_to_vmem [thread:$0]  %s133_s20, 80, %s135_s22, [#allocation15]  }
  0x2b   :  { %s176_s13 = sshll.u32 %s7624_s12, 4  ;;  %s6692_s29 = smov [#allocation19]   ;;  %s177_s13 = int_to_ptr.hbm [resolvable:$true] %s176_s13 }
  0x2c   :  { %s156_s5 = sshll.u32 %s6692_s29, 4  ;;  %s6693_s8 = smov [#allocation22]   ;;  %s157_s5 = int_to_ptr.vmem [resolvable:$true] %s156_s5 }
  0x2d   :  { %159 = dma.hbm_to_vmem [thread:$0]  %s155_s28, 48, %s157_s5, [#allocation18]  }
  0x2e   :  { %s178_s30 = sshll.u32 %s6693_s8, 4  ;;  %s198_s1 = sshll.u32 %s7626_s14, 4  ;;  %s179_s30 = int_to_ptr.vmem [resolvable:$true] %s178_s30  ;;  %s199_s1 = int_to_ptr.hbm [resolvable:$true] %s198_s1 }
  0x2f   :  { %181 = dma.hbm_to_vmem [thread:$0]  %s177_s13, 32, %s179_s30, [#allocation21]  }
  0x30   :  { %s6694_s10 = smov [#allocation25]  }
  0x31   :  { %s200_s17 = sshll.u32 %s6694_s10, 4  ;;  %s201_s17 = int_to_ptr.vmem [resolvable:$true] %s200_s17 }
  0x32   :  { %203 = dma.hbm_to_vmem [thread:$0]  %s199_s1, 16, %s201_s17, [#allocation24]  }
  0x33   :  { %6652 = dma.done.wait [#allocation3], 896  }
  0x34   :  { %6653 = vsyncadd [#allocation3], 4294966400 }
  0x35   :  { %6654 = dma.done.wait [#allocation6], 245760  }
  0x36   :  { %6655 = vsyncadd [#allocation6], 4294721536 }
  0x37   :  { %6656 = dma.done.wait [#allocation9], 43008  }
  0x38   :  { %6657 = vsyncadd [#allocation9], 4294924288 }
  0x39   :  { %6658 = dma.done.wait [#allocation12], 4256  }
  0x3a   :  { %6659 = vsyncadd [#allocation12], 4294963040 }
  0x3b   :  { %6660 = dma.done.wait [#allocation15], 240  }
  0x3c   :  { %6661 = vsyncadd [#allocation15], 4294967056 }
  0x3d   :  { %6662 = dma.done.wait [#allocation18], 128  }
  0x3e   :  { %6663 = vsyncadd [#allocation18], 4294967168 }
  0x3f   :  { %6664 = dma.done.wait [#allocation21], 80  }
  0x40   :  { %6665 = vsyncadd [#allocation21], 4294967216 }
  0x41   :  { %6666 = dma.done.wait [#allocation24], 48  }
  0x42   :  { %6667 = vsyncadd [#allocation24], 4294967248  ;;  %v421_v0 = vld [vmem:[#allocation5 + $0x4b0] sm:$0xff]  ;;  %v411_v4 = vld [vmem:[#allocation5 + $0x460] sm:$0xff]  ;;  %s6696_s12 = smov [#allocation26]   ;;  %s6158_s19 = sshll.u32 %s7627_s15, 4  ;;  %s6159_s19 = int_to_ptr.hbm [resolvable:$true] %s6158_s19 }
  0x43   :  { %v581_v1 = vld [vmem:[#allocation5 + $0x9b0] sm:$0xff]  ;;  %1391 = vmatpush.msra.mxu0 %v421_v0  ;;  %v571_v5 = vld [vmem:[#allocation5 + $0x960] sm:$0xff]  ;;  %s6156_s14 = sshll.u32 %s6696_s12, 4  ;;  %s6157_s14 = int_to_ptr.vmem [resolvable:$true] %s6156_s14 }
  0x44   :  { %v741_v2 = vld [vmem:[#allocation5 + $0xeb0] sm:$0xff]  ;;  %1411 = vmatpush.msra.mxu1 %v581_v1  ;;  %v731_v6 = vld [vmem:[#allocation5 + $0xe60] sm:$0xff] }
  0x45   :  { %v901_v3 = vld [vmem:[#allocation5 + $0x13b0] sm:$0xff]  ;;  %1431 = vmatpush.msra.mxu2 %v741_v2  ;;  %v891_v7 = vld [vmem:[#allocation5 + $0x1360] sm:$0xff]  ;;  %1392 = vmatpush.msra.mxu0 %v411_v4 }
  0x46   :  { %1451 = vmatpush.msra.mxu3 %v901_v3  ;;  %v401_v8 = vld [vmem:[#allocation5 + $0x410] sm:$0xff]  ;;  %1412 = vmatpush.msra.mxu1 %v571_v5  ;;  %v391_v12 = vld [vmem:[#allocation5 + $0x3c0] sm:$0xff]  ;;  %v422_v3 = vld [vmem:[#allocation5 + $0x4b8] sm:$0xff] }
  0x47   :  { %v561_v9 = vld [vmem:[#allocation5 + $0x910] sm:$0xff]  ;;  %1432 = vmatpush.msra.mxu2 %v731_v6  ;;  %v551_v13 = vld [vmem:[#allocation5 + $0x8c0] sm:$0xff]  ;;  %1393 = vmatpush.msra.mxu0 %v401_v8 }
  0x48   :  { %v721_v10 = vld [vmem:[#allocation5 + $0xe10] sm:$0xff]  ;;  %1452 = vmatpush.msra.mxu3 %v891_v7  ;;  %1413 = vmatpush.msra.mxu1 %v561_v9  ;;  %v711_v14 = vld [vmem:[#allocation5 + $0xdc0] sm:$0xff]  ;;  %v412_v7 = vld [vmem:[#allocation5 + $0x468] sm:$0xff] }
  0x49   :  { %v881_v11 = vld [vmem:[#allocation5 + $0x1310] sm:$0xff]  ;;  %v871_v15 = vld [vmem:[#allocation5 + $0x12c0] sm:$0xff]  ;;  %1433 = vmatpush.msra.mxu2 %v721_v10  ;;  %1394 = vmatpush.msra.mxu0 %v391_v12 }
  0x4a   :  { %1453 = vmatpush.msra.mxu3 %v881_v11  ;;  %v381_v16 = vld [vmem:[#allocation5 + $0x370] sm:$0xff]  ;;  %1414 = vmatpush.msra.mxu1 %v551_v13  ;;  %v371_v20 = vld [vmem:[#allocation5 + $0x320] sm:$0xff]  ;;  %v402_v11 = vld [vmem:[#allocation5 + $0x418] sm:$0xff] }
  0x4b   :  { %v541_v17 = vld [vmem:[#allocation5 + $0x870] sm:$0xff]  ;;  %1434 = vmatpush.msra.mxu2 %v711_v14  ;;  %v531_v21 = vld [vmem:[#allocation5 + $0x820] sm:$0xff]  ;;  %1395 = vmatpush.msra.mxu0 %v381_v16 }
  0x4c   :  { %v701_v18 = vld [vmem:[#allocation5 + $0xd70] sm:$0xff]  ;;  %1454 = vmatpush.msra.mxu3 %v871_v15  ;;  %1415 = vmatpush.msra.mxu1 %v541_v17  ;;  %v691_v22 = vld [vmem:[#allocation5 + $0xd20] sm:$0xff]  ;;  %v392_v15 = vld [vmem:[#allocation5 + $0x3c8] sm:$0xff] }
  0x4d   :  { %v861_v19 = vld [vmem:[#allocation5 + $0x1270] sm:$0xff]  ;;  %v851_v23 = vld [vmem:[#allocation5 + $0x1220] sm:$0xff]  ;;  %1435 = vmatpush.msra.mxu2 %v701_v18  ;;  %1396 = vmatpush.msra.mxu0 %v371_v20 }
  0x4e   :  { %1455 = vmatpush.msra.mxu3 %v861_v19  ;;  %v361_v24 = vld [vmem:[#allocation5 + $0x2d0] sm:$0xff]  ;;  %1416 = vmatpush.msra.mxu1 %v531_v21  ;;  %v351_v28 = vld [vmem:[#allocation5 + $0x280] sm:$0xff]  ;;  %v382_v19 = vld [vmem:[#allocation5 + $0x378] sm:$0xff] }
  0x4f   :  { %v521_v25 = vld [vmem:[#allocation5 + $0x7d0] sm:$0xff]  ;;  %1436 = vmatpush.msra.mxu2 %v691_v22  ;;  %v511_v29 = vld [vmem:[#allocation5 + $0x780] sm:$0xff]  ;;  %1397 = vmatpush.msra.mxu0 %v361_v24 }
  0x50   :  { %v681_v26 = vld [vmem:[#allocation5 + $0xcd0] sm:$0xff]  ;;  %1456 = vmatpush.msra.mxu3 %v851_v23  ;;  %1417 = vmatpush.msra.mxu1 %v521_v25  ;;  %v671_v30 = vld [vmem:[#allocation5 + $0xc80] sm:$0xff]  ;;  %v372_v23 = vld [vmem:[#allocation5 + $0x328] sm:$0xff] }
  0x51   :  { %v841_v27 = vld [vmem:[#allocation5 + $0x11d0] sm:$0xff]  ;;  %v831_v31 = vld [vmem:[#allocation5 + $0x1180] sm:$0xff]  ;;  %1437 = vmatpush.msra.mxu2 %v681_v26  ;;  %1398 = vmatpush.msra.mxu0 %v351_v28 }
  0x52   :  { %1457 = vmatpush.msra.mxu3 %v841_v27  ;;  %v341_v32 = vld [vmem:[#allocation5 + $0x230] sm:$0xff]  ;;  %1418 = vmatpush.msra.mxu1 %v511_v29  ;;  %v331_v36 = vld [vmem:[#allocation5 + $0x1e0] sm:$0xff]  ;;  %v362_v27 = vld [vmem:[#allocation5 + $0x2d8] sm:$0xff] }
  0x53   :  { %v501_v33 = vld [vmem:[#allocation5 + $0x730] sm:$0xff]  ;;  %1438 = vmatpush.msra.mxu2 %v671_v30  ;;  %v491_v37 = vld [vmem:[#allocation5 + $0x6e0] sm:$0xff]  ;;  %1399 = vmatpush.msra.mxu0 %v341_v32 }
  0x54   :  { %v661_v34 = vld [vmem:[#allocation5 + $0xc30] sm:$0xff]  ;;  %1458 = vmatpush.msra.mxu3 %v831_v31  ;;  %1419 = vmatpush.msra.mxu1 %v501_v33  ;;  %v651_v38 = vld [vmem:[#allocation5 + $0xbe0] sm:$0xff]  ;;  %v352_v31 = vld [vmem:[#allocation5 + $0x288] sm:$0xff] }
  0x55   :  { %v821_v35 = vld [vmem:[#allocation5 + $0x1130] sm:$0xff]  ;;  %v811_v39 = vld [vmem:[#allocation5 + $0x10e0] sm:$0xff]  ;;  %1439 = vmatpush.msra.mxu2 %v661_v34  ;;  %1400 = vmatpush.msra.mxu0 %v331_v36 }
  0x56   :  { %1459 = vmatpush.msra.mxu3 %v821_v35  ;;  %v321_v40 = vld [vmem:[#allocation5 + $0x190] sm:$0xff]  ;;  %1420 = vmatpush.msra.mxu1 %v491_v37  ;;  %v311_v44 = vld [vmem:[#allocation5 + $0x140] sm:$0xff]  ;;  %v342_v35 = vld [vmem:[#allocation5 + $0x238] sm:$0xff] }
  0x57   :  { %v481_v41 = vld [vmem:[#allocation5 + $0x690] sm:$0xff]  ;;  %1440 = vmatpush.msra.mxu2 %v651_v38  ;;  %v471_v45 = vld [vmem:[#allocation5 + $0x640] sm:$0xff]  ;;  %1401 = vmatpush.msra.mxu0 %v321_v40 }
  0x58   :  { %v641_v42 = vld [vmem:[#allocation5 + $0xb90] sm:$0xff]  ;;  %1460 = vmatpush.msra.mxu3 %v811_v39  ;;  %1421 = vmatpush.msra.mxu1 %v481_v41  ;;  %v631_v46 = vld [vmem:[#allocation5 + $0xb40] sm:$0xff]  ;;  %v332_v39 = vld [vmem:[#allocation5 + $0x1e8] sm:$0xff] }
  0x59   :  { %v801_v43 = vld [vmem:[#allocation5 + $0x1090] sm:$0xff]  ;;  %v791_v47 = vld [vmem:[#allocation5 + $0x1040] sm:$0xff]  ;;  %1441 = vmatpush.msra.mxu2 %v641_v42  ;;  %1402 = vmatpush.msra.mxu0 %v311_v44 }
  0x5a   :  { %1461 = vmatpush.msra.mxu3 %v801_v43  ;;  %v301_v48 = vld [vmem:[#allocation5 + $0xf0] sm:$0xff]  ;;  %1422 = vmatpush.msra.mxu1 %v471_v45  ;;  %v291_v52 = vld [vmem:[#allocation5 + $0xa0] sm:$0xff]  ;;  %v322_v43 = vld [vmem:[#allocation5 + $0x198] sm:$0xff] }
  0x5b   :  { %v461_v49 = vld [vmem:[#allocation5 + $0x5f0] sm:$0xff]  ;;  %1442 = vmatpush.msra.mxu2 %v631_v46  ;;  %v451_v53 = vld [vmem:[#allocation5 + $0x5a0] sm:$0xff]  ;;  %1403 = vmatpush.msra.mxu0 %v301_v48  ;;  %v6822_v48 = vld [vmem:[#allocation2 + $0x10] sm:$0xff] }
  0x5c   :  { %v621_v50 = vld [vmem:[#allocation5 + $0xaf0] sm:$0xff]  ;;  %1462 = vmatpush.msra.mxu3 %v791_v47  ;;  %1423 = vmatpush.msra.mxu1 %v461_v49  ;;  %v611_v54 = vld [vmem:[#allocation5 + $0xaa0] sm:$0xff]  ;;  %v312_v47 = vld [vmem:[#allocation5 + $0x148] sm:$0xff] }
  0x5d   :  { %v781_v51 = vld [vmem:[#allocation5 + $0xff0] sm:$0xff]  ;;  %v771_v55 = vld [vmem:[#allocation5 + $0xfa0] sm:$0xff]  ;;  %1443 = vmatpush.msra.mxu2 %v621_v50  ;;  %1404 = vmatpush.msra.mxu0 %v291_v52  ;;  %v302_v52 = vld [vmem:[#allocation5 + $0xf8] sm:$0xff] }
  0x5e   :  { %1463 = vmatpush.msra.mxu3 %v781_v51  ;;  %v281_v56 = vld [vmem:[#allocation5 + $0x50] sm:$0xff]  ;;  %1424 = vmatpush.msra.mxu1 %v451_v53  ;;  %v271_v60 = vld [vmem:[#allocation5] sm:$0xff]  ;;  %v6824_v53 = vld [vmem:[#allocation2] sm:$0xff] }
  0x5f   :  { %v441_v57 = vld [vmem:[#allocation5 + $0x550] sm:$0xff]  ;;  %1444 = vmatpush.msra.mxu2 %v611_v54  ;;  %v431_v61 = vld [vmem:[#allocation5 + $0x500] sm:$0xff]  ;;  %1405 = vmatpush.msra.mxu0 %v281_v56 }
  0x60   :  { %v601_v58 = vld [vmem:[#allocation5 + $0xa50] sm:$0xff]  ;;  %1464 = vmatpush.msra.mxu3 %v771_v55  ;;  %1425 = vmatpush.msra.mxu1 %v441_v57  ;;  %v591_v62 = vld [vmem:[#allocation5 + $0xa00] sm:$0xff] }
  0x61   :  { %v761_v59 = vld [vmem:[#allocation5 + $0xf50] sm:$0xff]  ;;  %v751_v63 = vld [vmem:[#allocation5 + $0xf00] sm:$0xff]  ;;  %1445 = vmatpush.msra.mxu2 %v601_v58  ;;  %1406 = vmatpush.msra.mxu0 %v271_v60  ;;  %v292_v58 = vld [vmem:[#allocation5 + $0xa8] sm:$0xff] }
  0x62   :  { %1465 = vmatpush.msra.mxu3 %v761_v59  ;;  %v1061_v0 = vld [vmem:[#allocation5 + $0x18b0] sm:$0xff]  ;;  %1426 = vmatpush.msra.mxu1 %v431_v61  ;;  %v1051_v4 = vld [vmem:[#allocation5 + $0x1860] sm:$0xff] }
  0x63   :  { %v1221_v1 = vld [vmem:[#allocation5 + $0x1db0] sm:$0xff]  ;;  %1446 = vmatpush.msra.mxu2 %v591_v62  ;;  %v1211_v5 = vld [vmem:[#allocation5 + $0x1d60] sm:$0xff]  ;;  %1471 = vmatpush.msrb.mxu0 %v1061_v0 }
  0x64   :  { %v1381_v2 = vld [vmem:[#allocation5 + $0x22b0] sm:$0xff]  ;;  %1466 = vmatpush.msra.mxu3 %v751_v63  ;;  %1491 = vmatpush.msrb.mxu1 %v1221_v1  ;;  %v1371_v6 = vld [vmem:[#allocation5 + $0x2260] sm:$0xff]  ;;  %v282_v63 = vld [vmem:[#allocation5 + $0x58] sm:$0xff] }
  0x65   :  { %1511 = vmatpush.msrb.mxu2 %v1381_v2  ;;  %v1041_v8 = vld [vmem:[#allocation5 + $0x1810] sm:$0xff]  ;;  %1472 = vmatpush.msrb.mxu0 %v1051_v4  ;;  %v1031_v12 = vld [vmem:[#allocation5 + $0x17c0] sm:$0xff]  ;;  %v6834_v4 = vld [vmem:[#allocation2 + $0x30] sm:$0xff] }
  0x66   :  { %1531 = vmatpush.msrb.mxu3 %v422_v3  ;;  %v1201_v9 = vld [vmem:[#allocation5 + $0x1d10] sm:$0xff]  ;;  %1492 = vmatpush.msrb.mxu1 %v1211_v5  ;;  %v1191_v13 = vld [vmem:[#allocation5 + $0x1cc0] sm:$0xff]  ;;  %v272_v3 = vld [vmem:[#allocation5 + $0x8] sm:$0xff] }
  0x67   :  { %v1361_v10 = vld [vmem:[#allocation5 + $0x2210] sm:$0xff]  ;;  %1512 = vmatpush.msrb.mxu2 %v1371_v6  ;;  %1473 = vmatpush.msrb.mxu0 %v1041_v8  ;;  %v1351_v14 = vld [vmem:[#allocation5 + $0x21c0] sm:$0xff]  ;;  %v582_v5 = vld [vmem:[#allocation5 + $0x9b8] sm:$0xff] }
  0x68   :  { %1532 = vmatpush.msrb.mxu3 %v412_v7  ;;  %1493 = vmatpush.msrb.mxu1 %v1201_v9  ;;  %v1021_v16 = vld [vmem:[#allocation5 + $0x1770] sm:$0xff]  ;;  %v1011_v20 = vld [vmem:[#allocation5 + $0x1720] sm:$0xff]  ;;  %v742_v6 = vld [vmem:[#allocation5 + $0xeb8] sm:$0xff] }
  0x69   :  { %1513 = vmatpush.msrb.mxu2 %v1361_v10  ;;  %v1181_v17 = vld [vmem:[#allocation5 + $0x1c70] sm:$0xff]  ;;  %1474 = vmatpush.msrb.mxu0 %v1031_v12  ;;  %v1171_v21 = vld [vmem:[#allocation5 + $0x1c20] sm:$0xff]  ;;  %v902_v7 = vld [vmem:[#allocation5 + $0x13b8] sm:$0xff] }
  0x6a   :  { %1533 = vmatpush.msrb.mxu3 %v402_v11  ;;  %1494 = vmatpush.msrb.mxu1 %v1191_v13  ;;  %v1341_v18 = vld [vmem:[#allocation5 + $0x2170] sm:$0xff]  ;;  %v1331_v22 = vld [vmem:[#allocation5 + $0x2120] sm:$0xff]  ;;  %v1062_v8 = vld [vmem:[#allocation5 + $0x18b8] sm:$0xff] }
  0x6b   :  { %1514 = vmatpush.msrb.mxu2 %v1351_v14  ;;  %1475 = vmatpush.msrb.mxu0 %v1021_v16  ;;  %v1001_v24 = vld [vmem:[#allocation5 + $0x16d0] sm:$0xff]  ;;  %v991_v28 = vld [vmem:[#allocation5 + $0x1680] sm:$0xff]  ;;  %v6836_v9 = vld [vmem:[#allocation2 + $0x20] sm:$0xff] }
  0x6c   :  { %1534 = vmatpush.msrb.mxu3 %v392_v15  ;;  %1495 = vmatpush.msrb.mxu1 %v1181_v17  ;;  %v1161_v25 = vld [vmem:[#allocation5 + $0x1bd0] sm:$0xff]  ;;  %v1151_v29 = vld [vmem:[#allocation5 + $0x1b80] sm:$0xff]  ;;  %v572_v10 = vld [vmem:[#allocation5 + $0x968] sm:$0xff] }
  0x6d   :  { %1515 = vmatpush.msrb.mxu2 %v1341_v18  ;;  %1476 = vmatpush.msrb.mxu0 %v1011_v20  ;;  %v1321_v26 = vld [vmem:[#allocation5 + $0x20d0] sm:$0xff]  ;;  %v1311_v30 = vld [vmem:[#allocation5 + $0x2080] sm:$0xff]  ;;  %v732_v11 = vld [vmem:[#allocation5 + $0xe68] sm:$0xff] }
  0x6e   :  { %1535 = vmatpush.msrb.mxu3 %v382_v19  ;;  %1496 = vmatpush.msrb.mxu1 %v1171_v21  ;;  %v981_v32 = vld [vmem:[#allocation5 + $0x1630] sm:$0xff]  ;;  %v971_v36 = vld [vmem:[#allocation5 + $0x15e0] sm:$0xff]  ;;  %v892_v12 = vld [vmem:[#allocation5 + $0x1368] sm:$0xff] }
  0x6f   :  { %1516 = vmatpush.msrb.mxu2 %v1331_v22  ;;  %1477 = vmatpush.msrb.mxu0 %v1001_v24  ;;  %v1141_v33 = vld [vmem:[#allocation5 + $0x1b30] sm:$0xff]  ;;  %v1131_v37 = vld [vmem:[#allocation5 + $0x1ae0] sm:$0xff]  ;;  %v1052_v13 = vld [vmem:[#allocation5 + $0x1868] sm:$0xff] }
  0x70   :  { %1536 = vmatpush.msrb.mxu3 %v372_v23  ;;  %1497 = vmatpush.msrb.mxu1 %v1161_v25  ;;  %v1301_v34 = vld [vmem:[#allocation5 + $0x2030] sm:$0xff]  ;;  %v1291_v38 = vld [vmem:[#allocation5 + $0x1fe0] sm:$0xff]  ;;  %v562_v15 = vld [vmem:[#allocation5 + $0x918] sm:$0xff] }
  0x71   :  { %1517 = vmatpush.msrb.mxu2 %v1321_v26  ;;  %1478 = vmatpush.msrb.mxu0 %v991_v28  ;;  %v961_v40 = vld [vmem:[#allocation5 + $0x1590] sm:$0xff]  ;;  %v951_v44 = vld [vmem:[#allocation5 + $0x1540] sm:$0xff]  ;;  %v722_v16 = vld [vmem:[#allocation5 + $0xe18] sm:$0xff] }
  0x72   :  { %1537 = vmatpush.msrb.mxu3 %v362_v27  ;;  %1498 = vmatpush.msrb.mxu1 %v1151_v29  ;;  %v1121_v41 = vld [vmem:[#allocation5 + $0x1a90] sm:$0xff]  ;;  %v1111_v45 = vld [vmem:[#allocation5 + $0x1a40] sm:$0xff]  ;;  %v882_v17 = vld [vmem:[#allocation5 + $0x1318] sm:$0xff] }
  0x73   :  { %1518 = vmatpush.msrb.mxu2 %v1311_v30  ;;  %1479 = vmatpush.msrb.mxu0 %v981_v32  ;;  %v1281_v42 = vld [vmem:[#allocation5 + $0x1f90] sm:$0xff]  ;;  %v1271_v46 = vld [vmem:[#allocation5 + $0x1f40] sm:$0xff]  ;;  %v1042_v18 = vld [vmem:[#allocation5 + $0x1818] sm:$0xff] }
  0x74   :  { %1538 = vmatpush.msrb.mxu3 %v352_v31  ;;  %1499 = vmatpush.msrb.mxu1 %v1141_v33  ;;  %v941_v49 = vld [vmem:[#allocation5 + $0x14f0] sm:$0xff]  ;;  %v6827_v54 = vld [vmem:[#allocation2 + $0x18] sm:$0xff]  ;;  %v552_v19 = vld [vmem:[#allocation5 + $0x8c8] sm:$0xff] }
  0x75   :  { %1519 = vmatpush.msrb.mxu2 %v1301_v34  ;;  %1480 = vmatpush.msrb.mxu0 %v971_v36  ;;  %v1101_v50 = vld [vmem:[#allocation5 + $0x19f0] sm:$0xff]  ;;  %v931_v55 = vld [vmem:[#allocation5 + $0x14a0] sm:$0xff]  ;;  %v712_v20 = vld [vmem:[#allocation5 + $0xdc8] sm:$0xff] }
  0x76   :  { %1539 = vmatpush.msrb.mxu3 %v342_v35  ;;  %1500 = vmatpush.msrb.mxu1 %v1131_v37  ;;  %v1261_v51 = vld [vmem:[#allocation5 + $0x1ef0] sm:$0xff]  ;;  %v1091_v56 = vld [vmem:[#allocation5 + $0x19a0] sm:$0xff]  ;;  %v872_v21 = vld [vmem:[#allocation5 + $0x12c8] sm:$0xff] }
  0x77   :  { %1520 = vmatpush.msrb.mxu2 %v1291_v38  ;;  %1481 = vmatpush.msrb.mxu0 %v961_v40  ;;  %v1251_v57 = vld [vmem:[#allocation5 + $0x1ea0] sm:$0xff]  ;;  %v6830_v59 = vld [vmem:[#allocation2 + $0x8] sm:$0xff]  ;;  %v1032_v22 = vld [vmem:[#allocation5 + $0x17c8] sm:$0xff] }
  0x78   :  { %1540 = vmatpush.msrb.mxu3 %v332_v39  ;;  %1501 = vmatpush.msrb.mxu1 %v1121_v41  ;;  %v921_v60 = vld [vmem:[#allocation5 + $0x1450] sm:$0xff]  ;;  %v911_v0 = vld [vmem:[#allocation5 + $0x1400] sm:$0xff]  ;;  %v542_v23 = vld [vmem:[#allocation5 + $0x878] sm:$0xff] }
  0x79   :  { %1521 = vmatpush.msrb.mxu2 %v1281_v42  ;;  %1482 = vmatpush.msrb.mxu0 %v951_v44  ;;  %v1081_v61 = vld [vmem:[#allocation5 + $0x1950] sm:$0xff]  ;;  %v1071_v1 = vld [vmem:[#allocation5 + $0x1900] sm:$0xff]  ;;  %v702_v24 = vld [vmem:[#allocation5 + $0xd78] sm:$0xff] }
  0x7a   :  { %1541 = vmatpush.msrb.mxu3 %v322_v43  ;;  %1502 = vmatpush.msrb.mxu1 %v1111_v45  ;;  %v1241_v62 = vld [vmem:[#allocation5 + $0x1e50] sm:$0xff]  ;;  %v1231_v2 = vld [vmem:[#allocation5 + $0x1e00] sm:$0xff]  ;;  %v862_v25 = vld [vmem:[#allocation5 + $0x1278] sm:$0xff] }
  0x7b   :  { %1522 = vmatpush.msrb.mxu2 %v1271_v46  ;;  %1483 = vmatpush.msrb.mxu0 %v941_v49  ;;  %v6840_v14 = vld [vmem:[#allocation2 + $0x28] sm:$0xff]  ;;  %v1022_v26 = vld [vmem:[#allocation5 + $0x1778] sm:$0xff]  ;;  %v532_v27 = vld [vmem:[#allocation5 + $0x828] sm:$0xff] }
  0x7c   :  { %1542 = vmatpush.msrb.mxu3 %v312_v47  ;;  %1447 = vmatmul.f32.vlgmr.msra.gmra.mxu2 %v6822_v48  ;;  %v692_v28 = vld [vmem:[#allocation5 + $0xd28] sm:$0xff]  ;;  %v522_v31 = vld [vmem:[#allocation5 + $0x7d8] sm:$0xff] }
  0x7d   :  { %1503 = vmatpush.msrb.mxu1 %v1101_v50  ;;  %1523 = vmatpush.msrb.mxu2 %v1261_v51  ;;  %v852_v29 = vld [vmem:[#allocation5 + $0x1228] sm:$0xff]  ;;  %v682_v32 = vld [vmem:[#allocation5 + $0xcd8] sm:$0xff] }
  0x7e   :  { %1543 = vmatpush.msrb.mxu3 %v302_v52  ;;  %1407 = vmatmul.f32.vlgmr.msra.gmra.mxu0 %v6824_v53  ;;  %v1012_v30 = vld [vmem:[#allocation5 + $0x1728] sm:$0xff]  ;;  %v842_v33 = vld [vmem:[#allocation5 + $0x11d8] sm:$0xff] }
  0x7f   :  { %1467 = vmatmul.f32.vlgmr.msra.gmra.mxu3 %v6827_v54  ;;  %1484 = vmatpush.msrb.mxu0 %v931_v55  ;;  %v1002_v34 = vld [vmem:[#allocation5 + $0x16d8] sm:$0xff]  ;;  %v512_v35 = vld [vmem:[#allocation5 + $0x788] sm:$0xff] }
  0x80   :  { %1504 = vmatpush.msrb.mxu1 %v1091_v56  ;;  %1524 = vmatpush.msrb.mxu2 %v1251_v57  ;;  %v672_v36 = vld [vmem:[#allocation5 + $0xc88] sm:$0xff]  ;;  %v502_v39 = vld [vmem:[#allocation5 + $0x738] sm:$0xff] }
  0x81   :  { %1544 = vmatpush.msrb.mxu3 %v292_v58  ;;  %1427 = vmatmul.f32.vlgmr.msra.gmra.mxu1 %v6830_v59  ;;  %v832_v37 = vld [vmem:[#allocation5 + $0x1188] sm:$0xff]  ;;  %v662_v40 = vld [vmem:[#allocation5 + $0xc38] sm:$0xff] }
  0x82   :  { %1485 = vmatpush.msrb.mxu0 %v921_v60  ;;  %1505 = vmatpush.msrb.mxu1 %v1081_v61  ;;  %v992_v38 = vld [vmem:[#allocation5 + $0x1688] sm:$0xff]  ;;  %v822_v41 = vld [vmem:[#allocation5 + $0x1138] sm:$0xff] }
  0x83   :  { %1525 = vmatpush.msrb.mxu2 %v1241_v62  ;;  %1545 = vmatpush.msrb.mxu3 %v282_v63  ;;  %v982_v42 = vld [vmem:[#allocation5 + $0x1638] sm:$0xff]  ;;  %v492_v43 = vld [vmem:[#allocation5 + $0x6e8] sm:$0xff] }
  0x84   :  { %1486 = vmatpush.msrb.mxu0 %v911_v0  ;;  %1506 = vmatpush.msrb.mxu1 %v1071_v1  ;;  %v652_v44 = vld [vmem:[#allocation5 + $0xbe8] sm:$0xff]  ;;  %v482_v47 = vld [vmem:[#allocation5 + $0x698] sm:$0xff] }
  0x85   :  { %1526 = vmatpush.msrb.mxu2 %v1231_v2  ;;  %1546 = vmatpush.msrb.mxu3 %v272_v3  ;;  %v812_v45 = vld [vmem:[#allocation5 + $0x10e8] sm:$0xff]  ;;  %v642_v49 = vld [vmem:[#allocation5 + $0xb98] sm:$0xff] }
  0x86   :  { %1527 = vmatmul.f32.vlgmr.msrb.gmra.mxu2 %v6834_v4  ;;  %1551 = vmatpush.msra.mxu0 %v582_v5  ;;  %v972_v46 = vld [vmem:[#allocation5 + $0x15e8] sm:$0xff]  ;;  %v802_v50 = vld [vmem:[#allocation5 + $0x1098] sm:$0xff] }
  0x87   :  { %1571 = vmatpush.msra.mxu1 %v742_v6  ;;  %1591 = vmatpush.msra.mxu2 %v902_v7  ;;  %v962_v51 = vld [vmem:[#allocation5 + $0x1598] sm:$0xff]  ;;  %v472_v52 = vld [vmem:[#allocation5 + $0x648] sm:$0xff] }
  0x88   :  { %1611 = vmatpush.msra.mxu3 %v1062_v8  ;;  %1487 = vmatmul.f32.vlgmr.msrb.gmra.mxu0 %v6836_v9  ;;  %v632_v55 = vld [vmem:[#allocation5 + $0xb48] sm:$0xff]  ;;  %v462_v58 = vld [vmem:[#allocation5 + $0x5f8] sm:$0xff] }
  0x89   :  { %1552 = vmatpush.msra.mxu0 %v572_v10  ;;  %1572 = vmatpush.msra.mxu1 %v732_v11  ;;  %v792_v56 = vld [vmem:[#allocation5 + $0x1048] sm:$0xff]  ;;  %v622_v60 = vld [vmem:[#allocation5 + $0xaf8] sm:$0xff] }
  0x8a   :  { %1592 = vmatpush.msra.mxu2 %v892_v12  ;;  %1612 = vmatpush.msra.mxu3 %v1052_v13  ;;  %v952_v57 = vld [vmem:[#allocation5 + $0x1548] sm:$0xff]  ;;  %v782_v61 = vld [vmem:[#allocation5 + $0xff8] sm:$0xff] }
  0x8b   :  { %1507 = vmatmul.f32.vlgmr.msrb.gmra.mxu1 %v6840_v14  ;;  %1553 = vmatpush.msra.mxu0 %v562_v15  ;;  %v942_v62 = vld [vmem:[#allocation5 + $0x14f8] sm:$0xff]  ;;  %v452_v63 = vld [vmem:[#allocation5 + $0x5a8] sm:$0xff] }
  0x8c   :  { %1573 = vmatpush.msra.mxu1 %v722_v16  ;;  %1593 = vmatpush.msra.mxu2 %v882_v17  ;;  %v612_v0 = vld [vmem:[#allocation5 + $0xaa8] sm:$0xff]  ;;  %v442_v3 = vld [vmem:[#allocation5 + $0x558] sm:$0xff]  ;;  %v423_v16 = vld [vmem:[#allocation5 + $0x4c0] sm:$0xff] }
  0x8d   :  { %1613 = vmatpush.msra.mxu3 %v1042_v18  ;;  %1554 = vmatpush.msra.mxu0 %v552_v19  ;;  %v772_v1 = vld [vmem:[#allocation5 + $0xfa8] sm:$0xff]  ;;  %v602_v5 = vld [vmem:[#allocation5 + $0xa58] sm:$0xff]  ;;  %v583_v17 = vld [vmem:[#allocation5 + $0x9c0] sm:$0xff] }
  0x8e   :  { %1574 = vmatpush.msra.mxu1 %v712_v20  ;;  %1594 = vmatpush.msra.mxu2 %v872_v21  ;;  %v932_v2 = vld [vmem:[#allocation5 + $0x14a8] sm:$0xff]  ;;  %v762_v6 = vld [vmem:[#allocation5 + $0xf58] sm:$0xff]  ;;  %v413_v20 = vld [vmem:[#allocation5 + $0x470] sm:$0xff] }
  0x8f   :  { %1614 = vmatpush.msra.mxu3 %v1032_v22  ;;  %1555 = vmatpush.msra.mxu0 %v542_v23  ;;  %v922_v7 = vld [vmem:[#allocation5 + $0x1458] sm:$0xff]  ;;  %v432_v8 = vld [vmem:[#allocation5 + $0x508] sm:$0xff]  ;;  %v573_v21 = vld [vmem:[#allocation5 + $0x970] sm:$0xff] }
  0x90   :  { %1575 = vmatpush.msra.mxu1 %v702_v24  ;;  %1595 = vmatpush.msra.mxu2 %v862_v25  ;;  %v592_v10 = vld [vmem:[#allocation5 + $0xa08] sm:$0xff]  ;;  %v1222_v13 = vld [vmem:[#allocation5 + $0x1db8] sm:$0xff]  ;;  %v403_v24 = vld [vmem:[#allocation5 + $0x420] sm:$0xff] }
  0x91   :  { %1615 = vmatpush.msra.mxu3 %v1022_v26  ;;  %1556 = vmatpush.msra.mxu0 %v532_v27  ;;  %v752_v11 = vld [vmem:[#allocation5 + $0xf08] sm:$0xff]  ;;  %v1382_v15 = vld [vmem:[#allocation5 + $0x22b8] sm:$0xff]  ;;  %v563_v25 = vld [vmem:[#allocation5 + $0x920] sm:$0xff] }
  0x92   :  { %1576 = vmatpush.msra.mxu1 %v692_v28  ;;  %1596 = vmatpush.msra.mxu2 %v852_v29  ;;  %v912_v12 = vld [vmem:[#allocation5 + $0x1408] sm:$0xff]  ;;  %v1202_v22 = vld [vmem:[#allocation5 + $0x1d18] sm:$0xff]  ;;  %v393_v28 = vld [vmem:[#allocation5 + $0x3d0] sm:$0xff] }
  0x93   :  { %1616 = vmatpush.msra.mxu3 %v1012_v30  ;;  %1557 = vmatpush.msra.mxu0 %v522_v31  ;;  %v1212_v18 = vld [vmem:[#allocation5 + $0x1d68] sm:$0xff]  ;;  %v1362_v23 = vld [vmem:[#allocation5 + $0x2218] sm:$0xff]  ;;  %v553_v29 = vld [vmem:[#allocation5 + $0x8d0] sm:$0xff] }
  0x94   :  { %1577 = vmatpush.msra.mxu1 %v682_v32  ;;  %1597 = vmatpush.msra.mxu2 %v842_v33  ;;  %v1372_v19 = vld [vmem:[#allocation5 + $0x2268] sm:$0xff]  ;;  %v1182_v30 = vld [vmem:[#allocation5 + $0x1c78] sm:$0xff]  ;;  %v383_v32 = vld [vmem:[#allocation5 + $0x380] sm:$0xff] }
  0x95   :  { %1617 = vmatpush.msra.mxu3 %v1002_v34  ;;  %1558 = vmatpush.msra.mxu0 %v512_v35  ;;  %v1192_v26 = vld [vmem:[#allocation5 + $0x1cc8] sm:$0xff]  ;;  %v1342_v31 = vld [vmem:[#allocation5 + $0x2178] sm:$0xff]  ;;  %v543_v33 = vld [vmem:[#allocation5 + $0x880] sm:$0xff] }
  0x96   :  { %1578 = vmatpush.msra.mxu1 %v672_v36  ;;  %1598 = vmatpush.msra.mxu2 %v832_v37  ;;  %v1352_v27 = vld [vmem:[#allocation5 + $0x21c8] sm:$0xff]  ;;  %v373_v36 = vld [vmem:[#allocation5 + $0x330] sm:$0xff] }
  0x97   :  { %1618 = vmatpush.msra.mxu3 %v992_v38  ;;  %1559 = vmatpush.msra.mxu0 %v502_v39  ;;  %v1172_v34 = vld [vmem:[#allocation5 + $0x1c28] sm:$0xff]  ;;  %v533_v37 = vld [vmem:[#allocation5 + $0x830] sm:$0xff]  ;;  %v1162_v38 = vld [vmem:[#allocation5 + $0x1bd8] sm:$0xff] }
  0x98   :  { %1579 = vmatpush.msra.mxu1 %v662_v40  ;;  %1599 = vmatpush.msra.mxu2 %v822_v41  ;;  %v1332_v35 = vld [vmem:[#allocation5 + $0x2128] sm:$0xff]  ;;  %v1322_v39 = vld [vmem:[#allocation5 + $0x20d8] sm:$0xff]  ;;  %v363_v40 = vld [vmem:[#allocation5 + $0x2e0] sm:$0xff] }
  0x99   :  { %1619 = vmatpush.msra.mxu3 %v982_v42  ;;  %1560 = vmatpush.msra.mxu0 %v492_v43  ;;  %v523_v41 = vld [vmem:[#allocation5 + $0x7e0] sm:$0xff]  ;;  %v1152_v42 = vld [vmem:[#allocation5 + $0x1b88] sm:$0xff] }
  0x9a   :  { %1580 = vmatpush.msra.mxu1 %v652_v44  ;;  %1600 = vmatpush.msra.mxu2 %v812_v45  ;;  %v1312_v43 = vld [vmem:[#allocation5 + $0x2088] sm:$0xff]  ;;  %v353_v44 = vld [vmem:[#allocation5 + $0x290] sm:$0xff] }
  0x9b   :  { %1620 = vmatpush.msra.mxu3 %v972_v46  ;;  %1561 = vmatpush.msra.mxu0 %v482_v47  ;;  %v513_v45 = vld [vmem:[#allocation5 + $0x790] sm:$0xff]  ;;  %v1142_v46 = vld [vmem:[#allocation5 + $0x1b38] sm:$0xff] }
  0x9c   :  { %1581 = vmatpush.msra.mxu1 %v642_v49  ;;  %1601 = vmatpush.msra.mxu2 %v802_v50  ;;  %v1302_v47 = vld [vmem:[#allocation5 + $0x2038] sm:$0xff]  ;;  %v343_v49 = vld [vmem:[#allocation5 + $0x240] sm:$0xff] }
  0x9d   :  { %1621 = vmatpush.msra.mxu3 %v962_v51  ;;  %1562 = vmatpush.msra.mxu0 %v472_v52  ;;  %v503_v50 = vld [vmem:[#allocation5 + $0x740] sm:$0xff]  ;;  %v1132_v51 = vld [vmem:[#allocation5 + $0x1ae8] sm:$0xff] }
  0x9e   :  { %1582 = vmatpush.msra.mxu1 %v632_v55  ;;  %1602 = vmatpush.msra.mxu2 %v792_v56  ;;  %v1292_v52 = vld [vmem:[#allocation5 + $0x1fe8] sm:$0xff]  ;;  %v333_v55 = vld [vmem:[#allocation5 + $0x1f0] sm:$0xff] }
  0x9f   :  { %1622 = vmatpush.msra.mxu3 %v952_v57  ;;  %1563 = vmatpush.msra.mxu0 %v462_v58  ;;  %v493_v56 = vld [vmem:[#allocation5 + $0x6f0] sm:$0xff]  ;;  %v1122_v57 = vld [vmem:[#allocation5 + $0x1a98] sm:$0xff] }
  0xa0   :  { %1583 = vmatpush.msra.mxu1 %v622_v60  ;;  %1603 = vmatpush.msra.mxu2 %v782_v61  ;;  %v1282_v58 = vld [vmem:[#allocation5 + $0x1f98] sm:$0xff]  ;;  %v323_v60 = vld [vmem:[#allocation5 + $0x1a0] sm:$0xff] }
  0xa1   :  { %1623 = vmatpush.msra.mxu3 %v942_v62  ;;  %1564 = vmatpush.msra.mxu0 %v452_v63  ;;  %v483_v61 = vld [vmem:[#allocation5 + $0x6a0] sm:$0xff]  ;;  %v1112_v62 = vld [vmem:[#allocation5 + $0x1a48] sm:$0xff] }
  0xa2   :  { %1584 = vmatpush.msra.mxu1 %v612_v0  ;;  %1604 = vmatpush.msra.mxu2 %v772_v1  ;;  %v1272_v63 = vld [vmem:[#allocation5 + $0x1f48] sm:$0xff]  ;;  %v313_v0 = vld [vmem:[#allocation5 + $0x150] sm:$0xff] }
  0xa3   :  { %1624 = vmatpush.msra.mxu3 %v932_v2  ;;  %1565 = vmatpush.msra.mxu0 %v442_v3  ;;  %v473_v1 = vld [vmem:[#allocation5 + $0x650] sm:$0xff]  ;;  %v1102_v2 = vld [vmem:[#allocation5 + $0x19f8] sm:$0xff] }
  0xa4   :  { %1585 = vmatpush.msra.mxu1 %v602_v5  ;;  %1605 = vmatpush.msra.mxu2 %v762_v6  ;;  %v1262_v3 = vld [vmem:[#allocation5 + $0x1ef8] sm:$0xff]  ;;  %v303_v5 = vld [vmem:[#allocation5 + $0x100] sm:$0xff] }
  0xa5   :  { %1625 = vmatpush.msra.mxu3 %v922_v7  ;;  %1566 = vmatpush.msra.mxu0 %v432_v8  ;;  %v463_v6 = vld [vmem:[#allocation5 + $0x600] sm:$0xff]  ;;  %v1092_v7 = vld [vmem:[#allocation5 + $0x19a8] sm:$0xff] }
  0xa6   :  { %1586 = vmatpush.msra.mxu1 %v592_v10  ;;  %1606 = vmatpush.msra.mxu2 %v752_v11  ;;  %v1252_v8 = vld [vmem:[#allocation5 + $0x1ea8] sm:$0xff]  ;;  %v293_v10 = vld [vmem:[#allocation5 + $0xb0] sm:$0xff] }
  0xa7   :  { %1626 = vmatpush.msra.mxu3 %v912_v12  ;;  %1631 = vmatpush.msrb.mxu0 %v1222_v13  ;;  %v453_v11 = vld [vmem:[#allocation5 + $0x5b0] sm:$0xff]  ;;  %v1242_v12 = vld [vmem:[#allocation5 + $0x1e58] sm:$0xff]  ;;  %v283_v13 = vld [vmem:[#allocation5 + $0x60] sm:$0xff] }
  0xa8   :  { %1547 = vmatmul.f32.vlgmr.msrb.gmra.mxu3 %v6824_v53  ;;  %1651 = vmatpush.msrb.mxu1 %v1382_v15  ;;  %v443_v15 = vld [vmem:[#allocation5 + $0x560] sm:$0xff] }
  0xa9   :  { %1671 = vmatpush.msrb.mxu2 %v423_v16  ;;  %1691 = vmatpush.msrb.mxu3 %v583_v17  ;;  %v1072_v16 = vld [vmem:[#allocation5 + $0x1908] sm:$0xff] }
  0xaa   :  { %1632 = vmatpush.msrb.mxu0 %v1212_v18  ;;  %1652 = vmatpush.msrb.mxu1 %v1372_v19  ;;  %v1232_v17 = vld [vmem:[#allocation5 + $0x1e08] sm:$0xff]  ;;  %v273_v18 = vld [vmem:[#allocation5 + $0x10] sm:$0xff] }
  0xab   :  { %1672 = vmatpush.msrb.mxu2 %v413_v20  ;;  %1692 = vmatpush.msrb.mxu3 %v573_v21  ;;  %v433_v19 = vld [vmem:[#allocation5 + $0x510] sm:$0xff]  ;;  %v903_v20 = vld [vmem:[#allocation5 + $0x13c0] sm:$0xff] }
  0xac   :  { %1633 = vmatpush.msrb.mxu0 %v1202_v22  ;;  %1653 = vmatpush.msrb.mxu1 %v1362_v23  ;;  %v1063_v21 = vld [vmem:[#allocation5 + $0x18c0] sm:$0xff]  ;;  %v733_v23 = vld [vmem:[#allocation5 + $0xe70] sm:$0xff] }
  0xad   :  { %1673 = vmatpush.msrb.mxu2 %v403_v24  ;;  %1693 = vmatpush.msrb.mxu3 %v563_v25  ;;  %v1223_v22 = vld [vmem:[#allocation5 + $0x1dc0] sm:$0xff]  ;;  %v893_v24 = vld [vmem:[#allocation5 + $0x1370] sm:$0xff] }
  0xae   :  { %1634 = vmatpush.msrb.mxu0 %v1192_v26  ;;  %1654 = vmatpush.msrb.mxu1 %v1352_v27  ;;  %v1053_v25 = vld [vmem:[#allocation5 + $0x1870] sm:$0xff]  ;;  %v723_v27 = vld [vmem:[#allocation5 + $0xe20] sm:$0xff] }
  0xaf   :  { %1674 = vmatpush.msrb.mxu2 %v393_v28  ;;  %1694 = vmatpush.msrb.mxu3 %v553_v29  ;;  %v1213_v26 = vld [vmem:[#allocation5 + $0x1d70] sm:$0xff]  ;;  %v883_v28 = vld [vmem:[#allocation5 + $0x1320] sm:$0xff] }
  0xb0   :  { %1635 = vmatpush.msrb.mxu0 %v1182_v30  ;;  %1655 = vmatpush.msrb.mxu1 %v1342_v31  ;;  %v1043_v29 = vld [vmem:[#allocation5 + $0x1820] sm:$0xff]  ;;  %v713_v31 = vld [vmem:[#allocation5 + $0xdd0] sm:$0xff] }
  0xb1   :  { %1675 = vmatpush.msrb.mxu2 %v383_v32  ;;  %1695 = vmatpush.msrb.mxu3 %v543_v33  ;;  %v1203_v30 = vld [vmem:[#allocation5 + $0x1d20] sm:$0xff]  ;;  %v873_v32 = vld [vmem:[#allocation5 + $0x12d0] sm:$0xff] }
  0xb2   :  { %1636 = vmatpush.msrb.mxu0 %v1172_v34  ;;  %1656 = vmatpush.msrb.mxu1 %v1332_v35  ;;  %v1033_v33 = vld [vmem:[#allocation5 + $0x17d0] sm:$0xff]  ;;  %v703_v35 = vld [vmem:[#allocation5 + $0xd80] sm:$0xff] }
  0xb3   :  { %1676 = vmatpush.msrb.mxu2 %v373_v36  ;;  %1696 = vmatpush.msrb.mxu3 %v533_v37  ;;  %v1193_v34 = vld [vmem:[#allocation5 + $0x1cd0] sm:$0xff]  ;;  %v863_v36 = vld [vmem:[#allocation5 + $0x1280] sm:$0xff] }
  0xb4   :  { %1637 = vmatpush.msrb.mxu0 %v1162_v38  ;;  %1657 = vmatpush.msrb.mxu1 %v1322_v39  ;;  %v1183_v37 = vld [vmem:[#allocation5 + $0x1c80] sm:$0xff]  ;;  %v693_v38 = vld [vmem:[#allocation5 + $0xd30] sm:$0xff] }
  0xb5   :  { %1677 = vmatpush.msrb.mxu2 %v363_v40  ;;  %1697 = vmatpush.msrb.mxu3 %v523_v41  ;;  %v853_v39 = vld [vmem:[#allocation5 + $0x1230] sm:$0xff] }
  0xb6   :  { %1638 = vmatpush.msrb.mxu0 %v1152_v42  ;;  %1658 = vmatpush.msrb.mxu1 %v1312_v43  ;;  %v1013_v40 = vld [vmem:[#allocation5 + $0x1730] sm:$0xff]  ;;  %v683_v42 = vld [vmem:[#allocation5 + $0xce0] sm:$0xff] }
  0xb7   :  { %1678 = vmatpush.msrb.mxu2 %v353_v44  ;;  %1698 = vmatpush.msrb.mxu3 %v513_v45  ;;  %v1173_v41 = vld [vmem:[#allocation5 + $0x1c30] sm:$0xff]  ;;  %v843_v43 = vld [vmem:[#allocation5 + $0x11e0] sm:$0xff] }
  0xb8   :  { %1639 = vmatpush.msrb.mxu0 %v1142_v46  ;;  %1659 = vmatpush.msrb.mxu1 %v1302_v47  ;;  %v1003_v44 = vld [vmem:[#allocation5 + $0x16e0] sm:$0xff]  ;;  %v673_v46 = vld [vmem:[#allocation5 + $0xc90] sm:$0xff] }
  0xb9   :  { %1679 = vmatpush.msrb.mxu2 %v343_v49  ;;  %1699 = vmatpush.msrb.mxu3 %v503_v50  ;;  %v1163_v45 = vld [vmem:[#allocation5 + $0x1be0] sm:$0xff]  ;;  %v833_v47 = vld [vmem:[#allocation5 + $0x1190] sm:$0xff] }
  0xba   :  { %1640 = vmatpush.msrb.mxu0 %v1132_v51  ;;  %1660 = vmatpush.msrb.mxu1 %v1292_v52  ;;  %v993_v49 = vld [vmem:[#allocation5 + $0x1690] sm:$0xff]  ;;  %v663_v51 = vld [vmem:[#allocation5 + $0xc40] sm:$0xff] }
  0xbb   :  { %1680 = vmatpush.msrb.mxu2 %v333_v55  ;;  %1700 = vmatpush.msrb.mxu3 %v493_v56  ;;  %v1153_v50 = vld [vmem:[#allocation5 + $0x1b90] sm:$0xff]  ;;  %v823_v52 = vld [vmem:[#allocation5 + $0x1140] sm:$0xff] }
  0xbc   :  { %1641 = vmatpush.msrb.mxu0 %v1122_v57  ;;  %1661 = vmatpush.msrb.mxu1 %v1282_v58  ;;  %v983_v55 = vld [vmem:[#allocation5 + $0x1640] sm:$0xff]  ;;  %v653_v57 = vld [vmem:[#allocation5 + $0xbf0] sm:$0xff] }
  0xbd   :  { %1681 = vmatpush.msrb.mxu2 %v323_v60  ;;  %1701 = vmatpush.msrb.mxu3 %v483_v61  ;;  %v1143_v56 = vld [vmem:[#allocation5 + $0x1b40] sm:$0xff]  ;;  %v813_v58 = vld [vmem:[#allocation5 + $0x10f0] sm:$0xff] }
  0xbe   :  { %1607 = vmatmul.f32.vlgmr.msra.gmra.mxu2 %v6827_v54  ;;  %1642 = vmatpush.msrb.mxu0 %v1112_v62  ;;  %v1082_v54 = vld [vmem:[#allocation5 + $0x1958] sm:$0xff]  ;;  %v973_v60 = vld [vmem:[#allocation5 + $0x15f0] sm:$0xff]  ;;  %v643_v62 = vld [vmem:[#allocation5 + $0xba0] sm:$0xff] }
  0xbf   :  { %1662 = vmatpush.msrb.mxu1 %v1272_v63  ;;  %1682 = vmatpush.msrb.mxu2 %v313_v0  ;;  %v1133_v61 = vld [vmem:[#allocation5 + $0x1af0] sm:$0xff]  ;;  %v803_v63 = vld [vmem:[#allocation5 + $0x10a0] sm:$0xff] }
  0xc0   :  { %1702 = vmatpush.msrb.mxu3 %v473_v1  ;;  %1567 = vmatmul.f32.vlgmr.msra.gmra.mxu0 %v6830_v59  ;;  %v963_v0 = vld [vmem:[#allocation5 + $0x15a0] sm:$0xff] }
  0xc1   :  { %1627 = vmatmul.f32.vlgmr.msra.gmra.mxu3 %v6836_v9  ;;  %1643 = vmatpush.msrb.mxu0 %v1102_v2  ;;  %v1123_v1 = vld [vmem:[#allocation5 + $0x1aa0] sm:$0xff]  ;;  %v633_v2 = vld [vmem:[#allocation5 + $0xb50] sm:$0xff] }
  0xc2   :  { %1663 = vmatpush.msrb.mxu1 %v1262_v3  ;;  %1683 = vmatpush.msrb.mxu2 %v303_v5  ;;  %v793_v3 = vld [vmem:[#allocation5 + $0x1050] sm:$0xff] }
  0xc3   :  { %1703 = vmatpush.msrb.mxu3 %v463_v6  ;;  %1587 = vmatmul.f32.vlgmr.msra.gmra.mxu1 %v6822_v48  ;;  %v743_v48 = vld [vmem:[#allocation5 + $0xec0] sm:$0xff]  ;;  %v953_v5 = vld [vmem:[#allocation5 + $0x1550] sm:$0xff] }
  0xc4   :  { %1644 = vmatpush.msrb.mxu0 %v1092_v7  ;;  %1664 = vmatpush.msrb.mxu1 %v1252_v8  ;;  %v1113_v6 = vld [vmem:[#allocation5 + $0x1a50] sm:$0xff]  ;;  %v623_v7 = vld [vmem:[#allocation5 + $0xb00] sm:$0xff] }
  0xc5   :  { %1684 = vmatpush.msrb.mxu2 %v293_v10  ;;  %1704 = vmatpush.msrb.mxu3 %v453_v11  ;;  %v783_v8 = vld [vmem:[#allocation5 + $0x1000] sm:$0xff] }
  0xc6   :  { %1645 = vmatpush.msrb.mxu0 %v1082_v54  ;;  %1665 = vmatpush.msrb.mxu1 %v1242_v12  ;;  %v943_v10 = vld [vmem:[#allocation5 + $0x1500] sm:$0xff]  ;;  %v613_v54 = vld [vmem:[#allocation5 + $0xab0] sm:$0xff] }
  0xc7   :  { %1685 = vmatpush.msrb.mxu2 %v283_v13  ;;  %1705 = vmatpush.msrb.mxu3 %v443_v15  ;;  %v1103_v11 = vld [vmem:[#allocation5 + $0x1a00] sm:$0xff]  ;;  %v773_v12 = vld [vmem:[#allocation5 + $0xfb0] sm:$0xff] }
  0xc8   :  { %1646 = vmatpush.msrb.mxu0 %v1072_v16  ;;  %1666 = vmatpush.msrb.mxu1 %v1232_v17  ;;  %v933_v13 = vld [vmem:[#allocation5 + $0x14b0] sm:$0xff]  ;;  %v603_v16 = vld [vmem:[#allocation5 + $0xa60] sm:$0xff] }
  0xc9   :  { %1686 = vmatpush.msrb.mxu2 %v273_v18  ;;  %1706 = vmatpush.msrb.mxu3 %v433_v19  ;;  %v1093_v15 = vld [vmem:[#allocation5 + $0x19b0] sm:$0xff]  ;;  %v763_v17 = vld [vmem:[#allocation5 + $0xf60] sm:$0xff] }
  0xca   :  { %1647 = vmatmul.f32.vlgmr.msrb.gmra.mxu0 %v6840_v14  ;;  %1731 = vmatpush.msra.mxu1 %v903_v20  ;;  %v923_v18 = vld [vmem:[#allocation5 + $0x1460] sm:$0xff]  ;;  %v593_v20 = vld [vmem:[#allocation5 + $0xa10] sm:$0xff] }
  0xcb   :  { %1711 = vmatpush.msra.mxu0 %v743_v48  ;;  %1751 = vmatpush.msra.mxu2 %v1063_v21  ;;  %v1083_v19 = vld [vmem:[#allocation5 + $0x1960] sm:$0xff]  ;;  %v753_v48 = vld [vmem:[#allocation5 + $0xf10] sm:$0xff] }
  0xcc   :  { %1771 = vmatpush.msra.mxu3 %v1223_v22  ;;  %1667 = vmatmul.f32.vlgmr.msrb.gmra.mxu1 %v6834_v4  ;;  %v1023_v4 = vld [vmem:[#allocation5 + $0x1780] sm:$0xff]  ;;  %v913_v21 = vld [vmem:[#allocation5 + $0x1410] sm:$0xff] }
  0xcd   :  { %1712 = vmatpush.msra.mxu0 %v733_v23  ;;  %1732 = vmatpush.msra.mxu1 %v893_v24  ;;  %v1073_v22 = vld [vmem:[#allocation5 + $0x1910] sm:$0xff]  ;;  %v1383_v23 = vld [vmem:[#allocation5 + $0x22c0] sm:$0xff]  ;;  %v424_v24 = vld [vmem:[#allocation5 + $0x4c8] sm:$0xff] }
  0xce   :  { %1752 = vmatpush.msra.mxu2 %v1053_v25  ;;  %1772 = vmatpush.msra.mxu3 %v1213_v26  ;;  %v584_v25 = vld [vmem:[#allocation5 + $0x9c8] sm:$0xff] }
  0xcf   :  { %1713 = vmatpush.msra.mxu0 %v723_v27  ;;  %1733 = vmatpush.msra.mxu1 %v883_v28  ;;  %v744_v26 = vld [vmem:[#allocation5 + $0xec8] sm:$0xff]  ;;  %v1373_v27 = vld [vmem:[#allocation5 + $0x2270] sm:$0xff]  ;;  %v414_v28 = vld [vmem:[#allocation5 + $0x478] sm:$0xff] }
  0xd0   :  { %1753 = vmatpush.msra.mxu2 %v1043_v29  ;;  %1773 = vmatpush.msra.mxu3 %v1203_v30  ;;  %v574_v29 = vld [vmem:[#allocation5 + $0x978] sm:$0xff] }
  0xd1   :  { %1714 = vmatpush.msra.mxu0 %v713_v31  ;;  %1734 = vmatpush.msra.mxu1 %v873_v32  ;;  %v734_v30 = vld [vmem:[#allocation5 + $0xe78] sm:$0xff]  ;;  %v1363_v31 = vld [vmem:[#allocation5 + $0x2220] sm:$0xff]  ;;  %v404_v32 = vld [vmem:[#allocation5 + $0x428] sm:$0xff] }
  0xd2   :  { %1754 = vmatpush.msra.mxu2 %v1033_v33  ;;  %1774 = vmatpush.msra.mxu3 %v1193_v34  ;;  %v564_v33 = vld [vmem:[#allocation5 + $0x928] sm:$0xff] }
  0xd3   :  { %1715 = vmatpush.msra.mxu0 %v703_v35  ;;  %1735 = vmatpush.msra.mxu1 %v863_v36  ;;  %v724_v34 = vld [vmem:[#allocation5 + $0xe28] sm:$0xff]  ;;  %v1353_v35 = vld [vmem:[#allocation5 + $0x21d0] sm:$0xff]  ;;  %v714_v36 = vld [vmem:[#allocation5 + $0xdd8] sm:$0xff] }
  0xd4   :  { %1755 = vmatpush.msra.mxu2 %v1023_v4  ;;  %1775 = vmatpush.msra.mxu3 %v1183_v37  ;;  %v1343_v4 = vld [vmem:[#allocation5 + $0x2180] sm:$0xff]  ;;  %v384_v37 = vld [vmem:[#allocation5 + $0x388] sm:$0xff] }
  0xd5   :  { %1716 = vmatpush.msra.mxu0 %v693_v38  ;;  %1736 = vmatpush.msra.mxu1 %v853_v39  ;;  %v544_v38 = vld [vmem:[#allocation5 + $0x888] sm:$0xff] }
  0xd6   :  { %1756 = vmatpush.msra.mxu2 %v1013_v40  ;;  %1776 = vmatpush.msra.mxu3 %v1173_v41  ;;  %v704_v39 = vld [vmem:[#allocation5 + $0xd88] sm:$0xff]  ;;  %v1333_v40 = vld [vmem:[#allocation5 + $0x2130] sm:$0xff]  ;;  %v374_v41 = vld [vmem:[#allocation5 + $0x338] sm:$0xff] }
  0xd7   :  { %1717 = vmatpush.msra.mxu0 %v683_v42  ;;  %1737 = vmatpush.msra.mxu1 %v843_v43  ;;  %v534_v42 = vld [vmem:[#allocation5 + $0x838] sm:$0xff] }
  0xd8   :  { %1757 = vmatpush.msra.mxu2 %v1003_v44  ;;  %1777 = vmatpush.msra.mxu3 %v1163_v45  ;;  %v694_v43 = vld [vmem:[#allocation5 + $0xd38] sm:$0xff]  ;;  %v1323_v44 = vld [vmem:[#allocation5 + $0x20e0] sm:$0xff]  ;;  %v364_v45 = vld [vmem:[#allocation5 + $0x2e8] sm:$0xff] }
  0xd9   :  { %1718 = vmatpush.msra.mxu0 %v673_v46  ;;  %1738 = vmatpush.msra.mxu1 %v833_v47  ;;  %v524_v46 = vld [vmem:[#allocation5 + $0x7e8] sm:$0xff] }
  0xda   :  { %1758 = vmatpush.msra.mxu2 %v993_v49  ;;  %1778 = vmatpush.msra.mxu3 %v1153_v50  ;;  %v684_v47 = vld [vmem:[#allocation5 + $0xce8] sm:$0xff]  ;;  %v1313_v49 = vld [vmem:[#allocation5 + $0x2090] sm:$0xff]  ;;  %v354_v50 = vld [vmem:[#allocation5 + $0x298] sm:$0xff] }
  0xdb   :  { %1719 = vmatpush.msra.mxu0 %v663_v51  ;;  %1739 = vmatpush.msra.mxu1 %v823_v52  ;;  %v514_v51 = vld [vmem:[#allocation5 + $0x798] sm:$0xff] }
  0xdc   :  { %1759 = vmatpush.msra.mxu2 %v983_v55  ;;  %1779 = vmatpush.msra.mxu3 %v1143_v56  ;;  %v674_v52 = vld [vmem:[#allocation5 + $0xc98] sm:$0xff]  ;;  %v1303_v55 = vld [vmem:[#allocation5 + $0x2040] sm:$0xff]  ;;  %v344_v56 = vld [vmem:[#allocation5 + $0x248] sm:$0xff] }
  0xdd   :  { %1720 = vmatpush.msra.mxu0 %v653_v57  ;;  %1740 = vmatpush.msra.mxu1 %v813_v58  ;;  %v504_v57 = vld [vmem:[#allocation5 + $0x748] sm:$0xff] }
  0xde   :  { %1760 = vmatpush.msra.mxu2 %v973_v60  ;;  %1780 = vmatpush.msra.mxu3 %v1133_v61  ;;  %v664_v58 = vld [vmem:[#allocation5 + $0xc48] sm:$0xff]  ;;  %v1293_v60 = vld [vmem:[#allocation5 + $0x1ff0] sm:$0xff]  ;;  %v334_v61 = vld [vmem:[#allocation5 + $0x1f8] sm:$0xff] }
  0xdf   :  { %1721 = vmatpush.msra.mxu0 %v643_v62  ;;  %1741 = vmatpush.msra.mxu1 %v803_v63  ;;  %v494_v62 = vld [vmem:[#allocation5 + $0x6f8] sm:$0xff] }
  0xe0   :  { %1761 = vmatpush.msra.mxu2 %v963_v0  ;;  %1781 = vmatpush.msra.mxu3 %v1123_v1  ;;  %v654_v63 = vld [vmem:[#allocation5 + $0xbf8] sm:$0xff]  ;;  %v1283_v0 = vld [vmem:[#allocation5 + $0x1fa0] sm:$0xff]  ;;  %v324_v1 = vld [vmem:[#allocation5 + $0x1a8] sm:$0xff] }
  0xe1   :  { %1722 = vmatpush.msra.mxu0 %v633_v2  ;;  %1742 = vmatpush.msra.mxu1 %v793_v3  ;;  %v484_v2 = vld [vmem:[#allocation5 + $0x6a8] sm:$0xff] }
  0xe2   :  { %1762 = vmatpush.msra.mxu2 %v953_v5  ;;  %1782 = vmatpush.msra.mxu3 %v1113_v6  ;;  %v644_v3 = vld [vmem:[#allocation5 + $0xba8] sm:$0xff]  ;;  %v1273_v5 = vld [vmem:[#allocation5 + $0x1f50] sm:$0xff]  ;;  %v314_v6 = vld [vmem:[#allocation5 + $0x158] sm:$0xff] }
  0xe3   :  { %1723 = vmatpush.msra.mxu0 %v623_v7  ;;  %1743 = vmatpush.msra.mxu1 %v783_v8  ;;  %v474_v7 = vld [vmem:[#allocation5 + $0x658] sm:$0xff] }
  0xe4   :  { %1763 = vmatpush.msra.mxu2 %v943_v10  ;;  %1783 = vmatpush.msra.mxu3 %v1103_v11  ;;  %v634_v8 = vld [vmem:[#allocation5 + $0xb58] sm:$0xff]  ;;  %v1263_v10 = vld [vmem:[#allocation5 + $0x1f00] sm:$0xff]  ;;  %v304_v11 = vld [vmem:[#allocation5 + $0x108] sm:$0xff] }
  0xe5   :  { %1724 = vmatpush.msra.mxu0 %v613_v54  ;;  %1744 = vmatpush.msra.mxu1 %v773_v12  ;;  %v464_v54 = vld [vmem:[#allocation5 + $0x608] sm:$0xff]  ;;  %v6853_v12 = vld [vmem:[#allocation2 + $0x10] sm:$0xff] }
  0xe6   :  { %1764 = vmatpush.msra.mxu2 %v933_v13  ;;  %1784 = vmatpush.msra.mxu3 %v1093_v15  ;;  %v624_v13 = vld [vmem:[#allocation5 + $0xb08] sm:$0xff]  ;;  %v1253_v15 = vld [vmem:[#allocation5 + $0x1eb0] sm:$0xff] }
  0xe7   :  { %1725 = vmatpush.msra.mxu0 %v603_v16  ;;  %1745 = vmatpush.msra.mxu1 %v763_v17  ;;  %v294_v16 = vld [vmem:[#allocation5 + $0xb8] sm:$0xff] }
  0xe8   :  { %1765 = vmatpush.msra.mxu2 %v923_v18  ;;  %1785 = vmatpush.msra.mxu3 %v1083_v19  ;;  %v614_v17 = vld [vmem:[#allocation5 + $0xab8] sm:$0xff]  ;;  %v6857_v18 = vld [vmem:[#allocation2 + $0x18] sm:$0xff] }
  0xe9   :  { %1726 = vmatpush.msra.mxu0 %v593_v20  ;;  %1746 = vmatpush.msra.mxu1 %v753_v48  ;;  %v1243_v19 = vld [vmem:[#allocation5 + $0x1e60] sm:$0xff]  ;;  %v284_v20 = vld [vmem:[#allocation5 + $0x68] sm:$0xff] }
  0xea   :  { %1766 = vmatpush.msra.mxu2 %v913_v21  ;;  %1786 = vmatpush.msra.mxu3 %v1073_v22  ;;  %v444_v48 = vld [vmem:[#allocation5 + $0x568] sm:$0xff]  ;;  %v274_v22 = vld [vmem:[#allocation5 + $0x18] sm:$0xff] }
  0xeb   :  { %1687 = vmatmul.f32.vlgmr.msrb.gmra.mxu2 %v6824_v53  ;;  %1707 = vmatmul.f32.vlgmr.msrb.gmra.mxu3 %v6830_v59  ;;  %v394_v53 = vld [vmem:[#allocation5 + $0x3d8] sm:$0xff]  ;;  %v604_v21 = vld [vmem:[#allocation5 + $0xa68] sm:$0xff] }
  0xec   :  { %1791 = vmatpush.msrb.mxu0 %v1383_v23  ;;  %1811 = vmatpush.msrb.mxu1 %v424_v24  ;;  %v554_v59 = vld [vmem:[#allocation5 + $0x8d8] sm:$0xff] }
  0xed   :  { %1831 = vmatpush.msrb.mxu2 %v584_v25  ;;  %1851 = vmatpush.msrb.mxu3 %v744_v26  ;;  %v434_v23 = vld [vmem:[#allocation5 + $0x518] sm:$0xff]  ;;  %v1064_v25 = vld [vmem:[#allocation5 + $0x18c8] sm:$0xff] }
  0xee   :  { %1792 = vmatpush.msrb.mxu0 %v1373_v27  ;;  %1812 = vmatpush.msrb.mxu1 %v414_v28  ;;  %v594_v24 = vld [vmem:[#allocation5 + $0xa18] sm:$0xff]  ;;  %v904_v26 = vld [vmem:[#allocation5 + $0x13c8] sm:$0xff] }
  0xef   :  { %1832 = vmatpush.msrb.mxu2 %v574_v29  ;;  %1852 = vmatpush.msrb.mxu3 %v734_v30  ;;  %v1224_v27 = vld [vmem:[#allocation5 + $0x1dc8] sm:$0xff]  ;;  %v1054_v29 = vld [vmem:[#allocation5 + $0x1878] sm:$0xff] }
  0xf0   :  { %1793 = vmatpush.msrb.mxu0 %v1363_v31  ;;  %1813 = vmatpush.msrb.mxu1 %v404_v32  ;;  %v1384_v28 = vld [vmem:[#allocation5 + $0x22c8] sm:$0xff]  ;;  %v6860_v30 = vld [vmem:[#allocation2 + $0x30] sm:$0xff] }
  0xf1   :  { %1833 = vmatpush.msrb.mxu2 %v564_v33  ;;  %1853 = vmatpush.msrb.mxu3 %v724_v34  ;;  %v894_v31 = vld [vmem:[#allocation5 + $0x1378] sm:$0xff]  ;;  %v1044_v34 = vld [vmem:[#allocation5 + $0x1828] sm:$0xff] }
  0xf2   :  { %1794 = vmatpush.msrb.mxu0 %v1353_v35  ;;  %1814 = vmatpush.msrb.mxu1 %v394_v53  ;;  %v1214_v32 = vld [vmem:[#allocation5 + $0x1d78] sm:$0xff]  ;;  %v884_v35 = vld [vmem:[#allocation5 + $0x1328] sm:$0xff] }
  0xf3   :  { %1834 = vmatpush.msrb.mxu2 %v554_v59  ;;  %1854 = vmatpush.msrb.mxu3 %v714_v36  ;;  %v1374_v33 = vld [vmem:[#allocation5 + $0x2278] sm:$0xff]  ;;  %v1204_v53 = vld [vmem:[#allocation5 + $0x1d28] sm:$0xff] }
  0xf4   :  { %1795 = vmatpush.msrb.mxu0 %v1343_v4  ;;  %1815 = vmatpush.msrb.mxu1 %v384_v37  ;;  %v1364_v59 = vld [vmem:[#allocation5 + $0x2228] sm:$0xff]  ;;  %v1034_v36 = vld [vmem:[#allocation5 + $0x17d8] sm:$0xff] }
  0xf5   :  { %1835 = vmatpush.msrb.mxu2 %v544_v38  ;;  %1855 = vmatpush.msrb.mxu3 %v704_v39  ;;  %v874_v4 = vld [vmem:[#allocation5 + $0x12d8] sm:$0xff]  ;;  %v1024_v39 = vld [vmem:[#allocation5 + $0x1788] sm:$0xff] }
  0xf6   :  { %1796 = vmatpush.msrb.mxu0 %v1333_v40  ;;  %1816 = vmatpush.msrb.mxu1 %v374_v41  ;;  %v1194_v37 = vld [vmem:[#allocation5 + $0x1cd8] sm:$0xff]  ;;  %v864_v40 = vld [vmem:[#allocation5 + $0x1288] sm:$0xff] }
  0xf7   :  { %1836 = vmatpush.msrb.mxu2 %v534_v42  ;;  %1856 = vmatpush.msrb.mxu3 %v694_v43  ;;  %v1354_v38 = vld [vmem:[#allocation5 + $0x21d8] sm:$0xff]  ;;  %v1184_v41 = vld [vmem:[#allocation5 + $0x1c88] sm:$0xff] }
  0xf8   :  { %1797 = vmatpush.msrb.mxu0 %v1323_v44  ;;  %1817 = vmatpush.msrb.mxu1 %v364_v45  ;;  %v1344_v42 = vld [vmem:[#allocation5 + $0x2188] sm:$0xff]  ;;  %v1014_v43 = vld [vmem:[#allocation5 + $0x1738] sm:$0xff] }
  0xf9   :  { %1837 = vmatpush.msrb.mxu2 %v524_v46  ;;  %1857 = vmatpush.msrb.mxu3 %v684_v47  ;;  %v854_v44 = vld [vmem:[#allocation5 + $0x1238] sm:$0xff]  ;;  %v1004_v47 = vld [vmem:[#allocation5 + $0x16e8] sm:$0xff] }
  0xfa   :  { %1798 = vmatpush.msrb.mxu0 %v1313_v49  ;;  %1818 = vmatpush.msrb.mxu1 %v354_v50  ;;  %v1174_v45 = vld [vmem:[#allocation5 + $0x1c38] sm:$0xff]  ;;  %v844_v49 = vld [vmem:[#allocation5 + $0x11e8] sm:$0xff] }
  0xfb   :  { %1838 = vmatpush.msrb.mxu2 %v514_v51  ;;  %1858 = vmatpush.msrb.mxu3 %v674_v52  ;;  %v1334_v46 = vld [vmem:[#allocation5 + $0x2138] sm:$0xff]  ;;  %v1164_v50 = vld [vmem:[#allocation5 + $0x1be8] sm:$0xff] }
  0xfc   :  { %1799 = vmatpush.msrb.mxu0 %v1303_v55  ;;  %1819 = vmatpush.msrb.mxu1 %v344_v56  ;;  %v1324_v51 = vld [vmem:[#allocation5 + $0x20e8] sm:$0xff]  ;;  %v994_v52 = vld [vmem:[#allocation5 + $0x1698] sm:$0xff] }
  0xfd   :  { %1839 = vmatpush.msrb.mxu2 %v504_v57  ;;  %1859 = vmatpush.msrb.mxu3 %v664_v58  ;;  %v834_v55 = vld [vmem:[#allocation5 + $0x1198] sm:$0xff]  ;;  %v984_v58 = vld [vmem:[#allocation5 + $0x1648] sm:$0xff] }
  0xfe   :  { %1800 = vmatpush.msrb.mxu0 %v1293_v60  ;;  %1820 = vmatpush.msrb.mxu1 %v334_v61  ;;  %v1154_v56 = vld [vmem:[#allocation5 + $0x1b98] sm:$0xff]  ;;  %v824_v60 = vld [vmem:[#allocation5 + $0x1148] sm:$0xff] }
  0xff   :  { %1840 = vmatpush.msrb.mxu2 %v494_v62  ;;  %1860 = vmatpush.msrb.mxu3 %v654_v63  ;;  %v1314_v57 = vld [vmem:[#allocation5 + $0x2098] sm:$0xff]  ;;  %v1144_v61 = vld [vmem:[#allocation5 + $0x1b48] sm:$0xff] }
 0x100   :  { %1801 = vmatpush.msrb.mxu0 %v1283_v0  ;;  %1821 = vmatpush.msrb.mxu1 %v324_v1  ;;  %v1304_v62 = vld [vmem:[#allocation5 + $0x2048] sm:$0xff]  ;;  %v974_v63 = vld [vmem:[#allocation5 + $0x15f8] sm:$0xff] }
 0x101   :  { %1841 = vmatpush.msrb.mxu2 %v484_v2  ;;  %1861 = vmatpush.msrb.mxu3 %v644_v3  ;;  %v814_v0 = vld [vmem:[#allocation5 + $0x10f8] sm:$0xff]  ;;  %v964_v3 = vld [vmem:[#allocation5 + $0x15a8] sm:$0xff] }
 0x102   :  { %1767 = vmatmul.f32.vlgmr.msra.gmra.mxu2 %v6836_v9  ;;  %1802 = vmatpush.msrb.mxu0 %v1273_v5  ;;  %v454_v9 = vld [vmem:[#allocation5 + $0x5b8] sm:$0xff]  ;;  %v804_v5 = vld [vmem:[#allocation5 + $0x10a8] sm:$0xff] }
 0x103   :  { %1822 = vmatpush.msrb.mxu1 %v314_v6  ;;  %1842 = vmatpush.msrb.mxu2 %v474_v7  ;;  %v1134_v1 = vld [vmem:[#allocation5 + $0x1af8] sm:$0xff]  ;;  %v1124_v6 = vld [vmem:[#allocation5 + $0x1aa8] sm:$0xff] }
 0x104   :  { %1862 = vmatpush.msrb.mxu3 %v634_v8  ;;  %1727 = vmatmul.f32.vlgmr.msra.gmra.mxu0 %v6853_v12  ;;  %v1294_v2 = vld [vmem:[#allocation5 + $0x1ff8] sm:$0xff]  ;;  %v1284_v7 = vld [vmem:[#allocation5 + $0x1fa8] sm:$0xff] }
 0x105   :  { %1787 = vmatmul.f32.vlgmr.msra.gmra.mxu3 %v6840_v14  ;;  %1803 = vmatpush.msrb.mxu0 %v1263_v10  ;;  %v1233_v14 = vld [vmem:[#allocation5 + $0x1e10] sm:$0xff]  ;;  %v954_v8 = vld [vmem:[#allocation5 + $0x1558] sm:$0xff] }
 0x106   :  { %1823 = vmatpush.msrb.mxu1 %v304_v11  ;;  %1843 = vmatpush.msrb.mxu2 %v464_v54  ;;  %v794_v10 = vld [vmem:[#allocation5 + $0x1058] sm:$0xff] }
 0x107   :  { %1863 = vmatpush.msrb.mxu3 %v624_v13  ;;  %1747 = vmatmul.f32.vlgmr.msra.gmra.mxu1 %v6857_v18  ;;  %v1114_v11 = vld [vmem:[#allocation5 + $0x1a58] sm:$0xff]  ;;  %v784_v13 = vld [vmem:[#allocation5 + $0x1008] sm:$0xff] }
 0x108   :  { %1804 = vmatpush.msrb.mxu0 %v1253_v15  ;;  %1824 = vmatpush.msrb.mxu1 %v294_v16  ;;  %v1274_v54 = vld [vmem:[#allocation5 + $0x1f58] sm:$0xff]  ;;  %v944_v15 = vld [vmem:[#allocation5 + $0x1508] sm:$0xff] }
 0x109   :  { %1844 = vmatpush.msrb.mxu2 %v454_v9  ;;  %1864 = vmatpush.msrb.mxu3 %v614_v17  ;;  %v1104_v16 = vld [vmem:[#allocation5 + $0x1a08] sm:$0xff]  ;;  %v6863_v17 = vld [vmem:[#allocation2 + $0x8] sm:$0xff] }
 0x10a   :  { %1805 = vmatpush.msrb.mxu0 %v1243_v19  ;;  %1825 = vmatpush.msrb.mxu1 %v284_v20  ;;  %v1264_v9 = vld [vmem:[#allocation5 + $0x1f08] sm:$0xff]  ;;  %v774_v19 = vld [vmem:[#allocation5 + $0xfb8] sm:$0xff] }
 0x10b   :  { %1845 = vmatpush.msrb.mxu2 %v444_v48  ;;  %1865 = vmatpush.msrb.mxu3 %v604_v21  ;;  %v934_v20 = vld [vmem:[#allocation5 + $0x14b8] sm:$0xff] }
 0x10c   :  { %1806 = vmatpush.msrb.mxu0 %v1233_v14  ;;  %1826 = vmatpush.msrb.mxu1 %v274_v22  ;;  %v1094_v48 = vld [vmem:[#allocation5 + $0x19b8] sm:$0xff]  ;;  %v764_v14 = vld [vmem:[#allocation5 + $0xf68] sm:$0xff] }
 0x10d   :  { %1846 = vmatpush.msrb.mxu2 %v434_v23  ;;  %1866 = vmatpush.msrb.mxu3 %v594_v24  ;;  %v1254_v21 = vld [vmem:[#allocation5 + $0x1eb8] sm:$0xff]  ;;  %v924_v22 = vld [vmem:[#allocation5 + $0x1468] sm:$0xff] }
 0x10e   :  { %1807 = vmatmul.f32.vlgmr.msrb.gmra.mxu0 %v6860_v30  ;;  %1891 = vmatpush.msra.mxu1 %v1064_v25  ;;  %v1084_v23 = vld [vmem:[#allocation5 + $0x1968] sm:$0xff] }
 0x10f   :  { %1871 = vmatpush.msra.mxu0 %v904_v26  ;;  %1911 = vmatpush.msra.mxu2 %v1224_v27  ;;  %v1244_v24 = vld [vmem:[#allocation5 + $0x1e68] sm:$0xff]  ;;  %v754_v26 = vld [vmem:[#allocation5 + $0xf18] sm:$0xff] }
 0x110   :  { %1931 = vmatpush.msra.mxu3 %v1384_v28  ;;  %1892 = vmatpush.msra.mxu1 %v1054_v29  ;;  %v6867_v25 = vld [vmem:[#allocation2] sm:$0xff]  ;;  %v914_v27 = vld [vmem:[#allocation5 + $0x1418] sm:$0xff] }
 0x111   :  { %1872 = vmatpush.msra.mxu0 %v894_v31  ;;  %1912 = vmatpush.msra.mxu2 %v1214_v32  ;;  %v1074_v28 = vld [vmem:[#allocation5 + $0x1918] sm:$0xff]  ;;  %v425_v31 = vld [vmem:[#allocation5 + $0x4d0] sm:$0xff] }
 0x112   :  { %1932 = vmatpush.msra.mxu3 %v1374_v33  ;;  %1893 = vmatpush.msra.mxu1 %v1044_v34  ;;  %v1234_v29 = vld [vmem:[#allocation5 + $0x1e18] sm:$0xff]  ;;  %v585_v32 = vld [vmem:[#allocation5 + $0x9d0] sm:$0xff] }
 0x113   :  { %1873 = vmatpush.msra.mxu0 %v884_v35  ;;  %1913 = vmatpush.msra.mxu2 %v1204_v53  ;;  %v745_v33 = vld [vmem:[#allocation5 + $0xed0] sm:$0xff]  ;;  %v415_v53 = vld [vmem:[#allocation5 + $0x480] sm:$0xff] }
 0x114   :  { %1933 = vmatpush.msra.mxu3 %v1364_v59  ;;  %1894 = vmatpush.msra.mxu1 %v1034_v36  ;;  %v905_v34 = vld [vmem:[#allocation5 + $0x13d0] sm:$0xff]  ;;  %v575_v59 = vld [vmem:[#allocation5 + $0x980] sm:$0xff] }
 0x115   :  { %1874 = vmatpush.msra.mxu0 %v874_v4  ;;  %1914 = vmatpush.msra.mxu2 %v1194_v37  ;;  %v6870_v35 = vld [vmem:[#allocation2 + $0x28] sm:$0xff]  ;;  %v735_v36 = vld [vmem:[#allocation5 + $0xe80] sm:$0xff] }
 0x116   :  { %1934 = vmatpush.msra.mxu3 %v1354_v38  ;;  %1895 = vmatpush.msra.mxu1 %v1024_v39  ;;  %v895_v4 = vld [vmem:[#allocation5 + $0x1380] sm:$0xff]  ;;  %v405_v37 = vld [vmem:[#allocation5 + $0x430] sm:$0xff] }
 0x117   :  { %1875 = vmatpush.msra.mxu0 %v864_v40  ;;  %1915 = vmatpush.msra.mxu2 %v1184_v41  ;;  %v565_v38 = vld [vmem:[#allocation5 + $0x930] sm:$0xff]  ;;  %v6875_v41 = vld [vmem:[#allocation2 + $0x20] sm:$0xff] }
 0x118   :  { %1935 = vmatpush.msra.mxu3 %v1344_v42  ;;  %1896 = vmatpush.msra.mxu1 %v1014_v43  ;;  %v725_v39 = vld [vmem:[#allocation5 + $0xe30] sm:$0xff]  ;;  %v395_v42 = vld [vmem:[#allocation5 + $0x3e0] sm:$0xff] }
 0x119   :  { %1876 = vmatpush.msra.mxu0 %v854_v44  ;;  %1916 = vmatpush.msra.mxu2 %v1174_v45  ;;  %v885_v40 = vld [vmem:[#allocation5 + $0x1330] sm:$0xff]  ;;  %v555_v43 = vld [vmem:[#allocation5 + $0x8e0] sm:$0xff] }
 0x11a   :  { %1936 = vmatpush.msra.mxu3 %v1334_v46  ;;  %1897 = vmatpush.msra.mxu1 %v1004_v47  ;;  %v715_v44 = vld [vmem:[#allocation5 + $0xde0] sm:$0xff]  ;;  %v385_v46 = vld [vmem:[#allocation5 + $0x390] sm:$0xff] }
 0x11b   :  { %1877 = vmatpush.msra.mxu0 %v844_v49  ;;  %1917 = vmatpush.msra.mxu2 %v1164_v50  ;;  %v875_v45 = vld [vmem:[#allocation5 + $0x12e0] sm:$0xff]  ;;  %v545_v47 = vld [vmem:[#allocation5 + $0x890] sm:$0xff] }
 0x11c   :  { %1937 = vmatpush.msra.mxu3 %v1324_v51  ;;  %1898 = vmatpush.msra.mxu1 %v994_v52  ;;  %v705_v49 = vld [vmem:[#allocation5 + $0xd90] sm:$0xff]  ;;  %v375_v51 = vld [vmem:[#allocation5 + $0x340] sm:$0xff] }
 0x11d   :  { %1878 = vmatpush.msra.mxu0 %v834_v55  ;;  %1918 = vmatpush.msra.mxu2 %v1154_v56  ;;  %v865_v50 = vld [vmem:[#allocation5 + $0x1290] sm:$0xff]  ;;  %v535_v52 = vld [vmem:[#allocation5 + $0x840] sm:$0xff] }
 0x11e   :  { %1938 = vmatpush.msra.mxu3 %v1314_v57  ;;  %1899 = vmatpush.msra.mxu1 %v984_v58  ;;  %v695_v55 = vld [vmem:[#allocation5 + $0xd40] sm:$0xff]  ;;  %v365_v57 = vld [vmem:[#allocation5 + $0x2f0] sm:$0xff] }
 0x11f   :  { %1879 = vmatpush.msra.mxu0 %v824_v60  ;;  %1919 = vmatpush.msra.mxu2 %v1144_v61  ;;  %v855_v56 = vld [vmem:[#allocation5 + $0x1240] sm:$0xff]  ;;  %v525_v58 = vld [vmem:[#allocation5 + $0x7f0] sm:$0xff] }
 0x120   :  { %1939 = vmatpush.msra.mxu3 %v1304_v62  ;;  %1900 = vmatpush.msra.mxu1 %v974_v63  ;;  %v685_v60 = vld [vmem:[#allocation5 + $0xcf0] sm:$0xff]  ;;  %v355_v62 = vld [vmem:[#allocation5 + $0x2a0] sm:$0xff] }
 0x121   :  { %1880 = vmatpush.msra.mxu0 %v814_v0  ;;  %1920 = vmatpush.msra.mxu2 %v1134_v1  ;;  %v845_v61 = vld [vmem:[#allocation5 + $0x11f0] sm:$0xff]  ;;  %v515_v63 = vld [vmem:[#allocation5 + $0x7a0] sm:$0xff] }
 0x122   :  { %1940 = vmatpush.msra.mxu3 %v1294_v2  ;;  %1901 = vmatpush.msra.mxu1 %v964_v3  ;;  %v675_v0 = vld [vmem:[#allocation5 + $0xca0] sm:$0xff]  ;;  %v345_v2 = vld [vmem:[#allocation5 + $0x250] sm:$0xff] }
 0x123   :  { %1881 = vmatpush.msra.mxu0 %v804_v5  ;;  %1921 = vmatpush.msra.mxu2 %v1124_v6  ;;  %v835_v1 = vld [vmem:[#allocation5 + $0x11a0] sm:$0xff]  ;;  %v505_v3 = vld [vmem:[#allocation5 + $0x750] sm:$0xff] }
 0x124   :  { %1941 = vmatpush.msra.mxu3 %v1284_v7  ;;  %1902 = vmatpush.msra.mxu1 %v954_v8  ;;  %v665_v5 = vld [vmem:[#allocation5 + $0xc50] sm:$0xff]  ;;  %v335_v7 = vld [vmem:[#allocation5 + $0x200] sm:$0xff] }
 0x125   :  { %1882 = vmatpush.msra.mxu0 %v794_v10  ;;  %1922 = vmatpush.msra.mxu2 %v1114_v11  ;;  %v825_v6 = vld [vmem:[#allocation5 + $0x1150] sm:$0xff]  ;;  %v495_v8 = vld [vmem:[#allocation5 + $0x700] sm:$0xff] }
 0x126   :  { %1942 = vmatpush.msra.mxu3 %v1274_v54  ;;  %1847 = vmatmul.f32.vlgmr.msrb.gmra.mxu2 %v6863_v17  ;;  %v655_v10 = vld [vmem:[#allocation5 + $0xc00] sm:$0xff]  ;;  %v325_v54 = vld [vmem:[#allocation5 + $0x1b0] sm:$0xff] }
 0x127   :  { %1883 = vmatpush.msra.mxu0 %v784_v13  ;;  %1903 = vmatpush.msra.mxu1 %v944_v15  ;;  %v815_v11 = vld [vmem:[#allocation5 + $0x1100] sm:$0xff]  ;;  %v485_v13 = vld [vmem:[#allocation5 + $0x6b0] sm:$0xff] }
 0x128   :  { %1923 = vmatpush.msra.mxu2 %v1104_v16  ;;  %1943 = vmatpush.msra.mxu3 %v1264_v9  ;;  %v645_v15 = vld [vmem:[#allocation5 + $0xbb0] sm:$0xff]  ;;  %v315_v9 = vld [vmem:[#allocation5 + $0x160] sm:$0xff] }
 0x129   :  { %1867 = vmatmul.f32.vlgmr.msrb.gmra.mxu3 %v6853_v12  ;;  %1884 = vmatpush.msra.mxu0 %v774_v19  ;;  %v805_v16 = vld [vmem:[#allocation5 + $0x10b0] sm:$0xff]  ;;  %v475_v19 = vld [vmem:[#allocation5 + $0x660] sm:$0xff] }
 0x12a   :  { %1904 = vmatpush.msra.mxu1 %v934_v20  ;;  %1924 = vmatpush.msra.mxu2 %v1094_v48  ;;  %v635_v20 = vld [vmem:[#allocation5 + $0xb60] sm:$0xff] }
 0x12b   :  { %1944 = vmatpush.msra.mxu3 %v1254_v21  ;;  %1827 = vmatmul.f32.vlgmr.msrb.gmra.mxu1 %v6867_v25  ;;  %v795_v48 = vld [vmem:[#allocation5 + $0x1060] sm:$0xff]  ;;  %v305_v21 = vld [vmem:[#allocation5 + $0x110] sm:$0xff] }
 0x12c   :  { %1885 = vmatpush.msra.mxu0 %v764_v14  ;;  %1905 = vmatpush.msra.mxu1 %v924_v22  ;;  %v465_v14 = vld [vmem:[#allocation5 + $0x610] sm:$0xff] }
 0x12d   :  { %1925 = vmatpush.msra.mxu2 %v1084_v23  ;;  %1945 = vmatpush.msra.mxu3 %v1244_v24  ;;  %v625_v22 = vld [vmem:[#allocation5 + $0xb10] sm:$0xff]  ;;  %v295_v24 = vld [vmem:[#allocation5 + $0xc0] sm:$0xff] }
 0x12e   :  { %1886 = vmatpush.msra.mxu0 %v754_v26  ;;  %1906 = vmatpush.msra.mxu1 %v914_v27  ;;  %v785_v23 = vld [vmem:[#allocation5 + $0x1010] sm:$0xff]  ;;  %v455_v26 = vld [vmem:[#allocation5 + $0x5c0] sm:$0xff] }
 0x12f   :  { %1926 = vmatpush.msra.mxu2 %v1074_v28  ;;  %1946 = vmatpush.msra.mxu3 %v1234_v29  ;;  %v615_v27 = vld [vmem:[#allocation5 + $0xac0] sm:$0xff]  ;;  %v285_v29 = vld [vmem:[#allocation5 + $0x70] sm:$0xff] }
 0x130   :  { %1927 = vmatmul.f32.vlgmr.msra.gmra.mxu2 %v6870_v35  ;;  %1951 = vmatpush.msrb.mxu0 %v425_v31  ;;  %v775_v28 = vld [vmem:[#allocation5 + $0xfc0] sm:$0xff]  ;;  %v445_v31 = vld [vmem:[#allocation5 + $0x570] sm:$0xff] }
 0x131   :  { %1971 = vmatpush.msrb.mxu1 %v585_v32  ;;  %1991 = vmatpush.msrb.mxu2 %v745_v33  ;;  %v605_v32 = vld [vmem:[#allocation5 + $0xa70] sm:$0xff] }
 0x132   :  { %2011 = vmatpush.msrb.mxu3 %v905_v34  ;;  %1887 = vmatmul.f32.vlgmr.msra.gmra.mxu0 %v6857_v18  ;;  %v765_v33 = vld [vmem:[#allocation5 + $0xf70] sm:$0xff]  ;;  %v275_v34 = vld [vmem:[#allocation5 + $0x20] sm:$0xff] }
 0x133   :  { %1947 = vmatmul.f32.vlgmr.msra.gmra.mxu3 %v6860_v30  ;;  %1952 = vmatpush.msrb.mxu0 %v415_v53  ;;  %v435_v53 = vld [vmem:[#allocation5 + $0x520] sm:$0xff] }
 0x134   :  { %1972 = vmatpush.msrb.mxu1 %v575_v59  ;;  %1992 = vmatpush.msrb.mxu2 %v735_v36  ;;  %v595_v59 = vld [vmem:[#allocation5 + $0xa20] sm:$0xff] }
 0x135   :  { %2012 = vmatpush.msrb.mxu3 %v895_v4  ;;  %1907 = vmatmul.f32.vlgmr.msra.gmra.mxu1 %v6875_v41  ;;  %v755_v36 = vld [vmem:[#allocation5 + $0xf20] sm:$0xff]  ;;  %v1065_v4 = vld [vmem:[#allocation5 + $0x18d0] sm:$0xff] }
 0x136   :  { %1953 = vmatpush.msrb.mxu0 %v405_v37  ;;  %1973 = vmatpush.msrb.mxu1 %v565_v38  ;;  %v1225_v37 = vld [vmem:[#allocation5 + $0x1dd0] sm:$0xff] }
 0x137   :  { %1993 = vmatpush.msrb.mxu2 %v725_v39  ;;  %2013 = vmatpush.msrb.mxu3 %v885_v40  ;;  %v1385_v38 = vld [vmem:[#allocation5 + $0x22d0] sm:$0xff]  ;;  %v426_v39 = vld [vmem:[#allocation5 + $0x4d8] sm:$0xff]  ;;  %v1055_v40 = vld [vmem:[#allocation5 + $0x1880] sm:$0xff] }
 0x138   :  { %1954 = vmatpush.msrb.mxu0 %v395_v42  ;;  %1974 = vmatpush.msrb.mxu1 %v555_v43  ;;  %v1215_v42 = vld [vmem:[#allocation5 + $0x1d80] sm:$0xff] }
 0x139   :  { %1994 = vmatpush.msrb.mxu2 %v715_v44  ;;  %2014 = vmatpush.msrb.mxu3 %v875_v45  ;;  %v1375_v43 = vld [vmem:[#allocation5 + $0x2280] sm:$0xff]  ;;  %v416_v44 = vld [vmem:[#allocation5 + $0x488] sm:$0xff]  ;;  %v1045_v45 = vld [vmem:[#allocation5 + $0x1830] sm:$0xff] }
 0x13a   :  { %1955 = vmatpush.msrb.mxu0 %v385_v46  ;;  %1975 = vmatpush.msrb.mxu1 %v545_v47  ;;  %v1205_v46 = vld [vmem:[#allocation5 + $0x1d30] sm:$0xff] }
 0x13b   :  { %1995 = vmatpush.msrb.mxu2 %v705_v49  ;;  %2015 = vmatpush.msrb.mxu3 %v865_v50  ;;  %v1365_v47 = vld [vmem:[#allocation5 + $0x2230] sm:$0xff]  ;;  %v406_v49 = vld [vmem:[#allocation5 + $0x438] sm:$0xff]  ;;  %v1035_v50 = vld [vmem:[#allocation5 + $0x17e0] sm:$0xff] }
 0x13c   :  { %1956 = vmatpush.msrb.mxu0 %v375_v51  ;;  %1976 = vmatpush.msrb.mxu1 %v535_v52  ;;  %v1195_v51 = vld [vmem:[#allocation5 + $0x1ce0] sm:$0xff] }
 0x13d   :  { %1996 = vmatpush.msrb.mxu2 %v695_v55  ;;  %2016 = vmatpush.msrb.mxu3 %v855_v56  ;;  %v1355_v52 = vld [vmem:[#allocation5 + $0x21e0] sm:$0xff]  ;;  %v396_v55 = vld [vmem:[#allocation5 + $0x3e8] sm:$0xff]  ;;  %v1025_v56 = vld [vmem:[#allocation5 + $0x1790] sm:$0xff] }
 0x13e   :  { %1957 = vmatpush.msrb.mxu0 %v365_v57  ;;  %1977 = vmatpush.msrb.mxu1 %v525_v58  ;;  %v1185_v57 = vld [vmem:[#allocation5 + $0x1c90] sm:$0xff] }
 0x13f   :  { %1997 = vmatpush.msrb.mxu2 %v685_v60  ;;  %2017 = vmatpush.msrb.mxu3 %v845_v61  ;;  %v1345_v58 = vld [vmem:[#allocation5 + $0x2190] sm:$0xff]  ;;  %v386_v60 = vld [vmem:[#allocation5 + $0x398] sm:$0xff]  ;;  %v1015_v61 = vld [vmem:[#allocation5 + $0x1740] sm:$0xff] }
 0x140   :  { %1958 = vmatpush.msrb.mxu0 %v355_v62  ;;  %1978 = vmatpush.msrb.mxu1 %v515_v63  ;;  %v1175_v62 = vld [vmem:[#allocation5 + $0x1c40] sm:$0xff] }
 0x141   :  { %1998 = vmatpush.msrb.mxu2 %v675_v0  ;;  %2018 = vmatpush.msrb.mxu3 %v835_v1  ;;  %v1335_v63 = vld [vmem:[#allocation5 + $0x2140] sm:$0xff]  ;;  %v376_v0 = vld [vmem:[#allocation5 + $0x348] sm:$0xff]  ;;  %v1005_v1 = vld [vmem:[#allocation5 + $0x16f0] sm:$0xff] }
 0x142   :  { %1959 = vmatpush.msrb.mxu0 %v345_v2  ;;  %1979 = vmatpush.msrb.mxu1 %v505_v3  ;;  %v1165_v2 = vld [vmem:[#allocation5 + $0x1bf0] sm:$0xff] }
 0x143   :  { %1999 = vmatpush.msrb.mxu2 %v665_v5  ;;  %2019 = vmatpush.msrb.mxu3 %v825_v6  ;;  %v1325_v3 = vld [vmem:[#allocation5 + $0x20f0] sm:$0xff]  ;;  %v366_v5 = vld [vmem:[#allocation5 + $0x2f8] sm:$0xff]  ;;  %v995_v6 = vld [vmem:[#allocation5 + $0x16a0] sm:$0xff] }
 0x144   :  { %1960 = vmatpush.msrb.mxu0 %v335_v7  ;;  %1980 = vmatpush.msrb.mxu1 %v495_v8  ;;  %v1155_v7 = vld [vmem:[#allocation5 + $0x1ba0] sm:$0xff] }
 0x145   :  { %2000 = vmatpush.msrb.mxu2 %v655_v10  ;;  %2020 = vmatpush.msrb.mxu3 %v815_v11  ;;  %v1315_v8 = vld [vmem:[#allocation5 + $0x20a0] sm:$0xff]  ;;  %v356_v10 = vld [vmem:[#allocation5 + $0x2a8] sm:$0xff]  ;;  %v985_v11 = vld [vmem:[#allocation5 + $0x1650] sm:$0xff] }
 0x146   :  { %1961 = vmatpush.msrb.mxu0 %v325_v54  ;;  %1981 = vmatpush.msrb.mxu1 %v485_v13  ;;  %v1145_v54 = vld [vmem:[#allocation5 + $0x1b50] sm:$0xff] }
 0x147   :  { %2001 = vmatpush.msrb.mxu2 %v645_v15  ;;  %2021 = vmatpush.msrb.mxu3 %v805_v16  ;;  %v1305_v13 = vld [vmem:[#allocation5 + $0x2050] sm:$0xff]  ;;  %v346_v15 = vld [vmem:[#allocation5 + $0x258] sm:$0xff]  ;;  %v975_v16 = vld [vmem:[#allocation5 + $0x1600] sm:$0xff] }
 0x148   :  { %1962 = vmatpush.msrb.mxu0 %v315_v9  ;;  %1982 = vmatpush.msrb.mxu1 %v475_v19  ;;  %v1135_v9 = vld [vmem:[#allocation5 + $0x1b00] sm:$0xff] }
 0x149   :  { %2002 = vmatpush.msrb.mxu2 %v635_v20  ;;  %2022 = vmatpush.msrb.mxu3 %v795_v48  ;;  %v1295_v19 = vld [vmem:[#allocation5 + $0x2000] sm:$0xff]  ;;  %v336_v20 = vld [vmem:[#allocation5 + $0x208] sm:$0xff]  ;;  %v965_v48 = vld [vmem:[#allocation5 + $0x15b0] sm:$0xff] }
 0x14a   :  { %1963 = vmatpush.msrb.mxu0 %v305_v21  ;;  %1983 = vmatpush.msrb.mxu1 %v465_v14  ;;  %v1125_v21 = vld [vmem:[#allocation5 + $0x1ab0] sm:$0xff] }
 0x14b   :  { %2003 = vmatpush.msrb.mxu2 %v625_v22  ;;  %2023 = vmatpush.msrb.mxu3 %v785_v23  ;;  %v1285_v14 = vld [vmem:[#allocation5 + $0x1fb0] sm:$0xff]  ;;  %v326_v22 = vld [vmem:[#allocation5 + $0x1b8] sm:$0xff]  ;;  %v955_v23 = vld [vmem:[#allocation5 + $0x1560] sm:$0xff] }
 0x14c   :  { %1964 = vmatpush.msrb.mxu0 %v295_v24  ;;  %1984 = vmatpush.msrb.mxu1 %v455_v26  ;;  %v1115_v24 = vld [vmem:[#allocation5 + $0x1a60] sm:$0xff] }
 0x14d   :  { %2004 = vmatpush.msrb.mxu2 %v615_v27  ;;  %2024 = vmatpush.msrb.mxu3 %v775_v28  ;;  %v1275_v26 = vld [vmem:[#allocation5 + $0x1f60] sm:$0xff]  ;;  %v316_v27 = vld [vmem:[#allocation5 + $0x168] sm:$0xff]  ;;  %v945_v28 = vld [vmem:[#allocation5 + $0x1510] sm:$0xff] }
 0x14e   :  { %1965 = vmatpush.msrb.mxu0 %v285_v29  ;;  %1985 = vmatpush.msrb.mxu1 %v445_v31  ;;  %v1105_v29 = vld [vmem:[#allocation5 + $0x1a10] sm:$0xff] }
 0x14f   :  { %2005 = vmatpush.msrb.mxu2 %v605_v32  ;;  %2025 = vmatpush.msrb.mxu3 %v765_v33  ;;  %v1265_v31 = vld [vmem:[#allocation5 + $0x1f10] sm:$0xff]  ;;  %v306_v32 = vld [vmem:[#allocation5 + $0x118] sm:$0xff]  ;;  %v935_v33 = vld [vmem:[#allocation5 + $0x14c0] sm:$0xff] }
 0x150   :  { %1966 = vmatpush.msrb.mxu0 %v275_v34  ;;  %1986 = vmatpush.msrb.mxu1 %v435_v53  ;;  %v1095_v34 = vld [vmem:[#allocation5 + $0x19c0] sm:$0xff] }
 0x151   :  { %2006 = vmatpush.msrb.mxu2 %v595_v59  ;;  %2026 = vmatpush.msrb.mxu3 %v755_v36  ;;  %v1255_v53 = vld [vmem:[#allocation5 + $0x1ec0] sm:$0xff]  ;;  %v296_v59 = vld [vmem:[#allocation5 + $0xc8] sm:$0xff]  ;;  %v925_v36 = vld [vmem:[#allocation5 + $0x1470] sm:$0xff] }
 0x152   :  { %2031 = vmatpush.msra.mxu0 %v1065_v4  ;;  %2051 = vmatpush.msra.mxu1 %v1225_v37  ;;  %v1085_v4 = vld [vmem:[#allocation5 + $0x1970] sm:$0xff] }
 0x153   :  { %2071 = vmatpush.msra.mxu2 %v1385_v38  ;;  %2091 = vmatpush.msra.mxu3 %v426_v39  ;;  %v1245_v37 = vld [vmem:[#allocation5 + $0x1e70] sm:$0xff]  ;;  %v286_v38 = vld [vmem:[#allocation5 + $0x78] sm:$0xff]  ;;  %v1075_v39 = vld [vmem:[#allocation5 + $0x1920] sm:$0xff] }
 0x154   :  { %2032 = vmatpush.msra.mxu0 %v1055_v40  ;;  %2052 = vmatpush.msra.mxu1 %v1215_v42  ;;  %v1235_v40 = vld [vmem:[#allocation5 + $0x1e20] sm:$0xff]  ;;  %v276_v42 = vld [vmem:[#allocation5 + $0x28] sm:$0xff] }
 0x155   :  { %2072 = vmatpush.msra.mxu2 %v1375_v43  ;;  %2092 = vmatpush.msra.mxu3 %v416_v44  ;;  %v586_v43 = vld [vmem:[#allocation5 + $0x9d8] sm:$0xff] }
 0x156   :  { %2033 = vmatpush.msra.mxu0 %v1045_v45  ;;  %2053 = vmatpush.msra.mxu1 %v1205_v46  ;;  %v906_v44 = vld [vmem:[#allocation5 + $0x13d8] sm:$0xff]  ;;  %v736_v46 = vld [vmem:[#allocation5 + $0xe88] sm:$0xff] }
 0x157   :  { %2073 = vmatpush.msra.mxu2 %v1365_v47  ;;  %2093 = vmatpush.msra.mxu3 %v406_v49  ;;  %v1066_v45 = vld [vmem:[#allocation5 + $0x18d8] sm:$0xff]  ;;  %v896_v47 = vld [vmem:[#allocation5 + $0x1388] sm:$0xff] }
 0x158   :  { %2034 = vmatpush.msra.mxu0 %v1035_v50  ;;  %2054 = vmatpush.msra.mxu1 %v1195_v51  ;;  %v1056_v49 = vld [vmem:[#allocation5 + $0x1888] sm:$0xff]  ;;  %v566_v50 = vld [vmem:[#allocation5 + $0x938] sm:$0xff] }
 0x159   :  { %2074 = vmatpush.msra.mxu2 %v1355_v52  ;;  %2094 = vmatpush.msra.mxu3 %v396_v55  ;;  %v726_v51 = vld [vmem:[#allocation5 + $0xe38] sm:$0xff] }
 0x15a   :  { %2035 = vmatpush.msra.mxu0 %v1025_v56  ;;  %2055 = vmatpush.msra.mxu1 %v1185_v57  ;;  %v886_v52 = vld [vmem:[#allocation5 + $0x1338] sm:$0xff]  ;;  %v556_v56 = vld [vmem:[#allocation5 + $0x8e8] sm:$0xff] }
 0x15b   :  { %2075 = vmatpush.msra.mxu2 %v1345_v58  ;;  %2095 = vmatpush.msra.mxu3 %v386_v60  ;;  %v1046_v55 = vld [vmem:[#allocation5 + $0x1838] sm:$0xff]  ;;  %v876_v57 = vld [vmem:[#allocation5 + $0x12e8] sm:$0xff] }
 0x15c   :  { %2036 = vmatpush.msra.mxu0 %v1015_v61  ;;  %2056 = vmatpush.msra.mxu1 %v1175_v62  ;;  %v1036_v58 = vld [vmem:[#allocation5 + $0x17e8] sm:$0xff]  ;;  %v546_v60 = vld [vmem:[#allocation5 + $0x898] sm:$0xff] }
 0x15d   :  { %2076 = vmatpush.msra.mxu2 %v1335_v63  ;;  %2096 = vmatpush.msra.mxu3 %v376_v0  ;;  %v706_v61 = vld [vmem:[#allocation5 + $0xd98] sm:$0xff]  ;;  %v536_v0 = vld [vmem:[#allocation5 + $0x848] sm:$0xff] }
 0x15e   :  { %2037 = vmatpush.msra.mxu0 %v1005_v1  ;;  %2057 = vmatpush.msra.mxu1 %v1165_v2  ;;  %v866_v62 = vld [vmem:[#allocation5 + $0x1298] sm:$0xff]  ;;  %v696_v1 = vld [vmem:[#allocation5 + $0xd48] sm:$0xff] }
 0x15f   :  { %2077 = vmatpush.msra.mxu2 %v1325_v3  ;;  %2097 = vmatpush.msra.mxu3 %v366_v5  ;;  %v1026_v63 = vld [vmem:[#allocation5 + $0x1798] sm:$0xff]  ;;  %v856_v2 = vld [vmem:[#allocation5 + $0x1248] sm:$0xff] }
 0x160   :  { %2038 = vmatpush.msra.mxu0 %v995_v6  ;;  %2058 = vmatpush.msra.mxu1 %v1155_v7  ;;  %v526_v3 = vld [vmem:[#allocation5 + $0x7f8] sm:$0xff] }
 0x161   :  { %2078 = vmatpush.msra.mxu2 %v1315_v8  ;;  %2098 = vmatpush.msra.mxu3 %v356_v10  ;;  %v686_v5 = vld [vmem:[#allocation5 + $0xcf8] sm:$0xff]  ;;  %v516_v8 = vld [vmem:[#allocation5 + $0x7a8] sm:$0xff] }
 0x162   :  { %2039 = vmatpush.msra.mxu0 %v985_v11  ;;  %2059 = vmatpush.msra.mxu1 %v1145_v54  ;;  %v846_v6 = vld [vmem:[#allocation5 + $0x11f8] sm:$0xff]  ;;  %v676_v10 = vld [vmem:[#allocation5 + $0xca8] sm:$0xff] }
 0x163   :  { %2079 = vmatpush.msra.mxu2 %v1305_v13  ;;  %2099 = vmatpush.msra.mxu3 %v346_v15  ;;  %v1006_v7 = vld [vmem:[#allocation5 + $0x16f8] sm:$0xff]  ;;  %v836_v11 = vld [vmem:[#allocation5 + $0x11a8] sm:$0xff] }
 0x164   :  { %2040 = vmatpush.msra.mxu0 %v975_v16  ;;  %2060 = vmatpush.msra.mxu1 %v1135_v9  ;;  %v996_v54 = vld [vmem:[#allocation5 + $0x16a8] sm:$0xff]  ;;  %v506_v13 = vld [vmem:[#allocation5 + $0x758] sm:$0xff] }
 0x165   :  { %2080 = vmatpush.msra.mxu2 %v1295_v19  ;;  %2100 = vmatpush.msra.mxu3 %v336_v20  ;;  %v666_v15 = vld [vmem:[#allocation5 + $0xc58] sm:$0xff]  ;;  %v496_v19 = vld [vmem:[#allocation5 + $0x708] sm:$0xff] }
 0x166   :  { %2041 = vmatpush.msra.mxu0 %v965_v48  ;;  %2061 = vmatpush.msra.mxu1 %v1125_v21  ;;  %v826_v16 = vld [vmem:[#allocation5 + $0x1158] sm:$0xff]  ;;  %v656_v20 = vld [vmem:[#allocation5 + $0xc08] sm:$0xff] }
 0x167   :  { %2081 = vmatpush.msra.mxu2 %v1285_v14  ;;  %2101 = vmatpush.msra.mxu3 %v326_v22  ;;  %v986_v9 = vld [vmem:[#allocation5 + $0x1658] sm:$0xff]  ;;  %v816_v48 = vld [vmem:[#allocation5 + $0x1108] sm:$0xff] }
 0x168   :  { %2042 = vmatpush.msra.mxu0 %v955_v23  ;;  %2062 = vmatpush.msra.mxu1 %v1115_v24  ;;  %v976_v21 = vld [vmem:[#allocation5 + $0x1608] sm:$0xff]  ;;  %v486_v14 = vld [vmem:[#allocation5 + $0x6b8] sm:$0xff] }
 0x169   :  { %2082 = vmatpush.msra.mxu2 %v1275_v26  ;;  %2102 = vmatpush.msra.mxu3 %v316_v27  ;;  %v646_v22 = vld [vmem:[#allocation5 + $0xbb8] sm:$0xff]  ;;  %v476_v26 = vld [vmem:[#allocation5 + $0x668] sm:$0xff] }
 0x16a   :  { %2007 = vmatmul.f32.vlgmr.msrb.gmra.mxu2 %v6853_v12  ;;  %2043 = vmatpush.msra.mxu0 %v945_v28  ;;  %v915_v12 = vld [vmem:[#allocation5 + $0x1420] sm:$0xff]  ;;  %v806_v23 = vld [vmem:[#allocation5 + $0x10b8] sm:$0xff]  ;;  %v636_v27 = vld [vmem:[#allocation5 + $0xb68] sm:$0xff] }
 0x16b   :  { %2063 = vmatpush.msra.mxu1 %v1105_v29  ;;  %2083 = vmatpush.msra.mxu2 %v1265_v31  ;;  %v966_v24 = vld [vmem:[#allocation5 + $0x15b8] sm:$0xff]  ;;  %v796_v28 = vld [vmem:[#allocation5 + $0x1068] sm:$0xff] }
 0x16c   :  { %2103 = vmatpush.msra.mxu3 %v306_v32  ;;  %1967 = vmatmul.f32.vlgmr.msrb.gmra.mxu0 %v6867_v25  ;;  %v956_v29 = vld [vmem:[#allocation5 + $0x1568] sm:$0xff]  ;;  %v466_v31 = vld [vmem:[#allocation5 + $0x618] sm:$0xff] }
 0x16d   :  { %2027 = vmatmul.f32.vlgmr.msrb.gmra.mxu3 %v6857_v18  ;;  %2044 = vmatpush.msra.mxu0 %v935_v33  ;;  %v746_v18 = vld [vmem:[#allocation5 + $0xed8] sm:$0xff] }
 0x16e   :  { %2064 = vmatpush.msra.mxu1 %v1095_v34  ;;  %2084 = vmatpush.msra.mxu2 %v1255_v53  ;;  %v626_v32 = vld [vmem:[#allocation5 + $0xb18] sm:$0xff]  ;;  %v456_v53 = vld [vmem:[#allocation5 + $0x5c8] sm:$0xff] }
 0x16f   :  { %2104 = vmatpush.msra.mxu3 %v296_v59  ;;  %1987 = vmatmul.f32.vlgmr.msrb.gmra.mxu1 %v6863_v17  ;;  %v576_v17 = vld [vmem:[#allocation5 + $0x988] sm:$0xff]  ;;  %v786_v33 = vld [vmem:[#allocation5 + $0x1018] sm:$0xff] }
 0x170   :  { %2045 = vmatpush.msra.mxu0 %v925_v36  ;;  %2065 = vmatpush.msra.mxu1 %v1085_v4  ;;  %v946_v34 = vld [vmem:[#allocation5 + $0x1518] sm:$0xff]  ;;  %v616_v59 = vld [vmem:[#allocation5 + $0xac8] sm:$0xff] }
 0x171   :  { %2085 = vmatpush.msra.mxu2 %v1245_v37  ;;  %2105 = vmatpush.msra.mxu3 %v286_v38  ;;  %v776_v36 = vld [vmem:[#allocation5 + $0xfc8] sm:$0xff]  ;;  %v446_v37 = vld [vmem:[#allocation5 + $0x578] sm:$0xff] }
 0x172   :  { %2046 = vmatpush.msra.mxu0 %v915_v12  ;;  %2066 = vmatpush.msra.mxu1 %v1075_v39  ;;  %v936_v4 = vld [vmem:[#allocation5 + $0x14c8] sm:$0xff]  ;;  %v606_v38 = vld [vmem:[#allocation5 + $0xa78] sm:$0xff] }
 0x173   :  { %2086 = vmatpush.msra.mxu2 %v1235_v40  ;;  %2106 = vmatpush.msra.mxu3 %v276_v42  ;;  %v766_v12 = vld [vmem:[#allocation5 + $0xf78] sm:$0xff]  ;;  %v436_v40 = vld [vmem:[#allocation5 + $0x528] sm:$0xff] }
 0x174   :  { %2087 = vmatmul.f32.vlgmr.msra.gmra.mxu2 %v6860_v30  ;;  %2111 = vmatpush.msrb.mxu0 %v586_v43  ;;  %v716_v30 = vld [vmem:[#allocation5 + $0xde8] sm:$0xff]  ;;  %v926_v39 = vld [vmem:[#allocation5 + $0x1478] sm:$0xff] }
 0x175   :  { %2131 = vmatpush.msrb.mxu1 %v746_v18  ;;  %2151 = vmatpush.msrb.mxu2 %v906_v44  ;;  %v596_v42 = vld [vmem:[#allocation5 + $0xa28] sm:$0xff]  ;;  %v1226_v44 = vld [vmem:[#allocation5 + $0x1dd8] sm:$0xff] }
 0x176   :  { %2171 = vmatpush.msrb.mxu3 %v1066_v45  ;;  %2047 = vmatmul.f32.vlgmr.msra.gmra.mxu0 %v6875_v41  ;;  %v756_v43 = vld [vmem:[#allocation5 + $0xf28] sm:$0xff]  ;;  %v1386_v45 = vld [vmem:[#allocation5 + $0x22d8] sm:$0xff] }
 0x177   :  { %2112 = vmatpush.msrb.mxu0 %v576_v17  ;;  %2132 = vmatpush.msrb.mxu1 %v736_v46  ;;  %v916_v18 = vld [vmem:[#allocation5 + $0x1428] sm:$0xff]  ;;  %v427_v17 = vld [vmem:[#allocation5 + $0x4e0] sm:$0xff] }
 0x178   :  { %2152 = vmatpush.msrb.mxu2 %v896_v47  ;;  %2172 = vmatpush.msrb.mxu3 %v1056_v49  ;;  %v587_v46 = vld [vmem:[#allocation5 + $0x9e0] sm:$0xff]  ;;  %v1216_v47 = vld [vmem:[#allocation5 + $0x1d88] sm:$0xff] }
 0x179   :  { %2067 = vmatmul.f32.vlgmr.msra.gmra.mxu1 %v6870_v35  ;;  %2113 = vmatpush.msrb.mxu0 %v566_v50  ;;  %v1016_v35 = vld [vmem:[#allocation5 + $0x1748] sm:$0xff]  ;;  %v417_v50 = vld [vmem:[#allocation5 + $0x490] sm:$0xff] }
 0x17a   :  { %2133 = vmatpush.msrb.mxu1 %v726_v51  ;;  %2153 = vmatpush.msrb.mxu2 %v886_v52  ;;  %v1376_v49 = vld [vmem:[#allocation5 + $0x2288] sm:$0xff]  ;;  %v577_v51 = vld [vmem:[#allocation5 + $0x990] sm:$0xff]  ;;  %v1206_v52 = vld [vmem:[#allocation5 + $0x1d38] sm:$0xff] }
 0x17b   :  { %2173 = vmatpush.msrb.mxu3 %v1046_v55  ;;  %2114 = vmatpush.msrb.mxu0 %v556_v56  ;;  %v1366_v55 = vld [vmem:[#allocation5 + $0x2238] sm:$0xff]  ;;  %v407_v56 = vld [vmem:[#allocation5 + $0x440] sm:$0xff] }
 0x17c   :  { %2134 = vmatpush.msrb.mxu1 %v716_v30  ;;  %2154 = vmatpush.msrb.mxu2 %v876_v57  ;;  %v567_v30 = vld [vmem:[#allocation5 + $0x940] sm:$0xff]  ;;  %v1196_v57 = vld [vmem:[#allocation5 + $0x1ce8] sm:$0xff] }
 0x17d   :  { %2174 = vmatpush.msrb.mxu3 %v1036_v58  ;;  %2115 = vmatpush.msrb.mxu0 %v546_v60  ;;  %v1356_v58 = vld [vmem:[#allocation5 + $0x21e8] sm:$0xff]  ;;  %v397_v60 = vld [vmem:[#allocation5 + $0x3f0] sm:$0xff] }
 0x17e   :  { %2135 = vmatpush.msrb.mxu1 %v706_v61  ;;  %2155 = vmatpush.msrb.mxu2 %v866_v62  ;;  %v557_v61 = vld [vmem:[#allocation5 + $0x8f0] sm:$0xff]  ;;  %v1346_v62 = vld [vmem:[#allocation5 + $0x2198] sm:$0xff] }
 0x17f   :  { %2175 = vmatpush.msrb.mxu3 %v1026_v63  ;;  %2116 = vmatpush.msrb.mxu0 %v536_v0  ;;  %v387_v63 = vld [vmem:[#allocation5 + $0x3a0] sm:$0xff] }
 0x180   :  { %2136 = vmatpush.msrb.mxu1 %v696_v1  ;;  %2156 = vmatpush.msrb.mxu2 %v856_v2  ;;  %v547_v0 = vld [vmem:[#allocation5 + $0x8a0] sm:$0xff]  ;;  %v1176_v1 = vld [vmem:[#allocation5 + $0x1c48] sm:$0xff] }
 0x181   :  { %2176 = vmatpush.msrb.mxu3 %v1016_v35  ;;  %2117 = vmatpush.msrb.mxu0 %v526_v3  ;;  %v1336_v2 = vld [vmem:[#allocation5 + $0x2148] sm:$0xff]  ;;  %v377_v35 = vld [vmem:[#allocation5 + $0x350] sm:$0xff] }
 0x182   :  { %2137 = vmatpush.msrb.mxu1 %v686_v5  ;;  %2157 = vmatpush.msrb.mxu2 %v846_v6  ;;  %v537_v3 = vld [vmem:[#allocation5 + $0x850] sm:$0xff]  ;;  %v1166_v5 = vld [vmem:[#allocation5 + $0x1bf8] sm:$0xff] }
 0x183   :  { %2177 = vmatpush.msrb.mxu3 %v1006_v7  ;;  %2118 = vmatpush.msrb.mxu0 %v516_v8  ;;  %v1326_v6 = vld [vmem:[#allocation5 + $0x20f8] sm:$0xff]  ;;  %v367_v7 = vld [vmem:[#allocation5 + $0x300] sm:$0xff] }
 0x184   :  { %2138 = vmatpush.msrb.mxu1 %v676_v10  ;;  %2158 = vmatpush.msrb.mxu2 %v836_v11  ;;  %v527_v8 = vld [vmem:[#allocation5 + $0x800] sm:$0xff]  ;;  %v1156_v10 = vld [vmem:[#allocation5 + $0x1ba8] sm:$0xff] }
 0x185   :  { %2178 = vmatpush.msrb.mxu3 %v996_v54  ;;  %2119 = vmatpush.msrb.mxu0 %v506_v13  ;;  %v1316_v11 = vld [vmem:[#allocation5 + $0x20a8] sm:$0xff]  ;;  %v357_v54 = vld [vmem:[#allocation5 + $0x2b0] sm:$0xff] }
 0x186   :  { %2139 = vmatpush.msrb.mxu1 %v666_v15  ;;  %2159 = vmatpush.msrb.mxu2 %v826_v16  ;;  %v517_v13 = vld [vmem:[#allocation5 + $0x7b0] sm:$0xff]  ;;  %v1146_v15 = vld [vmem:[#allocation5 + $0x1b58] sm:$0xff] }
 0x187   :  { %2179 = vmatpush.msrb.mxu3 %v986_v9  ;;  %2120 = vmatpush.msrb.mxu0 %v496_v19  ;;  %v1306_v16 = vld [vmem:[#allocation5 + $0x2058] sm:$0xff]  ;;  %v347_v9 = vld [vmem:[#allocation5 + $0x260] sm:$0xff] }
 0x188   :  { %2140 = vmatpush.msrb.mxu1 %v656_v20  ;;  %2160 = vmatpush.msrb.mxu2 %v816_v48  ;;  %v507_v19 = vld [vmem:[#allocation5 + $0x760] sm:$0xff]  ;;  %v1136_v20 = vld [vmem:[#allocation5 + $0x1b08] sm:$0xff] }
 0x189   :  { %2180 = vmatpush.msrb.mxu3 %v976_v21  ;;  %2121 = vmatpush.msrb.mxu0 %v486_v14  ;;  %v1296_v48 = vld [vmem:[#allocation5 + $0x2008] sm:$0xff]  ;;  %v337_v21 = vld [vmem:[#allocation5 + $0x210] sm:$0xff] }
 0x18a   :  { %2141 = vmatpush.msrb.mxu1 %v646_v22  ;;  %2161 = vmatpush.msrb.mxu2 %v806_v23  ;;  %v497_v14 = vld [vmem:[#allocation5 + $0x710] sm:$0xff]  ;;  %v1126_v22 = vld [vmem:[#allocation5 + $0x1ab8] sm:$0xff] }
 0x18b   :  { %2181 = vmatpush.msrb.mxu3 %v966_v24  ;;  %2122 = vmatpush.msrb.mxu0 %v476_v26  ;;  %v1286_v23 = vld [vmem:[#allocation5 + $0x1fb8] sm:$0xff]  ;;  %v327_v24 = vld [vmem:[#allocation5 + $0x1c0] sm:$0xff] }
 0x18c   :  { %2142 = vmatpush.msrb.mxu1 %v636_v27  ;;  %2162 = vmatpush.msrb.mxu2 %v796_v28  ;;  %v487_v26 = vld [vmem:[#allocation5 + $0x6c0] sm:$0xff]  ;;  %v1116_v27 = vld [vmem:[#allocation5 + $0x1a68] sm:$0xff] }
 0x18d   :  { %2182 = vmatpush.msrb.mxu3 %v956_v29  ;;  %2123 = vmatpush.msrb.mxu0 %v466_v31  ;;  %v1276_v28 = vld [vmem:[#allocation5 + $0x1f68] sm:$0xff]  ;;  %v317_v29 = vld [vmem:[#allocation5 + $0x170] sm:$0xff] }
 0x18e   :  { %2143 = vmatpush.msrb.mxu1 %v626_v32  ;;  %2163 = vmatpush.msrb.mxu2 %v786_v33  ;;  %v477_v31 = vld [vmem:[#allocation5 + $0x670] sm:$0xff]  ;;  %v6886_v32 = vld [vmem:[#allocation2 + $0x18] sm:$0xff]  ;;  %v1106_v33 = vld [vmem:[#allocation5 + $0x1a18] sm:$0xff] }
 0x18f   :  { %2183 = vmatpush.msrb.mxu3 %v946_v34  ;;  %2124 = vmatpush.msrb.mxu0 %v456_v53  ;;  %v1266_v34 = vld [vmem:[#allocation5 + $0x1f18] sm:$0xff]  ;;  %v307_v53 = vld [vmem:[#allocation5 + $0x120] sm:$0xff] }
 0x190   :  { %2144 = vmatpush.msrb.mxu1 %v616_v59  ;;  %2164 = vmatpush.msrb.mxu2 %v776_v36  ;;  %v6889_v59 = vld [vmem:[#allocation2 + $0x8] sm:$0xff]  ;;  %v467_v36 = vld [vmem:[#allocation5 + $0x620] sm:$0xff] }
 0x191   :  { %2184 = vmatpush.msrb.mxu3 %v936_v4  ;;  %2125 = vmatpush.msrb.mxu0 %v446_v37  ;;  %v1096_v4 = vld [vmem:[#allocation5 + $0x19c8] sm:$0xff] }
 0x192   :  { %2145 = vmatpush.msrb.mxu1 %v606_v38  ;;  %2165 = vmatpush.msrb.mxu2 %v766_v12  ;;  %v1256_v37 = vld [vmem:[#allocation5 + $0x1ec8] sm:$0xff]  ;;  %v297_v38 = vld [vmem:[#allocation5 + $0xd0] sm:$0xff] }
 0x193   :  { %2185 = vmatpush.msrb.mxu3 %v926_v39  ;;  %2126 = vmatpush.msrb.mxu0 %v436_v40  ;;  %v457_v12 = vld [vmem:[#allocation5 + $0x5d0] sm:$0xff]  ;;  %v6893_v39 = vld [vmem:[#allocation2 + $0x10] sm:$0xff] }
 0x194   :  { %2146 = vmatpush.msrb.mxu1 %v596_v42  ;;  %2166 = vmatpush.msrb.mxu2 %v756_v43  ;;  %v1086_v40 = vld [vmem:[#allocation5 + $0x1978] sm:$0xff]  ;;  %v287_v43 = vld [vmem:[#allocation5 + $0x80] sm:$0xff] }
 0x195   :  { %2186 = vmatpush.msrb.mxu3 %v916_v18  ;;  %2191 = vmatpush.msra.mxu0 %v1226_v44  ;;  %v1246_v42 = vld [vmem:[#allocation5 + $0x1e78] sm:$0xff]  ;;  %v447_v18 = vld [vmem:[#allocation5 + $0x580] sm:$0xff]  ;;  %v1236_v44 = vld [vmem:[#allocation5 + $0x1e28] sm:$0xff] }
 0x196   :  { %2107 = vmatmul.f32.vlgmr.msra.gmra.mxu3 %v6867_v25  ;;  %2211 = vmatpush.msra.mxu1 %v1386_v45  ;;  %v1186_v25 = vld [vmem:[#allocation5 + $0x1c98] sm:$0xff]  ;;  %v277_v45 = vld [vmem:[#allocation5 + $0x30] sm:$0xff] }
 0x197   :  { %2231 = vmatpush.msra.mxu2 %v427_v17  ;;  %2251 = vmatpush.msra.mxu3 %v587_v46  ;;  %v437_v17 = vld [vmem:[#allocation5 + $0x530] sm:$0xff]  ;;  %v907_v46 = vld [vmem:[#allocation5 + $0x13e0] sm:$0xff] }
 0x198   :  { %2192 = vmatpush.msra.mxu0 %v1216_v47  ;;  %2212 = vmatpush.msra.mxu1 %v1376_v49  ;;  %v747_v47 = vld [vmem:[#allocation5 + $0xee0] sm:$0xff] }
 0x199   :  { %2232 = vmatpush.msra.mxu2 %v417_v50  ;;  %2252 = vmatpush.msra.mxu3 %v577_v51  ;;  %v1067_v49 = vld [vmem:[#allocation5 + $0x18e0] sm:$0xff]  ;;  %v6896_v51 = vld [vmem:[#allocation2 + $0x28] sm:$0xff] }
 0x19a   :  { %2193 = vmatpush.msra.mxu0 %v1206_v52  ;;  %2213 = vmatpush.msra.mxu1 %v1366_v55  ;;  %v1227_v50 = vld [vmem:[#allocation5 + $0x1de0] sm:$0xff]  ;;  %v737_v52 = vld [vmem:[#allocation5 + $0xe90] sm:$0xff] }
 0x19b   :  { %2233 = vmatpush.msra.mxu2 %v407_v56  ;;  %2253 = vmatpush.msra.mxu3 %v567_v30  ;;  %v897_v55 = vld [vmem:[#allocation5 + $0x1390] sm:$0xff] }
 0x19c   :  { %2194 = vmatpush.msra.mxu0 %v1196_v57  ;;  %2214 = vmatpush.msra.mxu1 %v1356_v58  ;;  %v1057_v56 = vld [vmem:[#allocation5 + $0x1890] sm:$0xff]  ;;  %v6899_v57 = vld [vmem:[#allocation2 + $0x30] sm:$0xff]  ;;  %v727_v58 = vld [vmem:[#allocation5 + $0xe40] sm:$0xff] }
 0x19d   :  { %2234 = vmatpush.msra.mxu2 %v397_v60  ;;  %2254 = vmatpush.msra.mxu3 %v557_v61  ;;  %v1217_v30 = vld [vmem:[#allocation5 + $0x1d90] sm:$0xff]  ;;  %v887_v60 = vld [vmem:[#allocation5 + $0x1340] sm:$0xff] }
 0x19e   :  { %2195 = vmatpush.msra.mxu0 %v1186_v25  ;;  %2215 = vmatpush.msra.mxu1 %v1346_v62  ;;  %v1047_v61 = vld [vmem:[#allocation5 + $0x1840] sm:$0xff]  ;;  %v717_v62 = vld [vmem:[#allocation5 + $0xdf0] sm:$0xff] }
 0x19f   :  { %2235 = vmatpush.msra.mxu2 %v387_v63  ;;  %2255 = vmatpush.msra.mxu3 %v547_v0  ;;  %v1207_v25 = vld [vmem:[#allocation5 + $0x1d40] sm:$0xff]  ;;  %v877_v63 = vld [vmem:[#allocation5 + $0x12f0] sm:$0xff] }
 0x1a0   :  { %2196 = vmatpush.msra.mxu0 %v1176_v1  ;;  %2216 = vmatpush.msra.mxu1 %v1336_v2  ;;  %v1037_v0 = vld [vmem:[#allocation5 + $0x17f0] sm:$0xff]  ;;  %v707_v2 = vld [vmem:[#allocation5 + $0xda0] sm:$0xff] }
 0x1a1   :  { %2236 = vmatpush.msra.mxu2 %v377_v35  ;;  %2256 = vmatpush.msra.mxu3 %v537_v3  ;;  %v1197_v1 = vld [vmem:[#allocation5 + $0x1cf0] sm:$0xff]  ;;  %v867_v35 = vld [vmem:[#allocation5 + $0x12a0] sm:$0xff] }
 0x1a2   :  { %2197 = vmatpush.msra.mxu0 %v1166_v5  ;;  %2217 = vmatpush.msra.mxu1 %v1326_v6  ;;  %v1027_v3 = vld [vmem:[#allocation5 + $0x17a0] sm:$0xff]  ;;  %v697_v6 = vld [vmem:[#allocation5 + $0xd50] sm:$0xff] }
 0x1a3   :  { %2237 = vmatpush.msra.mxu2 %v367_v7  ;;  %2257 = vmatpush.msra.mxu3 %v527_v8  ;;  %v1187_v5 = vld [vmem:[#allocation5 + $0x1ca0] sm:$0xff]  ;;  %v857_v7 = vld [vmem:[#allocation5 + $0x1250] sm:$0xff] }
 0x1a4   :  { %2198 = vmatpush.msra.mxu0 %v1156_v10  ;;  %2218 = vmatpush.msra.mxu1 %v1316_v11  ;;  %v1017_v8 = vld [vmem:[#allocation5 + $0x1750] sm:$0xff]  ;;  %v687_v11 = vld [vmem:[#allocation5 + $0xd00] sm:$0xff] }
 0x1a5   :  { %2238 = vmatpush.msra.mxu2 %v357_v54  ;;  %2258 = vmatpush.msra.mxu3 %v517_v13  ;;  %v1177_v10 = vld [vmem:[#allocation5 + $0x1c50] sm:$0xff]  ;;  %v847_v54 = vld [vmem:[#allocation5 + $0x1200] sm:$0xff] }
 0x1a6   :  { %2199 = vmatpush.msra.mxu0 %v1146_v15  ;;  %2219 = vmatpush.msra.mxu1 %v1306_v16  ;;  %v1007_v13 = vld [vmem:[#allocation5 + $0x1700] sm:$0xff]  ;;  %v677_v16 = vld [vmem:[#allocation5 + $0xcb0] sm:$0xff] }
 0x1a7   :  { %2239 = vmatpush.msra.mxu2 %v347_v9  ;;  %2259 = vmatpush.msra.mxu3 %v507_v19  ;;  %v1167_v15 = vld [vmem:[#allocation5 + $0x1c00] sm:$0xff]  ;;  %v837_v9 = vld [vmem:[#allocation5 + $0x11b0] sm:$0xff] }
 0x1a8   :  { %2200 = vmatpush.msra.mxu0 %v1136_v20  ;;  %2220 = vmatpush.msra.mxu1 %v1296_v48  ;;  %v997_v19 = vld [vmem:[#allocation5 + $0x16b0] sm:$0xff]  ;;  %v667_v48 = vld [vmem:[#allocation5 + $0xc60] sm:$0xff] }
 0x1a9   :  { %2240 = vmatpush.msra.mxu2 %v337_v21  ;;  %2260 = vmatpush.msra.mxu3 %v497_v14  ;;  %v1157_v20 = vld [vmem:[#allocation5 + $0x1bb0] sm:$0xff]  ;;  %v827_v21 = vld [vmem:[#allocation5 + $0x1160] sm:$0xff] }
 0x1aa   :  { %2201 = vmatpush.msra.mxu0 %v1126_v22  ;;  %2221 = vmatpush.msra.mxu1 %v1286_v23  ;;  %v987_v14 = vld [vmem:[#allocation5 + $0x1660] sm:$0xff]  ;;  %v657_v23 = vld [vmem:[#allocation5 + $0xc10] sm:$0xff] }
 0x1ab   :  { %2241 = vmatpush.msra.mxu2 %v327_v24  ;;  %2261 = vmatpush.msra.mxu3 %v487_v26  ;;  %v1147_v22 = vld [vmem:[#allocation5 + $0x1b60] sm:$0xff]  ;;  %v817_v24 = vld [vmem:[#allocation5 + $0x1110] sm:$0xff] }
 0x1ac   :  { %2167 = vmatmul.f32.vlgmr.msrb.gmra.mxu2 %v6886_v32  ;;  %2202 = vmatpush.msra.mxu0 %v1116_v27  ;;  %v977_v26 = vld [vmem:[#allocation5 + $0x1610] sm:$0xff] }
 0x1ad   :  { %2222 = vmatpush.msra.mxu1 %v1276_v28  ;;  %2242 = vmatpush.msra.mxu2 %v317_v29  ;;  %v1137_v27 = vld [vmem:[#allocation5 + $0x1b10] sm:$0xff]  ;;  %v647_v28 = vld [vmem:[#allocation5 + $0xbc0] sm:$0xff] }
 0x1ae   :  { %2262 = vmatpush.msra.mxu3 %v477_v31  ;;  %2127 = vmatmul.f32.vlgmr.msrb.gmra.mxu0 %v6889_v59  ;;  %v807_v29 = vld [vmem:[#allocation5 + $0x10c0] sm:$0xff] }
 0x1af   :  { %2187 = vmatmul.f32.vlgmr.msrb.gmra.mxu3 %v6875_v41  ;;  %2203 = vmatpush.msra.mxu0 %v1106_v33  ;;  %v1076_v41 = vld [vmem:[#allocation5 + $0x1928] sm:$0xff]  ;;  %v967_v31 = vld [vmem:[#allocation5 + $0x15c0] sm:$0xff] }
 0x1b0   :  { %2223 = vmatpush.msra.mxu1 %v1266_v34  ;;  %2243 = vmatpush.msra.mxu2 %v307_v53  ;;  %v1127_v33 = vld [vmem:[#allocation5 + $0x1ac0] sm:$0xff]  ;;  %v637_v34 = vld [vmem:[#allocation5 + $0xb70] sm:$0xff] }
 0x1b1   :  { %2263 = vmatpush.msra.mxu3 %v467_v36  ;;  %2147 = vmatmul.f32.vlgmr.msrb.gmra.mxu1 %v6893_v39  ;;  %v797_v53 = vld [vmem:[#allocation5 + $0x1070] sm:$0xff] }
 0x1b2   :  { %2204 = vmatpush.msra.mxu0 %v1096_v4  ;;  %2224 = vmatpush.msra.mxu1 %v1256_v37  ;;  %v957_v36 = vld [vmem:[#allocation5 + $0x1570] sm:$0xff]  ;;  %v627_v37 = vld [vmem:[#allocation5 + $0xb20] sm:$0xff] }
 0x1b3   :  { %2244 = vmatpush.msra.mxu2 %v297_v38  ;;  %2264 = vmatpush.msra.mxu3 %v457_v12  ;;  %v1117_v4 = vld [vmem:[#allocation5 + $0x1a70] sm:$0xff]  ;;  %v787_v38 = vld [vmem:[#allocation5 + $0x1020] sm:$0xff] }
 0x1b4   :  { %2205 = vmatpush.msra.mxu0 %v1086_v40  ;;  %2225 = vmatpush.msra.mxu1 %v1246_v42  ;;  %v947_v12 = vld [vmem:[#allocation5 + $0x1520] sm:$0xff]  ;;  %v617_v42 = vld [vmem:[#allocation5 + $0xad0] sm:$0xff] }
 0x1b5   :  { %2245 = vmatpush.msra.mxu2 %v287_v43  ;;  %2265 = vmatpush.msra.mxu3 %v447_v18  ;;  %v1107_v40 = vld [vmem:[#allocation5 + $0x1a20] sm:$0xff]  ;;  %v777_v43 = vld [vmem:[#allocation5 + $0xfd0] sm:$0xff] }
 0x1b6   :  { %2206 = vmatpush.msra.mxu0 %v1076_v41  ;;  %2226 = vmatpush.msra.mxu1 %v1236_v44  ;;  %v937_v18 = vld [vmem:[#allocation5 + $0x14d0] sm:$0xff]  ;;  %v607_v44 = vld [vmem:[#allocation5 + $0xa80] sm:$0xff] }
 0x1b7   :  { %2246 = vmatpush.msra.mxu2 %v277_v45  ;;  %2266 = vmatpush.msra.mxu3 %v437_v17  ;;  %v1097_v41 = vld [vmem:[#allocation5 + $0x19d0] sm:$0xff]  ;;  %v767_v45 = vld [vmem:[#allocation5 + $0xf80] sm:$0xff] }
 0x1b8   :  { %2207 = vmatmul.f32.vlgmr.msra.gmra.mxu0 %v6896_v51  ;;  %2291 = vmatpush.msrb.mxu1 %v907_v46  ;;  %v927_v17 = vld [vmem:[#allocation5 + $0x1480] sm:$0xff] }
 0x1b9   :  { %2271 = vmatpush.msrb.mxu0 %v747_v47  ;;  %2311 = vmatpush.msrb.mxu2 %v1067_v49  ;;  %v1087_v46 = vld [vmem:[#allocation5 + $0x1980] sm:$0xff]  ;;  %v597_v47 = vld [vmem:[#allocation5 + $0xa30] sm:$0xff] }
 0x1ba   :  { %2331 = vmatpush.msrb.mxu3 %v1227_v50  ;;  %2227 = vmatmul.f32.vlgmr.msra.gmra.mxu1 %v6899_v57  ;;  %v757_v49 = vld [vmem:[#allocation5 + $0xf30] sm:$0xff] }
 0x1bb   :  { %2272 = vmatpush.msrb.mxu0 %v737_v52  ;;  %2292 = vmatpush.msrb.mxu1 %v897_v55  ;;  %v917_v50 = vld [vmem:[#allocation5 + $0x1430] sm:$0xff]  ;;  %v1387_v55 = vld [vmem:[#allocation5 + $0x22e0] sm:$0xff] }
 0x1bc   :  { %2312 = vmatpush.msrb.mxu2 %v1057_v56  ;;  %2332 = vmatpush.msrb.mxu3 %v1217_v30  ;;  %v1077_v52 = vld [vmem:[#allocation5 + $0x1930] sm:$0xff]  ;;  %v428_v56 = vld [vmem:[#allocation5 + $0x4e8] sm:$0xff] }
 0x1bd   :  { %2273 = vmatpush.msrb.mxu0 %v727_v58  ;;  %2293 = vmatpush.msrb.mxu1 %v887_v60  ;;  %v588_v30 = vld [vmem:[#allocation5 + $0x9e8] sm:$0xff] }
 0x1be   :  { %2313 = vmatpush.msrb.mxu2 %v1047_v61  ;;  %2333 = vmatpush.msrb.mxu3 %v1207_v25  ;;  %v748_v58 = vld [vmem:[#allocation5 + $0xee8] sm:$0xff]  ;;  %v1377_v61 = vld [vmem:[#allocation5 + $0x2290] sm:$0xff]  ;;  %v418_v25 = vld [vmem:[#allocation5 + $0x498] sm:$0xff] }
 0x1bf   :  { %2274 = vmatpush.msrb.mxu0 %v717_v62  ;;  %2294 = vmatpush.msrb.mxu1 %v877_v63  ;;  %v6902_v60 = vld [vmem:[#allocation2] sm:$0xff]  ;;  %v578_v62 = vld [vmem:[#allocation5 + $0x998] sm:$0xff] }
 0x1c0   :  { %2314 = vmatpush.msrb.mxu2 %v1037_v0  ;;  %2334 = vmatpush.msrb.mxu3 %v1197_v1  ;;  %v738_v63 = vld [vmem:[#allocation5 + $0xe98] sm:$0xff]  ;;  %v1367_v0 = vld [vmem:[#allocation5 + $0x2240] sm:$0xff]  ;;  %v408_v1 = vld [vmem:[#allocation5 + $0x448] sm:$0xff] }
 0x1c1   :  { %2275 = vmatpush.msrb.mxu0 %v707_v2  ;;  %2295 = vmatpush.msrb.mxu1 %v867_v35  ;;  %v568_v2 = vld [vmem:[#allocation5 + $0x948] sm:$0xff] }
 0x1c2   :  { %2315 = vmatpush.msrb.mxu2 %v1027_v3  ;;  %2335 = vmatpush.msrb.mxu3 %v1187_v5  ;;  %v728_v35 = vld [vmem:[#allocation5 + $0xe48] sm:$0xff]  ;;  %v1357_v3 = vld [vmem:[#allocation5 + $0x21f0] sm:$0xff]  ;;  %v398_v5 = vld [vmem:[#allocation5 + $0x3f8] sm:$0xff] }
 0x1c3   :  { %2276 = vmatpush.msrb.mxu0 %v697_v6  ;;  %2296 = vmatpush.msrb.mxu1 %v857_v7  ;;  %v558_v6 = vld [vmem:[#allocation5 + $0x8f8] sm:$0xff] }
 0x1c4   :  { %2316 = vmatpush.msrb.mxu2 %v1017_v8  ;;  %2336 = vmatpush.msrb.mxu3 %v1177_v10  ;;  %v718_v7 = vld [vmem:[#allocation5 + $0xdf8] sm:$0xff]  ;;  %v1347_v8 = vld [vmem:[#allocation5 + $0x21a0] sm:$0xff]  ;;  %v388_v10 = vld [vmem:[#allocation5 + $0x3a8] sm:$0xff] }
 0x1c5   :  { %2277 = vmatpush.msrb.mxu0 %v687_v11  ;;  %2297 = vmatpush.msrb.mxu1 %v847_v54  ;;  %v548_v11 = vld [vmem:[#allocation5 + $0x8a8] sm:$0xff] }
 0x1c6   :  { %2317 = vmatpush.msrb.mxu2 %v1007_v13  ;;  %2337 = vmatpush.msrb.mxu3 %v1167_v15  ;;  %v708_v54 = vld [vmem:[#allocation5 + $0xda8] sm:$0xff]  ;;  %v1337_v13 = vld [vmem:[#allocation5 + $0x2150] sm:$0xff]  ;;  %v378_v15 = vld [vmem:[#allocation5 + $0x358] sm:$0xff] }
 0x1c7   :  { %2278 = vmatpush.msrb.mxu0 %v677_v16  ;;  %2298 = vmatpush.msrb.mxu1 %v837_v9  ;;  %v538_v16 = vld [vmem:[#allocation5 + $0x858] sm:$0xff] }
 0x1c8   :  { %2318 = vmatpush.msrb.mxu2 %v997_v19  ;;  %2338 = vmatpush.msrb.mxu3 %v1157_v20  ;;  %v698_v9 = vld [vmem:[#allocation5 + $0xd58] sm:$0xff]  ;;  %v1327_v19 = vld [vmem:[#allocation5 + $0x2100] sm:$0xff]  ;;  %v368_v20 = vld [vmem:[#allocation5 + $0x308] sm:$0xff] }
 0x1c9   :  { %2279 = vmatpush.msrb.mxu0 %v667_v48  ;;  %2299 = vmatpush.msrb.mxu1 %v827_v21  ;;  %v528_v48 = vld [vmem:[#allocation5 + $0x808] sm:$0xff] }
 0x1ca   :  { %2319 = vmatpush.msrb.mxu2 %v987_v14  ;;  %2339 = vmatpush.msrb.mxu3 %v1147_v22  ;;  %v688_v21 = vld [vmem:[#allocation5 + $0xd08] sm:$0xff]  ;;  %v1317_v14 = vld [vmem:[#allocation5 + $0x20b0] sm:$0xff]  ;;  %v358_v22 = vld [vmem:[#allocation5 + $0x2b8] sm:$0xff] }
 0x1cb   :  { %2280 = vmatpush.msrb.mxu0 %v657_v23  ;;  %2300 = vmatpush.msrb.mxu1 %v817_v24  ;;  %v518_v23 = vld [vmem:[#allocation5 + $0x7b8] sm:$0xff] }
 0x1cc   :  { %2320 = vmatpush.msrb.mxu2 %v977_v26  ;;  %2340 = vmatpush.msrb.mxu3 %v1137_v27  ;;  %v678_v24 = vld [vmem:[#allocation5 + $0xcb8] sm:$0xff]  ;;  %v1307_v26 = vld [vmem:[#allocation5 + $0x2060] sm:$0xff]  ;;  %v348_v27 = vld [vmem:[#allocation5 + $0x268] sm:$0xff] }
 0x1cd   :  { %2281 = vmatpush.msrb.mxu0 %v647_v28  ;;  %2301 = vmatpush.msrb.mxu1 %v807_v29  ;;  %v508_v28 = vld [vmem:[#allocation5 + $0x768] sm:$0xff] }
 0x1ce   :  { %2321 = vmatpush.msrb.mxu2 %v967_v31  ;;  %2341 = vmatpush.msrb.mxu3 %v1127_v33  ;;  %v668_v29 = vld [vmem:[#allocation5 + $0xc68] sm:$0xff]  ;;  %v1297_v31 = vld [vmem:[#allocation5 + $0x2010] sm:$0xff]  ;;  %v338_v33 = vld [vmem:[#allocation5 + $0x218] sm:$0xff] }
 0x1cf   :  { %2282 = vmatpush.msrb.mxu0 %v637_v34  ;;  %2302 = vmatpush.msrb.mxu1 %v797_v53  ;;  %v498_v34 = vld [vmem:[#allocation5 + $0x718] sm:$0xff] }
 0x1d0   :  { %2322 = vmatpush.msrb.mxu2 %v957_v36  ;;  %2342 = vmatpush.msrb.mxu3 %v1117_v4  ;;  %v658_v53 = vld [vmem:[#allocation5 + $0xc18] sm:$0xff]  ;;  %v1287_v36 = vld [vmem:[#allocation5 + $0x1fc0] sm:$0xff]  ;;  %v328_v4 = vld [vmem:[#allocation5 + $0x1c8] sm:$0xff] }
 0x1d1   :  { %2283 = vmatpush.msrb.mxu0 %v627_v37  ;;  %2303 = vmatpush.msrb.mxu1 %v787_v38  ;;  %v6906_v37 = vpop.f32.mrf.mxu0  ;;  %v488_v38 = vld [vmem:[#allocation5 + $0x6c8] sm:$0xff] }
 0x1d2   :  { %2323 = vmatpush.msrb.mxu2 %v947_v12  ;;  %2343 = vmatpush.msrb.mxu3 %v1107_v40  ;;  %v648_v12 = vld [vmem:[#allocation5 + $0xbc8] sm:$0xff]  ;;  %v1277_v40 = vld [vmem:[#allocation5 + $0x1f70] sm:$0xff] }
 0x1d3   :  { %2284 = vmatpush.msrb.mxu0 %v617_v42  ;;  %2304 = vmatpush.msrb.mxu1 %v777_v43  ;;  %v318_v42 = vld [vmem:[#allocation5 + $0x178] sm:$0xff] }
 0x1d4   :  { %2324 = vmatpush.msrb.mxu2 %v937_v18  ;;  %2344 = vmatpush.msrb.mxu3 %v1097_v41  ;;  %v478_v43 = vld [vmem:[#allocation5 + $0x678] sm:$0xff]  ;;  %v6908_v41 = vpop.f32.mrf.mxu1 }
 0x1d5   :  { %2285 = vmatpush.msrb.mxu0 %v607_v44  ;;  %2305 = vmatpush.msrb.mxu1 %v767_v45  ;;  %v638_v18 = vld [vmem:[#allocation5 + $0xb78] sm:$0xff]  ;;  %v6910_v44 = vld [vmem:[#allocation2 + $0x20] sm:$0xff]  ;;  %v1267_v45 = vld [vmem:[#allocation5 + $0x1f20] sm:$0xff] }
 0x1d6   :  { %2325 = vmatpush.msrb.mxu2 %v927_v17  ;;  %2345 = vmatpush.msrb.mxu3 %v1087_v46  ;;  %v308_v17 = vld [vmem:[#allocation5 + $0x128] sm:$0xff] }
 0x1d7   :  { %2286 = vmatpush.msrb.mxu0 %v597_v47  ;;  %2306 = vmatpush.msrb.mxu1 %v757_v49  ;;  %v468_v46 = vld [vmem:[#allocation5 + $0x628] sm:$0xff]  ;;  %v1257_v49 = vld [vmem:[#allocation5 + $0x1ed0] sm:$0xff] }
 0x1d8   :  { %2326 = vmatpush.msrb.mxu2 %v917_v50  ;;  %2346 = vmatpush.msrb.mxu3 %v1077_v52  ;;  %v628_v47 = vld [vmem:[#allocation5 + $0xb28] sm:$0xff]  ;;  %v298_v50 = vld [vmem:[#allocation5 + $0xd8] sm:$0xff]  ;;  %v6915_v52 = vpop.f32.mrf.mxu2 }
 0x1d9   :  { %2247 = vmatmul.f32.vlgmr.msra.gmra.mxu2 %v6902_v60  ;;  %2267 = vmatmul.f32.vlgmr.msra.gmra.mxu3 %v6889_v59 }
 0x1da   :  { %2351 = vmatpush.msra.mxu0 %v1387_v55  ;;  %2371 = vmatpush.msra.mxu1 %v428_v56  ;;  %v458_v55 = vld [vmem:[#allocation5 + $0x5d8] sm:$0xff] }
 0x1db   :  { %2391 = vmatpush.msra.mxu2 %v588_v30  ;;  %2411 = vmatpush.msra.mxu3 %v748_v58  ;;  %v618_v56 = vld [vmem:[#allocation5 + $0xad8] sm:$0xff]  ;;  %v1247_v30 = vld [vmem:[#allocation5 + $0x1e80] sm:$0xff]  ;;  %v288_v58 = vld [vmem:[#allocation5 + $0x88] sm:$0xff] }
 0x1dc   :  { %2352 = vmatpush.msra.mxu0 %v1377_v61  ;;  %2372 = vmatpush.msra.mxu1 %v418_v25  ;;  %v6918_v61 = vpop.f32.mrf.mxu0  ;;  %v448_v25 = vld [vmem:[#allocation5 + $0x588] sm:$0xff] }
 0x1dd   :  { %2392 = vmatpush.msra.mxu2 %v578_v62  ;;  %2412 = vmatpush.msra.mxu3 %v738_v63  ;;  %v608_v62 = vld [vmem:[#allocation5 + $0xa88] sm:$0xff]  ;;  %v1237_v63 = vld [vmem:[#allocation5 + $0x1e30] sm:$0xff] }
 0x1de   :  { %2353 = vmatpush.msra.mxu0 %v1367_v0  ;;  %2373 = vmatpush.msra.mxu1 %v408_v1  ;;  %v278_v0 = vld [vmem:[#allocation5 + $0x38] sm:$0xff]  ;;  %v6920_v1 = vpop.f32.mrf.mxu3 }
 0x1df   :  { %2393 = vmatpush.msra.mxu2 %v568_v2  ;;  %2413 = vmatpush.msra.mxu3 %v728_v35  ;;  %v438_v2 = vld [vmem:[#allocation5 + $0x538] sm:$0xff] }
 0x1e0   :  { %2354 = vmatpush.msra.mxu0 %v1357_v3  ;;  %2374 = vmatpush.msra.mxu1 %v398_v5  ;;  %v598_v35 = vld [vmem:[#allocation5 + $0xa38] sm:$0xff]  ;;  %v1068_v3 = vld [vmem:[#allocation5 + $0x18e8] sm:$0xff]  ;;  %v6922_v5 = vpop.f32.mrf.mxu1 }
 0x1e1   :  { %2394 = vmatpush.msra.mxu2 %v558_v6  ;;  %2414 = vmatpush.msra.mxu3 %v718_v7  ;;  %v908_v6 = vld [vmem:[#allocation5 + $0x13e8] sm:$0xff] }
 0x1e2   :  { %2355 = vmatpush.msra.mxu0 %v1347_v8  ;;  %2375 = vmatpush.msra.mxu1 %v388_v10  ;;  %v1228_v7 = vld [vmem:[#allocation5 + $0x1de8] sm:$0xff]  ;;  %v1058_v10 = vld [vmem:[#allocation5 + $0x1898] sm:$0xff] }
 0x1e3   :  { %2395 = vmatpush.msra.mxu2 %v548_v11  ;;  %2415 = vmatpush.msra.mxu3 %v708_v54  ;;  %v1388_v8 = vld [vmem:[#allocation5 + $0x22e8] sm:$0xff]  ;;  %v898_v11 = vld [vmem:[#allocation5 + $0x1398] sm:$0xff] }
 0x1e4   :  { %2356 = vmatpush.msra.mxu0 %v1337_v13  ;;  %2376 = vmatpush.msra.mxu1 %v378_v15  ;;  %v1218_v54 = vld [vmem:[#allocation5 + $0x1d98] sm:$0xff]  ;;  %v1048_v15 = vld [vmem:[#allocation5 + $0x1848] sm:$0xff] }
 0x1e5   :  { %2396 = vmatpush.msra.mxu2 %v538_v16  ;;  %2416 = vmatpush.msra.mxu3 %v698_v9  ;;  %v1378_v13 = vld [vmem:[#allocation5 + $0x2298] sm:$0xff]  ;;  %v6925_v16 = vpop.f32.mrf.mxu2  ;;  %v6927_v9 = vpop.f32.mrf.mxu0 }
 0x1e6   :  { %2357 = vmatpush.msra.mxu0 %v1327_v19  ;;  %2377 = vmatpush.msra.mxu1 %v368_v20  ;;  %v888_v19 = vld [vmem:[#allocation5 + $0x1348] sm:$0xff] }
 0x1e7   :  { %2397 = vmatpush.msra.mxu2 %v528_v48  ;;  %2417 = vmatpush.msra.mxu3 %v688_v21  ;;  %v1208_v20 = vld [vmem:[#allocation5 + $0x1d48] sm:$0xff]  ;;  %v1038_v21 = vld [vmem:[#allocation5 + $0x17f8] sm:$0xff] }
 0x1e8   :  { %2358 = vmatpush.msra.mxu0 %v1317_v14  ;;  %2378 = vmatpush.msra.mxu1 %v358_v22  ;;  %v1368_v48 = vld [vmem:[#allocation5 + $0x2248] sm:$0xff]  ;;  %v6929_v14 = vpop.f32.mrf.mxu3  ;;  %v878_v22 = vld [vmem:[#allocation5 + $0x12f8] sm:$0xff] }
 0x1e9   :  { %2398 = vmatpush.msra.mxu2 %v518_v23  ;;  %2418 = vmatpush.msra.mxu3 %v678_v24  ;;  %v1198_v23 = vld [vmem:[#allocation5 + $0x1cf8] sm:$0xff] }
 0x1ea   :  { %2359 = vmatpush.msra.mxu0 %v1307_v26  ;;  %2379 = vmatpush.msra.mxu1 %v348_v27  ;;  %v1358_v24 = vld [vmem:[#allocation5 + $0x21f8] sm:$0xff]  ;;  %v1028_v26 = vld [vmem:[#allocation5 + $0x17a8] sm:$0xff]  ;;  %v6931_v27 = vpop.f32.mrf.mxu1 }
 0x1eb   :  { %2399 = vmatpush.msra.mxu2 %v508_v28  ;;  %2419 = vmatpush.msra.mxu3 %v668_v29  ;;  %v868_v28 = vld [vmem:[#allocation5 + $0x12a8] sm:$0xff] }
 0x1ec   :  { %2360 = vmatpush.msra.mxu0 %v1297_v31  ;;  %2380 = vmatpush.msra.mxu1 %v338_v33  ;;  %v1188_v29 = vld [vmem:[#allocation5 + $0x1ca8] sm:$0xff]  ;;  %v1018_v33 = vld [vmem:[#allocation5 + $0x1758] sm:$0xff] }
 0x1ed   :  { %2400 = vmatpush.msra.mxu2 %v498_v34  ;;  %2420 = vmatpush.msra.mxu3 %v658_v53  ;;  %v1348_v31 = vld [vmem:[#allocation5 + $0x21a8] sm:$0xff]  ;;  %v858_v34 = vld [vmem:[#allocation5 + $0x1258] sm:$0xff] }
 0x1ee   :  { %2361 = vmatpush.msra.mxu0 %v1287_v36  ;;  %2381 = vmatpush.msra.mxu1 %v328_v4  ;;  %v1178_v53 = vld [vmem:[#allocation5 + $0x1c58] sm:$0xff]  ;;  %v1008_v4 = vld [vmem:[#allocation5 + $0x1708] sm:$0xff] }
 0x1ef   :  { %2401 = vmatpush.msra.mxu2 %v488_v38  ;;  %2421 = vmatpush.msra.mxu3 %v648_v12  ;;  %v1338_v36 = vld [vmem:[#allocation5 + $0x2158] sm:$0xff]  ;;  %v6933_v38 = vpop.f32.mrf.mxu2  ;;  %v848_v12 = vld [vmem:[#allocation5 + $0x1208] sm:$0xff] }
 0x1f0   :  { %2327 = vmatmul.f32.vlgmr.msrb.gmra.mxu2 %v6910_v44  ;;  %2362 = vmatpush.msra.mxu0 %v1277_v40  ;;  %v1168_v40 = vld [vmem:[#allocation5 + $0x1c08] sm:$0xff] }
 0x1f1   :  { %2382 = vmatpush.msra.mxu1 %v318_v42  ;;  %2402 = vmatpush.msra.mxu2 %v478_v43  ;;  %v1328_v42 = vld [vmem:[#allocation5 + $0x2108] sm:$0xff]  ;;  %v998_v43 = vld [vmem:[#allocation5 + $0x16b8] sm:$0xff] }
 0x1f2   :  { %2422 = vmatpush.msra.mxu3 %v638_v18  ;;  %2287 = vmatmul.f32.vlgmr.msrb.gmra.mxu0 %v6893_v39  ;;  %v6935_v18 = vpop.f32.mrf.mxu0 }
 0x1f3   :  { %2347 = vmatmul.f32.vlgmr.msrb.gmra.mxu3 %v6896_v51  ;;  %2363 = vmatpush.msra.mxu0 %v1267_v45  ;;  %v838_v45 = vld [vmem:[#allocation5 + $0x11b8] sm:$0xff] }
 0x1f4   :  { %2383 = vmatpush.msra.mxu1 %v308_v17  ;;  %2403 = vmatpush.msra.mxu2 %v468_v46  ;;  %v1158_v17 = vld [vmem:[#allocation5 + $0x1bb8] sm:$0xff] }
 0x1f5   :  { %2423 = vmatpush.msra.mxu3 %v628_v47  ;;  %2307 = vmatmul.f32.vlgmr.msrb.gmra.mxu1 %v6886_v32  ;;  %v1318_v46 = vld [vmem:[#allocation5 + $0x20b8] sm:$0xff]  ;;  %v988_v47 = vld [vmem:[#allocation5 + $0x1668] sm:$0xff] }
 0x1f6   :  { %2364 = vmatpush.msra.mxu0 %v1257_v49  ;;  %2384 = vmatpush.msra.mxu1 %v298_v50  ;;  %v6937_v49 = vpop.f32.mrf.mxu3  ;;  %v828_v50 = vld [vmem:[#allocation5 + $0x1168] sm:$0xff] }
 0x1f7   :  { %2404 = vmatpush.msra.mxu2 %v458_v55  ;;  %2424 = vmatpush.msra.mxu3 %v618_v56  ;;  %v1148_v55 = vld [vmem:[#allocation5 + $0x1b68] sm:$0xff] }
 0x1f8   :  { %2365 = vmatpush.msra.mxu0 %v1247_v30  ;;  %2385 = vmatpush.msra.mxu1 %v288_v58  ;;  %v1308_v56 = vld [vmem:[#allocation5 + $0x2068] sm:$0xff]  ;;  %v978_v30 = vld [vmem:[#allocation5 + $0x1618] sm:$0xff]  ;;  %v6939_v58 = vpop.f32.mrf.mxu1 }
 0x1f9   :  { %2405 = vmatpush.msra.mxu2 %v448_v25  ;;  %2425 = vmatpush.msra.mxu3 %v608_v62  ;;  %v818_v25 = vld [vmem:[#allocation5 + $0x1118] sm:$0xff] }
 0x1fa   :  { %2366 = vmatpush.msra.mxu0 %v1237_v63  ;;  %2386 = vmatpush.msra.mxu1 %v278_v0  ;;  %v1138_v62 = vld [vmem:[#allocation5 + $0x1b18] sm:$0xff]  ;;  %v968_v0 = vld [vmem:[#allocation5 + $0x15c8] sm:$0xff] }
 0x1fb   :  { %2406 = vmatpush.msra.mxu2 %v438_v2  ;;  %2426 = vmatpush.msra.mxu3 %v598_v35  ;;  %v1298_v63 = vld [vmem:[#allocation5 + $0x2018] sm:$0xff]  ;;  %v6941_v2 = vpop.f32.mrf.mxu2  ;;  %v808_v35 = vld [vmem:[#allocation5 + $0x10c8] sm:$0xff] }
 0x1fc   :  { %2367 = vmatmul.f32.vlgmr.msra.gmra.mxu0 %v6899_v57  ;;  %2451 = vmatpush.msrb.mxu1 %v1068_v3  ;;  %v1128_v3 = vld [vmem:[#allocation5 + $0x1ac8] sm:$0xff] }
 0x1fd   :  { %2431 = vmatpush.msrb.mxu0 %v908_v6  ;;  %2471 = vmatpush.msrb.mxu2 %v1228_v7  ;;  %v1288_v6 = vld [vmem:[#allocation5 + $0x1fc8] sm:$0xff]  ;;  %v958_v7 = vld [vmem:[#allocation5 + $0x1578] sm:$0xff] }
 0x1fe   :  { %2491 = vmatpush.msrb.mxu3 %v1388_v8  ;;  %2452 = vmatpush.msrb.mxu1 %v1058_v10  ;;  %v6943_v8 = vpop.f32.mrf.mxu0  ;;  %v798_v10 = vld [vmem:[#allocation5 + $0x1078] sm:$0xff] }
 0x1ff   :  { %2432 = vmatpush.msrb.mxu0 %v898_v11  ;;  %2472 = vmatpush.msrb.mxu2 %v1218_v54  ;;  %v1118_v11 = vld [vmem:[#allocation5 + $0x1a78] sm:$0xff] }
 0x200   :  { %2492 = vmatpush.msrb.mxu3 %v1378_v13  ;;  %2453 = vmatpush.msrb.mxu1 %v1048_v15  ;;  %v1278_v54 = vld [vmem:[#allocation5 + $0x1f78] sm:$0xff]  ;;  %v6945_v13 = vpop.f32.mrf.mxu3  ;;  %v788_v15 = vld [vmem:[#allocation5 + $0x1028] sm:$0xff] }
 0x201   :  { %2433 = vmatpush.msrb.mxu0 %v888_v19  ;;  %2473 = vmatpush.msrb.mxu2 %v1208_v20  ;;  %v948_v19 = vld [vmem:[#allocation5 + $0x1528] sm:$0xff] }
 0x202   :  { %2493 = vmatpush.msrb.mxu3 %v1368_v48  ;;  %2454 = vmatpush.msrb.mxu1 %v1038_v21  ;;  %v1108_v20 = vld [vmem:[#allocation5 + $0x1a28] sm:$0xff]  ;;  %v6947_v21 = vpop.f32.mrf.mxu1 }
 0x203   :  { %2434 = vmatpush.msrb.mxu0 %v878_v22  ;;  %2474 = vmatpush.msrb.mxu2 %v1198_v23  ;;  %v1268_v48 = vld [vmem:[#allocation5 + $0x1f28] sm:$0xff]  ;;  %v778_v22 = vld [vmem:[#allocation5 + $0xfd8] sm:$0xff] }
 0x204   :  { %2494 = vmatpush.msrb.mxu3 %v1358_v24  ;;  %2455 = vmatpush.msrb.mxu1 %v1028_v26  ;;  %v938_v23 = vld [vmem:[#allocation5 + $0x14d8] sm:$0xff] }
 0x205   :  { %2435 = vmatpush.msrb.mxu0 %v868_v28  ;;  %2475 = vmatpush.msrb.mxu2 %v1188_v29  ;;  %v1098_v24 = vld [vmem:[#allocation5 + $0x19d8] sm:$0xff]  ;;  %v768_v28 = vld [vmem:[#allocation5 + $0xf88] sm:$0xff] }
 0x206   :  { %2495 = vmatpush.msrb.mxu3 %v1348_v31  ;;  %2456 = vmatpush.msrb.mxu1 %v1018_v33  ;;  %v1258_v26 = vld [vmem:[#allocation5 + $0x1ed8] sm:$0xff]  ;;  %v928_v29 = vld [vmem:[#allocation5 + $0x1488] sm:$0xff]  ;;  %v6951_v31 = vpop.f32.mrf.mxu2 }
 0x207   :  { %2436 = vmatpush.msrb.mxu0 %v858_v34  ;;  %2476 = vmatpush.msrb.mxu2 %v1178_v53  ;;  %v1088_v33 = vld [vmem:[#allocation5 + $0x1988] sm:$0xff]  ;;  %v918_v53 = vld [vmem:[#allocation5 + $0x1438] sm:$0xff] }
 0x208   :  { %2496 = vmatpush.msrb.mxu3 %v1338_v36  ;;  %2457 = vmatpush.msrb.mxu1 %v1008_v4  ;;  %v1248_v34 = vld [vmem:[#allocation5 + $0x1e88] sm:$0xff]  ;;  %v6954_v36 = vpop.f32.mrf.mxu0  ;;  %v1078_v4 = vld [vmem:[#allocation5 + $0x1938] sm:$0xff] }
 0x209   :  { %2437 = vmatpush.msrb.mxu0 %v848_v12  ;;  %2477 = vmatpush.msrb.mxu2 %v1168_v40  ;;  %v429_v12 = vld [vmem:[#allocation5 + $0x4f0] sm:$0xff]  ;;  %v1429_v40 = vadd.f32 %v6908_v41, %v6906_v37  ;;  %v579_v37 = vld [vmem:[#allocation5 + $0x9a0] sm:$0xff] }
 0x20a   :  { %2497 = vmatpush.msrb.mxu3 %v1328_v42  ;;  %2458 = vmatpush.msrb.mxu1 %v998_v43  ;;  %v6958_v42 = vpop.f32.mrf.mxu3  ;;  %v6960_v43 = vpop.f32.mrf.mxu1  ;;  %v739_v41 = vld [vmem:[#allocation5 + $0xea0] sm:$0xff] }
 0x20b   :  { %2438 = vmatpush.msrb.mxu0 %v838_v45  ;;  %2478 = vmatpush.msrb.mxu2 %v1158_v17  ;;  %v749_v45 = vld [vmem:[#allocation5 + $0xef0] sm:$0xff]  ;;  %v1569_v17 = vadd.f32 %v6927_v9, %v6929_v14 }
 0x20c   :  { %2498 = vmatpush.msrb.mxu3 %v1318_v46  ;;  %2459 = vmatpush.msrb.mxu1 %v988_v47  ;;  %v909_v46 = vld [vmem:[#allocation5 + $0x13f0] sm:$0xff]  ;;  %v419_v47 = vld [vmem:[#allocation5 + $0x4a0] sm:$0xff] }
 0x20d   :  { %2439 = vmatpush.msrb.mxu0 %v828_v50  ;;  %2479 = vmatpush.msrb.mxu2 %v1148_v55  ;;  %v1449_v50 = vadd.f32 %v6915_v52, %v1429_v40  ;;  %v1589_v9 = vadd.f32 %v6931_v27, %v1569_v17  ;;  %v569_v14 = vld [vmem:[#allocation5 + $0x950] sm:$0xff]  ;;  %v399_v52 = vld [vmem:[#allocation5 + $0x400] sm:$0xff] }
 0x20e   :  { %2499 = vmatpush.msrb.mxu3 %v1308_v56  ;;  %2460 = vmatpush.msrb.mxu1 %v978_v30  ;;  %v6966_v55 = vpop.f32.mrf.mxu2  ;;  %v899_v56 = vld [vmem:[#allocation5 + $0x13a0] sm:$0xff]  ;;  %v829_v40 = vld [vmem:[#allocation5 + $0x1170] sm:$0xff] }
 0x20f   :  { %2440 = vmatpush.msrb.mxu0 %v818_v25  ;;  %2480 = vmatpush.msrb.mxu2 %v1138_v62  ;;  %v729_v25 = vld [vmem:[#allocation5 + $0xe50] sm:$0xff]  ;;  %v879_v27 = vld [vmem:[#allocation5 + $0x1300] sm:$0xff] }
 0x210   :  { %2500 = vmatpush.msrb.mxu3 %v1298_v63  ;;  %2461 = vmatpush.msrb.mxu1 %v968_v0  ;;  %v6971_v30 = vpop.f32.mrf.mxu0  ;;  %v889_v62 = vld [vmem:[#allocation5 + $0x1350] sm:$0xff]  ;;  %v559_v63 = vld [vmem:[#allocation5 + $0x900] sm:$0xff] }
 0x211   :  { %2441 = vmatpush.msrb.mxu0 %v808_v35  ;;  %2481 = vmatpush.msrb.mxu2 %v1128_v3  ;;  %v1609_v35 = vadd.f32 %v6933_v38, %v1589_v9  ;;  %v389_v3 = vld [vmem:[#allocation5 + $0x3b0] sm:$0xff]  ;;  %v859_v38 = vld [vmem:[#allocation5 + $0x1260] sm:$0xff] }
 0x212   :  { %2501 = vmatpush.msrb.mxu3 %v1288_v6  ;;  %2462 = vmatpush.msrb.mxu1 %v958_v7  ;;  %v6975_v0 = vpop.f32.mrf.mxu3  ;;  %v549_v6 = vld [vmem:[#allocation5 + $0x8b0] sm:$0xff]  ;;  %v6978_v7 = vpop.f32.mrf.mxu1  ;;  %v659_v17 = vld [vmem:[#allocation5 + $0xc20] sm:$0xff] }
 0x213   :  { %2442 = vmatpush.msrb.mxu0 %v798_v10  ;;  %2482 = vmatpush.msrb.mxu2 %v1118_v11  ;;  %v869_v10 = vld [vmem:[#allocation5 + $0x12b0] sm:$0xff]  ;;  %v539_v11 = vld [vmem:[#allocation5 + $0x860] sm:$0xff] }
 0x214   :  { %2502 = vmatpush.msrb.mxu3 %v1278_v54  ;;  %2407 = vmatmul.f32.vlgmr.msra.gmra.mxu2 %v6889_v59  ;;  %v758_v59 = vld [vmem:[#allocation5 + $0xf38] sm:$0xff]  ;;  %v319_v9 = vld [vmem:[#allocation5 + $0x180] sm:$0xff] }
 0x215   :  { %2443 = vmatpush.msrb.mxu0 %v788_v15  ;;  %2463 = vmatpush.msrb.mxu1 %v948_v19  ;;  %v699_v15 = vld [vmem:[#allocation5 + $0xd60] sm:$0xff]  ;;  %v1629_v19 = vadd.f32 %v6937_v49, %v1609_v35  ;;  %v629_v35 = vld [vmem:[#allocation5 + $0xb30] sm:$0xff] }
 0x216   :  { %2483 = vmatpush.msrb.mxu2 %v1108_v20  ;;  %2503 = vmatpush.msrb.mxu3 %v1268_v48  ;;  %v369_v20 = vld [vmem:[#allocation5 + $0x310] sm:$0xff]  ;;  %v679_v49 = vld [vmem:[#allocation5 + $0xcc0] sm:$0xff] }
 0x217   :  { %2427 = vmatmul.f32.vlgmr.msra.gmra.mxu3 %v6893_v39  ;;  %2444 = vmatpush.msrb.mxu0 %v778_v22  ;;  %v1238_v39 = vld [vmem:[#allocation5 + $0x1e38] sm:$0xff]  ;;  %v529_v48 = vld [vmem:[#allocation5 + $0x810] sm:$0xff]  ;;  %v6982_v22 = vpop.f32.mrf.mxu2 }
 0x218   :  { %2464 = vmatpush.msrb.mxu1 %v938_v23  ;;  %2484 = vmatpush.msrb.mxu2 %v1098_v24  ;;  %v6984_v23 = vpop.f32.mrf.mxu0  ;;  %v689_v24 = vld [vmem:[#allocation5 + $0xd10] sm:$0xff] }
 0x219   :  { %2504 = vmatpush.msrb.mxu3 %v1258_v26  ;;  %2387 = vmatmul.f32.vlgmr.msra.gmra.mxu1 %v6902_v60  ;;  %v589_v60 = vld [vmem:[#allocation5 + $0x9f0] sm:$0xff] }
 0x21a   :  { %2445 = vmatpush.msrb.mxu0 %v768_v28  ;;  %2465 = vmatpush.msrb.mxu1 %v928_v29  ;;  %v849_v26 = vld [vmem:[#allocation5 + $0x1210] sm:$0xff]  ;;  %v519_v28 = vld [vmem:[#allocation5 + $0x7c0] sm:$0xff] }
 0x21b   :  { %2485 = vmatpush.msrb.mxu2 %v1088_v33  ;;  %2505 = vmatpush.msrb.mxu3 %v1248_v34  ;;  %v839_v33 = vld [vmem:[#allocation5 + $0x11c0] sm:$0xff]  ;;  %v1649_v34 = vadd.f32 %v6935_v18, %v1629_v19  ;;  %v6695_v18 = vmov 8.0   ;;  %v289_v19 = vld [vmem:[#allocation5 + $0x90] sm:$0xff] }
 0x21c   :  { %2446 = vmatpush.msrb.mxu0 %v758_v59  ;;  %2466 = vmatpush.msrb.mxu1 %v918_v53  ;;  %v349_v59 = vld [vmem:[#allocation5 + $0x270] sm:$0xff]  ;;  %6203 = vrcp.f32 %v6695_v18 }
 0x21d   :  { %2486 = vmatpush.msrb.mxu2 %v1078_v4  ;;  %2506 = vmatpush.msrb.mxu3 %v1238_v39  ;;  %v509_v53 = vld [vmem:[#allocation5 + $0x770] sm:$0xff]  ;;  %v6988_v4 = vpop.f32.mrf.mxu3  ;;  %v6990_v39 = vpop.f32.mrf.mxu1 }
 0x21e   :  { %2487 = vmatmul.f32.vlgmr.msrb.gmra.mxu2 %v6896_v51  ;;  %2511 = vmatpush.msra.mxu0 %v429_v12  ;;  %v409_v51 = vld [vmem:[#allocation5 + $0x450] sm:$0xff]  ;;  %v1989_v18 = vadd.f32 %v6990_v39, %v6984_v23 }
 0x21f   :  { %2531 = vmatpush.msra.mxu1 %v589_v60  ;;  %2551 = vmatpush.msra.mxu2 %v749_v45  ;;  %v669_v12 = vld [vmem:[#allocation5 + $0xc70] sm:$0xff]  ;;  %v499_v60 = vld [vmem:[#allocation5 + $0x720] sm:$0xff] }
 0x220   :  { %2571 = vmatpush.msra.mxu3 %v909_v46  ;;  %2447 = vmatmul.f32.vlgmr.msrb.gmra.mxu0 %v6886_v32  ;;  %v1469_v32 = vadd.f32 %v6920_v1, %v1449_v50  ;;  %v379_v1 = vld [vmem:[#allocation5 + $0x360] sm:$0xff]  ;;  %v6998_v50 = vpop.f32.mrf.mxu2 }
 0x221   :  { %2507 = vmatmul.f32.vlgmr.msrb.gmra.mxu3 %v6899_v57  ;;  %2512 = vmatpush.msra.mxu0 %v419_v47  ;;  %v719_v57 = vld [vmem:[#allocation5 + $0xe00] sm:$0xff]  ;;  %v6996_v47 = vadd.f32 %v6939_v58, %v1649_v34 }
 0x222   :  { %2532 = vmatpush.msra.mxu1 %v579_v37  ;;  %2552 = vmatpush.msra.mxu2 %v739_v41  ;;  %v1489_v54 = vadd.f32 %v6918_v61, %v1469_v32  ;;  %v359_v61 = vld [vmem:[#allocation5 + $0x2c0] sm:$0xff]  ;;  %v329_v37 = vld [vmem:[#allocation5 + $0x1d0] sm:$0xff] }
 0x223   :  { %2572 = vmatpush.msra.mxu3 %v899_v56  ;;  %2467 = vmatmul.f32.vlgmr.msrb.gmra.mxu1 %v6910_v44  ;;  %v709_v44 = vld [vmem:[#allocation5 + $0xdb0] sm:$0xff]  ;;  %v819_v46 = vld [vmem:[#allocation5 + $0x1120] sm:$0xff] }
 0x224   :  { %2513 = vmatpush.msra.mxu0 %v409_v51  ;;  %2533 = vmatpush.msra.mxu1 %v569_v14  ;;  %v1509_v29 = vadd.f32 %v6922_v5, %v1489_v54  ;;  %v339_v5 = vld [vmem:[#allocation5 + $0x220] sm:$0xff]  ;;  %v489_v41 = vld [vmem:[#allocation5 + $0x6d0] sm:$0xff] }
 0x225   :  { %2553 = vmatpush.msra.mxu2 %v729_v25  ;;  %2573 = vmatpush.msra.mxu3 %v889_v62  ;;  %v649_v56 = vld [vmem:[#allocation5 + $0xbd0] sm:$0xff]  ;;  %v479_v51 = vld [vmem:[#allocation5 + $0x680] sm:$0xff]  ;;  %v7001_v25 = vpop.f32.mrf.mxu0 }
 0x226   :  { %2514 = vmatpush.msra.mxu0 %v399_v52  ;;  %2534 = vmatpush.msra.mxu1 %v559_v63  ;;  %v6993_v45 = vadd.f32 %v6925_v16, %v1509_v29  ;;  %v809_v16 = vld [vmem:[#allocation5 + $0x10d0] sm:$0xff]  ;;  %v639_v58 = vld [vmem:[#allocation5 + $0xb80] sm:$0xff]  ;;  %v2797_v52 = vrot.slane %v6996_v47, 4  ;;  %v1709_v29 = vadd.f32 %v6945_v13, %v6941_v2 }
 0x227   :  { %2554 = vmatpush.msra.mxu2 %v719_v57  ;;  %2574 = vmatpush.msra.mxu3 %v879_v27  ;;  %v799_v62 = vld [vmem:[#allocation5 + $0x1080] sm:$0xff]  ;;  %v309_v63 = vld [vmem:[#allocation5 + $0x130] sm:$0xff]  ;;  %v7004_v57 = vpop.eup %6203  ;;  %v7006_v27 = vpop.f32.mrf.mxu3 }
 0x228   :  { %2515 = vmatpush.msra.mxu0 %v389_v3  ;;  %2535 = vmatpush.msra.mxu1 %v549_v6  ;;  %v2791_v14 = vrot.slane %v6993_v45, 4  ;;  %v469_v32 = vld [vmem:[#allocation5 + $0x630] sm:$0xff]  ;;  %v299_v6 = vld [vmem:[#allocation5 + $0xe0] sm:$0xff]  ;;  %vm2856_vm0 = vweird.f32 %v7004_v57 }
 0x229   :  { %2555 = vmatpush.msra.mxu2 %v709_v44  ;;  %2575 = vmatpush.msra.mxu3 %v869_v10  ;;  %v789_v3 = vld [vmem:[#allocation5 + $0x1030] sm:$0xff]  ;;  %v459_v44 = vld [vmem:[#allocation5 + $0x5e0] sm:$0xff] }
 0x22a   :  { %2516 = vmatpush.msra.mxu0 %v379_v1  ;;  %2536 = vmatpush.msra.mxu1 %v539_v11  ;;  %v2792_v10 = vadd.f32 %v2791_v14, %v6993_v45  ;;  %v7009_v1 = vpop.f32.mrf.mxu1  ;;  %v619_v11 = vld [vmem:[#allocation5 + $0xae0] sm:$0xff]  ;;  %v1389_v13 = vld [vmem:[#allocation5 + $0x22f0] sm:$0xff] }
 0x22b   :  { %2556 = vmatpush.msra.mxu2 %v699_v15  ;;  %2576 = vmatpush.msra.mxu3 %v859_v38  ;;  %v779_v54 = vld [vmem:[#allocation5 + $0xfe0] sm:$0xff]  ;;  %v2852_v15 = vmul.f32 8.0, %v7004_v57  ;;  %v2798_v38 = vadd.f32 %v2797_v52, %v6996_v47  ;;  %v1049_v14 = vld [vmem:[#allocation5 + $0x1850] sm:$0xff] }
 0x22c   :  { %2517 = vmatpush.msra.mxu0 %v369_v20  ;;  %2537 = vmatpush.msra.mxu1 %v529_v48  ;;  %v449_v20 = vld [vmem:[#allocation5 + $0x590] sm:$0xff]  ;;  %v599_v34 = vld [vmem:[#allocation5 + $0xa40] sm:$0xff] }
 0x22d   :  { %2557 = vmatpush.msra.mxu2 %v689_v24  ;;  %2577 = vmatpush.msra.mxu3 %v849_v26  ;;  %v609_v48 = vld [vmem:[#allocation5 + $0xa90] sm:$0xff]  ;;  %v279_v26 = vld [vmem:[#allocation5 + $0x40] sm:$0xff] }
 0x22e   :  { %2518 = vmatpush.msra.mxu0 %v359_v61  ;;  %2538 = vmatpush.msra.mxu1 %v519_v28  ;;  %v769_v24 = vld [vmem:[#allocation5 + $0xf90] sm:$0xff]  ;;  %v439_v61 = vld [vmem:[#allocation5 + $0x540] sm:$0xff]  ;;  %v2793_v28 = vrot.slane %v2792_v10, 2 }
 0x22f   :  { %2558 = vmatpush.msra.mxu2 %v679_v49  ;;  %2578 = vmatpush.msra.mxu3 %v839_v33  ;;  %v7015_v49 = vpop.f32.mrf.mxu2  ;;  %v2128_v33 = vpop.f32.mrf.mxu0  ;;  %v1369_v52 = vld [vmem:[#allocation5 + $0x2250] sm:$0xff] }
 0x230   :  { %2519 = vmatpush.msra.mxu0 %v349_v59  ;;  %2539 = vmatpush.msra.mxu1 %v509_v53  ;;  %v759_v59 = vld [vmem:[#allocation5 + $0xf40] sm:$0xff]  ;;  %v2853_v53 = vsub.f32 1.0, %v2852_v15  ;;  %v2108_v2 = vpop.f32.mrf.mxu3  ;;  %v1029_v15 = vld [vmem:[#allocation5 + $0x17b0] sm:$0xff] }
 0x231   :  { %2559 = vmatpush.msra.mxu2 %v669_v12  ;;  %2579 = vmatpush.msra.mxu3 %v829_v40  ;;  %v2799_v12 = vrot.slane %v2798_v38, 2  ;;  %v1849_v40 = vadd.f32 %v6966_v55, %v6960_v43  ;;  %v1729_v43 = vadd.f32 %v6943_v8, %v1709_v29  ;;  %v410_v8 = vld [vmem:[#allocation5 + $0x458] sm:$0xff]  ;;  %v1339_v29 = vld [vmem:[#allocation5 + $0x2160] sm:$0xff] }
 0x232   :  { %2520 = vmatpush.msra.mxu0 %v339_v5  ;;  %2540 = vmatpush.msra.mxu1 %v499_v60  ;;  %v1069_v5 = vld [vmem:[#allocation5 + $0x18f0] sm:$0xff]  ;;  %v2148_v55 = vpop.f32.mrf.mxu1  ;;  %v2854_v23 = vmul.f32 %v7004_v57, %v2853_v53 }
 0x233   :  { %2560 = vmatpush.msra.mxu2 %v659_v17  ;;  %2580 = vmatpush.msra.mxu3 %v819_v46  ;;  %v1229_v60 = vld [vmem:[#allocation5 + $0x1df0] sm:$0xff]  ;;  %v430_v17 = vld [vmem:[#allocation5 + $0x4f8] sm:$0xff]  ;;  %v2129_v46 = vadd.f32 %v2128_v33, %v2108_v2  ;;  %v2800_v39 = vadd.f32 %v2799_v12, %v2798_v38  ;;  %v380_v33 = vld [vmem:[#allocation5 + $0x368] sm:$0xff] }
 0x234   :  { %2521 = vmatpush.msra.mxu0 %v329_v37  ;;  %2541 = vmatpush.msra.mxu1 %v489_v41  ;;  %v1059_v37 = vld [vmem:[#allocation5 + $0x18a0] sm:$0xff]  ;;  %v1189_v38 = vld [vmem:[#allocation5 + $0x1cb0] sm:$0xff] }
 0x235   :  { %2561 = vmatpush.msra.mxu2 %v649_v56  ;;  %2581 = vmatpush.msra.mxu3 %v809_v16  ;;  %v1219_v41 = vld [vmem:[#allocation5 + $0x1da0] sm:$0xff]  ;;  %v2794_v56 = vadd.f32 %v2793_v28, %v2792_v10  ;;  %v400_v10 = vld [vmem:[#allocation5 + $0x408] sm:$0xff]  ;;  %v1009_v53 = vld [vmem:[#allocation5 + $0x1710] sm:$0xff] }
 0x236   :  { %2522 = vmatpush.msra.mxu0 %v319_v9  ;;  %2542 = vmatpush.msra.mxu1 %v479_v51  ;;  %v1379_v16 = vld [vmem:[#allocation5 + $0x22a0] sm:$0xff]  ;;  %v420_v9 = vld [vmem:[#allocation5 + $0x4a8] sm:$0xff]  ;;  %v1869_v51 = vadd.f32 %v6975_v0, %v1849_v40  ;;  %v1169_v12 = vld [vmem:[#allocation5 + $0x1c10] sm:$0xff] }
 0x237   :  { %2562 = vmatpush.msra.mxu2 %v639_v58  ;;  %2582 = vmatpush.msra.mxu3 %v799_v62  ;;  %v1209_v58 = vld [vmem:[#allocation5 + $0x1d50] sm:$0xff]  ;;  %v2009_v62 = vadd.f32 %v6998_v50, %v1989_v18  ;;  %v1359_v0 = vld [vmem:[#allocation5 + $0x2200] sm:$0xff]  ;;  %v2801_v50 = vrot.slane %v2800_v39, 1 }
 0x238   :  { %2523 = vmatpush.msra.mxu0 %v309_v63  ;;  %2543 = vmatpush.msra.mxu1 %v469_v32  ;;  %v2149_v63 = vadd.f32 %v2148_v55, %v2129_v46  ;;  %v1039_v32 = vld [vmem:[#allocation5 + $0x1800] sm:$0xff]  ;;  %v2188_v28 = vpop.f32.mrf.mxu3  ;;  %v360_v46 = vld [vmem:[#allocation5 + $0x2c8] sm:$0xff]  ;;  %v1309_v55 = vld [vmem:[#allocation5 + $0x2070] sm:$0xff] }
 0x239   :  { %2563 = vmatpush.msra.mxu2 %v629_v35  ;;  %2583 = vmatpush.msra.mxu3 %v789_v3  ;;  %v1199_v35 = vld [vmem:[#allocation5 + $0x1d00] sm:$0xff]  ;;  %v2795_v3 = vrot.slane %v2794_v56, 1 }
 0x23a   :  { %2524 = vmatpush.msra.mxu0 %v299_v6  ;;  %2544 = vmatpush.msra.mxu1 %v459_v44  ;;  %v1749_v6 = vadd.f32 %v6947_v21, %v1729_v43  ;;  %v2168_v44 = vpop.f32.mrf.mxu2  ;;  %v1349_v21 = vld [vmem:[#allocation5 + $0x21b0] sm:$0xff]  ;;  %v999_v18 = vld [vmem:[#allocation5 + $0x16c0] sm:$0xff] }
 0x23b   :  { %2564 = vmatpush.msra.mxu2 %v619_v11  ;;  %2584 = vmatpush.msra.mxu3 %v779_v54  ;;  %v2855_v11 = vadd.f32 %v7004_v57, %v2854_v23  ;;  %v1889_v54 = vadd.f32 %v6971_v30, %v1869_v51  ;;  %v1159_v2 = vld [vmem:[#allocation5 + $0x1bc0] sm:$0xff]  ;;  %v2228_v51 = vpop.f32.mrf.mxu1 }
 0x23c   :  { %2525 = vmatpush.msra.mxu0 %v289_v19  ;;  %2545 = vmatpush.msra.mxu1 %v449_v20  ;;  %v2029_v19 = vadd.f32 %v7006_v27, %v2009_v62  ;;  %v390_v20 = vld [vmem:[#allocation5 + $0x3b8] sm:$0xff]  ;;  %v1769_v30 = vadd.f32 %v6951_v31, %v1749_v6  ;;  %v1329_v31 = vld [vmem:[#allocation5 + $0x2110] sm:$0xff]  ;;  %v1139_v23 = vld [vmem:[#allocation5 + $0x1b20] sm:$0xff] }
 0x23d   :  { %2565 = vmatpush.msra.mxu2 %v609_v48  ;;  %2585 = vmatpush.msra.mxu3 %v769_v24  ;;  %v2169_v48 = vadd.f32 %v2168_v44, %v2149_v63  ;;  %v1019_v24 = vld [vmem:[#allocation5 + $0x1760] sm:$0xff]  ;;  %v7034_v27 = vsel %vm2856_vm0, %v7004_v57, %v2855_v11  ;;  %v330_v63 = vld [vmem:[#allocation5 + $0x1d8] sm:$0xff] }
 0x23e   :  { %2526 = vmatpush.msra.mxu0 %v279_v26  ;;  %2546 = vmatpush.msra.mxu1 %v439_v61  ;;  %v1179_v26 = vld [vmem:[#allocation5 + $0x1c60] sm:$0xff]  ;;  %v2796_v61 = vadd.f32 %v2795_v3, %v2794_v56  ;;  %v2049_v40 = vadd.f32 %v7001_v25, %v2029_v19  ;;  %v1149_v56 = vld [vmem:[#allocation5 + $0x1b70] sm:$0xff] }
 0x23f   :  { %2566 = vmatpush.msra.mxu2 %v599_v34  ;;  %2586 = vmatpush.msra.mxu3 %v759_v59  ;;  %v2802_v34 = vadd.f32 %v2801_v50, %v2800_v39  ;;  %v1909_v59 = vadd.f32 %v6978_v7, %v1889_v54  ;;  %v2208_v7 = vpop.f32.mrf.mxu0  ;;  %v1279_v6 = vld [vmem:[#allocation5 + $0x1f80] sm:$0xff]  ;;  %v1109_v50 = vld [vmem:[#allocation5 + $0x1a30] sm:$0xff] }
 0x240   :  { %2591 = vmatpush.msrb.mxu0 %v1069_v5  ;;  %2611 = vmatpush.msrb.mxu1 %v1229_v60  ;;  %v370_v5 = vld [vmem:[#allocation5 + $0x318] sm:$0xff]  ;;  %v2189_v60 = vadd.f32 %v2188_v28, %v2169_v48  ;;  %v2858_v57 = vmul.f32 %v7034_v27, %v2796_v61  ;;  %v2069_v43 = vadd.f32 %v7009_v1, %v2049_v40  ;;  %v340_v1 = vld [vmem:[#allocation5 + $0x228] sm:$0xff]  ;;  %v1269_v54 = vld [vmem:[#allocation5 + $0x1f30] sm:$0xff] }
 0x241   :  { %2631 = vmatpush.msrb.mxu2 %v1389_v13  ;;  %2651 = vmatpush.msrb.mxu3 %v430_v17  ;;  %v1789_v13 = vadd.f32 %v6958_v42, %v1769_v30  ;;  %v1319_v17 = vld [vmem:[#allocation5 + $0x20c0] sm:$0xff]  ;;  %v2859_v25 = vmul.f32 %v7034_v27, %v2802_v34 }
 0x242   :  { %2592 = vmatpush.msrb.mxu0 %v1059_v37  ;;  %2612 = vmatpush.msrb.mxu1 %v1219_v41  ;;  %v1929_v37 = vadd.f32 %v6982_v22, %v1909_v59  ;;  %v989_v41 = vld [vmem:[#allocation5 + $0x1670] sm:$0xff]  ;;  %v2209_v42 = vadd.f32 %v2208_v7, %v2189_v60  ;;  %v7044_v39 = vsub.f32 %v6993_v45, %v2858_v57  ;;  %v939_v48 = vld [vmem:[#allocation5 + $0x14e0] sm:$0xff]  ;;  %v290_v60 = vld [vmem:[#allocation5 + $0x98] sm:$0xff] }
 0x243   :  { %2632 = vmatpush.msrb.mxu2 %v1379_v16  ;;  %2652 = vmatpush.msrb.mxu3 %v420_v9  ;;  %v350_v16 = vld [vmem:[#allocation5 + $0x278] sm:$0xff]  ;;  %v979_v9 = vld [vmem:[#allocation5 + $0x1620] sm:$0xff]  ;;  %v7047_v22 = vadd.f32 %v6954_v36, %v1789_v13  ;;  %v7056_v45 = vadd.f32 %v7015_v49, %v2069_v43  ;;  %v1289_v36 = vld [vmem:[#allocation5 + $0x1fd0] sm:$0xff] }
 0x244   :  { %2593 = vmatpush.msrb.mxu0 %v1049_v14  ;;  %2613 = vmatpush.msrb.mxu1 %v1209_v58  ;;  %v1299_v14 = vld [vmem:[#allocation5 + $0x2020] sm:$0xff]  ;;  %v7050_v58 = vsub.f32 %v6996_v47, %v2859_v25  ;;  %v7053_v62 = vadd.f32 %v6988_v4, %v1929_v37  ;;  %v2878_v4 = vmul.f32 %v7044_v39, %v7044_v39  ;;  %v320_v49 = vld [vmem:[#allocation5 + $0x188] sm:$0xff]  ;;  %v7081_v57 = vld [vmem:[#allocation2 + $0x8] sm:$0xff] }
 0x245   :  { %2633 = vmatpush.msrb.mxu2 %v1369_v52  ;;  %2653 = vmatpush.msrb.mxu3 %v410_v8  ;;  %v969_v52 = vld [vmem:[#allocation5 + $0x15d0] sm:$0xff]  ;;  %v959_v47 = vld [vmem:[#allocation5 + $0x1580] sm:$0xff]  ;;  %v2803_v3 = vrot.slane %v7047_v22, 4  ;;  %v2815_v11 = vrot.slane %v7056_v45, 4  ;;  %v280_v25 = vld [vmem:[#allocation5 + $0x48] sm:$0xff] }
 0x246   :  { %2594 = vmatpush.msrb.mxu0 %v1039_v32  ;;  %2614 = vmatpush.msrb.mxu1 %v1199_v35  ;;  %v1129_v8 = vld [vmem:[#allocation5 + $0x1ad0] sm:$0xff]  ;;  %v7058_v32 = vadd.f32 %v2228_v51, %v2209_v42  ;;  %v1119_v35 = vld [vmem:[#allocation5 + $0x1a80] sm:$0xff]  ;;  %v2879_v44 = vmul.f32 %v7050_v58, %v7050_v58  ;;  %v2888_v19 = vrot.slane %v2878_v4, 4 }
 0x247   :  { %2634 = vmatpush.msrb.mxu2 %v1359_v0  ;;  %2654 = vmatpush.msrb.mxu3 %v400_v10  ;;  %v2809_v0 = vrot.slane %v7053_v62, 4  ;;  %v949_v10 = vld [vmem:[#allocation5 + $0x1530] sm:$0xff]  ;;  %v1099_v61 = vld [vmem:[#allocation5 + $0x19e0] sm:$0xff]  ;;  %v2816_v28 = vadd.f32 %v2815_v11, %v7056_v45  ;;  %v1050_v11 = vld [vmem:[#allocation5 + $0x1858] sm:$0xff] }
 0x248   :  { %2595 = vmatpush.msrb.mxu0 %v1029_v15  ;;  %2615 = vmatpush.msrb.mxu1 %v1189_v38  ;;  %v2821_v15 = vrot.slane %v7058_v32, 4  ;;  %v310_v38 = vld [vmem:[#allocation5 + $0x138] sm:$0xff]  ;;  %v1259_v30 = vld [vmem:[#allocation5 + $0x1ee0] sm:$0xff]  ;;  %v2889_v40 = vadd.f32 %v2888_v19, %v2878_v4  ;;  %v7087_v4 = vld [vmem:[#allocation2 + $0x20] sm:$0xff] }
 0x249   :  { %2635 = vmatpush.msrb.mxu2 %v1349_v21  ;;  %2655 = vmatpush.msrb.mxu3 %v390_v20  ;;  %v2804_v21 = vadd.f32 %v2803_v3, %v7047_v22  ;;  %v7069_v20 = vld [vmem:[#allocation2 + $0x10] sm:$0xff]  ;;  %v7078_v59 = vld [vmem:[#allocation2 + $0x18] sm:$0xff]  ;;  %v880_v19 = vld [vmem:[#allocation5 + $0x1308] sm:$0xff] }
 0x24a   :  { %2596 = vmatpush.msrb.mxu0 %v1019_v24  ;;  %2616 = vmatpush.msrb.mxu1 %v1179_v26  ;;  %v2894_v24 = vrot.slane %v2879_v44, 4  ;;  %v2810_v26 = vadd.f32 %v2809_v0, %v7053_v62  ;;  %v2822_v34 = vadd.f32 %v2821_v15, %v7058_v32  ;;  %v919_v13 = vld [vmem:[#allocation5 + $0x1440] sm:$0xff]  ;;  %v570_v3 = vld [vmem:[#allocation5 + $0x958] sm:$0xff]  ;;  %v7090_v15 = vld [vmem:[#allocation2 + $0x28] sm:$0xff] }
 0x24b   :  { %2636 = vmatpush.msrb.mxu2 %v1339_v29  ;;  %2656 = vmatpush.msrb.mxu3 %v380_v33  ;;  %v7074_v29 = vld [vmem:[#allocation2] sm:$0xff]  ;;  %v1079_v7 = vld [vmem:[#allocation5 + $0x1940] sm:$0xff]  ;;  %v890_v0 = vld [vmem:[#allocation5 + $0x1358] sm:$0xff] }
 0x24c   :  { %2597 = vmatpush.msrb.mxu0 %v1009_v53  ;;  %2617 = vmatpush.msrb.mxu1 %v1169_v12  ;;  %v300_v33 = vld [vmem:[#allocation5 + $0xe8] sm:$0xff]  ;;  %v929_v53 = vld [vmem:[#allocation5 + $0x1490] sm:$0xff]  ;;  %v2823_v37 = vrot.slane %v2822_v34, 2 }
 0x24d   :  { %2637 = vmatpush.msrb.mxu2 %v1329_v31  ;;  %2657 = vmatpush.msrb.mxu3 %v370_v5  ;;  %v1089_v12 = vld [vmem:[#allocation5 + $0x1990] sm:$0xff]  ;;  %v2805_v31 = vrot.slane %v2804_v21, 2 }
 0x24e   :  { %2598 = vmatpush.msrb.mxu0 %v999_v18  ;;  %2618 = vmatpush.msrb.mxu1 %v1159_v2  ;;  %v1249_v5 = vld [vmem:[#allocation5 + $0x1e90] sm:$0xff]  ;;  %v2895_v18 = vadd.f32 %v2894_v24, %v2879_v44  ;;  %v2811_v2 = vrot.slane %v2810_v26, 2  ;;  %v730_v44 = vld [vmem:[#allocation5 + $0xe58] sm:$0xff]  ;;  %v1040_v24 = vld [vmem:[#allocation5 + $0x1808] sm:$0xff] }
 0x24f   :  { %2638 = vmatpush.msrb.mxu2 %v1319_v17  ;;  %2658 = vmatpush.msrb.mxu3 %v360_v46  ;;  %v2817_v17 = vrot.slane %v2816_v28, 2  ;;  %v1239_v46 = vld [vmem:[#allocation5 + $0x1e40] sm:$0xff]  ;;  %v2806_v43 = vadd.f32 %v2805_v31, %v2804_v21  ;;  %v540_v31 = vld [vmem:[#allocation5 + $0x868] sm:$0xff] }
 0x250   :  { %2599 = vmatpush.msrb.mxu0 %v989_v41  ;;  %2619 = vmatpush.msrb.mxu1 %v1149_v56  ;;  %v590_v41 = vld [vmem:[#allocation5 + $0x9f8] sm:$0xff]  ;;  %v2890_v56 = vrot.slane %v2889_v40, 2  ;;  %v2896_v42 = vrot.slane %v2895_v18, 2 }
 0x251   :  { %2639 = vmatpush.msrb.mxu2 %v1309_v55  ;;  %2659 = vmatpush.msrb.mxu3 %v350_v16  ;;  %v750_v55 = vld [vmem:[#allocation5 + $0xef8] sm:$0xff]  ;;  %v2818_v51 = vadd.f32 %v2817_v17, %v2816_v28 }
 0x252   :  { %2600 = vmatpush.msrb.mxu0 %v979_v9  ;;  %2620 = vmatpush.msrb.mxu1 %v1139_v23  ;;  %v910_v16 = vld [vmem:[#allocation5 + $0x13f8] sm:$0xff]  ;;  %v2812_v9 = vadd.f32 %v2811_v2, %v2810_v26 }
 0x253   :  { %2640 = vmatpush.msrb.mxu2 %v1299_v14  ;;  %2660 = vmatpush.msrb.mxu3 %v340_v1  ;;  %v1070_v23 = vld [vmem:[#allocation5 + $0x18f8] sm:$0xff]  ;;  %v580_v1 = vld [vmem:[#allocation5 + $0x9a8] sm:$0xff] }
 0x254   :  { %2601 = vmatpush.msrb.mxu0 %v969_v52  ;;  %2621 = vmatpush.msrb.mxu1 %v1129_v8  ;;  %v7084_v14 = vld [vmem:[#allocation2 + $0x30] sm:$0xff]  ;;  %v740_v52 = vld [vmem:[#allocation5 + $0xea8] sm:$0xff]  ;;  %v2824_v8 = vadd.f32 %v2823_v37, %v2822_v34 }
 0x255   :  { %2641 = vmatpush.msrb.mxu2 %v1289_v36  ;;  %2661 = vmatpush.msrb.mxu3 %v330_v63  ;;  %v900_v36 = vld [vmem:[#allocation5 + $0x13a8] sm:$0xff]  ;;  %v550_v26 = vld [vmem:[#allocation5 + $0x8b8] sm:$0xff] }
 0x256   :  { %2602 = vmatpush.msrb.mxu0 %v959_v47  ;;  %2622 = vmatpush.msrb.mxu1 %v1119_v35  ;;  %v1060_v63 = vld [vmem:[#allocation5 + $0x18a8] sm:$0xff]  ;;  %v2891_v47 = vadd.f32 %v2890_v56, %v2889_v40  ;;  %v2807_v35 = vrot.slane %v2806_v43, 1  ;;  %v710_v28 = vld [vmem:[#allocation5 + $0xdb8] sm:$0xff] }
 0x257   :  { %2642 = vmatpush.msrb.mxu2 %v1279_v6  ;;  %2662 = vmatpush.msrb.mxu3 %v320_v49  ;;  %v2897_v6 = vadd.f32 %v2896_v42, %v2895_v18  ;;  %v2813_v49 = vrot.slane %v2812_v9, 1  ;;  %v1030_v40 = vld [vmem:[#allocation5 + $0x17b8] sm:$0xff]  ;;  %v860_v18 = vld [vmem:[#allocation5 + $0x1268] sm:$0xff] }
 0x258   :  { %2567 = vmatmul.f32.vlgmr.msra.gmra.mxu2 %v7069_v20  ;;  %2603 = vmatpush.msrb.mxu0 %v949_v10  ;;  %v2819_v10 = vrot.slane %v2818_v51, 1  ;;  %v2892_v21 = vrot.slane %v2891_v47, 1  ;;  %v530_v17 = vld [vmem:[#allocation5 + $0x818] sm:$0xff] }
 0x259   :  { %2623 = vmatpush.msrb.mxu1 %v1109_v50  ;;  %2643 = vmatpush.msrb.mxu2 %v1269_v54  ;;  %v560_v50 = vld [vmem:[#allocation5 + $0x908] sm:$0xff]  ;;  %v2825_v54 = vrot.slane %v2824_v8, 1  ;;  %v850_v56 = vld [vmem:[#allocation5 + $0x1218] sm:$0xff] }
 0x25a   :  { %2663 = vmatpush.msrb.mxu3 %v310_v38  ;;  %2527 = vmatmul.f32.vlgmr.msra.gmra.mxu0 %v7074_v29  ;;  %v720_v38 = vld [vmem:[#allocation5 + $0xe08] sm:$0xff]  ;;  %v2893_v2 = vadd.f32 %v2892_v21, %v2891_v47  ;;  %v490_v21 = vld [vmem:[#allocation5 + $0x6d8] sm:$0xff] }
 0x25b   :  { %2587 = vmatmul.f32.vlgmr.msra.gmra.mxu3 %v7078_v59  ;;  %2604 = vmatpush.msrb.mxu0 %v939_v48  ;;  %v2808_v48 = vadd.f32 %v2807_v35, %v2806_v43 }
 0x25c   :  { %2624 = vmatpush.msrb.mxu1 %v1099_v61  ;;  %2644 = vmatpush.msrb.mxu2 %v1259_v30  ;;  %v2898_v61 = vrot.slane %v2897_v6, 1  ;;  %v2814_v30 = vadd.f32 %v2813_v49, %v2812_v9  ;;  %v2248_v34 = vpop.f32.mrf.mxu2  ;;  %v680_v9 = vld [vmem:[#allocation5 + $0xcc8] sm:$0xff] }
 0x25d   :  { %2664 = vmatpush.msrb.mxu3 %v300_v33  ;;  %2547 = vmatmul.f32.vlgmr.msra.gmra.mxu1 %v7081_v57  ;;  %v870_v33 = vld [vmem:[#allocation5 + $0x12b8] sm:$0xff] }
 0x25e   :  { %2605 = vmatpush.msrb.mxu0 %v929_v53  ;;  %2625 = vmatpush.msrb.mxu1 %v1089_v12  ;;  %v2268_v53 = vpop.f32.mrf.mxu3  ;;  %v2820_v12 = vadd.f32 %v2819_v10, %v2818_v51  ;;  %v2861_v37 = vmul.f32 %v7034_v27, %v2814_v30 }
 0x25f   :  { %2645 = vmatpush.msrb.mxu2 %v1249_v5  ;;  %2665 = vmatpush.msrb.mxu3 %v290_v60  ;;  %v2826_v5 = vadd.f32 %v2825_v54, %v2824_v8  ;;  %v700_v60 = vld [vmem:[#allocation5 + $0xd68] sm:$0xff] }
 0x260   :  { %2606 = vmatpush.msrb.mxu0 %v919_v13  ;;  %2626 = vmatpush.msrb.mxu1 %v1079_v7  ;;  %v2860_v13 = vmul.f32 %v7034_v27, %v2808_v48  ;;  %v1020_v7 = vld [vmem:[#allocation5 + $0x1768] sm:$0xff]  ;;  %v2862_v43 = vmul.f32 %v7034_v27, %v2820_v12  ;;  %v7103_v35 = vsub.f32 %v7053_v62, %v2861_v37 }
 0x261   :  { %2646 = vmatpush.msrb.mxu2 %v1239_v46  ;;  %2666 = vmatpush.msrb.mxu3 %v280_v25  ;;  %v2269_v46 = vadd.f32 %v2268_v53, %v2248_v34  ;;  %v2899_v25 = vadd.f32 %v2898_v61, %v2897_v6  ;;  %v2863_v42 = vmul.f32 %v7034_v27, %v2826_v5  ;;  %v1000_v8 = vld [vmem:[#allocation5 + $0x16c8] sm:$0xff]  ;;  %v830_v6 = vld [vmem:[#allocation5 + $0x1178] sm:$0xff] }
 0x262   :  { %2647 = vmatmul.f32.vlgmr.msrb.gmra.mxu2 %v7084_v14  ;;  %2671 = vmatpush.msra.mxu0 %v590_v41  ;;  %v690_v41 = vld [vmem:[#allocation5 + $0xd18] sm:$0xff]  ;;  %v7106_v49 = vsub.f32 %v7056_v45, %v2862_v43  ;;  %v820_v62 = vld [vmem:[#allocation5 + $0x1128] sm:$0xff] }
 0x263   :  { %2691 = vmatpush.msra.mxu1 %v750_v55  ;;  %2711 = vmatpush.msra.mxu2 %v910_v16  ;;  %v1010_v55 = vld [vmem:[#allocation5 + $0x1718] sm:$0xff]  ;;  %v520_v16 = vld [vmem:[#allocation5 + $0x7c8] sm:$0xff]  ;;  %v2949_v47 = vmul.f32 %v2899_v25, %v7034_v27  ;;  %v7109_v10 = vsub.f32 %v7058_v32, %v2863_v42  ;;  %v2881_v32 = vmul.f32 %v7103_v35, %v7103_v35 }
 0x264   :  { %2731 = vmatpush.msra.mxu3 %v1070_v23  ;;  %2607 = vmatmul.f32.vlgmr.msrb.gmra.mxu0 %v7087_v4  ;;  %v840_v23 = vld [vmem:[#allocation5 + $0x11c8] sm:$0xff]  ;;  %v2882_v30 = vmul.f32 %v7106_v49, %v7106_v49  ;;  %v950_v25 = vld [vmem:[#allocation5 + $0x1538] sm:$0xff] }
 0x265   :  { %2672 = vmatpush.msra.mxu0 %v580_v1  ;;  %2692 = vmatpush.msra.mxu1 %v740_v52  ;;  %v2948_v1 = vmul.f32 %v2893_v2, %v7034_v27  ;;  %v7099_v52 = vsub.f32 %v7047_v22, %v2860_v13  ;;  %v990_v22 = vld [vmem:[#allocation5 + $0x1678] sm:$0xff]  ;;  %v7115_v48 = vadd.f32 1e-05, %v2949_v47  ;;  %v2883_v53 = vmul.f32 %v7109_v10, %v7109_v10  ;;  %v640_v12 = vld [vmem:[#allocation5 + $0xb88] sm:$0xff] }
 0x266   :  { %2712 = vmatpush.msra.mxu2 %v900_v36  ;;  %2732 = vmatpush.msra.mxu3 %v1060_v63  ;;  %v510_v36 = vld [vmem:[#allocation5 + $0x778] sm:$0xff]  ;;  %v2906_v2 = vrot.slane %v2881_v32, 4  ;;  %v460_v37 = vld [vmem:[#allocation5 + $0x5e8] sm:$0xff] }
 0x267   :  { %2627 = vmatmul.f32.vlgmr.msrb.gmra.mxu1 %v7090_v15  ;;  %2673 = vmatpush.msra.mxu0 %v570_v3  ;;  %v670_v3 = vld [vmem:[#allocation5 + $0xc78] sm:$0xff]  ;;  %v2880_v45 = vmul.f32 %v7099_v52, %v7099_v52  ;;  %v620_v43 = vld [vmem:[#allocation5 + $0xae8] sm:$0xff]  ;;  %vm2984_vm5 = vweird.f32 %v7115_v48 }
 0x268   :  { %2693 = vmatpush.msra.mxu1 %v730_v44  ;;  %2713 = vmatpush.msra.mxu2 %v890_v0  ;;  %v500_v44 = vld [vmem:[#allocation5 + $0x728] sm:$0xff]  ;;  %v630_v13 = vld [vmem:[#allocation5 + $0xb38] sm:$0xff] }
 0x269   :  { %2733 = vmatpush.msra.mxu3 %v1050_v11  ;;  %2674 = vmatpush.msra.mxu0 %v560_v50  ;;  %v660_v11 = vld [vmem:[#allocation5 + $0xc28] sm:$0xff]  ;;  %v2900_v5 = vrot.slane %v2880_v45, 4  ;;  %v930_v47 = vld [vmem:[#allocation5 + $0x1498] sm:$0xff] }
 0x26a   :  { %2694 = vmatpush.msra.mxu1 %v720_v38  ;;  %2714 = vmatpush.msra.mxu2 %v880_v19  ;;  %v7111_v38 = vadd.f32 1e-05, %v2948_v1  ;;  %v980_v19 = vld [vmem:[#allocation5 + $0x1628] sm:$0xff]  ;;  %v610_v1 = vld [vmem:[#allocation5 + $0xa98] sm:$0xff] }
 0x26b   :  { %2734 = vmatpush.msra.mxu3 %v1040_v24  ;;  %2675 = vmatpush.msra.mxu0 %v550_v26  ;;  %v650_v24 = vld [vmem:[#allocation5 + $0xbd8] sm:$0xff]  ;;  %v940_v42 = vld [vmem:[#allocation5 + $0x14e8] sm:$0xff] }
 0x26c   :  { %2695 = vmatpush.msra.mxu1 %v710_v28  ;;  %2715 = vmatpush.msra.mxu2 %v870_v33  ;;  %v810_v26 = vld [vmem:[#allocation5 + $0x10d8] sm:$0xff]  ;;  %v480_v33 = vld [vmem:[#allocation5 + $0x688] sm:$0xff]  ;;  %6205 = vrsqrt.f32 %v7111_v38  ;;  %vm2974_vm3 = vweird.f32 %v7111_v38 }
 0x26d   :  { %2735 = vmatpush.msra.mxu3 %v1030_v40  ;;  %2676 = vmatpush.msra.mxu0 %v540_v31  ;;  %v970_v28 = vld [vmem:[#allocation5 + $0x15d8] sm:$0xff]  ;;  %v800_v40 = vld [vmem:[#allocation5 + $0x1088] sm:$0xff]  ;;  %6207 = vrsqrt.f32 %v7115_v48 }
 0x26e   :  { %2696 = vmatpush.msra.mxu1 %v700_v60  ;;  %2716 = vmatpush.msra.mxu2 %v860_v18  ;;  %v960_v60 = vld [vmem:[#allocation5 + $0x1588] sm:$0xff]  ;;  %v470_v18 = vld [vmem:[#allocation5 + $0x638] sm:$0xff] }
 0x26f   :  { %2736 = vmatpush.msra.mxu3 %v1020_v7  ;;  %2677 = vmatpush.msra.mxu0 %v530_v17  ;;  %v2288_v51 = vpop.f32.mrf.mxu0  ;;  %v790_v7 = vld [vmem:[#allocation5 + $0x1038] sm:$0xff] }
 0x270   :  { %2697 = vmatpush.msra.mxu1 %v690_v41  ;;  %2717 = vmatpush.msra.mxu2 %v850_v56  ;;  %v2289_v63 = vadd.f32 %v2288_v51, %v2269_v46  ;;  %v2912_v46 = vrot.slane %v2882_v30, 4  ;;  %v2918_v56 = vrot.slane %v2883_v53, 4  ;;  %v2907_v51 = vadd.f32 %v2906_v2, %v2881_v32  ;;  %v1390_v32 = vld [vmem:[#allocation5 + $0x22f8] sm:$0xff] }
 0x271   :  { %2737 = vmatpush.msra.mxu3 %v1010_v55  ;;  %2678 = vmatpush.msra.mxu0 %v520_v16  ;;  %v780_v55 = vld [vmem:[#allocation5 + $0xfe8] sm:$0xff]  ;;  %v2901_v16 = vadd.f32 %v2900_v5, %v2880_v45  ;;  %v1370_v2 = vld [vmem:[#allocation5 + $0x2258] sm:$0xff] }
 0x272   :  { %2698 = vmatpush.msra.mxu1 %v680_v9  ;;  %2718 = vmatpush.msra.mxu2 %v840_v23  ;;  %v2308_v0 = vpop.f32.mrf.mxu1  ;;  %v450_v9 = vld [vmem:[#allocation5 + $0x598] sm:$0xff] }
 0x273   :  { %2738 = vmatpush.msra.mxu3 %v1000_v8  ;;  %2679 = vmatpush.msra.mxu0 %v510_v36  ;;  %v2309_v50 = vadd.f32 %v2308_v0, %v2289_v63  ;;  %v2328_v54 = vpop.f32.mrf.mxu2  ;;  %v770_v8 = vld [vmem:[#allocation5 + $0xf98] sm:$0xff]  ;;  %v7128_v36 = vpop.eup %6205  ;;  %v2913_v63 = vadd.f32 %v2912_v46, %v2882_v30  ;;  %v600_v0 = vld [vmem:[#allocation5 + $0xa48] sm:$0xff] }
 0x274   :  { %2699 = vmatpush.msra.mxu1 %v670_v3  ;;  %2719 = vmatpush.msra.mxu2 %v830_v6  ;;  %v440_v3 = vld [vmem:[#allocation5 + $0x548] sm:$0xff]  ;;  %v3311_v30 = vld [vmem:[#allocation7 + $0x4d8] sm:$0xff]  ;;  %vm2975_vm1 = vweird.f32 %v7128_v36 }
 0x275   :  { %2739 = vmatpush.msra.mxu3 %v990_v22  ;;  %2680 = vmatpush.msra.mxu0 %v500_v44  ;;  %v2329_v61 = vadd.f32 %v2328_v54, %v2309_v50  ;;  %v7131_v22 = vpop.eup %6207  ;;  %v2919_v44 = vadd.f32 %v2918_v56, %v2883_v53  ;;  %v920_v50 = vld [vmem:[#allocation5 + $0x1448] sm:$0xff]  ;;  %v1230_v54 = vld [vmem:[#allocation5 + $0x1df8] sm:$0xff]  ;;  %vm7155_vm4 = vmor %vm2974_vm3, %vm2975_vm1 }
 0x276   :  { %2700 = vmatpush.msra.mxu1 %v660_v11  ;;  %2720 = vmatpush.msra.mxu2 %v820_v62  ;;  %v2348_v34 = vpop.f32.mrf.mxu3  ;;  %v760_v11 = vld [vmem:[#allocation5 + $0xf48] sm:$0xff]  ;;  %v2902_v62 = vrot.slane %v2901_v16, 2  ;;  %vm2985_vm2 = vweird.f32 %v7131_v22 }
 0x277   :  { %2740 = vmatpush.msra.mxu3 %v980_v19  ;;  %2681 = vmatpush.msra.mxu0 %v490_v21  ;;  %v2349_v31 = vadd.f32 %v2348_v34, %v2329_v61  ;;  %v2969_v19 = vmul.f32 %v7128_v36, %v7111_v38  ;;  %v2908_v21 = vrot.slane %v2907_v51, 2  ;;  %v3231_v61 = vld [vmem:[#allocation7 + $0x258] sm:$0xff]  ;;  %v1220_v34 = vld [vmem:[#allocation5 + $0x1da8] sm:$0xff]  ;;  %v3186_v38 = vld [vmem:[#allocation7 + $0xf0] sm:$0xff] }
 0x278   :  { %2701 = vmatpush.msra.mxu1 %v650_v24  ;;  %2721 = vmatpush.msra.mxu2 %v810_v26  ;;  %v2979_v24 = vmul.f32 %v7131_v22, %v7115_v48  ;;  %v2914_v26 = vrot.slane %v2913_v63, 2  ;;  %v1380_v53 = vld [vmem:[#allocation5 + $0x22a8] sm:$0xff]  ;;  %vm7169_vm6 = vmor %vm2984_vm5, %vm2985_vm2  ;;  %v1130_v48 = vld [vmem:[#allocation5 + $0x1ad8] sm:$0xff] }
 0x279   :  { %2741 = vmatpush.msra.mxu3 %v970_v28  ;;  %2682 = vmatpush.msra.mxu0 %v480_v33  ;;  %v2368_v17 = vpop.f32.mrf.mxu0  ;;  %v2920_v28 = vrot.slane %v2919_v44, 2  ;;  %v2970_v5 = vmul.f32 %v7128_v36, %v2969_v19  ;;  %v3301_v46 = vld [vmem:[#allocation7 + $0x488] sm:$0xff]  ;;  %v1170_v19 = vld [vmem:[#allocation5 + $0x1c18] sm:$0xff] }
 0x27a   :  { %2702 = vmatpush.msra.mxu1 %v640_v12  ;;  %2722 = vmatpush.msra.mxu2 %v800_v40  ;;  %v7125_v41 = vadd.f32 %v2368_v17, %v2349_v31  ;;  %v2903_v12 = vadd.f32 %v2902_v62, %v2901_v16  ;;  %v3226_v40 = vld [vmem:[#allocation7 + $0x230] sm:$0xff]  ;;  %v3221_v17 = vld [vmem:[#allocation7 + $0x208] sm:$0xff]  ;;  %v3296_v16 = vld [vmem:[#allocation7 + $0x460] sm:$0xff] }
 0x27b   :  { %2742 = vmatpush.msra.mxu3 %v960_v60  ;;  %2683 = vmatpush.msra.mxu0 %v470_v18  ;;  %v3306_v31 = vld [vmem:[#allocation7 + $0x4b0] sm:$0xff]  ;;  %v2909_v60 = vadd.f32 %v2908_v21, %v2907_v51  ;;  %v1210_v18 = vld [vmem:[#allocation5 + $0x1d58] sm:$0xff]  ;;  %v1360_v56 = vld [vmem:[#allocation5 + $0x2208] sm:$0xff] }
 0x27c   :  { %2703 = vmatpush.msra.mxu1 %v630_v13  ;;  %2723 = vmatpush.msra.mxu2 %v790_v7  ;;  %v2827_v23 = vrot.slane %v7125_v41, 4  ;;  %v2980_v13 = vmul.f32 %v7131_v22, %v2979_v24  ;;  %v2915_v7 = vadd.f32 %v2914_v26, %v2913_v63  ;;  %v1350_v51 = vld [vmem:[#allocation5 + $0x21b8] sm:$0xff]  ;;  %v3206_v62 = vld [vmem:[#allocation7 + $0x190] sm:$0xff]  ;;  %v3201_v26 = vld [vmem:[#allocation7 + $0x168] sm:$0xff] }
 0x27d   :  { %2743 = vmatpush.msra.mxu3 %v950_v25  ;;  %2684 = vmatpush.msra.mxu0 %v460_v37  ;;  %v2921_v25 = vadd.f32 %v2920_v28, %v2919_v44  ;;  %v3211_v63 = vld [vmem:[#allocation7 + $0x1b8] sm:$0xff]  ;;  %v1180_v44 = vld [vmem:[#allocation5 + $0x1c68] sm:$0xff] }
 0x27e   :  { %2704 = vmatpush.msra.mxu1 %v620_v43  ;;  %2724 = vmatpush.msra.mxu2 %v780_v55  ;;  %v2828_v6 = vadd.f32 %v2827_v23, %v7125_v41  ;;  %v2904_v43 = vrot.slane %v2903_v12, 1  ;;  %v3216_v55 = vld [vmem:[#allocation7 + $0x1e0] sm:$0xff]  ;;  %v1190_v23 = vld [vmem:[#allocation5 + $0x1cb8] sm:$0xff] }
 0x27f   :  { %2744 = vmatpush.msra.mxu3 %v940_v42  ;;  %2685 = vmatpush.msra.mxu0 %v450_v9  ;;  %v2971_v42 = vmul.f32 0.5, %v2970_v5  ;;  %v2910_v9 = vrot.slane %v2909_v60, 1  ;;  %v1330_v21 = vld [vmem:[#allocation5 + $0x2118] sm:$0xff] }
 0x280   :  { %2705 = vmatpush.msra.mxu1 %v610_v1  ;;  %2725 = vmatpush.msra.mxu2 %v770_v8  ;;  %v2829_v45 = vrot.slane %v2828_v6, 2  ;;  %v2981_v1 = vmul.f32 0.5, %v2980_v13  ;;  %v2916_v8 = vrot.slane %v2915_v7, 1 }
 0x281   :  { %2745 = vmatpush.msra.mxu3 %v930_v47  ;;  %2686 = vmatpush.msra.mxu0 %v440_v3  ;;  %v3291_v47 = vld [vmem:[#allocation7 + $0x438] sm:$0xff]  ;;  %v2922_v3 = vrot.slane %v2921_v25, 1 }
 0x282   :  { %2706 = vmatpush.msra.mxu1 %v600_v0  ;;  %2726 = vmatpush.msra.mxu2 %v760_v11  ;;  %v2830_v33 = vadd.f32 %v2829_v45, %v2828_v6  ;;  %v1340_v0 = vld [vmem:[#allocation5 + $0x2168] sm:$0xff]  ;;  %v2905_v11 = vadd.f32 %v2904_v43, %v2903_v12  ;;  %v2911_v45 = vadd.f32 %v2910_v9, %v2909_v60  ;;  %v3196_v12 = vld [vmem:[#allocation7 + $0x140] sm:$0xff]  ;;  %v1150_v60 = vld [vmem:[#allocation5 + $0x1b78] sm:$0xff] }
 0x283   :  { %2746 = vmatpush.msra.mxu3 %v920_v50  ;;  %2751 = vmatpush.msrb.mxu0 %v1230_v54  ;;  %v3286_v50 = vld [vmem:[#allocation7 + $0x410] sm:$0xff]  ;;  %v2972_v54 = vsub.f32 1.5, %v2971_v42  ;;  %v2917_v24 = vadd.f32 %v2916_v8, %v2915_v7  ;;  %v3191_v7 = vld [vmem:[#allocation7 + $0x118] sm:$0xff] }
 0x284   :  { %2667 = vmatmul.f32.vlgmr.msrb.gmra.mxu3 %v7074_v29  ;;  %2771 = vmatpush.msrb.mxu1 %v1390_v32  ;;  %v2831_v37 = vrot.slane %v2830_v33, 1  ;;  %v1200_v29 = vld [vmem:[#allocation5 + $0x1d08] sm:$0xff]  ;;  %v2982_v32 = vsub.f32 1.5, %v2981_v1  ;;  %v2951_v5 = vmul.f32 %v2911_v45, %v7034_v27  ;;  %v3176_v45 = vld [vmem:[#allocation7 + $0xa0] sm:$0xff] }
 0x285   :  { %3956 = vmatpush.msrb.mxu2 %v3231_v61  ;;  %3976 = vmatpush.msrb.mxu3 %v3311_v30  ;;  %v3281_v61 = vld [vmem:[#allocation7 + $0x3e8] sm:$0xff]  ;;  %v2923_v30 = vadd.f32 %v2922_v3, %v2921_v25  ;;  %v2952_v13 = vmul.f32 %v2917_v24, %v7034_v27 }
 0x286   :  { %2752 = vmatpush.msrb.mxu0 %v1220_v34  ;;  %2772 = vmatpush.msrb.mxu1 %v1380_v53  ;;  %v2832_v6 = vadd.f32 %v2831_v37, %v2830_v33  ;;  %v1160_v33 = vld [vmem:[#allocation5 + $0x1bc8] sm:$0xff]  ;;  %v2950_v53 = vmul.f32 %v2905_v11, %v7034_v27  ;;  %v7173_v9 = vadd.f32 1e-05, %v2951_v5 }
 0x287   :  { %3957 = vmatpush.msrb.mxu2 %v3226_v40  ;;  %3977 = vmatpush.msrb.mxu3 %v3306_v31  ;;  %v1320_v34 = vld [vmem:[#allocation5 + $0x20c8] sm:$0xff]  ;;  %v3276_v40 = vld [vmem:[#allocation7 + $0x3c0] sm:$0xff]  ;;  %v2973_v31 = vmul.f32 %v7128_v36, %v2972_v54 }
 0x288   :  { %2753 = vmatpush.msrb.mxu0 %v1210_v18  ;;  %2773 = vmatpush.msrb.mxu1 %v1370_v2  ;;  %v2864_v28 = vmul.f32 %v7034_v27, %v2832_v6  ;;  %v1310_v18 = vld [vmem:[#allocation5 + $0x2078] sm:$0xff]  ;;  %v2983_v2 = vmul.f32 %v7131_v22, %v2982_v32  ;;  %v1140_v37 = vld [vmem:[#allocation5 + $0x1b28] sm:$0xff]  ;;  %v7160_v43 = vadd.f32 1e-05, %v2950_v53  ;;  %vm3004_vm12 = vweird.f32 %v7173_v9 }
 0x289   :  { %3958 = vmatpush.msrb.mxu2 %v3221_v17  ;;  %3978 = vmatpush.msrb.mxu3 %v3301_v46  ;;  %v3271_v17 = vld [vmem:[#allocation7 + $0x398] sm:$0xff]  ;;  %v2953_v46 = vmul.f32 %v2923_v30, %v7034_v27  ;;  %v3181_v1 = vld [vmem:[#allocation7 + $0xc8] sm:$0xff] }
 0x28a   :  { %2754 = vmatpush.msrb.mxu0 %v1200_v29  ;;  %2774 = vmatpush.msrb.mxu1 %v1360_v56  ;;  %v7151_v25 = vsub.f32 %v7125_v41, %v2864_v28  ;;  %v1300_v29 = vld [vmem:[#allocation5 + $0x2028] sm:$0xff]  ;;  %v2977_v41 = vsel %vm7155_vm4, %v7128_v36, %v2973_v31  ;;  %v1290_v36 = vld [vmem:[#allocation5 + $0x1fd8] sm:$0xff]  ;;  %6209 = vrsqrt.f32 %v7160_v43  ;;  %v3246_v31 = vld [vmem:[#allocation7 + $0x2d0] sm:$0xff]  ;;  %vm2994_vm8 = vweird.f32 %v7160_v43 }
 0x28b   :  { %3959 = vmatpush.msrb.mxu2 %v3216_v55  ;;  %3979 = vmatpush.msrb.mxu3 %v3296_v16  ;;  %v3266_v55 = vld [vmem:[#allocation7 + $0x370] sm:$0xff]  ;;  %v7165_v16 = vld [vmem:[#allocation13] sm:$0xff]  ;;  %v3261_v3 = vld [vmem:[#allocation7 + $0x348] sm:$0xff]  ;;  %6211 = vrsqrt.f32 %v7173_v9 }
 0x28c   :  { %2755 = vmatpush.msrb.mxu0 %v1190_v23  ;;  %2775 = vmatpush.msrb.mxu1 %v1350_v51  ;;  %v2987_v23 = vsel %vm7169_vm6, %v7131_v22, %v2983_v2  ;;  %v7178_v51 = vadd.f32 1e-05, %v2952_v13  ;;  %v3082_v22 = vperm.slane %v7165_v16, 0  ;;  %v3083_v54 = vperm.slane %v7165_v16, 1  ;;  %v1270_v32 = vld [vmem:[#allocation5 + $0x1f38] sm:$0xff]  ;;  %v1260_v53 = vld [vmem:[#allocation5 + $0x1ee8] sm:$0xff] }
 0x28d   :  { %3960 = vmatpush.msrb.mxu2 %v3211_v63  ;;  %3980 = vmatpush.msrb.mxu3 %v3291_v47  ;;  %v7180_v63 = vadd.f32 1e-05, %v2953_v46  ;;  %v2884_v47 = vmul.f32 %v7151_v25, %v7151_v25  ;;  %v3171_v30 = vld [vmem:[#allocation7 + $0x78] sm:$0xff]  ;;  %v3241_v46 = vld [vmem:[#allocation7 + $0x2a8] sm:$0xff] }
 0x28e   :  { %2756 = vmatpush.msrb.mxu0 %v1180_v44  ;;  %2776 = vmatpush.msrb.mxu1 %v1340_v0  ;;  %v3068_v44 = vmul.f32 %v2977_v41, %v7044_v39  ;;  %v1120_v0 = vld [vmem:[#allocation5 + $0x1a88] sm:$0xff]  ;;  %6213 = vrsqrt.f32 %v7178_v51  ;;  %v3251_v28 = vld [vmem:[#allocation7 + $0x2f8] sm:$0xff]  ;;  %vm3014_vm15 = vweird.f32 %v7178_v51 }
 0x28f   :  { %3961 = vmatpush.msrb.mxu2 %v3206_v62  ;;  %3981 = vmatpush.msrb.mxu3 %v3286_v50  ;;  %v7188_v62 = vld [vmem:[#allocation14] sm:$0xff]  ;;  %v3069_v50 = vmul.f32 %v2987_v23, %v7050_v58  ;;  %6215 = vrsqrt.f32 %v7180_v63  ;;  %v1110_v58 = vld [vmem:[#allocation5 + $0x1a38] sm:$0xff]  ;;  %vm3024_vm1 = vweird.f32 %v7180_v63 }
 0x290   :  { %2757 = vmatpush.msrb.mxu0 %v1170_v19  ;;  %2777 = vmatpush.msrb.mxu1 %v1330_v21  ;;  %v1280_v39 = vld [vmem:[#allocation5 + $0x1f88] sm:$0xff]  ;;  %v2924_v21 = vrot.slane %v2884_v47, 4  ;;  %v1090_v2 = vld [vmem:[#allocation5 + $0x1998] sm:$0xff] }
 0x291   :  { %3962 = vmatpush.msrb.mxu2 %v3201_v26  ;;  %3982 = vmatpush.msrb.mxu3 %v3281_v61  ;;  %v3102_v26 = vmul.f32 %v3082_v22, %v3068_v44  ;;  %v3116_v61 = vperm.slane %v7188_v62, 0  ;;  %v1250_v13 = vld [vmem:[#allocation5 + $0x1e98] sm:$0xff] }
 0x292   :  { %2758 = vmatpush.msrb.mxu0 %v1160_v33  ;;  %2778 = vmatpush.msrb.mxu1 %v1320_v34  ;;  %v3103_v33 = vmul.f32 %v3083_v54, %v3069_v50  ;;  %v1100_v34 = vld [vmem:[#allocation5 + $0x19e8] sm:$0xff]  ;;  %v3391_v22 = vld [vmem:[#allocation7 + $0x758] sm:$0xff] }
 0x293   :  { %3963 = vmatpush.msrb.mxu2 %v3196_v12  ;;  %3983 = vmatpush.msrb.mxu3 %v3276_v40  ;;  %v7200_v12 = vpop.eup %6209  ;;  %v3166_v40 = vld [vmem:[#allocation7 + $0x50] sm:$0xff]  ;;  %v3471_v50 = vld [vmem:[#allocation7 + $0x9d8] sm:$0xff] }
 0x294   :  { %2759 = vmatpush.msrb.mxu0 %v1150_v60  ;;  %2779 = vmatpush.msrb.mxu1 %v1310_v18  ;;  %v7202_v60 = vpop.eup %6211  ;;  %v2925_v18 = vadd.f32 %v2924_v21, %v2884_v47  ;;  %v3551_v54 = vld [vmem:[#allocation7 + $0xc58] sm:$0xff]  ;;  %vm2995_vm7 = vweird.f32 %v7200_v12 }
 0x295   :  { %3964 = vmatpush.msrb.mxu2 %v3191_v7  ;;  %3984 = vmatpush.msrb.mxu3 %v3271_v17  ;;  %v7204_v7 = vpop.eup %6213  ;;  %v3161_v17 = vld [vmem:[#allocation7 + $0x28] sm:$0xff]  ;;  %v2999_v23 = vmul.f32 %v7202_v60, %v7173_v9  ;;  %vm3005_vm9 = vweird.f32 %v7202_v60  ;;  %vm7245_vm11 = vmor %vm2994_vm8, %vm2995_vm7  ;;  %v3351_v9 = vld [vmem:[#allocation7 + $0x618] sm:$0xff] }
 0x296   :  { %2760 = vmatpush.msrb.mxu0 %v1140_v37  ;;  %2780 = vmatpush.msrb.mxu1 %v1300_v29  ;;  %v2388_v8 = vpop.f32.mrf.mxu1  ;;  %v7206_v29 = vpop.eup %6215  ;;  %v2926_v47 = vrot.slane %v2925_v18, 2  ;;  %vm3015_vm10 = vweird.f32 %v7204_v7  ;;  %vm7254_vm14 = vmor %vm3004_vm12, %vm3005_vm9 }
 0x297   :  { %3965 = vmatpush.msrb.mxu2 %v3186_v38  ;;  %3985 = vmatpush.msrb.mxu3 %v3266_v55  ;;  %v2408_v6 = vpop.f32.mrf.mxu2  ;;  %v1080_v38 = vld [vmem:[#allocation5 + $0x1948] sm:$0xff]  ;;  %vm3025_vm13 = vweird.f32 %v7206_v29  ;;  %vm7267_vm0 = vmor %vm3014_vm15, %vm3015_vm10 }
 0x298   :  { %2727 = vmatmul.f32.vlgmr.msra.gmra.mxu2 %v7078_v59  ;;  %2761 = vmatpush.msrb.mxu0 %v1130_v48  ;;  %v2409_v11 = vadd.f32 %v2408_v6, %v2388_v8  ;;  %v3256_v59 = vld [vmem:[#allocation7 + $0x320] sm:$0xff]  ;;  %v1240_v55 = vld [vmem:[#allocation5 + $0x1e48] sm:$0xff]  ;;  %v2989_v48 = vmul.f32 %v7200_v12, %v7160_v43  ;;  %v3009_v8 = vmul.f32 %v7204_v7, %v7178_v51  ;;  %v3511_v51 = vld [vmem:[#allocation7 + $0xb18] sm:$0xff] }
 0x299   :  { %2781 = vmatpush.msrb.mxu1 %v1290_v36  ;;  %3966 = vmatpush.msrb.mxu2 %v3181_v1  ;;  %v3156_v36 = vld [vmem:[#allocation7] sm:$0xff]  ;;  %v3019_v6 = vmul.f32 %v7206_v29, %v7180_v63  ;;  %vm7280_vm2 = vmor %vm3024_vm1, %vm3025_vm13 }
 0x29a   :  { %3986 = vmatpush.msrb.mxu3 %v3261_v3  ;;  %2687 = vmatmul.f32.vlgmr.msra.gmra.mxu0 %v7081_v57  ;;  %v2428_v19 = vpop.f32.mrf.mxu3  ;;  %v3117_v57 = vperm.slane %v7188_v62, 1  ;;  %v3236_v1 = vld [vmem:[#allocation7 + $0x280] sm:$0xff]  ;;  %v3010_v21 = vmul.f32 %v7204_v7, %v3009_v8  ;;  %v3446_v8 = vld [vmem:[#allocation7 + $0x910] sm:$0xff] }
 0x29b   :  { %2747 = vmatmul.f32.vlgmr.msra.gmra.mxu3 %v7087_v4  ;;  %2762 = vmatpush.msrb.mxu0 %v1120_v0  ;;  %v2429_v24 = vadd.f32 %v2428_v19, %v2409_v11  ;;  %v3631_v19 = vld [vmem:[#allocation7 + $0xed8] sm:$0xff] }
 0x29c   :  { %2782 = vmatpush.msrb.mxu1 %v1280_v39  ;;  %3967 = vmatpush.msrb.mxu2 %v3176_v45  ;;  %v3137_v56 = vadd.f32 %v3117_v57, %v3103_v33  ;;  %v2990_v45 = vmul.f32 %v7200_v12, %v2989_v48  ;;  %v3461_v33 = vld [vmem:[#allocation7 + $0x988] sm:$0xff] }
 0x29d   :  { %3987 = vmatpush.msrb.mxu3 %v3256_v59  ;;  %2707 = vmatmul.f32.vlgmr.msra.gmra.mxu1 %v7069_v20  ;;  %v2448_v4 = vpop.f32.mrf.mxu0  ;;  %v3136_v20 = vadd.f32 %v3116_v61, %v3102_v26  ;;  %v3000_v59 = vmul.f32 %v7202_v60, %v2999_v23  ;;  %v3020_v61 = vmul.f32 %v7206_v29, %v3019_v6  ;;  %v3606_v6 = vld [vmem:[#allocation7 + $0xe10] sm:$0xff] }
 0x29e   :  { %2763 = vmatpush.msrb.mxu0 %v1110_v58  ;;  %2783 = vmatpush.msrb.mxu1 %v1270_v32  ;;  %v2449_v5 = vadd.f32 %v2448_v4, %v2429_v24  ;;  %v7218_v11 = vmax.f32 %v3137_v56, 0.0  ;;  %v2927_v58 = vadd.f32 %v2926_v47, %v2925_v18  ;;  %v3386_v32 = vld [vmem:[#allocation7 + $0x730] sm:$0xff]  ;;  %v3541_v4 = vld [vmem:[#allocation7 + $0xc08] sm:$0xff]  ;;  %v3376_v18 = vld [vmem:[#allocation7 + $0x6e0] sm:$0xff] }
 0x29f   :  { %3968 = vmatpush.msrb.mxu2 %v3171_v30  ;;  %3988 = vmatpush.msrb.mxu3 %v3251_v28  ;;  %v7216_v44 = vmax.f32 %v3136_v20, 0.0  ;;  %v3466_v24 = vld [vmem:[#allocation7 + $0x9b0] sm:$0xff]  ;;  %v3021_v20 = vmul.f32 0.5, %v3020_v61 }
 0x2a0   :  { %2764 = vmatpush.msrb.mxu0 %v1100_v34  ;;  %2784 = vmatpush.msrb.mxu1 %v1260_v53  ;;  %v2468_v37 = vpop.f32.mrf.mxu1  ;;  %v3546_v30 = vld [vmem:[#allocation7 + $0xc30] sm:$0xff]  ;;  %v2991_v34 = vmul.f32 0.5, %v2990_v45  ;;  %v3001_v53 = vmul.f32 0.5, %v3000_v59  ;;  %v3521_v59 = vld [vmem:[#allocation7 + $0xb68] sm:$0xff] }
 0x2a1   :  { %3969 = vmatpush.msrb.mxu2 %v3166_v40  ;;  %3989 = vmatpush.msrb.mxu3 %v3246_v31  ;;  %v2469_v41 = vadd.f32 %v2468_v37, %v2449_v5  ;;  %v2488_v42 = vpop.f32.mrf.mxu2  ;;  %v3626_v28 = vld [vmem:[#allocation7 + $0xeb0] sm:$0xff]  ;;  %v3621_v40 = vld [vmem:[#allocation7 + $0xe88] sm:$0xff]  ;;  %v3011_v31 = vmul.f32 0.5, %v3010_v21  ;;  %v2928_v5 = vrot.slane %v2927_v58, 1  ;;  %v3451_v37 = vld [vmem:[#allocation7 + $0x938] sm:$0xff]  ;;  %v3022_v47 = vsub.f32 1.5, %v3021_v20 }
 0x2a2   :  { %2765 = vmatpush.msrb.mxu0 %v1090_v2  ;;  %2785 = vmatpush.msrb.mxu1 %v1250_v13  ;;  %v3456_v2 = vld [vmem:[#allocation7 + $0x960] sm:$0xff]  ;;  %v3084_v20 = vperm.slane %v7165_v16, 2 }
 0x2a3   :  { %3970 = vmatpush.msrb.mxu2 %v3161_v17  ;;  %3990 = vmatpush.msrb.mxu3 %v3241_v46  ;;  %v2489_v3 = vadd.f32 %v2488_v42, %v2469_v41  ;;  %v3616_v17 = vld [vmem:[#allocation7 + $0xe60] sm:$0xff]  ;;  %v3371_v46 = vld [vmem:[#allocation7 + $0x6b8] sm:$0xff]  ;;  %v3012_v48 = vsub.f32 1.5, %v3011_v31  ;;  %v2929_v23 = vadd.f32 %v2928_v5, %v2927_v58  ;;  %v3346_v5 = vld [vmem:[#allocation7 + $0x5f0] sm:$0xff] }
 0x2a4   :  { %2766 = vmatpush.msrb.mxu0 %v1080_v38  ;;  %2786 = vmatpush.msrb.mxu1 %v1240_v55  ;;  %v2508_v0 = vpop.f32.mrf.mxu3  ;;  %v2992_v38 = vsub.f32 1.5, %v2991_v34  ;;  %v3002_v55 = vsub.f32 1.5, %v3001_v53  ;;  %v3531_v41 = vld [vmem:[#allocation7 + $0xbb8] sm:$0xff] }
 0x2a5   :  { %3971 = vmatpush.msrb.mxu2 %v3156_v36  ;;  %3991 = vmatpush.msrb.mxu3 %v3236_v1  ;;  %v7220_v39 = vadd.f32 %v2508_v0, %v2489_v3  ;;  %v3611_v42 = vld [vmem:[#allocation7 + $0xe38] sm:$0xff]  ;;  %v3366_v1 = vld [vmem:[#allocation7 + $0x690] sm:$0xff]  ;;  %v3361_v0 = vld [vmem:[#allocation7 + $0x668] sm:$0xff]  ;;  %v3013_v21 = vmul.f32 %v7204_v7, %v3012_v48  ;;  %v2954_v58 = vmul.f32 %v2929_v23, %v7034_v27 }
 0x2a6   :  { %2767 = vmatmul.f32.vlgmr.msrb.gmra.mxu0 %v7090_v15  ;;  %3972 = vmatmul.f32.vlgmr.msrb.gmra.mxu2 %v7216_v44  ;;  %v3381_v15 = vld [vmem:[#allocation7 + $0x708] sm:$0xff]  ;;  %v3526_v3 = vld [vmem:[#allocation7 + $0xb90] sm:$0xff]  ;;  %v3003_v45 = vmul.f32 %v7202_v60, %v3002_v55  ;;  %v3416_v23 = vld [vmem:[#allocation7 + $0x820] sm:$0xff] }
 0x2a7   :  { %3992 = vmatmul.f32.vlgmr.msrb.gmra.mxu3 %v7218_v11  ;;  %3996 = vmatpush.msra.mxu0 %v3391_v22  ;;  %v2833_v26 = vrot.slane %v7220_v39, 4  ;;  %v7284_v31 = vadd.f32 1e-05, %v2954_v58  ;;  %v3501_v55 = vld [vmem:[#allocation7 + $0xac8] sm:$0xff]  ;;  %v3326_v58 = vld [vmem:[#allocation7 + $0x550] sm:$0xff] }
 0x2a8   :  { %4016 = vmatpush.msra.mxu1 %v3471_v50  ;;  %4036 = vmatpush.msra.mxu2 %v3551_v54  ;;  %v3441_v50 = vld [vmem:[#allocation7 + $0x8e8] sm:$0xff]  ;;  %v2993_v54 = vmul.f32 %v7200_v12, %v2992_v38 }
 0x2a9   :  { %4056 = vmatpush.msra.mxu3 %v3631_v19  ;;  %2787 = vmatmul.f32.vlgmr.msrb.gmra.mxu1 %v7084_v14  ;;  %v2834_v57 = vadd.f32 %v2833_v26, %v7220_v39  ;;  %v3536_v14 = vld [vmem:[#allocation7 + $0xbe0] sm:$0xff]  ;;  %v3601_v19 = vld [vmem:[#allocation7 + $0xde8] sm:$0xff]  ;;  %6217 = vrsqrt.f32 %v7284_v31  ;;  %vm3034_vm4 = vweird.f32 %v7284_v31 }
 0x2aa   :  { %3997 = vmatpush.msra.mxu0 %v3386_v32  ;;  %4017 = vmatpush.msra.mxu1 %v3466_v24  ;;  %v3356_v24 = vld [vmem:[#allocation7 + $0x640] sm:$0xff]  ;;  %v2997_v34 = vsel %vm7245_vm11, %v7200_v12, %v2993_v54  ;;  %v3017_v12 = vsel %vm7267_vm0, %v7204_v7, %v3013_v21  ;;  %v3506_v7 = vld [vmem:[#allocation7 + $0xaf0] sm:$0xff]  ;;  %v3571_v54 = vld [vmem:[#allocation7 + $0xcf8] sm:$0xff] }
 0x2ab   :  { %4037 = vmatpush.msra.mxu2 %v3546_v30  ;;  %4057 = vmatpush.msra.mxu3 %v3626_v28  ;;  %v2835_v13 = vrot.slane %v2834_v57, 2  ;;  %v3436_v26 = vld [vmem:[#allocation7 + $0x8c0] sm:$0xff]  ;;  %v3023_v30 = vmul.f32 %v7206_v29, %v3022_v47  ;;  %v3072_v38 = vmul.f32 %v3017_v12, %v7106_v49  ;;  %v3331_v47 = vld [vmem:[#allocation7 + $0x578] sm:$0xff] }
 0x2ac   :  { %3998 = vmatpush.msra.mxu0 %v3381_v15  ;;  %4018 = vmatpush.msra.mxu1 %v3461_v33  ;;  %v3516_v28 = vld [vmem:[#allocation7 + $0xb40] sm:$0xff] }
 0x2ad   :  { %4038 = vmatpush.msra.mxu2 %v3541_v4  ;;  %4058 = vmatpush.msra.mxu3 %v3621_v40  ;;  %v2836_v56 = vadd.f32 %v2835_v13, %v2834_v57  ;;  %v3596_v15 = vld [vmem:[#allocation7 + $0xdc0] sm:$0xff]  ;;  %v3431_v57 = vld [vmem:[#allocation7 + $0x898] sm:$0xff]  ;;  %v3007_v4 = vsel %vm7254_vm14, %v7202_v60, %v3003_v45  ;;  %v3027_v60 = vsel %vm7280_vm2, %v7206_v29, %v3023_v30  ;;  %v3086_v29 = vperm.slane %v7165_v16, 4 }
 0x2ae   :  { %3999 = vmatpush.msra.mxu0 %v3376_v18  ;;  %4019 = vmatpush.msra.mxu1 %v3456_v2  ;;  %v3426_v18 = vld [vmem:[#allocation7 + $0x870] sm:$0xff]  ;;  %v3070_v13 = vmul.f32 %v2997_v34, %v7099_v52  ;;  %v3073_v52 = vmul.f32 %v3027_v60, %v7109_v10  ;;  %v3496_v49 = vld [vmem:[#allocation7 + $0xaa0] sm:$0xff]  ;;  %v3411_v10 = vld [vmem:[#allocation7 + $0x7f8] sm:$0xff] }
 0x2af   :  { %4039 = vmatpush.msra.mxu2 %v3536_v14  ;;  %4059 = vmatpush.msra.mxu3 %v3616_v17  ;;  %v2837_v36 = vrot.slane %v2836_v56, 1  ;;  %v3586_v2 = vld [vmem:[#allocation7 + $0xd70] sm:$0xff]  ;;  %v3341_v17 = vld [vmem:[#allocation7 + $0x5c8] sm:$0xff]  ;;  %v3106_v45 = vmul.f32 %v3086_v29, %v3072_v38  ;;  %v7304_v61 = vpop.eup %6217  ;;  %v3396_v12 = vld [vmem:[#allocation7 + $0x780] sm:$0xff] }
 0x2b0   :  { %4000 = vmatpush.msra.mxu0 %v3371_v46  ;;  %4020 = vmatpush.msra.mxu1 %v3451_v37  ;;  %v3421_v46 = vld [vmem:[#allocation7 + $0x848] sm:$0xff]  ;;  %v3071_v37 = vmul.f32 %v3007_v4, %v7103_v35  ;;  %v3336_v35 = vld [vmem:[#allocation7 + $0x5a0] sm:$0xff]  ;;  %v3029_v40 = vmul.f32 %v7304_v61, %v7284_v31  ;;  %vm3035_vm3 = vweird.f32 %v7304_v61 }
 0x2b1   :  { %4040 = vmatpush.msra.mxu2 %v3531_v41  ;;  %4060 = vmatpush.msra.mxu3 %v3611_v42  ;;  %v2838_v22 = vadd.f32 %v2837_v36, %v2836_v56  ;;  %v3085_v56 = vperm.slane %v7165_v16, 3  ;;  %v3581_v41 = vld [vmem:[#allocation7 + $0xd48] sm:$0xff]  ;;  %v3087_v42 = vperm.slane %v7165_v16, 5  ;;  %v3576_v36 = vld [vmem:[#allocation7 + $0xd20] sm:$0xff]  ;;  %vm7329_vm5 = vmor %vm3034_vm4, %vm3035_vm3 }
 0x2b2   :  { %4001 = vmatpush.msra.mxu0 %v3366_v1  ;;  %4021 = vmatpush.msra.mxu1 %v3446_v8  ;;  %v3118_v1 = vperm.slane %v7188_v62, 2  ;;  %v3561_v34 = vld [vmem:[#allocation7 + $0xca8] sm:$0xff]  ;;  %v3316_v4 = vld [vmem:[#allocation7 + $0x500] sm:$0xff] }
 0x2b3   :  { %v2865_v32 = vmul.f32 %v7034_v27, %v2838_v22  ;;  %4041 = vmatpush.msra.mxu2 %v3526_v3  ;;  %4061 = vmatpush.msra.mxu3 %v3606_v6  ;;  %v3104_v3 = vmul.f32 %v3084_v20, %v3070_v13  ;;  %v3105_v6 = vmul.f32 %v3085_v56, %v3071_v37  ;;  %v3119_v22 = vperm.slane %v7188_v62, 3  ;;  %v3706_v37 = vld [vmem:[#allocation7 + $0x1130] sm:$0xff]  ;;  %v3701_v38 = vld [vmem:[#allocation7 + $0x1108] sm:$0xff] }
 0x2b4   :  { %4002 = vmatpush.msra.mxu0 %v3361_v0  ;;  %4022 = vmatpush.msra.mxu1 %v3441_v50  ;;  %v3120_v0 = vperm.slane %v7188_v62, 4  ;;  %v3491_v50 = vld [vmem:[#allocation7 + $0xa78] sm:$0xff]  ;;  %v3786_v56 = vld [vmem:[#allocation7 + $0x13b0] sm:$0xff]  ;;  %v3781_v29 = vld [vmem:[#allocation7 + $0x1388] sm:$0xff] }
 0x2b5   :  { %v7260_v43 = vsub.f32 %v7220_v39, %v2865_v32  ;;  %4042 = vmatpush.msra.mxu2 %v3521_v59  ;;  %4062 = vmatpush.msra.mxu3 %v3601_v19  ;;  %v3591_v39 = vld [vmem:[#allocation7 + $0xd98] sm:$0xff]  ;;  %v3107_v59 = vmul.f32 %v3087_v42, %v3073_v52  ;;  %v3121_v19 = vperm.slane %v7188_v62, 5  ;;  %v3406_v32 = vld [vmem:[#allocation7 + $0x7d0] sm:$0xff]  ;;  %v3138_v33 = vadd.f32 %v3118_v1, %v3104_v3  ;;  %v3776_v52 = vld [vmem:[#allocation7 + $0x1360] sm:$0xff] }
 0x2b6   :  { %4003 = vmatpush.msra.mxu0 %v3356_v24  ;;  %4023 = vmatpush.msra.mxu1 %v3436_v26  ;;  %v3486_v24 = vld [vmem:[#allocation7 + $0xa50] sm:$0xff]  ;;  %v3140_v53 = vadd.f32 %v3120_v0, %v3106_v45  ;;  %v3761_v3 = vld [vmem:[#allocation7 + $0x12e8] sm:$0xff] }
 0x2b7   :  { %v2885_v63 = vmul.f32 %v7260_v43, %v7260_v43  ;;  %4043 = vmatpush.msra.mxu2 %v3516_v28  ;;  %4063 = vmatpush.msra.mxu3 %v3596_v15  ;;  %v3566_v26 = vld [vmem:[#allocation7 + $0xcd0] sm:$0xff]  ;;  %v3321_v28 = vld [vmem:[#allocation7 + $0x528] sm:$0xff]  ;;  %v7309_v60 = vmax.f32 %v3138_v33, 0.0 }
 0x2b8   :  { %4004 = vmatpush.msra.mxu0 %v3351_v9  ;;  %4024 = vmatpush.msra.mxu1 %v3431_v57  ;;  %v3401_v15 = vld [vmem:[#allocation7 + $0x7a8] sm:$0xff]  ;;  %v3139_v9 = vadd.f32 %v3119_v22, %v3105_v6  ;;  %v7315_v13 = vmax.f32 %v3140_v53, 0.0  ;;  %v3766_v1 = vld [vmem:[#allocation7 + $0x1310] sm:$0xff] }
 0x2b9   :  { %v2930_v14 = vrot.slane %v2885_v63, 4  ;;  %4044 = vmatpush.msra.mxu2 %v3511_v51  ;;  %4064 = vmatpush.msra.mxu3 %v3591_v39  ;;  %v3481_v57 = vld [vmem:[#allocation7 + $0xa28] sm:$0xff]  ;;  %v3141_v51 = vadd.f32 %v3121_v19, %v3107_v59  ;;  %v3866_v6 = vld [vmem:[#allocation7 + $0x1630] sm:$0xff]  ;;  %v3816_v59 = vld [vmem:[#allocation7 + $0x14a0] sm:$0xff] }
 0x2ba   :  { %4005 = vmatpush.msra.mxu0 %v3346_v5  ;;  %4025 = vmatpush.msra.mxu1 %v3426_v18  ;;  %v3556_v5 = vld [vmem:[#allocation7 + $0xc80] sm:$0xff]  ;;  %v3861_v45 = vld [vmem:[#allocation7 + $0x1608] sm:$0xff] }
 0x2bb   :  { %v2931_v48 = vadd.f32 %v2930_v14, %v2885_v63  ;;  %4045 = vmatpush.msra.mxu2 %v3506_v7  ;;  %4065 = vmatpush.msra.mxu3 %v3586_v2  ;;  %v3476_v63 = vld [vmem:[#allocation7 + $0xa00] sm:$0xff]  ;;  %v7311_v7 = vmax.f32 %v3139_v9, 0.0  ;;  %v7317_v20 = vmax.f32 %v3141_v51, 0.0  ;;  %v3711_v14 = vld [vmem:[#allocation7 + $0x1158] sm:$0xff]  ;;  %v3089_v9 = vperm.slane %v7165_v16, 7  ;;  %v3661_v51 = vld [vmem:[#allocation7 + $0xfc8] sm:$0xff] }
 0x2bc   :  { %4006 = vmatpush.msra.mxu0 %v3341_v17  ;;  %4026 = vmatpush.msra.mxu1 %v3421_v46  ;;  %v3791_v17 = vld [vmem:[#allocation7 + $0x13d8] sm:$0xff]  ;;  %v3030_v46 = vmul.f32 %v7304_v61, %v3029_v40  ;;  %v3846_v40 = vld [vmem:[#allocation7 + $0x1590] sm:$0xff] }
 0x2bd   :  { %v2932_v8 = vrot.slane %v2931_v48, 2  ;;  %4046 = vmatpush.msra.mxu2 %v3501_v55  ;;  %4066 = vmatpush.msra.mxu3 %v3581_v41  ;;  %v3696_v41 = vld [vmem:[#allocation7 + $0x10e0] sm:$0xff] }
 0x2be   :  { %4007 = vmatpush.msra.mxu0 %v3336_v35  ;;  %4027 = vmatpush.msra.mxu1 %v3416_v23  ;;  %v3031_v55 = vmul.f32 0.5, %v3030_v46  ;;  %v3771_v35 = vld [vmem:[#allocation7 + $0x1338] sm:$0xff] }
 0x2bf   :  { %v2933_v21 = vadd.f32 %v2932_v8, %v2931_v48  ;;  %4047 = vmatpush.msra.mxu2 %v3496_v49  ;;  %4067 = vmatpush.msra.mxu3 %v3576_v36  ;;  %v3691_v48 = vld [vmem:[#allocation7 + $0x10b8] sm:$0xff]  ;;  %v3686_v36 = vld [vmem:[#allocation7 + $0x1090] sm:$0xff] }
 0x2c0   :  { %4008 = vmatpush.msra.mxu0 %v3331_v47  ;;  %4028 = vmatpush.msra.mxu1 %v3411_v10  ;;  %v3032_v23 = vsub.f32 1.5, %v3031_v55  ;;  %v3871_v8 = vld [vmem:[#allocation7 + $0x1658] sm:$0xff]  ;;  %v3681_v10 = vld [vmem:[#allocation7 + $0x1068] sm:$0xff]  ;;  %v3726_v55 = vld [vmem:[#allocation7 + $0x11d0] sm:$0xff] }
 0x2c1   :  { %v2934_v30 = vrot.slane %v2933_v21, 1  ;;  %4048 = vmatpush.msra.mxu2 %v3491_v50  ;;  %4068 = vmatpush.msra.mxu3 %v3571_v54  ;;  %v3676_v50 = vld [vmem:[#allocation7 + $0x1040] sm:$0xff]  ;;  %v3651_v46 = vld [vmem:[#allocation7 + $0xf78] sm:$0xff] }
 0x2c2   :  { %4009 = vmatpush.msra.mxu0 %v3326_v58  ;;  %4029 = vmatpush.msra.mxu1 %v3406_v32  ;;  %v3033_v22 = vmul.f32 %v7304_v61, %v3032_v23  ;;  %v3756_v54 = vld [vmem:[#allocation7 + $0x12c0] sm:$0xff]  ;;  %v3751_v58 = vld [vmem:[#allocation7 + $0x1298] sm:$0xff]  ;;  %v3641_v23 = vld [vmem:[#allocation7 + $0xf28] sm:$0xff] }
 0x2c3   :  { %v2935_v39 = vadd.f32 %v2934_v30, %v2933_v21  ;;  %4049 = vmatpush.msra.mxu2 %v3486_v24  ;;  %4069 = vmatpush.msra.mxu3 %v3566_v26  ;;  %v3671_v21 = vld [vmem:[#allocation7 + $0x1018] sm:$0xff]  ;;  %v3856_v24 = vld [vmem:[#allocation7 + $0x15e0] sm:$0xff]  ;;  %v3666_v30 = vld [vmem:[#allocation7 + $0xff0] sm:$0xff] }
 0x2c4   :  { %4010 = vmatpush.msra.mxu0 %v3321_v28  ;;  %4030 = vmatpush.msra.mxu1 %v3401_v15  ;;  %v3037_v31 = vsel %vm7329_vm5, %v7304_v61, %v3033_v22  ;;  %v3746_v28 = vld [vmem:[#allocation7 + $0x1270] sm:$0xff]  ;;  %v3851_v15 = vld [vmem:[#allocation7 + $0x15b8] sm:$0xff]  ;;  %v3088_v61 = vperm.slane %v7165_v16, 6  ;;  %v3312_v22 = vld [vmem:[#allocation7 + $0x4e0] sm:$0xff] }
 0x2c5   :  { %v2955_v18 = vmul.f32 %v2935_v39, %v7034_v27  ;;  %4050 = vmatpush.msra.mxu2 %v3481_v57  ;;  %4070 = vmatpush.msra.mxu3 %v3561_v34  ;;  %v3074_v34 = vmul.f32 %v3037_v31, %v7151_v25  ;;  %v3741_v39 = vld [vmem:[#allocation7 + $0x1248] sm:$0xff]  ;;  %v3123_v25 = vperm.slane %v7188_v62, 7 }
 0x2c6   :  { %4011 = vmatpush.msra.mxu0 %v3316_v4  ;;  %4031 = vmatpush.msra.mxu1 %v3396_v12 }
 0x2c7   :  { %v7313_v2 = vadd.f32 1e-05, %v2955_v18  ;;  %4051 = vmatpush.msra.mxu2 %v3476_v63  ;;  %4071 = vmatpush.msra.mxu3 %v3556_v5  ;;  %v3656_v63 = vld [vmem:[#allocation7 + $0xfa0] sm:$0xff] }
 0x2c8   :  { %4012 = vmatmul.f32.vlgmr.msra.gmra.mxu0 %v7309_v60  ;;  %4032 = vmatmul.f32.vlgmr.msra.gmra.mxu1 %v7311_v7  ;;  %v3736_v5 = vld [vmem:[#allocation7 + $0x1220] sm:$0xff] }
 0x2c9   :  { %6219 = vrsqrt.f32 %v7313_v2  ;;  %4052 = vmatmul.f32.vlgmr.msra.gmra.mxu2 %v7315_v13  ;;  %4072 = vmatmul.f32.vlgmr.msra.gmra.mxu3 %v7317_v20  ;;  %vm3044_vm7 = vweird.f32 %v7313_v2 }
 0x2ca   :  { %4076 = vmatpush.msrb.mxu0 %v3711_v14  ;;  %4096 = vmatpush.msrb.mxu1 %v3791_v17  ;;  %v3122_v17 = vperm.slane %v7188_v62, 6  ;;  %v3826_v62 = vld [vmem:[#allocation7 + $0x14f0] sm:$0xff] }
 0x2cb   :  { %4116 = vmatpush.msrb.mxu2 %v3871_v8  ;;  %v3716_v8 = vld [vmem:[#allocation7 + $0x1180] sm:$0xff] }
 0x2cc   :  { %4077 = vmatpush.msrb.mxu0 %v3706_v37  ;;  %4097 = vmatpush.msrb.mxu1 %v3786_v56  ;;  %v3731_v37 = vld [vmem:[#allocation7 + $0x11f8] sm:$0xff] }
 0x2cd   :  { %4117 = vmatpush.msrb.mxu2 %v3866_v6 }
 0x2ce   :  { %4078 = vmatpush.msrb.mxu0 %v3701_v38  ;;  %4098 = vmatpush.msrb.mxu1 %v3781_v29  ;;  %v3836_v38 = vld [vmem:[#allocation7 + $0x1540] sm:$0xff]  ;;  %v3646_v29 = vld [vmem:[#allocation7 + $0xf50] sm:$0xff] }
 0x2cf   :  { %v6220_v42 = vpop.eup %6219  ;;  %4118 = vmatpush.msrb.mxu2 %v3861_v45  ;;  %v3307_v45 = vld [vmem:[#allocation7 + $0x4b8] sm:$0xff] }
 0x2d0   :  { %v3039_v49 = vmul.f32 %v6220_v42, %v7313_v2  ;;  %4079 = vmatpush.msrb.mxu0 %v3696_v41  ;;  %4099 = vmatpush.msrb.mxu1 %v3776_v52  ;;  %vm3045_vm6 = vweird.f32 %v6220_v42  ;;  %v3841_v2 = vld [vmem:[#allocation7 + $0x1568] sm:$0xff]  ;;  %v3831_v52 = vld [vmem:[#allocation7 + $0x1518] sm:$0xff] }
 0x2d1   :  { %vm3046_vm8 = vmor %vm3044_vm7, %vm3045_vm6  ;;  %4119 = vmatpush.msrb.mxu2 %v3856_v24  ;;  %v3222_v24 = vld [vmem:[#allocation7 + $0x210] sm:$0xff] }
 0x2d2   :  { %v3040_v47 = vmul.f32 %v6220_v42, %v3039_v49  ;;  %4080 = vmatpush.msrb.mxu0 %v3691_v48  ;;  %4100 = vmatpush.msrb.mxu1 %v3771_v35  ;;  %v3721_v49 = vld [vmem:[#allocation7 + $0x11a8] sm:$0xff] }
 0x2d3   :  { %4120 = vmatpush.msrb.mxu2 %v3851_v15 }
 0x2d4   :  { %v3041_v0 = vmul.f32 0.5, %v3040_v47  ;;  %4081 = vmatpush.msrb.mxu0 %v3686_v36  ;;  %4101 = vmatpush.msrb.mxu1 %v3766_v1  ;;  %v3636_v1 = vld [vmem:[#allocation7 + $0xf00] sm:$0xff] }
 0x2d5   :  { %4121 = vmatpush.msrb.mxu2 %v3846_v40 }
 0x2d6   :  { %v3042_v19 = vsub.f32 1.5, %v3041_v0  ;;  %4082 = vmatpush.msrb.mxu0 %v3681_v10  ;;  %4102 = vmatpush.msrb.mxu1 %v3761_v3  ;;  %v3821_v3 = vld [vmem:[#allocation7 + $0x14c8] sm:$0xff] }
 0x2d7   :  { %v2528_v32 = vpop.f32.mrf.mxu0  ;;  %4122 = vmatpush.msrb.mxu2 %v3841_v2 }
 0x2d8   :  { %v3043_v26 = vmul.f32 %v6220_v42, %v3042_v19  ;;  %4083 = vmatpush.msrb.mxu0 %v3676_v50  ;;  %4103 = vmatpush.msrb.mxu1 %v3756_v54  ;;  %v3232_v50 = vld [vmem:[#allocation7 + $0x260] sm:$0xff]  ;;  %v3227_v19 = vld [vmem:[#allocation7 + $0x238] sm:$0xff] }
 0x2d9   :  { %4123 = vmatpush.msrb.mxu2 %v3836_v38  ;;  %v3187_v38 = vld [vmem:[#allocation7 + $0xf8] sm:$0xff] }
 0x2da   :  { %v3047_v33 = vsel %vm3046_vm8, %v6220_v42, %v3043_v26  ;;  %4084 = vmatpush.msrb.mxu0 %v3671_v21  ;;  %4104 = vmatpush.msrb.mxu1 %v3751_v58  ;;  %v2548_v57 = vpop.f32.mrf.mxu1  ;;  %v3302_v58 = vld [vmem:[#allocation7 + $0x490] sm:$0xff]  ;;  %v3297_v26 = vld [vmem:[#allocation7 + $0x468] sm:$0xff] }
 0x2db   :  { %v3075_v53 = vmul.f32 %v3047_v33, %v7260_v43  ;;  %v2549_v4 = vadd.f32 %v2548_v57, %v2528_v32  ;;  %v2568_v12 = vpop.f32.mrf.mxu2  ;;  %v3108_v43 = vmul.f32 %v3088_v61, %v3074_v34  ;;  %4124 = vmatpush.msrb.mxu2 %v3831_v52  ;;  %v3811_v32 = vld [vmem:[#allocation7 + $0x1478] sm:$0xff]  ;;  %v3292_v33 = vld [vmem:[#allocation7 + $0x440] sm:$0xff]  ;;  %v3182_v52 = vld [vmem:[#allocation7 + $0xd0] sm:$0xff] }
 0x2dc   :  { %4085 = vmatpush.msrb.mxu0 %v3666_v30  ;;  %4105 = vmatpush.msrb.mxu1 %v3746_v28  ;;  %v3806_v30 = vld [vmem:[#allocation7 + $0x1450] sm:$0xff]  ;;  %v3217_v28 = vld [vmem:[#allocation7 + $0x1e8] sm:$0xff]  ;;  %v3212_v34 = vld [vmem:[#allocation7 + $0x1c0] sm:$0xff] }
 0x2dd   :  { %v2569_v18 = vadd.f32 %v2568_v12, %v2549_v4  ;;  %v3109_v14 = vmul.f32 %v3089_v9, %v3075_v53  ;;  %v3142_v35 = vadd.f32 %v3122_v17, %v3108_v43  ;;  %4125 = vmatpush.msrb.mxu2 %v3826_v62  ;;  %v3801_v9 = vld [vmem:[#allocation7 + $0x1428] sm:$0xff]  ;;  %v3287_v61 = vld [vmem:[#allocation7 + $0x418] sm:$0xff]  ;;  %v3796_v53 = vld [vmem:[#allocation7 + $0x1400] sm:$0xff] }
 0x2de   :  { %4086 = vmatpush.msrb.mxu0 %v3661_v51  ;;  %4106 = vmatpush.msrb.mxu1 %v3741_v39  ;;  %v2588_v16 = vpop.f32.mrf.mxu3  ;;  %v3207_v39 = vld [vmem:[#allocation7 + $0x198] sm:$0xff]  ;;  %v3392_v4 = vld [vmem:[#allocation7 + $0x760] sm:$0xff]  ;;  %v3282_v12 = vld [vmem:[#allocation7 + $0x3f0] sm:$0xff] }
 0x2df   :  { %v2589_v56 = vadd.f32 %v2588_v16, %v2569_v18  ;;  %v3143_v42 = vadd.f32 %v3123_v25, %v3109_v14  ;;  %v7345_v0 = vmax.f32 %v3142_v35, 0.0  ;;  %4126 = vmatpush.msrb.mxu2 %v3821_v3  ;;  %v3277_v18 = vld [vmem:[#allocation7 + $0x3c8] sm:$0xff]  ;;  %v3382_v25 = vld [vmem:[#allocation7 + $0x710] sm:$0xff]  ;;  %v3272_v16 = vld [vmem:[#allocation7 + $0x3a0] sm:$0xff] }
 0x2e0   :  { %4087 = vmatpush.msrb.mxu0 %v3656_v63  ;;  %4107 = vmatpush.msrb.mxu1 %v3736_v5  ;;  %v3202_v63 = vld [vmem:[#allocation7 + $0x170] sm:$0xff]  ;;  %v3387_v5 = vld [vmem:[#allocation7 + $0x738] sm:$0xff]  ;;  %v3197_v14 = vld [vmem:[#allocation7 + $0x148] sm:$0xff] }
 0x2e1   :  { %v2608_v41 = vpop.f32.mrf.mxu0  ;;  %v7343_v6 = vmax.f32 %v3143_v42, 0.0  ;;  %4127 = vmatpush.msrb.mxu2 %v3816_v59  ;;  %v3192_v17 = vld [vmem:[#allocation7 + $0x120] sm:$0xff]  ;;  %v3367_v42 = vld [vmem:[#allocation7 + $0x698] sm:$0xff] }
 0x2e2   :  { %4088 = vmatpush.msrb.mxu0 %v3651_v46  ;;  %4108 = vmatpush.msrb.mxu1 %v3731_v37  ;;  %v2609_v48 = vadd.f32 %v2608_v41, %v2589_v56  ;;  %v3377_v46 = vld [vmem:[#allocation7 + $0x6e8] sm:$0xff]  ;;  %v3267_v37 = vld [vmem:[#allocation7 + $0x378] sm:$0xff]  ;;  %v3252_v62 = vld [vmem:[#allocation7 + $0x300] sm:$0xff] }
 0x2e3   :  { %4128 = vmatpush.msrb.mxu2 %v3811_v32  ;;  %v3167_v3 = vld [vmem:[#allocation7 + $0x58] sm:$0xff]  ;;  %v3632_v32 = vld [vmem:[#allocation7 + $0xee0] sm:$0xff] }
 0x2e4   :  { %4089 = vmatpush.msrb.mxu0 %v3646_v29  ;;  %4109 = vmatpush.msrb.mxu1 %v3726_v55  ;;  %v2628_v36 = vpop.f32.mrf.mxu1  ;;  %v3372_v29 = vld [vmem:[#allocation7 + $0x6c0] sm:$0xff]  ;;  %v3262_v55 = vld [vmem:[#allocation7 + $0x350] sm:$0xff]  ;;  %v3347_v59 = vld [vmem:[#allocation7 + $0x5f8] sm:$0xff] }
 0x2e5   :  { %v2629_v47 = vadd.f32 %v2628_v36, %v2609_v48  ;;  %v2648_v10 = vpop.f32.mrf.mxu2  ;;  %4129 = vmatpush.msrb.mxu2 %v3806_v30  ;;  %v3257_v48 = vld [vmem:[#allocation7 + $0x328] sm:$0xff]  ;;  %v3627_v30 = vld [vmem:[#allocation7 + $0xeb8] sm:$0xff] }
 0x2e6   :  { %4090 = vmatpush.msrb.mxu0 %v3641_v23  ;;  %4110 = vmatpush.msrb.mxu1 %v3721_v49  ;;  %v3177_v23 = vld [vmem:[#allocation7 + $0xa8] sm:$0xff]  ;;  %v3362_v49 = vld [vmem:[#allocation7 + $0x670] sm:$0xff] }
 0x2e7   :  { %v2649_v54 = vadd.f32 %v2648_v10, %v2629_v47  ;;  %4130 = vmatpush.msrb.mxu2 %v3801_v9  ;;  %v3247_v47 = vld [vmem:[#allocation7 + $0x2d8] sm:$0xff]  ;;  %v3622_v9 = vld [vmem:[#allocation7 + $0xe90] sm:$0xff] }
 0x2e8   :  { %4091 = vmatpush.msrb.mxu0 %v3636_v1  ;;  %4111 = vmatpush.msrb.mxu1 %v3716_v8  ;;  %v3172_v1 = vld [vmem:[#allocation7 + $0x80] sm:$0xff]  ;;  %v3357_v8 = vld [vmem:[#allocation7 + $0x648] sm:$0xff] }
 0x2e9   :  { %4092 = vmatmul.f32.vlgmr.msrb.gmra.mxu0 %v7345_v0  ;;  %v2839_v21 = vrot.slane %v2649_v54, 4  ;;  %4112 = vmatmul.f32.vlgmr.msrb.gmra.mxu1 %v7343_v6 }
 0x2ea   :  { %4176 = vmatpush.msra.mxu1 %v3312_v22  ;;  %4156 = vmatpush.msra.mxu0 %v3232_v50  ;;  %v3352_v22 = vld [vmem:[#allocation7 + $0x620] sm:$0xff]  ;;  %v3242_v50 = vld [vmem:[#allocation7 + $0x2b0] sm:$0xff] }
 0x2eb   :  { %v2840_v31 = vadd.f32 %v2839_v21, %v2649_v54  ;;  %4131 = vmatpush.msrb.mxu2 %v3796_v53  ;;  %v3537_v53 = vld [vmem:[#allocation7 + $0xbe8] sm:$0xff] }
 0x2ec   :  { %4177 = vmatpush.msra.mxu1 %v3307_v45  ;;  %4157 = vmatpush.msra.mxu0 %v3227_v19  ;;  %v3162_v45 = vld [vmem:[#allocation7 + $0x30] sm:$0xff]  ;;  %v3237_v19 = vld [vmem:[#allocation7 + $0x288] sm:$0xff] }
 0x2ed   :  { %v2841_v15 = vrot.slane %v2840_v31, 2  ;;  %4196 = vmatpush.msra.mxu2 %v3392_v4  ;;  %v3612_v4 = vld [vmem:[#allocation7 + $0xe40] sm:$0xff] }
 0x2ee   :  { %4178 = vmatpush.msra.mxu1 %v3302_v58  ;;  %4158 = vmatpush.msra.mxu0 %v3222_v24  ;;  %v3157_v58 = vld [vmem:[#allocation7 + $0x8] sm:$0xff] }
 0x2ef   :  { %v2842_v57 = vadd.f32 %v2841_v15, %v2840_v31  ;;  %4197 = vmatpush.msra.mxu2 %v3387_v5  ;;  %v3552_v31 = vld [vmem:[#allocation7 + $0xc60] sm:$0xff]  ;;  %v3547_v15 = vld [vmem:[#allocation7 + $0xc38] sm:$0xff] }
 0x2f0   :  { %4179 = vmatpush.msra.mxu1 %v3297_v26  ;;  %4159 = vmatpush.msra.mxu0 %v3217_v28  ;;  %v3342_v26 = vld [vmem:[#allocation7 + $0x5d0] sm:$0xff]  ;;  %v3607_v5 = vld [vmem:[#allocation7 + $0xe18] sm:$0xff] }
 0x2f1   :  { %v2843_v51 = vrot.slane %v2842_v57, 1  ;;  %4198 = vmatpush.msra.mxu2 %v3382_v25  ;;  %v3941_v25 = vld [vmem:[#allocation7 + $0x1888] sm:$0xff] }
 0x2f2   :  { %4180 = vmatpush.msra.mxu1 %v3292_v33  ;;  %4160 = vmatpush.msra.mxu0 %v3212_v34  ;;  %v3337_v33 = vld [vmem:[#allocation7 + $0x5a8] sm:$0xff]  ;;  %v3332_v34 = vld [vmem:[#allocation7 + $0x580] sm:$0xff] }
 0x2f3   :  { %v2844_v40 = vadd.f32 %v2843_v51, %v2842_v57  ;;  %4199 = vmatpush.msra.mxu2 %v3377_v46  ;;  %v3542_v57 = vld [vmem:[#allocation7 + $0xc10] sm:$0xff]  ;;  %v3327_v51 = vld [vmem:[#allocation7 + $0x558] sm:$0xff] }
 0x2f4   :  { %4181 = vmatpush.msra.mxu1 %v3287_v61  ;;  %4161 = vmatpush.msra.mxu0 %v3207_v39  ;;  %v3617_v61 = vld [vmem:[#allocation7 + $0xe68] sm:$0xff]  ;;  %v3951_v39 = vld [vmem:[#allocation7 + $0x18d8] sm:$0xff]  ;;  %v3522_v46 = vld [vmem:[#allocation7 + $0xb70] sm:$0xff] }
 0x2f5   :  { %v2866_v2 = vmul.f32 %v7034_v27, %v2844_v40  ;;  %4200 = vmatpush.msra.mxu2 %v3372_v29  ;;  %4136 = vmatpush.msrb.mxu3 %v3951_v39  ;;  %v3322_v40 = vld [vmem:[#allocation7 + $0x530] sm:$0xff]  ;;  %v3517_v29 = vld [vmem:[#allocation7 + $0xb48] sm:$0xff] }
 0x2f6   :  { %4182 = vmatpush.msra.mxu1 %v3282_v12  ;;  %4162 = vmatpush.msra.mxu0 %v3202_v63  ;;  %v3532_v12 = vld [vmem:[#allocation7 + $0xbc0] sm:$0xff]  ;;  %v3946_v63 = vld [vmem:[#allocation7 + $0x18b0] sm:$0xff] }
 0x2f7   :  { %v7350_v43 = vsub.f32 %v2649_v54, %v2866_v2  ;;  %4201 = vmatpush.msra.mxu2 %v3367_v42  ;;  %v3527_v2 = vld [vmem:[#allocation7 + $0xb98] sm:$0xff]  ;;  %4137 = vmatpush.msrb.mxu3 %v3946_v63  ;;  %v3592_v42 = vld [vmem:[#allocation7 + $0xda0] sm:$0xff] }
 0x2f8   :  { %4183 = vmatpush.msra.mxu1 %v3277_v18  ;;  %4163 = vmatpush.msra.mxu0 %v3197_v14  ;;  %v3317_v14 = vld [vmem:[#allocation7 + $0x508] sm:$0xff] }
 0x2f9   :  { %v2886_v56 = vmul.f32 %v7350_v43, %v7350_v43  ;;  %4202 = vmatpush.msra.mxu2 %v3362_v49  ;;  %4138 = vmatpush.msrb.mxu3 %v3941_v25  ;;  %v3477_v25 = vld [vmem:[#allocation7 + $0xa08] sm:$0xff] }
 0x2fa   :  { %4184 = vmatpush.msra.mxu1 %v3272_v16  ;;  %4164 = vmatpush.msra.mxu0 %v3192_v17  ;;  %v3602_v17 = vld [vmem:[#allocation7 + $0xdf0] sm:$0xff] }
 0x2fb   :  { %v2936_v41 = vrot.slane %v2886_v56, 4  ;;  %4203 = vmatpush.msra.mxu2 %v3357_v8  ;;  %v3507_v8 = vld [vmem:[#allocation7 + $0xaf8] sm:$0xff] }
 0x2fc   :  { %4185 = vmatpush.msra.mxu1 %v3267_v37  ;;  %4165 = vmatpush.msra.mxu0 %v3187_v38  ;;  %v3936_v37 = vld [vmem:[#allocation7 + $0x1860] sm:$0xff]  ;;  %v3597_v38 = vld [vmem:[#allocation7 + $0xdc8] sm:$0xff] }
 0x2fd   :  { %v2937_v35 = vadd.f32 %v2936_v41, %v2886_v56  ;;  %4204 = vmatpush.msra.mxu2 %v3352_v22  ;;  %4139 = vmatpush.msrb.mxu3 %v3936_v37  ;;  %v3931_v41 = vld [vmem:[#allocation7 + $0x1838] sm:$0xff]  ;;  %v3582_v22 = vld [vmem:[#allocation7 + $0xd50] sm:$0xff] }
 0x2fe   :  { %4186 = vmatpush.msra.mxu1 %v3262_v55  ;;  %4166 = vmatpush.msra.mxu0 %v3182_v52 }
 0x2ff   :  { %v2938_v36 = vrot.slane %v2937_v35, 2  ;;  %4205 = vmatpush.msra.mxu2 %v3347_v59  ;;  %4140 = vmatpush.msrb.mxu3 %v3931_v41 }
 0x300   :  { %4187 = vmatpush.msra.mxu1 %v3257_v48  ;;  %4167 = vmatpush.msra.mxu0 %v3177_v23  ;;  %v3512_v48 = vld [vmem:[#allocation7 + $0xb20] sm:$0xff]  ;;  %v3926_v23 = vld [vmem:[#allocation7 + $0x1810] sm:$0xff] }
 0x301   :  { %v2939_v10 = vadd.f32 %v2938_v36, %v2937_v35  ;;  %4206 = vmatpush.msra.mxu2 %v3342_v26  ;;  %v3587_v36 = vld [vmem:[#allocation7 + $0xd78] sm:$0xff]  ;;  %4141 = vmatpush.msrb.mxu3 %v3926_v23  ;;  %v3497_v26 = vld [vmem:[#allocation7 + $0xaa8] sm:$0xff] }
 0x302   :  { %4188 = vmatpush.msra.mxu1 %v3252_v62  ;;  %4168 = vmatpush.msra.mxu0 %v3172_v1  ;;  %v7361_v62 = vld [vmem:[#allocation13 + $0x8] sm:$0x3] }
 0x303   :  { %v2940_v54 = vrot.slane %v2939_v10, 1  ;;  %4207 = vmatpush.msra.mxu2 %v3337_v33  ;;  %v3697_v23 = vld [vmem:[#allocation7 + $0x10e8] sm:$0xff] }
 0x304   :  { %4189 = vmatpush.msra.mxu1 %v3247_v47  ;;  %4169 = vmatpush.msra.mxu0 %v3167_v3  ;;  %v3921_v47 = vld [vmem:[#allocation7 + $0x17e8] sm:$0xff]  ;;  %v7364_v3 = vld [vmem:[#allocation14 + $0x8] sm:$0x3] }
 0x305   :  { %v2941_v21 = vadd.f32 %v2940_v54, %v2939_v10  ;;  %4208 = vmatpush.msra.mxu2 %v3332_v34  ;;  %v3090_v54 = vperm.slane %v7361_v62, 0  ;;  %4142 = vmatpush.msrb.mxu3 %v3921_v47  ;;  %v3906_v34 = vld [vmem:[#allocation7 + $0x1770] sm:$0xff]  ;;  %v3692_v47 = vld [vmem:[#allocation7 + $0x10c0] sm:$0xff] }
 0x306   :  { %4190 = vmatpush.msra.mxu1 %v3242_v50  ;;  %4170 = vmatpush.msra.mxu0 %v3162_v45  ;;  %v3502_v45 = vld [vmem:[#allocation7 + $0xad0] sm:$0xff] }
 0x307   :  { %v2956_v24 = vmul.f32 %v2941_v21, %v7034_v27  ;;  %4209 = vmatpush.msra.mxu2 %v3327_v51  ;;  %v2668_v55 = vpop.f32.mrf.mxu3  ;;  %v3916_v21 = vld [vmem:[#allocation7 + $0x17c0] sm:$0xff]  ;;  %v3901_v51 = vld [vmem:[#allocation7 + $0x1748] sm:$0xff] }
 0x308   :  { %4191 = vmatpush.msra.mxu1 %v3237_v19  ;;  %4171 = vmatpush.msra.mxu0 %v3157_v58 }
 0x309   :  { %4192 = vmatmul.f32.vlgmr.msra.gmra.mxu1 %v7218_v11  ;;  %v7356_v28 = vadd.f32 1e-05, %v2956_v24  ;;  %4172 = vmatmul.f32.vlgmr.msra.gmra.mxu0 %v7216_v44 }
 0x30a   :  { %4256 = vmatpush.msrb.mxu1 %v3632_v32  ;;  %4236 = vmatpush.msrb.mxu0 %v3552_v31  ;;  %v3577_v32 = vld [vmem:[#allocation7 + $0xd28] sm:$0xff]  ;;  %v3124_v31 = vperm.slane %v7364_v3, 0 }
 0x30b   :  { %6221 = vrsqrt.f32 %v7356_v28  ;;  %4210 = vmatpush.msra.mxu2 %v3322_v40  ;;  %vm3054_vm10 = vweird.f32 %v7356_v28  ;;  %4143 = vmatpush.msrb.mxu3 %v3916_v21  ;;  %v3482_v40 = vld [vmem:[#allocation7 + $0xa30] sm:$0xff] }
 0x30c   :  { %4257 = vmatpush.msrb.mxu1 %v3627_v30  ;;  %4237 = vmatpush.msrb.mxu0 %v3547_v15  ;;  %v3911_v30 = vld [vmem:[#allocation7 + $0x1798] sm:$0xff] }
 0x30d   :  { %4211 = vmatpush.msra.mxu2 %v3317_v14  ;;  %4144 = vmatpush.msrb.mxu3 %v3911_v30  ;;  %v3896_v14 = vld [vmem:[#allocation7 + $0x1720] sm:$0xff]  ;;  %v3842_v30 = vld [vmem:[#allocation7 + $0x1570] sm:$0xff] }
 0x30e   :  { %4258 = vmatpush.msrb.mxu1 %v3622_v9  ;;  %4238 = vmatpush.msrb.mxu0 %v3542_v57  ;;  %v3492_v9 = vld [vmem:[#allocation7 + $0xa80] sm:$0xff] }
 0x30f   :  { %4145 = vmatpush.msrb.mxu3 %v3906_v34  ;;  %v3672_v34 = vld [vmem:[#allocation7 + $0x1020] sm:$0xff] }
 0x310   :  { %4259 = vmatpush.msrb.mxu1 %v3617_v61  ;;  %4239 = vmatpush.msrb.mxu0 %v3537_v53  ;;  %v3567_v61 = vld [vmem:[#allocation7 + $0xcd8] sm:$0xff] }
 0x311   :  { %v6222_v18 = vpop.eup %6221  ;;  %4146 = vmatpush.msrb.mxu3 %v3901_v51  ;;  %v3832_v51 = vld [vmem:[#allocation7 + $0x1520] sm:$0xff] }
 0x312   :  { %4260 = vmatpush.msrb.mxu1 %v3612_v4  ;;  %v3049_v16 = vmul.f32 %v6222_v18, %v7356_v28  ;;  %4240 = vmatpush.msrb.mxu0 %v3532_v12  ;;  %vm3055_vm9 = vweird.f32 %v6222_v18  ;;  %v3572_v28 = vld [vmem:[#allocation7 + $0xd00] sm:$0xff]  ;;  %v3562_v4 = vld [vmem:[#allocation7 + $0xcb0] sm:$0xff] }
 0x313   :  { %vm3056_vm11 = vmor %vm3054_vm10, %vm3055_vm9  ;;  %4147 = vmatpush.msrb.mxu3 %v3896_v14  ;;  %v3452_v14 = vld [vmem:[#allocation7 + $0x940] sm:$0xff] }
 0x314   :  { %4261 = vmatpush.msrb.mxu1 %v3607_v5  ;;  %v3050_v56 = vmul.f32 %v6222_v18, %v3049_v16  ;;  %4241 = vmatpush.msrb.mxu0 %v3527_v2  ;;  %v3712_v5 = vld [vmem:[#allocation7 + $0x1160] sm:$0xff] }
 0x316   :  { %4262 = vmatpush.msrb.mxu1 %v3602_v17  ;;  %v3051_v52 = vmul.f32 0.5, %v3050_v56  ;;  %4242 = vmatpush.msrb.mxu0 %v3522_v46  ;;  %v3952_v17 = vld [vmem:[#allocation7 + $0x18e0] sm:$0xff]  ;;  %v3707_v56 = vld [vmem:[#allocation7 + $0x1138] sm:$0xff] }
 0x317   :  { %v2688_v35 = vpop.f32.mrf.mxu0  ;;  %v3872_v46 = vld [vmem:[#allocation7 + $0x1660] sm:$0xff] }
 0x318   :  { %4263 = vmatpush.msrb.mxu1 %v3597_v38  ;;  %v3052_v49 = vsub.f32 1.5, %v3051_v52  ;;  %4243 = vmatpush.msrb.mxu0 %v3517_v29  ;;  %v2689_v1 = vadd.f32 %v2688_v35, %v2668_v55  ;;  %v3947_v38 = vld [vmem:[#allocation7 + $0x18b8] sm:$0xff]  ;;  %v3702_v52 = vld [vmem:[#allocation7 + $0x1110] sm:$0xff] }
 0x319   :  { %v3891_v29 = vld [vmem:[#allocation7 + $0x16f8] sm:$0xff]  ;;  %v3862_v35 = vld [vmem:[#allocation7 + $0x1610] sm:$0xff] }
 0x31a   :  { %4264 = vmatpush.msrb.mxu1 %v3592_v42  ;;  %v3053_v10 = vmul.f32 %v6222_v18, %v3052_v49  ;;  %4244 = vmatpush.msrb.mxu0 %v3512_v48  ;;  %v2708_v50 = vpop.f32.mrf.mxu1  ;;  %v3867_v55 = vld [vmem:[#allocation7 + $0x1638] sm:$0xff]  ;;  %v3942_v42 = vld [vmem:[#allocation7 + $0x1890] sm:$0xff]  ;;  %v3937_v49 = vld [vmem:[#allocation7 + $0x1868] sm:$0xff] }
 0x31b   :  { %v2709_v59 = vadd.f32 %v2708_v50, %v2689_v1  ;;  %v2728_v19 = vpop.f32.mrf.mxu2  ;;  %4148 = vmatpush.msrb.mxu3 %v3891_v29  ;;  %v3652_v29 = vld [vmem:[#allocation7 + $0xf80] sm:$0xff] }
 0x31c   :  { %4265 = vmatpush.msrb.mxu1 %v3587_v36  ;;  %v3057_v58 = vsel %vm3056_vm11, %v6222_v18, %v3053_v10  ;;  %4245 = vmatpush.msrb.mxu0 %v3507_v8  ;;  %v3557_v18 = vld [vmem:[#allocation7 + $0xc88] sm:$0xff]  ;;  %v3886_v36 = vld [vmem:[#allocation7 + $0x16d0] sm:$0xff]  ;;  %v3932_v10 = vld [vmem:[#allocation7 + $0x1840] sm:$0xff] }
 0x31d   :  { %v3076_v24 = vmul.f32 %v3057_v58, %v7350_v43  ;;  %v2729_v15 = vadd.f32 %v2728_v19, %v2709_v59  ;;  %v3487_v43 = vld [vmem:[#allocation7 + $0xa58] sm:$0xff]  ;;  %v3857_v8 = vld [vmem:[#allocation7 + $0x15e8] sm:$0xff]  ;;  %4149 = vmatpush.msrb.mxu3 %v3886_v36  ;;  %v3876_v19 = vld [vmem:[#allocation7 + $0x1680] sm:$0xff] }
 0x31e   :  { %4266 = vmatpush.msrb.mxu1 %v3582_v22  ;;  %4246 = vmatpush.msrb.mxu0 %v3502_v45  ;;  %v2748_v57 = vpop.f32.mrf.mxu3  ;;  %v3881_v22 = vld [vmem:[#allocation7 + $0x16a8] sm:$0xff]  ;;  %v3687_v45 = vld [vmem:[#allocation7 + $0x1098] sm:$0xff] }
 0x31f   :  { %v3110_v33 = vmul.f32 %v3090_v54, %v3076_v24  ;;  %v2749_v39 = vadd.f32 %v2748_v57, %v2729_v15  ;;  %v3852_v54 = vld [vmem:[#allocation7 + $0x15c0] sm:$0xff]  ;;  %v3927_v59 = vld [vmem:[#allocation7 + $0x1818] sm:$0xff]  ;;  %4150 = vmatpush.msrb.mxu3 %v3881_v22  ;;  %v3922_v24 = vld [vmem:[#allocation7 + $0x17f0] sm:$0xff] }
 0x320   :  { %4267 = vmatpush.msrb.mxu1 %v3577_v32  ;;  %4247 = vmatpush.msrb.mxu0 %v3497_v26  ;;  %v3847_v58 = vld [vmem:[#allocation7 + $0x1598] sm:$0xff]  ;;  %v3682_v32 = vld [vmem:[#allocation7 + $0x1070] sm:$0xff]  ;;  %v3917_v15 = vld [vmem:[#allocation7 + $0x17c8] sm:$0xff] }
 0x321   :  { %v3144_v53 = vadd.f32 %v3124_v31, %v3110_v33  ;;  %v3472_v31 = vld [vmem:[#allocation7 + $0x9e0] sm:$0xff]  ;;  %4151 = vmatpush.msrb.mxu3 %v3876_v19  ;;  %v3467_v33 = vld [vmem:[#allocation7 + $0x9b8] sm:$0xff]  ;;  %v3837_v57 = vld [vmem:[#allocation7 + $0x1548] sm:$0xff] }
 0x322   :  { %4268 = vmatpush.msrb.mxu1 %v3572_v28  ;;  %4248 = vmatpush.msrb.mxu0 %v3492_v9  ;;  %v3677_v28 = vld [vmem:[#allocation7 + $0x1048] sm:$0xff]  ;;  %v3807_v36 = vld [vmem:[#allocation7 + $0x1458] sm:$0xff]  ;;  %v3802_v22 = vld [vmem:[#allocation7 + $0x1430] sm:$0xff] }
 0x323   :  { %v7370_v12 = vmax.f32 %v3144_v53, 0.0  ;;  %v2768_v63 = vpop.f32.mrf.mxu0  ;;  %4216 = vmatpush.msra.mxu3 %v3472_v31  ;;  %v3462_v53 = vld [vmem:[#allocation7 + $0x990] sm:$0xff]  ;;  %v3473_v19 = vld [vmem:[#allocation7 + $0x9e8] sm:$0xff]  ;;  %v3228_v31 = vld [vmem:[#allocation7 + $0x240] sm:$0xff] }
 0x324   :  { %4269 = vmatpush.msrb.mxu1 %v3567_v61  ;;  %4249 = vmatpush.msrb.mxu0 %v3487_v43  ;;  %v2769_v2 = vadd.f32 %v2768_v63, %v2749_v39  ;;  %v3912_v61 = vld [vmem:[#allocation7 + $0x17a0] sm:$0xff]  ;;  %v3667_v39 = vld [vmem:[#allocation7 + $0xff8] sm:$0xff] }
 0x325   :  { %4132 = vmatmul.f32.vlgmr.msrb.gmra.mxu2 %v7370_v12  ;;  %4217 = vmatpush.msra.mxu3 %v3467_v33  ;;  %v3223_v33 = vld [vmem:[#allocation7 + $0x218] sm:$0xff] }
 0x326   :  { %4270 = vmatpush.msrb.mxu1 %v3562_v4  ;;  %4250 = vmatpush.msrb.mxu0 %v3482_v40  ;;  %v2788_v16 = vpop.f32.mrf.mxu1  ;;  %v3907_v4 = vld [vmem:[#allocation7 + $0x1778] sm:$0xff]  ;;  %v3457_v40 = vld [vmem:[#allocation7 + $0x968] sm:$0xff] }
 0x327   :  { %4276 = vmatpush.msrb.mxu2 %v3712_v5  ;;  %v7373_v37 = vadd.f32 %v2788_v16, %v2769_v2  ;;  %v3827_v5 = vld [vmem:[#allocation7 + $0x14f8] sm:$0xff]  ;;  %4218 = vmatpush.msra.mxu3 %v3462_v53  ;;  %v3902_v2 = vld [vmem:[#allocation7 + $0x1750] sm:$0xff]  ;;  %v3417_v53 = vld [vmem:[#allocation7 + $0x828] sm:$0xff] }
 0x328   :  { %4271 = vmatpush.msrb.mxu1 %v3557_v18  ;;  %4251 = vmatpush.msrb.mxu0 %v3477_v25  ;;  %v3662_v18 = vld [vmem:[#allocation7 + $0xfd0] sm:$0xff] }
 0x329   :  { %4272 = vmatmul.f32.vlgmr.msrb.gmra.mxu1 %v7317_v20  ;;  %4252 = vmatmul.f32.vlgmr.msrb.gmra.mxu0 %v7315_v13  ;;  %v2845_v41 = vrot.slane %v7373_v37, 4  ;;  %v3822_v16 = vld [vmem:[#allocation7 + $0x14d0] sm:$0xff] }
 0x32a   :  { %4336 = vmatpush.msra.mxu1 %v3952_v17  ;;  %4316 = vmatpush.msra.mxu0 %v3872_v46  ;;  %v3657_v17 = vld [vmem:[#allocation7 + $0xfa8] sm:$0xff] }
 0x32b   :  { %4277 = vmatpush.msrb.mxu2 %v3707_v56  ;;  %v2846_v48 = vadd.f32 %v2845_v41, %v7373_v37  ;;  %4219 = vmatpush.msra.mxu3 %v3457_v40  ;;  %v3897_v46 = vld [vmem:[#allocation7 + $0x1728] sm:$0xff]  ;;  %v3442_v41 = vld [vmem:[#allocation7 + $0x8f0] sm:$0xff]  ;;  %v3412_v40 = vld [vmem:[#allocation7 + $0x800] sm:$0xff] }
 0x32c   :  { %4337 = vmatpush.msra.mxu1 %v3947_v38  ;;  %4317 = vmatpush.msra.mxu0 %v3867_v55  ;;  %v3817_v38 = vld [vmem:[#allocation7 + $0x14a8] sm:$0xff]  ;;  %v3892_v55 = vld [vmem:[#allocation7 + $0x1700] sm:$0xff] }
 0x32d   :  { %4278 = vmatpush.msrb.mxu2 %v3702_v52  ;;  %v2847_v1 = vrot.slane %v2846_v48, 2  ;;  %4220 = vmatpush.msra.mxu3 %v3452_v14 }
 0x32e   :  { %4338 = vmatpush.msra.mxu1 %v3942_v42  ;;  %4212 = vmatmul.f32.vlgmr.msra.gmra.mxu2 %v7309_v60  ;;  %v3812_v42 = vld [vmem:[#allocation7 + $0x1480] sm:$0xff] }
 0x32f   :  { %4318 = vmatpush.msra.mxu0 %v3862_v35  ;;  %4279 = vmatpush.msrb.mxu2 %v3697_v23  ;;  %v2848_v50 = vadd.f32 %v2847_v1, %v2846_v48  ;;  %v3647_v48 = vld [vmem:[#allocation7 + $0xf58] sm:$0xff]  ;;  %v3437_v23 = vld [vmem:[#allocation7 + $0x8c8] sm:$0xff]  ;;  %v3642_v1 = vld [vmem:[#allocation7 + $0xf30] sm:$0xff] }
 0x330   :  { %4339 = vmatpush.msra.mxu1 %v3937_v49  ;;  %v3887_v35 = vld [vmem:[#allocation7 + $0x16d8] sm:$0xff] }
 0x331   :  { %4319 = vmatpush.msra.mxu0 %v3857_v8  ;;  %4280 = vmatpush.msrb.mxu2 %v3692_v47  ;;  %v2849_v21 = vrot.slane %v2848_v50, 1  ;;  %v3882_v8 = vld [vmem:[#allocation7 + $0x16b0] sm:$0xff]  ;;  %v3432_v47 = vld [vmem:[#allocation7 + $0x8a0] sm:$0xff] }
 0x332   :  { %4340 = vmatpush.msra.mxu1 %v3932_v10 }
 0x333   :  { %4320 = vmatpush.msra.mxu0 %v3852_v54  ;;  %4281 = vmatpush.msrb.mxu2 %v3687_v45  ;;  %v2850_v26 = vadd.f32 %v2849_v21, %v2848_v50  ;;  %v3637_v50 = vld [vmem:[#allocation7 + $0xf08] sm:$0xff] }
 0x334   :  { %4341 = vmatpush.msra.mxu1 %v3927_v59  ;;  %v3877_v54 = vld [vmem:[#allocation7 + $0x1688] sm:$0xff] }
 0x335   :  { %4321 = vmatpush.msra.mxu0 %v3847_v58  ;;  %4282 = vmatpush.msrb.mxu2 %v3682_v32  ;;  %v2867_v9 = vmul.f32 %v7034_v27, %v2850_v26  ;;  %v3797_v59 = vld [vmem:[#allocation7 + $0x1408] sm:$0xff]  ;;  %v3427_v26 = vld [vmem:[#allocation7 + $0x878] sm:$0xff] }
 0x336   :  { %4342 = vmatpush.msra.mxu1 %v3922_v24  ;;  %v3233_v21 = vld [vmem:[#allocation7 + $0x268] sm:$0xff]  ;;  %v3468_v24 = vld [vmem:[#allocation7 + $0x9c0] sm:$0xff] }
 0x337   :  { %4322 = vmatpush.msra.mxu0 %v3842_v30  ;;  %4283 = vmatpush.msrb.mxu2 %v3677_v28  ;;  %v7382_v43 = vsub.f32 %v7373_v37, %v2867_v9  ;;  %v3447_v37 = vld [vmem:[#allocation7 + $0x918] sm:$0xff]  ;;  %v3393_v32 = vld [vmem:[#allocation7 + $0x768] sm:$0xff]  ;;  %v3388_v28 = vld [vmem:[#allocation7 + $0x740] sm:$0xff] }
 0x338   :  { %4343 = vmatpush.msra.mxu1 %v3917_v15  ;;  %4221 = vmatpush.msra.mxu3 %v3447_v37  ;;  %v3463_v15 = vld [vmem:[#allocation7 + $0x998] sm:$0xff]  ;;  %v3422_v9 = vld [vmem:[#allocation7 + $0x850] sm:$0xff] }
 0x339   :  { %4323 = vmatpush.msra.mxu0 %v3837_v57  ;;  %4284 = vmatpush.msrb.mxu2 %v3672_v34  ;;  %v2887_v63 = vmul.f32 %v7382_v43, %v7382_v43  ;;  %v3383_v57 = vld [vmem:[#allocation7 + $0x718] sm:$0xff]  ;;  %v3458_v34 = vld [vmem:[#allocation7 + $0x970] sm:$0xff] }
 0x33a   :  { %4344 = vmatpush.msra.mxu1 %v3912_v61  ;;  %4222 = vmatpush.msra.mxu3 %v3442_v41  ;;  %v3218_v61 = vld [vmem:[#allocation7 + $0x1f0] sm:$0xff]  ;;  %v3397_v41 = vld [vmem:[#allocation7 + $0x788] sm:$0xff] }
 0x33b   :  { %4324 = vmatpush.msra.mxu0 %v3832_v51  ;;  %4285 = vmatpush.msrb.mxu2 %v3667_v39  ;;  %v2942_v25 = vrot.slane %v2887_v63, 4  ;;  %v3378_v51 = vld [vmem:[#allocation7 + $0x6f0] sm:$0xff]  ;;  %v3453_v39 = vld [vmem:[#allocation7 + $0x948] sm:$0xff] }
 0x33c   :  { %4345 = vmatpush.msra.mxu1 %v3907_v4  ;;  %4223 = vmatpush.msra.mxu3 %v3437_v23  ;;  %v3213_v4 = vld [vmem:[#allocation7 + $0x1c8] sm:$0xff]  ;;  %v3402_v37 = vld [vmem:[#allocation7 + $0x7b0] sm:$0xff] }
 0x33d   :  { %4325 = vmatpush.msra.mxu0 %v3827_v5  ;;  %4286 = vmatpush.msrb.mxu2 %v3662_v18  ;;  %v2943_v56 = vadd.f32 %v2942_v25, %v2887_v63  ;;  %v3373_v63 = vld [vmem:[#allocation7 + $0x6c8] sm:$0xff]  ;;  %v3448_v5 = vld [vmem:[#allocation7 + $0x920] sm:$0xff] }
 0x33e   :  { %4346 = vmatpush.msra.mxu1 %v3902_v2  ;;  %4224 = vmatpush.msra.mxu3 %v3432_v47  ;;  %v3208_v18 = vld [vmem:[#allocation7 + $0x1a0] sm:$0xff]  ;;  %v3407_v2 = vld [vmem:[#allocation7 + $0x7d8] sm:$0xff]  ;;  %v3353_v23 = vld [vmem:[#allocation7 + $0x628] sm:$0xff] }
 0x33f   :  { %4326 = vmatpush.msra.mxu0 %v3822_v16  ;;  %4287 = vmatpush.msrb.mxu2 %v3657_v17  ;;  %v2944_v52 = vrot.slane %v2943_v56, 2  ;;  %v3368_v25 = vld [vmem:[#allocation7 + $0x6a0] sm:$0xff]  ;;  %v3443_v16 = vld [vmem:[#allocation7 + $0x8f8] sm:$0xff] }
 0x340   :  { %4347 = vmatpush.msra.mxu1 %v3897_v46  ;;  %4225 = vmatpush.msra.mxu3 %v3427_v26  ;;  %v3203_v46 = vld [vmem:[#allocation7 + $0x178] sm:$0xff] }
 0x341   :  { %4327 = vmatpush.msra.mxu0 %v3817_v38  ;;  %4288 = vmatpush.msrb.mxu2 %v3652_v29  ;;  %v2945_v49 = vadd.f32 %v2944_v52, %v2943_v56  ;;  %v3363_v56 = vld [vmem:[#allocation7 + $0x678] sm:$0xff]  ;;  %v3438_v38 = vld [vmem:[#allocation7 + $0x8d0] sm:$0xff] }
 0x342   :  { %4348 = vmatpush.msra.mxu1 %v3892_v55  ;;  %4226 = vmatpush.msra.mxu3 %v3422_v9  ;;  %v3198_v55 = vld [vmem:[#allocation7 + $0x150] sm:$0xff]  ;;  %v3423_v47 = vld [vmem:[#allocation7 + $0x858] sm:$0xff] }
 0x343   :  { %4328 = vmatpush.msra.mxu0 %v3812_v42  ;;  %4289 = vmatpush.msrb.mxu2 %v3647_v48  ;;  %v2946_v10 = vrot.slane %v2945_v49, 1  ;;  %v3358_v52 = vld [vmem:[#allocation7 + $0x650] sm:$0xff]  ;;  %v3433_v42 = vld [vmem:[#allocation7 + $0x8a8] sm:$0xff]  ;;  %v3403_v9 = vld [vmem:[#allocation7 + $0x7b8] sm:$0xff] }
 0x344   :  { %4349 = vmatpush.msra.mxu1 %v3887_v35  ;;  %4227 = vmatpush.msra.mxu3 %v3417_v53  ;;  %v3193_v35 = vld [vmem:[#allocation7 + $0x128] sm:$0xff]  ;;  %v3318_v53 = vld [vmem:[#allocation7 + $0x510] sm:$0xff] }
 0x345   :  { %4329 = vmatpush.msra.mxu0 %v3807_v36  ;;  %4290 = vmatpush.msrb.mxu2 %v3642_v1  ;;  %v2947_v45 = vadd.f32 %v2946_v10, %v2945_v49  ;;  %v3428_v49 = vld [vmem:[#allocation7 + $0x880] sm:$0xff] }
 0x346   :  { %4350 = vmatpush.msra.mxu1 %v3882_v8  ;;  %4228 = vmatpush.msra.mxu3 %v3412_v40  ;;  %v3188_v1 = vld [vmem:[#allocation7 + $0x100] sm:$0xff] }
 0x347   :  { %4330 = vmatpush.msra.mxu0 %v3802_v22  ;;  %4291 = vmatpush.msrb.mxu2 %v3637_v50  ;;  %v2957_v58 = vmul.f32 %v2947_v45, %v7034_v27  ;;  %v3348_v8 = vld [vmem:[#allocation7 + $0x600] sm:$0xff]  ;;  %v3183_v22 = vld [vmem:[#allocation7 + $0xd8] sm:$0xff]  ;;  %v3091_v50 = vperm.slane %v7361_v62, 1  ;;  %v3418_v45 = vld [vmem:[#allocation7 + $0x830] sm:$0xff] }
 0x348   :  { %4351 = vmatpush.msra.mxu1 %v3877_v54  ;;  %4292 = vmatmul.f32.vlgmr.msrb.gmra.mxu2 %v7345_v0  ;;  %v3343_v54 = vld [vmem:[#allocation7 + $0x5d8] sm:$0xff]  ;;  %v3408_v62 = vld [vmem:[#allocation7 + $0x7e0] sm:$0xff] }
 0x349   :  { %4331 = vmatpush.msra.mxu0 %v3797_v59  ;;  %v7388_v30 = vadd.f32 1e-05, %v2957_v58  ;;  %4356 = vmatpush.msra.mxu2 %v3233_v21  ;;  %v3125_v58 = vperm.slane %v7364_v3, 1  ;;  %v3788_v40 = vld [vmem:[#allocation7 + $0x13c0] sm:$0xff] }
 0x34a   :  { %4416 = vmatpush.msrb.mxu1 %v3473_v19  ;;  %4332 = vmatmul.f32.vlgmr.msra.gmra.mxu0 %v7370_v12  ;;  %v3178_v19 = vld [vmem:[#allocation7 + $0xb0] sm:$0xff] }
 0x34b   :  { %4396 = vmatpush.msrb.mxu0 %v3393_v32  ;;  %6223 = vrsqrt.f32 %v7388_v30  ;;  %4357 = vmatpush.msra.mxu2 %v3228_v31  ;;  %vm3064_vm13 = vweird.f32 %v7388_v30  ;;  %v3338_v32 = vld [vmem:[#allocation7 + $0x5b0] sm:$0xff]  ;;  %v3173_v31 = vld [vmem:[#allocation7 + $0x88] sm:$0xff] }
 0x34c   :  { %4417 = vmatpush.msrb.mxu1 %v3468_v24  ;;  %4229 = vmatpush.msra.mxu3 %v3407_v2  ;;  %v3413_v24 = vld [vmem:[#allocation7 + $0x808] sm:$0xff] }
 0x34d   :  { %4397 = vmatpush.msrb.mxu0 %v3388_v28  ;;  %4358 = vmatpush.msra.mxu2 %v3223_v33  ;;  %v3168_v28 = vld [vmem:[#allocation7 + $0x60] sm:$0xff]  ;;  %v3553_v2 = vld [vmem:[#allocation7 + $0xc68] sm:$0xff] }
 0x34e   :  { %4418 = vmatpush.msrb.mxu1 %v3463_v15  ;;  %4230 = vmatpush.msra.mxu3 %v3402_v37  ;;  %v3328_v33 = vld [vmem:[#allocation7 + $0x560] sm:$0xff]  ;;  %v3698_v37 = vld [vmem:[#allocation7 + $0x10f0] sm:$0xff] }
 0x34f   :  { %4398 = vmatpush.msrb.mxu0 %v3383_v57  ;;  %4359 = vmatpush.msra.mxu2 %v3218_v61  ;;  %v3398_v57 = vld [vmem:[#allocation7 + $0x790] sm:$0xff]  ;;  %v3793_v61 = vld [vmem:[#allocation7 + $0x13e8] sm:$0xff] }
 0x350   :  { %4419 = vmatpush.msrb.mxu1 %v3458_v34  ;;  %4231 = vmatpush.msra.mxu3 %v3397_v41  ;;  %v3792_v34 = vld [vmem:[#allocation7 + $0x13e0] sm:$0xff]  ;;  %v3767_v41 = vld [vmem:[#allocation7 + $0x1318] sm:$0xff] }
 0x351   :  { %4399 = vmatpush.msrb.mxu0 %v3378_v51  ;;  %v6224_v14 = vpop.eup %6223  ;;  %4360 = vmatpush.msra.mxu2 %v3213_v4  ;;  %v3163_v51 = vld [vmem:[#allocation7 + $0x38] sm:$0xff]  ;;  %v3713_v4 = vld [vmem:[#allocation7 + $0x1168] sm:$0xff] }
 0x352   :  { %4420 = vmatpush.msrb.mxu1 %v3453_v39  ;;  %v3059_v17 = vmul.f32 %v6224_v14, %v7388_v30  ;;  %vm3065_vm12 = vweird.f32 %v6224_v14  ;;  %v3333_v30 = vld [vmem:[#allocation7 + $0x588] sm:$0xff]  ;;  %v3787_v39 = vld [vmem:[#allocation7 + $0x13b8] sm:$0xff] }
 0x353   :  { %4400 = vmatpush.msrb.mxu0 %v3373_v63  ;;  %4361 = vmatpush.msra.mxu2 %v3208_v18  ;;  %vm3066_vm14 = vmor %vm3064_vm13, %vm3065_vm12  ;;  %v3158_v63 = vld [vmem:[#allocation7 + $0x10] sm:$0xff]  ;;  %v3708_v18 = vld [vmem:[#allocation7 + $0x1140] sm:$0xff] }
 0x354   :  { %4421 = vmatpush.msrb.mxu1 %v3448_v5  ;;  %v3060_v29 = vmul.f32 %v6224_v14, %v3059_v17  ;;  %v3782_v5 = vld [vmem:[#allocation7 + $0x1390] sm:$0xff]  ;;  %v3548_v17 = vld [vmem:[#allocation7 + $0xc40] sm:$0xff] }
 0x355   :  { %4401 = vmatpush.msrb.mxu0 %v3368_v25  ;;  %4362 = vmatpush.msra.mxu2 %v3203_v46  ;;  %v3703_v25 = vld [vmem:[#allocation7 + $0x1118] sm:$0xff]  ;;  %v3778_v46 = vld [vmem:[#allocation7 + $0x1370] sm:$0xff] }
 0x356   :  { %4422 = vmatpush.msrb.mxu1 %v3443_v16  ;;  %v3061_v48 = vmul.f32 0.5, %v3060_v29  ;;  %v3777_v16 = vld [vmem:[#allocation7 + $0x1368] sm:$0xff]  ;;  %v3543_v29 = vld [vmem:[#allocation7 + $0xc18] sm:$0xff] }
 0x357   :  { %4402 = vmatpush.msrb.mxu0 %v3363_v56  ;;  %4363 = vmatpush.msra.mxu2 %v3198_v55  ;;  %v3772_v56 = vld [vmem:[#allocation7 + $0x1340] sm:$0xff]  ;;  %v3773_v55 = vld [vmem:[#allocation7 + $0x1348] sm:$0xff] }
 0x358   :  { %4423 = vmatpush.msrb.mxu1 %v3438_v38  ;;  %v3062_v36 = vsub.f32 1.5, %v3061_v48  ;;  %v3693_v38 = vld [vmem:[#allocation7 + $0x10c8] sm:$0xff]  ;;  %v3768_v48 = vld [vmem:[#allocation7 + $0x1320] sm:$0xff] }
 0x359   :  { %4403 = vmatpush.msrb.mxu0 %v3358_v52  ;;  %4364 = vmatpush.msra.mxu2 %v3193_v35  ;;  %v3688_v52 = vld [vmem:[#allocation7 + $0x10a0] sm:$0xff]  ;;  %v3762_v35 = vld [vmem:[#allocation7 + $0x12f0] sm:$0xff] }
 0x35a   :  { %4424 = vmatpush.msrb.mxu1 %v3433_v42  ;;  %v3063_v10 = vmul.f32 %v6224_v14, %v3062_v36  ;;  %v3538_v42 = vld [vmem:[#allocation7 + $0xbf0] sm:$0xff]  ;;  %v3763_v36 = vld [vmem:[#allocation7 + $0x12f8] sm:$0xff] }
 0x35b   :  { %4404 = vmatpush.msrb.mxu0 %v3353_v23  ;;  %4365 = vmatpush.msra.mxu2 %v3188_v1  ;;  %v3683_v23 = vld [vmem:[#allocation7 + $0x1078] sm:$0xff]  ;;  %v3757_v1 = vld [vmem:[#allocation7 + $0x12c8] sm:$0xff] }
 0x35c   :  { %4425 = vmatpush.msrb.mxu1 %v3428_v49  ;;  %v3067_v59 = vsel %vm3066_vm14, %v6224_v14, %v3063_v10  ;;  %v3783_v14 = vld [vmem:[#allocation7 + $0x1398] sm:$0xff]  ;;  %v3533_v49 = vld [vmem:[#allocation7 + $0xbc8] sm:$0xff]  ;;  %v3758_v10 = vld [vmem:[#allocation7 + $0x12d0] sm:$0xff] }
 0x35d   :  { %4405 = vmatpush.msrb.mxu0 %v3348_v8  ;;  %v3077_v21 = vmul.f32 %v3067_v59, %v7382_v43  ;;  %4366 = vmatpush.msra.mxu2 %v3183_v22  ;;  %v3323_v43 = vld [vmem:[#allocation7 + $0x538] sm:$0xff]  ;;  %v3678_v8 = vld [vmem:[#allocation7 + $0x1050] sm:$0xff]  ;;  %v3752_v22 = vld [vmem:[#allocation7 + $0x12a0] sm:$0xff] }
 0x35e   :  { %4426 = vmatpush.msrb.mxu1 %v3423_v47  ;;  %v3528_v47 = vld [vmem:[#allocation7 + $0xba0] sm:$0xff]  ;;  %v3747_v59 = vld [vmem:[#allocation7 + $0x1278] sm:$0xff] }
 0x35f   :  { %4406 = vmatpush.msrb.mxu0 %v3343_v54  ;;  %v3111_v26 = vmul.f32 %v3091_v50, %v3077_v21  ;;  %4367 = vmatpush.msra.mxu2 %v3178_v19  ;;  %v3673_v50 = vld [vmem:[#allocation7 + $0x1028] sm:$0xff]  ;;  %v3523_v54 = vld [vmem:[#allocation7 + $0xb78] sm:$0xff]  ;;  %v3668_v19 = vld [vmem:[#allocation7 + $0x1000] sm:$0xff] }
 0x360   :  { %4427 = vmatpush.msrb.mxu1 %v3418_v45  ;;  %v3753_v45 = vld [vmem:[#allocation7 + $0x12a8] sm:$0xff]  ;;  %v3518_v21 = vld [vmem:[#allocation7 + $0xb50] sm:$0xff] }
 0x361   :  { %4407 = vmatpush.msrb.mxu0 %v3338_v32  ;;  %v3145_v15 = vadd.f32 %v3125_v58, %v3111_v26  ;;  %4368 = vmatpush.msra.mxu2 %v3173_v31  ;;  %v3748_v58 = vld [vmem:[#allocation7 + $0x1280] sm:$0xff]  ;;  %v3742_v32 = vld [vmem:[#allocation7 + $0x1250] sm:$0xff]  ;;  %v3513_v31 = vld [vmem:[#allocation7 + $0xb28] sm:$0xff] }
 0x362   :  { %4428 = vmatpush.msrb.mxu1 %v3413_v24  ;;  %v3663_v24 = vld [vmem:[#allocation7 + $0xfd8] sm:$0xff] }
 0x363   :  { %4408 = vmatpush.msrb.mxu0 %v3333_v30  ;;  %v7397_v3 = vmax.f32 %v3145_v15, 0.0  ;;  %4369 = vmatpush.msra.mxu2 %v3168_v28  ;;  %v3743_v26 = vld [vmem:[#allocation7 + $0x1258] sm:$0xff]  ;;  %v3737_v30 = vld [vmem:[#allocation7 + $0x1228] sm:$0xff]  ;;  %v3508_v28 = vld [vmem:[#allocation7 + $0xb00] sm:$0xff] }
 0x364   :  { %4429 = vmatpush.msrb.mxu1 %v3408_v62  ;;  %v3658_v62 = vld [vmem:[#allocation7 + $0xfb0] sm:$0xff] }
 0x365   :  { %4409 = vmatpush.msrb.mxu0 %v3328_v33  ;;  %4152 = vmatmul.f32.vlgmr.msrb.gmra.mxu3 %v7397_v3  ;;  %v3738_v15 = vld [vmem:[#allocation7 + $0x1230] sm:$0xff]  ;;  %v3732_v33 = vld [vmem:[#allocation7 + $0x1200] sm:$0xff] }
 0x366   :  { %4430 = vmatpush.msrb.mxu1 %v3403_v9  ;;  %4296 = vmatpush.msrb.mxu3 %v3792_v34  ;;  %v3653_v9 = vld [vmem:[#allocation7 + $0xf88] sm:$0xff]  ;;  %v3727_v34 = vld [vmem:[#allocation7 + $0x11d8] sm:$0xff] }
 0x367   :  { %4352 = vmatmul.f32.vlgmr.msra.gmra.mxu1 %v7397_v3  ;;  %4410 = vmatpush.msrb.mxu0 %v3323_v43  ;;  %v3503_v43 = vld [vmem:[#allocation7 + $0xad8] sm:$0xff] }
 0x368   :  { %4431 = vmatpush.msrb.mxu1 %v3398_v57  ;;  %4370 = vmatpush.msra.mxu2 %v3163_v51  ;;  %v3733_v57 = vld [vmem:[#allocation7 + $0x1208] sm:$0xff]  ;;  %v3728_v51 = vld [vmem:[#allocation7 + $0x11e0] sm:$0xff] }
 0x369   :  { %4411 = vmatpush.msrb.mxu0 %v3318_v53  ;;  %4297 = vmatpush.msrb.mxu3 %v3787_v39  ;;  %v3498_v53 = vld [vmem:[#allocation7 + $0xab0] sm:$0xff] }
 0x36a   :  { %4496 = vmatpush.msra.mxu1 %v3793_v61  ;;  %4412 = vmatmul.f32.vlgmr.msrb.gmra.mxu0 %v7309_v60  ;;  %v3648_v61 = vld [vmem:[#allocation7 + $0xf60] sm:$0xff]  ;;  %v3722_v39 = vld [vmem:[#allocation7 + $0x11b0] sm:$0xff] }
 0x36b   :  { %4476 = vmatpush.msra.mxu0 %v3713_v4  ;;  %4371 = vmatpush.msra.mxu2 %v3158_v63  ;;  %v3643_v4 = vld [vmem:[#allocation7 + $0xf38] sm:$0xff] }
 0x36c   :  { %4497 = vmatpush.msra.mxu1 %v3788_v40  ;;  %4298 = vmatpush.msrb.mxu3 %v3782_v5  ;;  %v3493_v40 = vld [vmem:[#allocation7 + $0xa88] sm:$0xff]  ;;  %v3723_v63 = vld [vmem:[#allocation7 + $0x11b8] sm:$0xff] }
 0x36d   :  { %4477 = vmatpush.msra.mxu0 %v3708_v18  ;;  %4372 = vmatmul.f32.vlgmr.msra.gmra.mxu2 %v7216_v44  ;;  %v3717_v5 = vld [vmem:[#allocation7 + $0x1188] sm:$0xff]  ;;  %v3638_v18 = vld [vmem:[#allocation7 + $0xf10] sm:$0xff] }
 0x36e   :  { %4436 = vmatpush.msrb.mxu2 %v3553_v2  ;;  %4498 = vmatpush.msra.mxu1 %v3783_v14  ;;  %v3488_v2 = vld [vmem:[#allocation7 + $0xa60] sm:$0xff]  ;;  %v3718_v14 = vld [vmem:[#allocation7 + $0x1190] sm:$0xff] }
 0x36f   :  { %4478 = vmatpush.msra.mxu0 %v3703_v25  ;;  %4299 = vmatpush.msrb.mxu3 %v3777_v16  ;;  %v3234_v25 = vld [vmem:[#allocation7 + $0x270] sm:$0xff]  ;;  %v3313_v16 = vld [vmem:[#allocation7 + $0x4e8] sm:$0xff] }
 0x370   :  { %4437 = vmatpush.msrb.mxu2 %v3548_v17  ;;  %4499 = vmatpush.msra.mxu1 %v3778_v46  ;;  %v3229_v17 = vld [vmem:[#allocation7 + $0x248] sm:$0xff]  ;;  %v3314_v46 = vld [vmem:[#allocation7 + $0x4f0] sm:$0xff] }
 0x371   :  { %4479 = vmatpush.msra.mxu0 %v3698_v37  ;;  %4232 = vmatmul.f32.vlgmr.msra.gmra.mxu3 %v7311_v7  ;;  %v3483_v37 = vld [vmem:[#allocation7 + $0xa38] sm:$0xff] }
 0x372   :  { %4300 = vmatpush.msrb.mxu3 %v3772_v56  ;;  %4432 = vmatmul.f32.vlgmr.msrb.gmra.mxu1 %v7311_v7  ;;  %v3308_v56 = vld [vmem:[#allocation7 + $0x4c0] sm:$0xff] }
 0x373   :  { %4480 = vmatpush.msra.mxu0 %v3693_v38  ;;  %4438 = vmatpush.msrb.mxu2 %v3543_v29  ;;  %v3224_v38 = vld [vmem:[#allocation7 + $0x220] sm:$0xff]  ;;  %v3309_v29 = vld [vmem:[#allocation7 + $0x4c8] sm:$0xff] }
 0x374   :  { %4500 = vmatpush.msra.mxu1 %v3773_v55  ;;  %4301 = vmatpush.msrb.mxu3 %v3767_v41  ;;  %v3478_v55 = vld [vmem:[#allocation7 + $0xa10] sm:$0xff]  ;;  %v3303_v41 = vld [vmem:[#allocation7 + $0x498] sm:$0xff] }
 0x375   :  { %4481 = vmatpush.msra.mxu0 %v3688_v52  ;;  %4439 = vmatpush.msrb.mxu2 %v3538_v42  ;;  %v3219_v52 = vld [vmem:[#allocation7 + $0x1f8] sm:$0xff]  ;;  %v3873_v42 = vld [vmem:[#allocation7 + $0x1668] sm:$0xff] }
 0x376   :  { %4501 = vmatpush.msra.mxu1 %v3768_v48  ;;  %4302 = vmatpush.msrb.mxu3 %v3762_v35  ;;  %v3304_v48 = vld [vmem:[#allocation7 + $0x4a0] sm:$0xff]  ;;  %v3214_v35 = vld [vmem:[#allocation7 + $0x1d0] sm:$0xff] }
 0x377   :  { %4482 = vmatpush.msra.mxu0 %v3683_v23  ;;  %4440 = vmatpush.msrb.mxu2 %v3533_v49  ;;  %v3298_v23 = vld [vmem:[#allocation7 + $0x470] sm:$0xff]  ;;  %v3868_v49 = vld [vmem:[#allocation7 + $0x1640] sm:$0xff] }
 0x378   :  { %4502 = vmatpush.msra.mxu1 %v3763_v36  ;;  %4303 = vmatpush.msrb.mxu3 %v3757_v1  ;;  %v3299_v36 = vld [vmem:[#allocation7 + $0x478] sm:$0xff]  ;;  %v3209_v1 = vld [vmem:[#allocation7 + $0x1a8] sm:$0xff] }
 0x379   :  { %4483 = vmatpush.msra.mxu0 %v3678_v8  ;;  %4441 = vmatpush.msrb.mxu2 %v3528_v47  ;;  %v3293_v8 = vld [vmem:[#allocation7 + $0x448] sm:$0xff]  ;;  %v3863_v47 = vld [vmem:[#allocation7 + $0x1618] sm:$0xff] }
 0x37a   :  { %4503 = vmatpush.msra.mxu1 %v3758_v10  ;;  %4304 = vmatpush.msrb.mxu3 %v3752_v22  ;;  %v3294_v10 = vld [vmem:[#allocation7 + $0x450] sm:$0xff]  ;;  %v3204_v22 = vld [vmem:[#allocation7 + $0x180] sm:$0xff] }
 0x37b   :  { %4484 = vmatpush.msra.mxu0 %v3673_v50  ;;  %4442 = vmatpush.msrb.mxu2 %v3523_v54  ;;  %v3288_v50 = vld [vmem:[#allocation7 + $0x420] sm:$0xff]  ;;  %v3858_v54 = vld [vmem:[#allocation7 + $0x15f0] sm:$0xff] }
 0x37c   :  { %4504 = vmatpush.msra.mxu1 %v3753_v45  ;;  %4305 = vmatpush.msrb.mxu3 %v3747_v59  ;;  %v3289_v45 = vld [vmem:[#allocation7 + $0x428] sm:$0xff]  ;;  %v3199_v59 = vld [vmem:[#allocation7 + $0x158] sm:$0xff] }
 0x37d   :  { %4485 = vmatpush.msra.mxu0 %v3668_v19  ;;  %4443 = vmatpush.msrb.mxu2 %v3518_v21  ;;  %v3283_v19 = vld [vmem:[#allocation7 + $0x3f8] sm:$0xff]  ;;  %v3853_v21 = vld [vmem:[#allocation7 + $0x15c8] sm:$0xff] }
 0x37e   :  { %4505 = vmatpush.msra.mxu1 %v3748_v58  ;;  %4306 = vmatpush.msrb.mxu3 %v3742_v32  ;;  %v3284_v58 = vld [vmem:[#allocation7 + $0x400] sm:$0xff]  ;;  %v3194_v32 = vld [vmem:[#allocation7 + $0x130] sm:$0xff] }
 0x37f   :  { %4486 = vmatpush.msra.mxu0 %v3663_v24  ;;  %4444 = vmatpush.msrb.mxu2 %v3513_v31  ;;  %v3278_v24 = vld [vmem:[#allocation7 + $0x3d0] sm:$0xff]  ;;  %v3848_v31 = vld [vmem:[#allocation7 + $0x15a0] sm:$0xff] }
 0x380   :  { %4506 = vmatpush.msra.mxu1 %v3743_v26  ;;  %4307 = vmatpush.msrb.mxu3 %v3737_v30  ;;  %v3279_v26 = vld [vmem:[#allocation7 + $0x3d8] sm:$0xff]  ;;  %v3189_v30 = vld [vmem:[#allocation7 + $0x108] sm:$0xff] }
 0x381   :  { %4487 = vmatpush.msra.mxu0 %v3658_v62  ;;  %4445 = vmatpush.msrb.mxu2 %v3508_v28  ;;  %v3273_v62 = vld [vmem:[#allocation7 + $0x3a8] sm:$0xff]  ;;  %v3843_v28 = vld [vmem:[#allocation7 + $0x1578] sm:$0xff] }
 0x382   :  { %4507 = vmatpush.msra.mxu1 %v3738_v15  ;;  %4308 = vmatpush.msrb.mxu3 %v3732_v33  ;;  %v3274_v15 = vld [vmem:[#allocation7 + $0x3b0] sm:$0xff]  ;;  %v3184_v33 = vld [vmem:[#allocation7 + $0xe0] sm:$0xff] }
 0x383   :  { %4488 = vmatpush.msra.mxu0 %v3653_v9  ;;  %4446 = vmatpush.msrb.mxu2 %v3503_v43  ;;  %v3268_v9 = vld [vmem:[#allocation7 + $0x380] sm:$0xff]  ;;  %v3838_v43 = vld [vmem:[#allocation7 + $0x1550] sm:$0xff] }
 0x384   :  { %4508 = vmatpush.msra.mxu1 %v3733_v57  ;;  %4309 = vmatpush.msrb.mxu3 %v3727_v34  ;;  %v3269_v57 = vld [vmem:[#allocation7 + $0x388] sm:$0xff]  ;;  %v3179_v34 = vld [vmem:[#allocation7 + $0xb8] sm:$0xff] }
 0x385   :  { %4489 = vmatpush.msra.mxu0 %v3648_v61  ;;  %4447 = vmatpush.msrb.mxu2 %v3498_v53  ;;  %v3263_v61 = vld [vmem:[#allocation7 + $0x358] sm:$0xff]  ;;  %v3833_v53 = vld [vmem:[#allocation7 + $0x1528] sm:$0xff] }
 0x386   :  { %4509 = vmatpush.msra.mxu1 %v3728_v51  ;;  %4310 = vmatpush.msrb.mxu3 %v3722_v39  ;;  %v3264_v51 = vld [vmem:[#allocation7 + $0x360] sm:$0xff]  ;;  %v3174_v39 = vld [vmem:[#allocation7 + $0x90] sm:$0xff] }
 0x387   :  { %4490 = vmatpush.msra.mxu0 %v3643_v4  ;;  %4448 = vmatpush.msrb.mxu2 %v3493_v40  ;;  %v3258_v4 = vld [vmem:[#allocation7 + $0x330] sm:$0xff]  ;;  %v3828_v40 = vld [vmem:[#allocation7 + $0x1500] sm:$0xff] }
 0x388   :  { %4510 = vmatpush.msra.mxu1 %v3723_v63  ;;  %4311 = vmatpush.msrb.mxu3 %v3717_v5  ;;  %v3259_v63 = vld [vmem:[#allocation7 + $0x338] sm:$0xff]  ;;  %v3169_v5 = vld [vmem:[#allocation7 + $0x68] sm:$0xff] }
 0x389   :  { %4491 = vmatpush.msra.mxu0 %v3638_v18  ;;  %4449 = vmatpush.msrb.mxu2 %v3488_v2  ;;  %v3253_v18 = vld [vmem:[#allocation7 + $0x308] sm:$0xff]  ;;  %v3823_v2 = vld [vmem:[#allocation7 + $0x14d8] sm:$0xff] }
 0x38a   :  { %4492 = vmatmul.f32.vlgmr.msra.gmra.mxu0 %v7345_v0  ;;  %4511 = vmatpush.msra.mxu1 %v3718_v14  ;;  %v3254_v14 = vld [vmem:[#allocation7 + $0x310] sm:$0xff] }
 0x38b   :  { %4556 = vmatpush.msrb.mxu0 %v3234_v25  ;;  %4312 = vmatmul.f32.vlgmr.msrb.gmra.mxu3 %v7343_v6  ;;  %v3164_v25 = vld [vmem:[#allocation7 + $0x40] sm:$0xff] }
 0x38c   :  { %4376 = vmatpush.msra.mxu3 %v3313_v16  ;;  %4512 = vmatmul.f32.vlgmr.msra.gmra.mxu1 %v7343_v6  ;;  %v3248_v16 = vld [vmem:[#allocation7 + $0x2e0] sm:$0xff] }
 0x38d   :  { %4557 = vmatpush.msrb.mxu0 %v3229_v17  ;;  %4576 = vmatpush.msrb.mxu1 %v3314_v46  ;;  %v3818_v17 = vld [vmem:[#allocation7 + $0x14b0] sm:$0xff]  ;;  %v3249_v46 = vld [vmem:[#allocation7 + $0x2e8] sm:$0xff] }
 0x38e   :  { %4450 = vmatpush.msrb.mxu2 %v3483_v37  ;;  %4377 = vmatpush.msra.mxu3 %v3308_v56  ;;  %v3159_v37 = vld [vmem:[#allocation7 + $0x18] sm:$0xff] }
 0x38f   :  { %4558 = vmatpush.msrb.mxu0 %v3224_v38  ;;  %4577 = vmatpush.msrb.mxu1 %v3309_v29  ;;  %v3243_v56 = vld [vmem:[#allocation7 + $0x2b8] sm:$0xff]  ;;  %v3813_v38 = vld [vmem:[#allocation7 + $0x1488] sm:$0xff]  ;;  %v3554_v29 = vld [vmem:[#allocation7 + $0xc70] sm:$0xff] }
 0x390   :  { %4451 = vmatpush.msrb.mxu2 %v3478_v55  ;;  %4378 = vmatpush.msra.mxu3 %v3303_v41  ;;  %v3244_v55 = vld [vmem:[#allocation7 + $0x2c0] sm:$0xff]  ;;  %v3238_v41 = vld [vmem:[#allocation7 + $0x290] sm:$0xff] }
 0x391   :  { %4559 = vmatpush.msrb.mxu0 %v3219_v52  ;;  %4452 = vmatmul.f32.vlgmr.msrb.gmra.mxu2 %v7315_v13  ;;  %v3808_v52 = vld [vmem:[#allocation7 + $0x1460] sm:$0xff] }
 0x392   :  { %4516 = vmatpush.msra.mxu2 %v3873_v42  ;;  %4578 = vmatpush.msrb.mxu1 %v3304_v48  ;;  %v3549_v42 = vld [vmem:[#allocation7 + $0xc48] sm:$0xff]  ;;  %v3239_v48 = vld [vmem:[#allocation7 + $0x298] sm:$0xff] }
 0x393   :  { %4560 = vmatpush.msrb.mxu0 %v3214_v35  ;;  %4379 = vmatpush.msra.mxu3 %v3298_v23  ;;  %v3633_v35 = vld [vmem:[#allocation7 + $0xee8] sm:$0xff]  ;;  %v3544_v23 = vld [vmem:[#allocation7 + $0xc20] sm:$0xff] }
 0x394   :  { %4517 = vmatpush.msra.mxu2 %v3868_v49  ;;  %4579 = vmatpush.msrb.mxu1 %v3299_v36  ;;  %v3634_v49 = vld [vmem:[#allocation7 + $0xef0] sm:$0xff]  ;;  %v3803_v36 = vld [vmem:[#allocation7 + $0x1438] sm:$0xff] }
 0x395   :  { %4561 = vmatpush.msrb.mxu0 %v3209_v1  ;;  %4380 = vmatpush.msra.mxu3 %v3293_v8  ;;  %v3628_v1 = vld [vmem:[#allocation7 + $0xec0] sm:$0xff]  ;;  %v3539_v8 = vld [vmem:[#allocation7 + $0xbf8] sm:$0xff] }
 0x396   :  { %4518 = vmatpush.msra.mxu2 %v3863_v47  ;;  %4580 = vmatpush.msrb.mxu1 %v3294_v10  ;;  %v3629_v47 = vld [vmem:[#allocation7 + $0xec8] sm:$0xff]  ;;  %v3798_v10 = vld [vmem:[#allocation7 + $0x1410] sm:$0xff] }
 0x397   :  { %4562 = vmatpush.msrb.mxu0 %v3204_v22  ;;  %4381 = vmatpush.msra.mxu3 %v3288_v50  ;;  %v3623_v22 = vld [vmem:[#allocation7 + $0xe98] sm:$0xff]  ;;  %v3394_v50 = vld [vmem:[#allocation7 + $0x770] sm:$0xff] }
 0x398   :  { %4519 = vmatpush.msra.mxu2 %v3858_v54  ;;  %4581 = vmatpush.msrb.mxu1 %v3289_v45  ;;  %v3534_v54 = vld [vmem:[#allocation7 + $0xbd0] sm:$0xff]  ;;  %v3624_v45 = vld [vmem:[#allocation7 + $0xea0] sm:$0xff] }
 0x399   :  { %4563 = vmatpush.msrb.mxu0 %v3199_v59  ;;  %4382 = vmatpush.msra.mxu3 %v3283_v19  ;;  %v3618_v59 = vld [vmem:[#allocation7 + $0xe70] sm:$0xff]  ;;  %v3389_v19 = vld [vmem:[#allocation7 + $0x748] sm:$0xff] }
 0x39a   :  { %4520 = vmatpush.msra.mxu2 %v3853_v21  ;;  %4582 = vmatpush.msrb.mxu1 %v3284_v58  ;;  %v3529_v21 = vld [vmem:[#allocation7 + $0xba8] sm:$0xff]  ;;  %v3619_v58 = vld [vmem:[#allocation7 + $0xe78] sm:$0xff] }
 0x39b   :  { %4564 = vmatpush.msrb.mxu0 %v3194_v32  ;;  %4383 = vmatpush.msra.mxu3 %v3278_v24  ;;  %v3613_v32 = vld [vmem:[#allocation7 + $0xe48] sm:$0xff]  ;;  %v3384_v24 = vld [vmem:[#allocation7 + $0x720] sm:$0xff] }
 0x39c   :  { %4521 = vmatpush.msra.mxu2 %v3848_v31  ;;  %4583 = vmatpush.msrb.mxu1 %v3279_v26  ;;  %v3524_v31 = vld [vmem:[#allocation7 + $0xb80] sm:$0xff]  ;;  %v3614_v26 = vld [vmem:[#allocation7 + $0xe50] sm:$0xff] }
 0x39d   :  { %4565 = vmatpush.msrb.mxu0 %v3189_v30  ;;  %4384 = vmatpush.msra.mxu3 %v3273_v62  ;;  %v3608_v30 = vld [vmem:[#allocation7 + $0xe20] sm:$0xff]  ;;  %v3379_v62 = vld [vmem:[#allocation7 + $0x6f8] sm:$0xff] }
 0x39e   :  { %4522 = vmatpush.msra.mxu2 %v3843_v28  ;;  %4584 = vmatpush.msrb.mxu1 %v3274_v15  ;;  %v3519_v28 = vld [vmem:[#allocation7 + $0xb58] sm:$0xff]  ;;  %v3609_v15 = vld [vmem:[#allocation7 + $0xe28] sm:$0xff] }
 0x39f   :  { %4566 = vmatpush.msrb.mxu0 %v3184_v33  ;;  %4385 = vmatpush.msra.mxu3 %v3268_v9  ;;  %v3603_v33 = vld [vmem:[#allocation7 + $0xdf8] sm:$0xff]  ;;  %v3374_v9 = vld [vmem:[#allocation7 + $0x6d0] sm:$0xff] }
 0x3a0   :  { %4523 = vmatpush.msra.mxu2 %v3838_v43  ;;  %4585 = vmatpush.msrb.mxu1 %v3269_v57  ;;  %v3514_v43 = vld [vmem:[#allocation7 + $0xb30] sm:$0xff]  ;;  %v3604_v57 = vld [vmem:[#allocation7 + $0xe00] sm:$0xff] }
 0x3a1   :  { %4567 = vmatpush.msrb.mxu0 %v3179_v34  ;;  %4386 = vmatpush.msra.mxu3 %v3263_v61  ;;  %v3598_v34 = vld [vmem:[#allocation7 + $0xdd0] sm:$0xff]  ;;  %v3369_v61 = vld [vmem:[#allocation7 + $0x6a8] sm:$0xff] }
 0x3a2   :  { %4524 = vmatpush.msra.mxu2 %v3833_v53  ;;  %4586 = vmatpush.msrb.mxu1 %v3264_v51  ;;  %v3509_v53 = vld [vmem:[#allocation7 + $0xb08] sm:$0xff]  ;;  %v3599_v51 = vld [vmem:[#allocation7 + $0xdd8] sm:$0xff] }
 0x3a3   :  { %4568 = vmatpush.msrb.mxu0 %v3174_v39  ;;  %4387 = vmatpush.msra.mxu3 %v3258_v4  ;;  %v3593_v39 = vld [vmem:[#allocation7 + $0xda8] sm:$0xff]  ;;  %v3364_v4 = vld [vmem:[#allocation7 + $0x680] sm:$0xff] }
 0x3a4   :  { %4525 = vmatpush.msra.mxu2 %v3828_v40  ;;  %4587 = vmatpush.msrb.mxu1 %v3259_v63  ;;  %v3504_v40 = vld [vmem:[#allocation7 + $0xae0] sm:$0xff]  ;;  %v3594_v63 = vld [vmem:[#allocation7 + $0xdb0] sm:$0xff] }
 0x3a5   :  { %4569 = vmatpush.msrb.mxu0 %v3169_v5  ;;  %4388 = vmatpush.msra.mxu3 %v3253_v18  ;;  %v3588_v5 = vld [vmem:[#allocation7 + $0xd80] sm:$0xff]  ;;  %v3359_v18 = vld [vmem:[#allocation7 + $0x658] sm:$0xff] }
 0x3a6   :  { %4526 = vmatpush.msra.mxu2 %v3823_v2  ;;  %4588 = vmatpush.msrb.mxu1 %v3254_v14  ;;  %v3499_v2 = vld [vmem:[#allocation7 + $0xab8] sm:$0xff]  ;;  %v3589_v14 = vld [vmem:[#allocation7 + $0xd88] sm:$0xff] }
 0x3a7   :  { %4570 = vmatpush.msrb.mxu0 %v3164_v25  ;;  %4389 = vmatpush.msra.mxu3 %v3248_v16  ;;  %v3583_v25 = vld [vmem:[#allocation7 + $0xd58] sm:$0xff]  ;;  %v3354_v16 = vld [vmem:[#allocation7 + $0x630] sm:$0xff] }
 0x3a8   :  { %4527 = vmatpush.msra.mxu2 %v3818_v17  ;;  %4589 = vmatpush.msrb.mxu1 %v3249_v46  ;;  %v3494_v17 = vld [vmem:[#allocation7 + $0xa90] sm:$0xff]  ;;  %v3584_v46 = vld [vmem:[#allocation7 + $0xd60] sm:$0xff] }
 0x3a9   :  { %4571 = vmatpush.msrb.mxu0 %v3159_v37  ;;  %4390 = vmatpush.msra.mxu3 %v3243_v56  ;;  %v3578_v37 = vld [vmem:[#allocation7 + $0xd30] sm:$0xff]  ;;  %v3349_v56 = vld [vmem:[#allocation7 + $0x608] sm:$0xff] }
 0x3aa   :  { %4572 = vmatmul.f32.vlgmr.msrb.gmra.mxu0 %v7216_v44  ;;  %4528 = vmatpush.msra.mxu2 %v3813_v38  ;;  %v3489_v38 = vld [vmem:[#allocation7 + $0xa68] sm:$0xff] }
 0x3ab   :  { %4636 = vmatpush.msra.mxu0 %v3554_v29  ;;  %4590 = vmatpush.msrb.mxu1 %v3244_v55  ;;  %v3579_v29 = vld [vmem:[#allocation7 + $0xd38] sm:$0xff]  ;;  %v3573_v55 = vld [vmem:[#allocation7 + $0xd08] sm:$0xff] }
 0x3ac   :  { %4391 = vmatpush.msra.mxu3 %v3238_v41  ;;  %4529 = vmatpush.msra.mxu2 %v3808_v52  ;;  %v3344_v41 = vld [vmem:[#allocation7 + $0x5e0] sm:$0xff] }
 0x3ad   :  { %4637 = vmatpush.msra.mxu0 %v3549_v42  ;;  %4591 = vmatpush.msrb.mxu1 %v3239_v48  ;;  %v3484_v52 = vld [vmem:[#allocation7 + $0xa40] sm:$0xff]  ;;  %v3574_v42 = vld [vmem:[#allocation7 + $0xd10] sm:$0xff] }
 0x3ae   :  { %4392 = vmatmul.f32.vlgmr.msra.gmra.mxu3 %v7218_v11  ;;  %4592 = vmatmul.f32.vlgmr.msrb.gmra.mxu1 %v7218_v11  ;;  %v3568_v48 = vld [vmem:[#allocation7 + $0xce0] sm:$0xff] }
 0x3af   :  { %4456 = vmatpush.msrb.mxu3 %v3633_v35  ;;  %4638 = vmatpush.msra.mxu0 %v3544_v23  ;;  %v3339_v35 = vld [vmem:[#allocation7 + $0x5b8] sm:$0xff] }
 0x3b0   :  { %4656 = vmatpush.msra.mxu1 %v3634_v49  ;;  %4530 = vmatpush.msra.mxu2 %v3803_v36  ;;  %v3479_v23 = vld [vmem:[#allocation7 + $0xa18] sm:$0xff]  ;;  %v3569_v49 = vld [vmem:[#allocation7 + $0xce8] sm:$0xff]  ;;  %v3874_v36 = vld [vmem:[#allocation7 + $0x1670] sm:$0xff] }
 0x3b1   :  { %4457 = vmatpush.msrb.mxu3 %v3628_v1  ;;  %4639 = vmatpush.msra.mxu0 %v3539_v8  ;;  %v3563_v1 = vld [vmem:[#allocation7 + $0xcb8] sm:$0xff]  ;;  %v3334_v8 = vld [vmem:[#allocation7 + $0x590] sm:$0xff] }
 0x3b2   :  { %4657 = vmatpush.msra.mxu1 %v3629_v47  ;;  %4531 = vmatpush.msra.mxu2 %v3798_v10  ;;  %v3564_v47 = vld [vmem:[#allocation7 + $0xcc0] sm:$0xff]  ;;  %v3869_v10 = vld [vmem:[#allocation7 + $0x1648] sm:$0xff] }
 0x3b3   :  { %4458 = vmatpush.msrb.mxu3 %v3623_v22  ;;  %4532 = vmatmul.f32.vlgmr.msra.gmra.mxu2 %v7370_v12  ;;  %v3558_v22 = vld [vmem:[#allocation7 + $0xc90] sm:$0xff] }
 0x3b4   :  { %4596 = vmatpush.msrb.mxu2 %v3394_v50  ;;  %4640 = vmatpush.msra.mxu0 %v3534_v54  ;;  %v3329_v50 = vld [vmem:[#allocation7 + $0x568] sm:$0xff]  ;;  %v3559_v54 = vld [vmem:[#allocation7 + $0xc98] sm:$0xff] }
 0x3b5   :  { %4658 = vmatpush.msra.mxu1 %v3624_v45  ;;  %4459 = vmatpush.msrb.mxu3 %v3618_v59  ;;  %v3953_v45 = vld [vmem:[#allocation7 + $0x18e8] sm:$0xff]  ;;  %v3864_v59 = vld [vmem:[#allocation7 + $0x1620] sm:$0xff] }
 0x3b6   :  { %4597 = vmatpush.msrb.mxu2 %v3389_v19  ;;  %4641 = vmatpush.msra.mxu0 %v3529_v21  ;;  %v3954_v19 = vld [vmem:[#allocation7 + $0x18f0] sm:$0xff]  ;;  %v3324_v21 = vld [vmem:[#allocation7 + $0x540] sm:$0xff] }
 0x3b7   :  { %4659 = vmatpush.msra.mxu1 %v3619_v58  ;;  %4460 = vmatpush.msrb.mxu3 %v3613_v32  ;;  %v3948_v58 = vld [vmem:[#allocation7 + $0x18c0] sm:$0xff]  ;;  %v3859_v32 = vld [vmem:[#allocation7 + $0x15f8] sm:$0xff] }
 0x3b8   :  { %4598 = vmatpush.msrb.mxu2 %v3384_v24  ;;  %4642 = vmatpush.msra.mxu0 %v3524_v31  ;;  %v3949_v24 = vld [vmem:[#allocation7 + $0x18c8] sm:$0xff]  ;;  %v3319_v31 = vld [vmem:[#allocation7 + $0x518] sm:$0xff] }
 0x3b9   :  { %4660 = vmatpush.msra.mxu1 %v3614_v26  ;;  %4461 = vmatpush.msrb.mxu3 %v3608_v30  ;;  %v3943_v26 = vld [vmem:[#allocation7 + $0x1898] sm:$0xff]  ;;  %v3973_v30 = vpop.f32.mrf.mxu2 }
 0x3ba   :  { %4599 = vmatpush.msrb.mxu2 %v3379_v62  ;;  %4643 = vmatpush.msra.mxu0 %v3519_v28  ;;  %v3993_v62 = vpop.f32.mrf.mxu3  ;;  %v3714_v28 = vld [vmem:[#allocation7 + $0x1170] sm:$0xff] }
 0x3bb   :  { %4661 = vmatpush.msra.mxu1 %v3609_v15  ;;  %4462 = vmatpush.msrb.mxu3 %v3603_v33  ;;  %v3854_v15 = vld [vmem:[#allocation7 + $0x15d0] sm:$0xff]  ;;  %v3944_v33 = vld [vmem:[#allocation7 + $0x18a0] sm:$0xff] }
 0x3bc   :  { %4600 = vmatpush.msrb.mxu2 %v3374_v9  ;;  %4644 = vmatpush.msra.mxu0 %v3514_v43  ;;  %v3938_v9 = vld [vmem:[#allocation7 + $0x1870] sm:$0xff]  ;;  %v4013_v43 = vpop.f32.mrf.mxu0 }
 0x3bd   :  { %4662 = vmatpush.msra.mxu1 %v3604_v57  ;;  %4463 = vmatpush.msrb.mxu3 %v3598_v34  ;;  %v3709_v57 = vld [vmem:[#allocation7 + $0x1148] sm:$0xff] }
 0x3be   :  { %4601 = vmatpush.msrb.mxu2 %v3369_v61  ;;  %4645 = vmatpush.msra.mxu0 %v3509_v53  ;;  %v3849_v34 = vld [vmem:[#allocation7 + $0x15a8] sm:$0xff]  ;;  %v3994_v61 = vadd.f32 %v3993_v62, %v3973_v30  ;;  %v3939_v53 = vld [vmem:[#allocation7 + $0x1878] sm:$0xff] }
 0x3bf   :  { %4663 = vmatpush.msra.mxu1 %v3599_v51  ;;  %4464 = vmatpush.msrb.mxu3 %v3593_v39  ;;  %v3933_v51 = vld [vmem:[#allocation7 + $0x1848] sm:$0xff]  ;;  %v3704_v39 = vld [vmem:[#allocation7 + $0x1120] sm:$0xff]  ;;  %v3899_v62 = vld [vmem:[#allocation7 + $0x1738] sm:$0xff] }
 0x3c0   :  { %4602 = vmatpush.msrb.mxu2 %v3364_v4  ;;  %4646 = vmatpush.msra.mxu0 %v3504_v40  ;;  %v3844_v4 = vld [vmem:[#allocation7 + $0x1580] sm:$0xff]  ;;  %v4014_v40 = vadd.f32 %v4013_v43, %v3994_v61  ;;  %v3894_v43 = vld [vmem:[#allocation7 + $0x1710] sm:$0xff]  ;;  %v3799_v61 = vld [vmem:[#allocation7 + $0x1418] sm:$0xff] }
 0x3c1   :  { %4664 = vmatpush.msra.mxu1 %v3594_v63  ;;  %4465 = vmatpush.msrb.mxu3 %v3588_v5  ;;  %v3934_v63 = vld [vmem:[#allocation7 + $0x1850] sm:$0xff]  ;;  %v3928_v5 = vld [vmem:[#allocation7 + $0x1820] sm:$0xff] }
 0x3c2   :  { %4603 = vmatpush.msrb.mxu2 %v3359_v18  ;;  %4647 = vmatpush.msra.mxu0 %v3499_v2  ;;  %v3699_v18 = vld [vmem:[#allocation7 + $0x10f8] sm:$0xff] }
 0x3c3   :  { %4665 = vmatpush.msra.mxu1 %v3589_v14  ;;  %4466 = vmatpush.msrb.mxu3 %v3583_v25  ;;  %v3839_v2 = vld [vmem:[#allocation7 + $0x1558] sm:$0xff]  ;;  %v3929_v14 = vld [vmem:[#allocation7 + $0x1828] sm:$0xff] }
 0x3c4   :  { %4604 = vmatpush.msrb.mxu2 %v3354_v16  ;;  %4648 = vmatpush.msra.mxu0 %v3494_v17  ;;  %v3923_v25 = vld [vmem:[#allocation7 + $0x17f8] sm:$0xff]  ;;  %v4033_v16 = vpop.f32.mrf.mxu1  ;;  %v4053_v17 = vpop.f32.mrf.mxu2 }
 0x3c5   :  { %4666 = vmatpush.msra.mxu1 %v3584_v46  ;;  %4467 = vmatpush.msrb.mxu3 %v3578_v37  ;;  %v3694_v46 = vld [vmem:[#allocation7 + $0x10d0] sm:$0xff] }
 0x3c6   :  { %4605 = vmatpush.msrb.mxu2 %v3349_v56  ;;  %4649 = vmatpush.msra.mxu0 %v3489_v38  ;;  %v3834_v37 = vld [vmem:[#allocation7 + $0x1530] sm:$0xff]  ;;  %v4034_v56 = vadd.f32 %v4033_v16, %v4014_v40  ;;  %v3924_v38 = vld [vmem:[#allocation7 + $0x1800] sm:$0xff]  ;;  %v3883_v40 = vld [vmem:[#allocation7 + $0x16b8] sm:$0xff] }
 0x3c7   :  { %4667 = vmatpush.msra.mxu1 %v3579_v29  ;;  %4468 = vmatpush.msrb.mxu3 %v3573_v55  ;;  %v3918_v29 = vld [vmem:[#allocation7 + $0x17d0] sm:$0xff]  ;;  %v3689_v55 = vld [vmem:[#allocation7 + $0x10a8] sm:$0xff]  ;;  %v3879_v16 = vld [vmem:[#allocation7 + $0x1698] sm:$0xff] }
 0x3c8   :  { %4606 = vmatpush.msrb.mxu2 %v3344_v41  ;;  %4650 = vmatpush.msra.mxu0 %v3484_v52  ;;  %v3829_v41 = vld [vmem:[#allocation7 + $0x1508] sm:$0xff]  ;;  %v4054_v52 = vadd.f32 %v4053_v17, %v4034_v56 }
 0x3c9   :  { %4668 = vmatpush.msra.mxu1 %v3574_v42  ;;  %4469 = vmatpush.msrb.mxu3 %v3568_v48  ;;  %v3919_v42 = vld [vmem:[#allocation7 + $0x17d8] sm:$0xff]  ;;  %v3913_v48 = vld [vmem:[#allocation7 + $0x17a8] sm:$0xff] }
 0x3ca   :  { %4607 = vmatpush.msrb.mxu2 %v3339_v35  ;;  %4651 = vmatpush.msra.mxu0 %v3479_v23  ;;  %v3684_v35 = vld [vmem:[#allocation7 + $0x1080] sm:$0xff] }
 0x3cb   :  { %4669 = vmatpush.msra.mxu1 %v3569_v49  ;;  %4652 = vmatmul.f32.vlgmr.msra.gmra.mxu0 %v7315_v13  ;;  %v3824_v23 = vld [vmem:[#allocation7 + $0x14e0] sm:$0xff]  ;;  %v3914_v49 = vld [vmem:[#allocation7 + $0x17b0] sm:$0xff] }
 0x3cc   :  { %4716 = vmatpush.msrb.mxu0 %v3874_v36  ;;  %4470 = vmatpush.msrb.mxu3 %v3563_v1  ;;  %v3908_v36 = vld [vmem:[#allocation7 + $0x1780] sm:$0xff]  ;;  %v4073_v1 = vpop.f32.mrf.mxu3 }
 0x3cd   :  { %4608 = vmatpush.msrb.mxu2 %v3334_v8  ;;  %4670 = vmatpush.msra.mxu1 %v3564_v47  ;;  %v4093_v8 = vpop.f32.mrf.mxu0  ;;  %v3679_v47 = vld [vmem:[#allocation7 + $0x1058] sm:$0xff] }
 0x3ce   :  { %4717 = vmatpush.msrb.mxu0 %v3869_v10  ;;  %4471 = vmatpush.msrb.mxu3 %v3558_v22  ;;  %v3819_v10 = vld [vmem:[#allocation7 + $0x14b8] sm:$0xff]  ;;  %v4074_v22 = vadd.f32 %v4073_v1, %v4054_v52  ;;  %v3465_v1 = vld [vmem:[#allocation7 + $0x9a8] sm:$0xff] }
 0x3cf   :  { %4609 = vmatpush.msrb.mxu2 %v3329_v50  ;;  %4671 = vmatpush.msra.mxu1 %v3559_v54  ;;  %v3909_v50 = vld [vmem:[#allocation7 + $0x1788] sm:$0xff]  ;;  %v3903_v54 = vld [vmem:[#allocation7 + $0x1758] sm:$0xff] }
 0x3d0   :  { %4472 = vmatmul.f32.vlgmr.msrb.gmra.mxu3 %v7317_v20  ;;  %4672 = vmatmul.f32.vlgmr.msra.gmra.mxu1 %v7317_v20 }
 0x3d1   :  { %4536 = vmatpush.msra.mxu3 %v3953_v45  ;;  %4718 = vmatpush.msrb.mxu0 %v3864_v59  ;;  %v4113_v45 = vpop.f32.mrf.mxu1  ;;  %v3674_v59 = vld [vmem:[#allocation7 + $0x1030] sm:$0xff] }
 0x3d2   :  { %4736 = vmatpush.msrb.mxu1 %v3954_v19  ;;  %4610 = vmatpush.msrb.mxu2 %v3324_v21  ;;  %v3814_v19 = vld [vmem:[#allocation7 + $0x1490] sm:$0xff]  ;;  %v4094_v21 = vadd.f32 %v4093_v8, %v4074_v22  ;;  %v3459_v8 = vld [vmem:[#allocation7 + $0x978] sm:$0xff] }
 0x3d3   :  { %4537 = vmatpush.msra.mxu3 %v3948_v58  ;;  %4719 = vmatpush.msrb.mxu0 %v3859_v32  ;;  %v3904_v58 = vld [vmem:[#allocation7 + $0x1760] sm:$0xff]  ;;  %v3898_v32 = vld [vmem:[#allocation7 + $0x1730] sm:$0xff] }
 0x3d4   :  { %4737 = vmatpush.msrb.mxu1 %v3949_v24  ;;  %4611 = vmatpush.msrb.mxu2 %v3319_v31  ;;  %v4133_v24 = vpop.f32.mrf.mxu2  ;;  %v3669_v31 = vld [vmem:[#allocation7 + $0x1008] sm:$0xff]  ;;  %v4114_v30 = vadd.f32 %v4113_v45, %v4094_v21  ;;  %v3370_v22 = vld [vmem:[#allocation7 + $0x6b0] sm:$0xff] }
 0x3d5   :  { %4538 = vmatpush.msra.mxu3 %v3943_v26  ;;  %4612 = vmatmul.f32.vlgmr.msrb.gmra.mxu2 %v7309_v60  ;;  %v3809_v26 = vld [vmem:[#allocation7 + $0x1468] sm:$0xff]  ;;  %v4173_v21 = vpop.f32.mrf.mxu0 }
 0x3d6   :  { %4676 = vmatpush.msra.mxu2 %v3714_v28  ;;  %4720 = vmatpush.msrb.mxu0 %v3854_v15  ;;  %v3893_v28 = vld [vmem:[#allocation7 + $0x1708] sm:$0xff]  ;;  %v3664_v15 = vld [vmem:[#allocation7 + $0xfe0] sm:$0xff] }
 0x3d7   :  { %4738 = vmatpush.msrb.mxu1 %v3944_v33  ;;  %4539 = vmatpush.msra.mxu3 %v3938_v9  ;;  %v3804_v33 = vld [vmem:[#allocation7 + $0x1440] sm:$0xff]  ;;  %v4134_v9 = vadd.f32 %v4133_v24, %v4114_v30  ;;  %v3449_v24 = vld [vmem:[#allocation7 + $0x928] sm:$0xff] }
 0x3d8   :  { %4677 = vmatpush.msra.mxu2 %v3709_v57  ;;  %4721 = vmatpush.msrb.mxu0 %v3849_v34  ;;  %v3888_v57 = vld [vmem:[#allocation7 + $0x16e0] sm:$0xff]  ;;  %v3659_v34 = vld [vmem:[#allocation7 + $0xfb8] sm:$0xff] }
 0x3d9   :  { %4739 = vmatpush.msrb.mxu1 %v3939_v53  ;;  %4540 = vmatpush.msra.mxu3 %v3933_v51  ;;  %v3889_v51 = vld [vmem:[#allocation7 + $0x16e8] sm:$0xff] }
 0x3da   :  { %4678 = vmatpush.msra.mxu2 %v3704_v39  ;;  %4722 = vmatpush.msrb.mxu0 %v3844_v4  ;;  %v3395_v4 = vld [vmem:[#allocation7 + $0x778] sm:$0xff] }
 0x3db   :  { %4740 = vmatpush.msrb.mxu1 %v3934_v63  ;;  %4541 = vmatpush.msra.mxu3 %v3928_v5  ;;  %v3654_v63 = vld [vmem:[#allocation7 + $0xf90] sm:$0xff]  ;;  %v3884_v5 = vld [vmem:[#allocation7 + $0x16c0] sm:$0xff] }
 0x3dc   :  { %4679 = vmatpush.msra.mxu2 %v3699_v18  ;;  %4723 = vmatpush.msrb.mxu0 %v3839_v2  ;;  %v3390_v2 = vld [vmem:[#allocation7 + $0x750] sm:$0xff]  ;;  %v4213_v30 = vpop.f32.mrf.mxu2 }
 0x3dd   :  { %4741 = vmatpush.msrb.mxu1 %v3929_v14  ;;  %4542 = vmatpush.msra.mxu3 %v3923_v25  ;;  %v3878_v14 = vld [vmem:[#allocation7 + $0x1690] sm:$0xff]  ;;  %v3649_v25 = vld [vmem:[#allocation7 + $0xf68] sm:$0xff] }
 0x3de   :  { %4680 = vmatpush.msra.mxu2 %v3694_v46  ;;  %4724 = vmatpush.msrb.mxu0 %v3834_v37  ;;  %v3474_v46 = vld [vmem:[#allocation7 + $0x9f0] sm:$0xff]  ;;  %v3385_v37 = vld [vmem:[#allocation7 + $0x728] sm:$0xff] }
 0x3df   :  { %4742 = vmatpush.msrb.mxu1 %v3924_v38  ;;  %4543 = vmatpush.msra.mxu3 %v3918_v29  ;;  %v3475_v38 = vld [vmem:[#allocation7 + $0x9f8] sm:$0xff]  ;;  %v3644_v29 = vld [vmem:[#allocation7 + $0xf40] sm:$0xff] }
 0x3e0   :  { %4681 = vmatpush.msra.mxu2 %v3689_v55  ;;  %4725 = vmatpush.msrb.mxu0 %v3829_v41  ;;  %v3469_v55 = vld [vmem:[#allocation7 + $0x9c8] sm:$0xff]  ;;  %v3380_v41 = vld [vmem:[#allocation7 + $0x700] sm:$0xff] }
 0x3e1   :  { %4743 = vmatpush.msrb.mxu1 %v3919_v42  ;;  %4544 = vmatpush.msra.mxu3 %v3913_v48  ;;  %v3470_v42 = vld [vmem:[#allocation7 + $0x9d0] sm:$0xff]  ;;  %v3639_v48 = vld [vmem:[#allocation7 + $0xf18] sm:$0xff] }
 0x3e2   :  { %4682 = vmatpush.msra.mxu2 %v3684_v35  ;;  %4726 = vmatpush.msrb.mxu0 %v3824_v23  ;;  %v3464_v35 = vld [vmem:[#allocation7 + $0x9a0] sm:$0xff] }
 0x3e3   :  { %4744 = vmatpush.msrb.mxu1 %v3914_v49  ;;  %4545 = vmatpush.msra.mxu3 %v3908_v36  ;;  %v3235_v49 = vld [vmem:[#allocation7 + $0x278] sm:$0xff] }
 0x3e4   :  { %4683 = vmatpush.msra.mxu2 %v3679_v47  ;;  %4727 = vmatpush.msrb.mxu0 %v3819_v10  ;;  %v3375_v36 = vld [vmem:[#allocation7 + $0x6d8] sm:$0xff]  ;;  %v3230_v10 = vld [vmem:[#allocation7 + $0x250] sm:$0xff] }
 0x3e5   :  { %4745 = vmatpush.msrb.mxu1 %v3909_v50  ;;  %4546 = vmatpush.msra.mxu3 %v3903_v54  ;;  %v3460_v50 = vld [vmem:[#allocation7 + $0x980] sm:$0xff]  ;;  %v3454_v54 = vld [vmem:[#allocation7 + $0x950] sm:$0xff] }
 0x3e6   :  { %4684 = vmatpush.msra.mxu2 %v3674_v59  ;;  %4728 = vmatpush.msrb.mxu0 %v3814_v19  ;;  %v3225_v59 = vld [vmem:[#allocation7 + $0x228] sm:$0xff] }
 0x3e7   :  { %4746 = vmatpush.msrb.mxu1 %v3904_v58  ;;  %4547 = vmatpush.msra.mxu3 %v3898_v32  ;;  %v3365_v19 = vld [vmem:[#allocation7 + $0x688] sm:$0xff]  ;;  %v4193_v58 = vpop.f32.mrf.mxu1  ;;  %v3455_v32 = vld [vmem:[#allocation7 + $0x958] sm:$0xff] }
 0x3e8   :  { %4685 = vmatpush.msra.mxu2 %v3669_v31  ;;  %4729 = vmatpush.msrb.mxu0 %v3809_v26  ;;  %v4153_v53 = vpop.f32.mrf.mxu3  ;;  %v3220_v31 = vld [vmem:[#allocation7 + $0x200] sm:$0xff] }
 0x3e9   :  { %4747 = vmatpush.msrb.mxu1 %v3899_v62  ;;  %4548 = vmatpush.msra.mxu3 %v3893_v28  ;;  %v7417_v39 = vadd.f32 %v4153_v53, %v4134_v9  ;;  %v3360_v26 = vld [vmem:[#allocation7 + $0x660] sm:$0xff]  ;;  %v3450_v62 = vld [vmem:[#allocation7 + $0x930] sm:$0xff]  ;;  %v3215_v9 = vld [vmem:[#allocation7 + $0x1d8] sm:$0xff] }
 0x3ea   :  { %4686 = vmatpush.msra.mxu2 %v3664_v15  ;;  %4730 = vmatpush.msrb.mxu0 %v3804_v33  ;;  %v3444_v28 = vld [vmem:[#allocation7 + $0x900] sm:$0xff]  ;;  %v4194_v15 = vadd.f32 %v4193_v58, %v4173_v21  ;;  %v3715_v58 = vld [vmem:[#allocation7 + $0x1178] sm:$0xff] }
 0x3eb   :  { %4748 = vmatpush.msrb.mxu1 %v3894_v43  ;;  %4549 = vmatpush.msra.mxu3 %v3888_v57  ;;  %v4956_v18 = vrot.slane %v7417_v39, 4  ;;  %v3355_v43 = vld [vmem:[#allocation7 + $0x638] sm:$0xff]  ;;  %v3445_v57 = vld [vmem:[#allocation7 + $0x908] sm:$0xff] }
 0x3ec   :  { %4687 = vmatpush.msra.mxu2 %v3659_v34  ;;  %4731 = vmatpush.msrb.mxu0 %v3799_v61  ;;  %v3439_v34 = vld [vmem:[#allocation7 + $0x8d8] sm:$0xff]  ;;  %v4214_v53 = vadd.f32 %v4213_v30, %v4194_v15 }
 0x3ed   :  { %4749 = vmatpush.msrb.mxu1 %v3889_v51  ;;  %4732 = vmatmul.f32.vlgmr.msrb.gmra.mxu0 %v7370_v12  ;;  %v4957_v17 = vadd.f32 %v4956_v18, %v7417_v39  ;;  %v3210_v51 = vld [vmem:[#allocation7 + $0x1b0] sm:$0xff]  ;;  %v3205_v18 = vld [vmem:[#allocation7 + $0x188] sm:$0xff] }
 0x3ee   :  { %4796 = vmatpush.msra.mxu0 %v3395_v4  ;;  %4550 = vmatpush.msra.mxu3 %v3883_v40  ;;  %v3350_v4 = vld [vmem:[#allocation7 + $0x610] sm:$0xff]  ;;  %v3440_v40 = vld [vmem:[#allocation7 + $0x8e0] sm:$0xff] }
 0x3ef   :  { %4688 = vmatpush.msra.mxu2 %v3654_v63  ;;  %4750 = vmatpush.msrb.mxu1 %v3884_v5  ;;  %v4958_v56 = vrot.slane %v4957_v17, 2  ;;  %v3434_v63 = vld [vmem:[#allocation7 + $0x8b0] sm:$0xff] }
 0x3f0   :  { %4797 = vmatpush.msra.mxu0 %v3390_v2  ;;  %4551 = vmatpush.msra.mxu3 %v3878_v14  ;;  %v3345_v2 = vld [vmem:[#allocation7 + $0x5e8] sm:$0xff]  ;;  %v3435_v14 = vld [vmem:[#allocation7 + $0x8b8] sm:$0xff] }
 0x3f1   :  { %4689 = vmatpush.msra.mxu2 %v3649_v25  ;;  %4751 = vmatpush.msrb.mxu1 %v3879_v16  ;;  %v4959_v52 = vadd.f32 %v4958_v56, %v4957_v17  ;;  %v3429_v25 = vld [vmem:[#allocation7 + $0x888] sm:$0xff]  ;;  %v3200_v16 = vld [vmem:[#allocation7 + $0x160] sm:$0xff] }
 0x3f2   :  { %4552 = vmatmul.f32.vlgmr.msra.gmra.mxu3 %v7397_v3  ;;  %4752 = vmatmul.f32.vlgmr.msrb.gmra.mxu1 %v7397_v3  ;;  %v3340_v17 = vld [vmem:[#allocation7 + $0x5c0] sm:$0xff] }
 0x3f3   :  { %4616 = vmatpush.msrb.mxu3 %v3474_v46  ;;  %4798 = vmatpush.msra.mxu0 %v3385_v37  ;;  %v4960_v23 = vrot.slane %v4959_v52, 1  ;;  %v4253_v46 = vpop.f32.mrf.mxu0  ;;  %v3430_v37 = vld [vmem:[#allocation7 + $0x890] sm:$0xff]  ;;  %v3424_v56 = vld [vmem:[#allocation7 + $0x860] sm:$0xff] }
 0x3f4   :  { %4816 = vmatpush.msra.mxu1 %v3475_v38  ;;  %4690 = vmatpush.msra.mxu2 %v3644_v29  ;;  %v4233_v61 = vpop.f32.mrf.mxu3 }
 0x3f5   :  { %4617 = vmatpush.msrb.mxu3 %v3469_v55  ;;  %4799 = vmatpush.msra.mxu0 %v3380_v41  ;;  %v4961_v47 = vadd.f32 %v4960_v23, %v4959_v52  ;;  %v4234_v5 = vadd.f32 %v4233_v61, %v4214_v53  ;;  %v3195_v55 = vld [vmem:[#allocation7 + $0x138] sm:$0xff]  ;;  %v3425_v52 = vld [vmem:[#allocation7 + $0x868] sm:$0xff]  ;;  %v4273_v23 = vpop.f32.mrf.mxu1 }
 0x3f6   :  { %4817 = vmatpush.msra.mxu1 %v3470_v42  ;;  %4691 = vmatpush.msra.mxu2 %v3639_v48  ;;  %v3335_v41 = vld [vmem:[#allocation7 + $0x598] sm:$0xff]  ;;  %v3190_v48 = vld [vmem:[#allocation7 + $0x110] sm:$0xff] }
 0x3f7   :  { %4618 = vmatpush.msrb.mxu3 %v3464_v35  ;;  %4692 = vmatmul.f32.vlgmr.msra.gmra.mxu2 %v7345_v0  ;;  %v4986_v45 = vmul.f32 %v4961_v47, %v7034_v27  ;;  %v4254_v29 = vadd.f32 %v4253_v46, %v4234_v5  ;;  %v3419_v42 = vld [vmem:[#allocation7 + $0x838] sm:$0xff]  ;;  %v3330_v35 = vld [vmem:[#allocation7 + $0x570] sm:$0xff]  ;;  %v3325_v47 = vld [vmem:[#allocation7 + $0x548] sm:$0xff] }
 0x3f8   :  { %4756 = vmatpush.msrb.mxu2 %v3235_v49  ;;  %4800 = vmatpush.msra.mxu0 %v3375_v36  ;;  %v3420_v49 = vld [vmem:[#allocation7 + $0x840] sm:$0xff]  ;;  %v3414_v36 = vld [vmem:[#allocation7 + $0x810] sm:$0xff]  ;;  %v3695_v46 = vld [vmem:[#allocation7 + $0x10d8] sm:$0xff] }
 0x3f9   :  { %4818 = vmatpush.msra.mxu1 %v3465_v1  ;;  %4619 = vmatpush.msrb.mxu3 %v3459_v8  ;;  %v7427_v33 = vsub.f32 %v7417_v39, %v4986_v45  ;;  %v3185_v8 = vld [vmem:[#allocation7 + $0xe8] sm:$0xff]  ;;  %v3320_v45 = vld [vmem:[#allocation7 + $0x520] sm:$0xff] }
 0x3fa   :  { %4757 = vmatpush.msrb.mxu2 %v3230_v10  ;;  %4801 = vmatpush.msra.mxu0 %v3370_v22  ;;  %v4274_v10 = vadd.f32 %v4273_v23, %v4254_v29  ;;  %v3415_v22 = vld [vmem:[#allocation7 + $0x818] sm:$0xff]  ;;  %v3700_v5 = vld [vmem:[#allocation7 + $0x1100] sm:$0xff]  ;;  %v3550_v29 = vld [vmem:[#allocation7 + $0xc50] sm:$0xff] }
 0x3fb   :  { %4819 = vmatpush.msra.mxu1 %v3460_v50  ;;  %4620 = vmatpush.msrb.mxu3 %v3454_v54  ;;  %v4996_v39 = vmul.f32 %v7427_v33, %v7427_v33  ;;  %v3409_v50 = vld [vmem:[#allocation7 + $0x7e8] sm:$0xff]  ;;  %v3180_v54 = vld [vmem:[#allocation7 + $0xc0] sm:$0xff] }
 0x3fc   :  { %4758 = vmatpush.msrb.mxu2 %v3225_v59  ;;  %4802 = vmatpush.msra.mxu0 %v3365_v19  ;;  %v4293_v59 = vpop.f32.mrf.mxu2  ;;  %v3410_v19 = vld [vmem:[#allocation7 + $0x7f0] sm:$0xff]  ;;  %v3685_v23 = vld [vmem:[#allocation7 + $0x1088] sm:$0xff] }
 0x3fd   :  { %4820 = vmatpush.msra.mxu1 %v3455_v32  ;;  %4621 = vmatpush.msrb.mxu3 %v3449_v24  ;;  %v5001_v38 = vrot.slane %v4996_v39, 4  ;;  %v3404_v32 = vld [vmem:[#allocation7 + $0x7c0] sm:$0xff]  ;;  %v4294_v24 = vadd.f32 %v4293_v59, %v4274_v10  ;;  %v4353_v53 = vpop.f32.mrf.mxu1  ;;  %v3770_v10 = vld [vmem:[#allocation7 + $0x1330] sm:$0xff]  ;;  %v3765_v59 = vld [vmem:[#allocation7 + $0x1308] sm:$0xff] }
 0x3fe   :  { %4759 = vmatpush.msrb.mxu2 %v3220_v31  ;;  %4803 = vmatpush.msra.mxu0 %v3360_v26  ;;  %v3175_v31 = vld [vmem:[#allocation7 + $0x98] sm:$0xff]  ;;  %v3405_v26 = vld [vmem:[#allocation7 + $0x7c8] sm:$0xff] }
 0x3ff   :  { %4821 = vmatpush.msra.mxu1 %v3450_v62  ;;  %4622 = vmatpush.msrb.mxu3 %v3444_v28  ;;  %v5002_v1 = vadd.f32 %v5001_v38, %v4996_v39  ;;  %v3710_v62 = vld [vmem:[#allocation7 + $0x1150] sm:$0xff]  ;;  %v3399_v28 = vld [vmem:[#allocation7 + $0x798] sm:$0xff]  ;;  %v3789_v39 = vld [vmem:[#allocation7 + $0x13c8] sm:$0xff] }
 0x400   :  { %4760 = vmatpush.msrb.mxu2 %v3215_v9  ;;  %4804 = vmatpush.msra.mxu0 %v3355_v43  ;;  %v4333_v9 = vpop.f32.mrf.mxu0  ;;  %v3170_v43 = vld [vmem:[#allocation7 + $0x70] sm:$0xff] }
 0x401   :  { %4822 = vmatpush.msra.mxu1 %v3445_v57  ;;  %4623 = vmatpush.msrb.mxu3 %v3439_v34  ;;  %v5003_v21 = vrot.slane %v5002_v1, 2  ;;  %v3400_v57 = vld [vmem:[#allocation7 + $0x7a0] sm:$0xff] }
 0x402   :  { %4761 = vmatpush.msrb.mxu2 %v3210_v51  ;;  %4805 = vmatpush.msra.mxu0 %v3350_v4  ;;  %v3794_v51 = vld [vmem:[#allocation7 + $0x13f0] sm:$0xff]  ;;  %v3705_v4 = vld [vmem:[#allocation7 + $0x1128] sm:$0xff] }
 0x403   :  { %4823 = vmatpush.msra.mxu1 %v3440_v40  ;;  %4624 = vmatpush.msrb.mxu3 %v3434_v63  ;;  %v5004_v34 = vadd.f32 %v5003_v21, %v5002_v1  ;;  %v3165_v40 = vld [vmem:[#allocation7 + $0x48] sm:$0xff] }
 0x404   :  { %4762 = vmatpush.msrb.mxu2 %v3205_v18  ;;  %4806 = vmatpush.msra.mxu0 %v3345_v2  ;;  %v3790_v2 = vld [vmem:[#allocation7 + $0x13d0] sm:$0xff] }
 0x405   :  { %4824 = vmatpush.msra.mxu1 %v3435_v14  ;;  %4625 = vmatpush.msrb.mxu3 %v3429_v25  ;;  %v5005_v18 = vrot.slane %v5004_v34, 1  ;;  %v3160_v14 = vld [vmem:[#allocation7 + $0x20] sm:$0xff] }
 0x406   :  { %4763 = vmatpush.msrb.mxu2 %v3200_v16  ;;  %4807 = vmatpush.msra.mxu0 %v3340_v17  ;;  %v3784_v16 = vld [vmem:[#allocation7 + $0x13a0] sm:$0xff]  ;;  %v3555_v17 = vld [vmem:[#allocation7 + $0xc78] sm:$0xff] }
 0x407   :  { %4825 = vmatpush.msra.mxu1 %v3430_v37  ;;  %4626 = vmatpush.msrb.mxu3 %v3424_v56  ;;  %v3779_v56 = vld [vmem:[#allocation7 + $0x1378] sm:$0xff]  ;;  %v5006_v38 = vadd.f32 %v5005_v18, %v5004_v34  ;;  %v3660_v34 = vld [vmem:[#allocation7 + $0xfc0] sm:$0xff]  ;;  %v3650_v18 = vld [vmem:[#allocation7 + $0xf70] sm:$0xff] }
 0x408   :  { %4764 = vmatpush.msrb.mxu2 %v3195_v55  ;;  %4808 = vmatpush.msra.mxu0 %v3335_v41  ;;  %v3690_v55 = vld [vmem:[#allocation7 + $0x10b0] sm:$0xff] }
 0x409   :  { %4826 = vmatpush.msra.mxu1 %v3425_v52  ;;  %4627 = vmatpush.msrb.mxu3 %v3419_v42  ;;  %v3780_v52 = vld [vmem:[#allocation7 + $0x1380] sm:$0xff]  ;;  %v3774_v42 = vld [vmem:[#allocation7 + $0x1350] sm:$0xff]  ;;  %v5031_v1 = vmul.f32 %v5006_v38, %v7034_v27 }
 0x40a   :  { %4765 = vmatpush.msrb.mxu2 %v3190_v48  ;;  %4809 = vmatpush.msra.mxu0 %v3330_v35  ;;  %v3545_v35 = vld [vmem:[#allocation7 + $0xc28] sm:$0xff]  ;;  %v3500_v38 = vld [vmem:[#allocation7 + $0xac0] sm:$0xff] }
 0x40b   :  { %4827 = vmatpush.msra.mxu1 %v3420_v49  ;;  %4628 = vmatpush.msrb.mxu3 %v3414_v36  ;;  %v3775_v49 = vld [vmem:[#allocation7 + $0x1358] sm:$0xff]  ;;  %v3769_v36 = vld [vmem:[#allocation7 + $0x1328] sm:$0xff]  ;;  %v7440_v21 = vadd.f32 1e-05, %v5031_v1 }
 0x40c   :  { %4766 = vmatpush.msrb.mxu2 %v3185_v8  ;;  %4810 = vmatpush.msra.mxu0 %v3325_v47  ;;  %v3540_v8 = vld [vmem:[#allocation7 + $0xc00] sm:$0xff]  ;;  %v3719_v1 = vld [vmem:[#allocation7 + $0x1198] sm:$0xff] }
 0x40d   :  { %4828 = vmatpush.msra.mxu1 %v3415_v22  ;;  %4629 = vmatpush.msrb.mxu3 %v3409_v50  ;;  %v3680_v47 = vld [vmem:[#allocation7 + $0x1060] sm:$0xff]  ;;  %6225 = vrsqrt.f32 %v7440_v21  ;;  %vm5047_vm0 = vweird.f32 %v7440_v21 }
 0x40e   :  { %4767 = vmatpush.msrb.mxu2 %v3180_v54  ;;  %4811 = vmatpush.msra.mxu0 %v3320_v45  ;;  %v4313_v30 = vpop.f32.mrf.mxu3  ;;  %v3764_v22 = vld [vmem:[#allocation7 + $0x1300] sm:$0xff]  ;;  %v3535_v54 = vld [vmem:[#allocation7 + $0xbd8] sm:$0xff] }
 0x40f   :  { %4829 = vmatpush.msra.mxu1 %v3410_v19  ;;  %4812 = vmatmul.f32.vlgmr.msra.gmra.mxu0 %v7309_v60  ;;  %v4314_v15 = vadd.f32 %v4313_v30, %v4294_v24  ;;  %v3795_v60 = vld [vmem:[#allocation7 + $0x13f8] sm:$0xff]  ;;  %v3670_v24 = vld [vmem:[#allocation7 + $0x1010] sm:$0xff] }
 0x410   :  { %4876 = vmatpush.msrb.mxu0 %v3715_v58  ;;  %4630 = vmatpush.msrb.mxu3 %v3404_v32  ;;  %v3675_v45 = vld [vmem:[#allocation7 + $0x1038] sm:$0xff]  ;;  %v3530_v32 = vld [vmem:[#allocation7 + $0xbb0] sm:$0xff] }
 0x411   :  { %4768 = vmatpush.msrb.mxu2 %v3175_v31  ;;  %4830 = vmatpush.msra.mxu1 %v3405_v26  ;;  %v4334_v61 = vadd.f32 %v4333_v9, %v4314_v15  ;;  %v3759_v19 = vld [vmem:[#allocation7 + $0x12d8] sm:$0xff]  ;;  %v3760_v31 = vld [vmem:[#allocation7 + $0x12e0] sm:$0xff]  ;;  %v3754_v26 = vld [vmem:[#allocation7 + $0x12b0] sm:$0xff] }
 0x412   :  { %4877 = vmatpush.msrb.mxu0 %v3710_v62  ;;  %4631 = vmatpush.msrb.mxu3 %v3399_v28  ;;  %v3525_v62 = vld [vmem:[#allocation7 + $0xb88] sm:$0xff]  ;;  %v3755_v15 = vld [vmem:[#allocation7 + $0x12b8] sm:$0xff] }
 0x413   :  { %4769 = vmatpush.msrb.mxu2 %v3170_v43  ;;  %4831 = vmatpush.msra.mxu1 %v3400_v57  ;;  %v7432_v63 = vadd.f32 %v4353_v53, %v4334_v61  ;;  %v3665_v28 = vld [vmem:[#allocation7 + $0xfe8] sm:$0xff]  ;;  %v3520_v57 = vld [vmem:[#allocation7 + $0xb60] sm:$0xff]  ;;  %v3750_v61 = vld [vmem:[#allocation7 + $0x1290] sm:$0xff] }
 0x414   :  { %4632 = vmatmul.f32.vlgmr.msrb.gmra.mxu3 %v7311_v7  ;;  %4832 = vmatmul.f32.vlgmr.msra.gmra.mxu1 %v7311_v7  ;;  %v3785_v7 = vld [vmem:[#allocation7 + $0x13a8] sm:$0xff]  ;;  %v3744_v53 = vld [vmem:[#allocation7 + $0x1260] sm:$0xff] }
 0x415   :  { %4696 = vmatpush.msra.mxu3 %v3794_v51  ;;  %4878 = vmatpush.msrb.mxu0 %v3705_v4  ;;  %v4962_v25 = vrot.slane %v7432_v63, 4  ;;  %v3749_v9 = vld [vmem:[#allocation7 + $0x1288] sm:$0xff]  ;;  %v3515_v4 = vld [vmem:[#allocation7 + $0xb38] sm:$0xff] }
 0x416   :  { %4896 = vmatpush.msrb.mxu1 %v3795_v60  ;;  %4770 = vmatpush.msrb.mxu2 %v3165_v40  ;;  %v3655_v60 = vld [vmem:[#allocation7 + $0xf98] sm:$0xff]  ;;  %v3745_v40 = vld [vmem:[#allocation7 + $0x1268] sm:$0xff] }
 0x417   :  { %4697 = vmatpush.msra.mxu3 %v3789_v39  ;;  %4879 = vmatpush.msrb.mxu0 %v3700_v5  ;;  %v4963_v37 = vadd.f32 %v4962_v25, %v7432_v63  ;;  %v3510_v5 = vld [vmem:[#allocation7 + $0xb10] sm:$0xff]  ;;  %v7449_v25 = vpop.eup %6225 }
 0x418   :  { %4897 = vmatpush.msrb.mxu1 %v3790_v2  ;;  %4771 = vmatpush.msrb.mxu2 %v3160_v14  ;;  %v3740_v2 = vld [vmem:[#allocation7 + $0x1240] sm:$0xff]  ;;  %v3734_v14 = vld [vmem:[#allocation7 + $0x1210] sm:$0xff]  ;;  %vm5048_vm15 = vweird.f32 %v7449_v25 }
 0x419   :  { %4698 = vmatpush.msra.mxu3 %v3784_v16  ;;  %4772 = vmatmul.f32.vlgmr.msrb.gmra.mxu2 %v7216_v44  ;;  %v4964_v41 = vrot.slane %v4963_v37, 2  ;;  %vm7472_vm1 = vmor %vm5047_vm0, %vm5048_vm15 }
 0x41a   :  { %4836 = vmatpush.msra.mxu2 %v3555_v17  ;;  %4880 = vmatpush.msrb.mxu0 %v3695_v46  ;;  %v3505_v17 = vld [vmem:[#allocation7 + $0xae8] sm:$0xff] }
 0x41b   :  { %4898 = vmatpush.msrb.mxu1 %v3785_v7  ;;  %4699 = vmatpush.msra.mxu3 %v3779_v56  ;;  %v4965_v48 = vadd.f32 %v4964_v41, %v4963_v37  ;;  %v3645_v46 = vld [vmem:[#allocation7 + $0xf48] sm:$0xff]  ;;  %v3735_v37 = vld [vmem:[#allocation7 + $0x1218] sm:$0xff]  ;;  %v3730_v41 = vld [vmem:[#allocation7 + $0x11f0] sm:$0xff] }
 0x41c   :  { %4837 = vmatpush.msra.mxu2 %v3550_v29  ;;  %4881 = vmatpush.msrb.mxu0 %v3690_v55  ;;  %v3729_v7 = vld [vmem:[#allocation7 + $0x11e8] sm:$0xff]  ;;  %v3640_v29 = vld [vmem:[#allocation7 + $0xf20] sm:$0xff]  ;;  %v5042_v55 = vmul.f32 %v7449_v25, %v7440_v21 }
 0x41d   :  { %4899 = vmatpush.msrb.mxu1 %v3780_v52  ;;  %v4966_v44 = vrot.slane %v4965_v48, 1  ;;  %4700 = vmatpush.msra.mxu3 %v3774_v42  ;;  %v5180_v42 = vld [vmem:[#allocation8 + $0x168] sm:$0xff] }
 0x41e   :  { %4838 = vmatpush.msra.mxu2 %v3545_v35  ;;  %4882 = vmatpush.msrb.mxu0 %v3685_v23  ;;  %v3495_v35 = vld [vmem:[#allocation7 + $0xa98] sm:$0xff]  ;;  %v3725_v23 = vld [vmem:[#allocation7 + $0x11c8] sm:$0xff] }
 0x41f   :  { %v4967_v50 = vadd.f32 %v4966_v44, %v4965_v48  ;;  %4900 = vmatpush.msrb.mxu1 %v3775_v49  ;;  %4701 = vmatpush.msra.mxu3 %v3769_v36  ;;  %v3724_v48 = vld [vmem:[#allocation7 + $0x11c0] sm:$0xff]  ;;  %v5177_v36 = vld [vmem:[#allocation8 + $0x150] sm:$0xff]  ;;  %v5043_v44 = vmul.f32 %v7449_v25, %v5042_v55 }
 0x420   :  { %4839 = vmatpush.msra.mxu2 %v3540_v8  ;;  %4883 = vmatpush.msrb.mxu0 %v3680_v47  ;;  %v3490_v8 = vld [vmem:[#allocation7 + $0xa70] sm:$0xff]  ;;  %v3720_v47 = vld [vmem:[#allocation7 + $0x11a0] sm:$0xff] }
 0x421   :  { %v4987_v58 = vmul.f32 %v4967_v50, %v7034_v27  ;;  %4901 = vmatpush.msrb.mxu1 %v3770_v10  ;;  %4702 = vmatpush.msra.mxu3 %v3764_v22  ;;  %v3315_v22 = vld [vmem:[#allocation7 + $0x4f8] sm:$0xff] }
 0x422   :  { %4840 = vmatpush.msra.mxu2 %v3535_v54  ;;  %4884 = vmatpush.msrb.mxu0 %v3675_v45  ;;  %v5174_v50 = vld [vmem:[#allocation8 + $0x138] sm:$0xff]  ;;  %v3485_v45 = vld [vmem:[#allocation7 + $0xa48] sm:$0xff] }
 0x423   :  { %v7444_v30 = vsub.f32 %v7432_v63, %v4987_v58  ;;  %4902 = vmatpush.msrb.mxu1 %v3765_v59  ;;  %4703 = vmatpush.msra.mxu3 %v3759_v19  ;;  %v3739_v63 = vld [vmem:[#allocation7 + $0x1238] sm:$0xff]  ;;  %v5044_v59 = vmul.f32 0.5, %v5043_v44  ;;  %v3310_v19 = vld [vmem:[#allocation7 + $0x4d0] sm:$0xff]  ;;  %v5171_v58 = vld [vmem:[#allocation8 + $0x120] sm:$0xff] }
 0x424   :  { %4841 = vmatpush.msra.mxu2 %v3530_v32  ;;  %4885 = vmatpush.msrb.mxu0 %v3670_v24  ;;  %v5225_v32 = vld [vmem:[#allocation8 + $0x2d0] sm:$0xff]  ;;  %v3480_v24 = vld [vmem:[#allocation7 + $0xa20] sm:$0xff] }
 0x425   :  { %v4997_v43 = vmul.f32 %v7444_v30, %v7444_v30  ;;  %4903 = vmatpush.msrb.mxu1 %v3760_v31  ;;  %4704 = vmatpush.msra.mxu3 %v3754_v26  ;;  %v3305_v31 = vld [vmem:[#allocation7 + $0x4a8] sm:$0xff]  ;;  %v3875_v26 = vld [vmem:[#allocation7 + $0x1678] sm:$0xff]  ;;  %v5147_v44 = vld [vmem:[#allocation8 + $0x60] sm:$0xff] }
 0x426   :  { %4842 = vmatpush.msra.mxu2 %v3525_v62  ;;  %4886 = vmatpush.msrb.mxu0 %v3665_v28  ;;  %v5168_v62 = vld [vmem:[#allocation8 + $0x108] sm:$0xff]  ;;  %v5045_v28 = vsub.f32 1.5, %v5044_v59 }
 0x427   :  { %v5007_v51 = vrot.slane %v4997_v43, 4  ;;  %4904 = vmatpush.msrb.mxu1 %v3755_v15  ;;  %4705 = vmatpush.msra.mxu3 %v3749_v9  ;;  %v5222_v15 = vld [vmem:[#allocation8 + $0x2b8] sm:$0xff]  ;;  %v3870_v9 = vld [vmem:[#allocation7 + $0x1650] sm:$0xff]  ;;  %v5144_v59 = vld [vmem:[#allocation8 + $0x48] sm:$0xff] }
 0x428   :  { %4843 = vmatpush.msra.mxu2 %v3520_v57  ;;  %4887 = vmatpush.msrb.mxu0 %v3660_v34  ;;  %v5219_v57 = vld [vmem:[#allocation8 + $0x2a0] sm:$0xff]  ;;  %v3295_v34 = vld [vmem:[#allocation7 + $0x458] sm:$0xff] }
 0x429   :  { %v5008_v39 = vadd.f32 %v5007_v51, %v4997_v43  ;;  %4905 = vmatpush.msrb.mxu1 %v3750_v61  ;;  %4706 = vmatpush.msra.mxu3 %v3744_v53  ;;  %v5165_v43 = vld [vmem:[#allocation8 + $0xf0] sm:$0xff]  ;;  %v3865_v53 = vld [vmem:[#allocation7 + $0x1628] sm:$0xff]  ;;  %v5162_v51 = vld [vmem:[#allocation8 + $0xd8] sm:$0xff] }
 0x42a   :  { %4844 = vmatpush.msra.mxu2 %v3515_v4  ;;  %4888 = vmatpush.msrb.mxu0 %v3655_v60  ;;  %v5046_v4 = vmul.f32 %v7449_v25, %v5045_v28  ;;  %v3825_v28 = vld [vmem:[#allocation7 + $0x14e8] sm:$0xff] }
 0x42b   :  { %v5009_v16 = vrot.slane %v5008_v39, 2  ;;  %4906 = vmatpush.msrb.mxu1 %v3745_v40  ;;  %4707 = vmatpush.msra.mxu3 %v3739_v63  ;;  %v3290_v40 = vld [vmem:[#allocation7 + $0x430] sm:$0xff]  ;;  %v3860_v63 = vld [vmem:[#allocation7 + $0x1600] sm:$0xff] }
 0x42c   :  { %4845 = vmatpush.msra.mxu2 %v3510_v5  ;;  %4889 = vmatpush.msrb.mxu0 %v3650_v18  ;;  %v5213_v18 = vld [vmem:[#allocation8 + $0x270] sm:$0xff]  ;;  %v5050_v21 = vsel %vm7472_vm1, %v7449_v25, %v5046_v4  ;;  %v3815_v4 = vld [vmem:[#allocation7 + $0x1498] sm:$0xff] }
 0x42d   :  { %v5010_v56 = vadd.f32 %v5009_v16, %v5008_v39  ;;  %4907 = vmatpush.msrb.mxu1 %v3740_v2  ;;  %4708 = vmatpush.msra.mxu3 %v3734_v14  ;;  %v5159_v39 = vld [vmem:[#allocation8 + $0xc0] sm:$0xff]  ;;  %v3285_v2 = vld [vmem:[#allocation7 + $0x408] sm:$0xff]  ;;  %v3855_v16 = vld [vmem:[#allocation7 + $0x15d8] sm:$0xff]  ;;  %v5091_v25 = vmul.f32 %v5050_v21, %v7427_v33 }
 0x42e   :  { %4846 = vmatpush.msra.mxu2 %v3505_v17  ;;  %4890 = vmatpush.msrb.mxu0 %v3645_v46  ;;  %v5156_v17 = vld [vmem:[#allocation8 + $0xa8] sm:$0xff]  ;;  %v7479_v46 = vld [vmem:[#allocation16] sm:$0x1f]  ;;  %v3840_v33 = vld [vmem:[#allocation7 + $0x1560] sm:$0xff] }
 0x42f   :  { %v5011_v52 = vrot.slane %v5010_v56, 1  ;;  %4908 = vmatpush.msrb.mxu1 %v3735_v37  ;;  %4709 = vmatpush.msra.mxu3 %v3729_v7  ;;  %v5210_v7 = vld [vmem:[#allocation8 + $0x258] sm:$0xff]  ;;  %v3805_v14 = vld [vmem:[#allocation7 + $0x1448] sm:$0xff] }
 0x430   :  { %4847 = vmatpush.msra.mxu2 %v3500_v38  ;;  %4891 = vmatpush.msrb.mxu0 %v3640_v29  ;;  %v3850_v38 = vld [vmem:[#allocation7 + $0x15b0] sm:$0xff]  ;;  %v5178_v21 = vld [vmem:[#allocation8 + $0x158] sm:$0xff] }
 0x431   :  { %v5012_v49 = vadd.f32 %v5011_v52, %v5010_v56  ;;  %4909 = vmatpush.msrb.mxu1 %v3730_v41  ;;  %4892 = vmatmul.f32.vlgmr.msrb.gmra.mxu0 %v7345_v0  ;;  %v5228_v0 = vld [vmem:[#allocation8 + $0x2e8] sm:$0xff]  ;;  %v3280_v56 = vld [vmem:[#allocation7 + $0x3e0] sm:$0xff]  ;;  %v5153_v29 = vld [vmem:[#allocation8 + $0x90] sm:$0xff] }
 0x432   :  { %5375 = vmatpush.msra.mxu0 %v5180_v42  ;;  %4710 = vmatpush.msra.mxu3 %v3724_v48  ;;  %v5207_v41 = vld [vmem:[#allocation8 + $0x240] sm:$0xff]  ;;  %v3275_v52 = vld [vmem:[#allocation7 + $0x3b8] sm:$0xff]  ;;  %v5098_v42 = vperm.slane %v7479_v46, 0  ;;  %v3845_v48 = vld [vmem:[#allocation7 + $0x1588] sm:$0xff] }
 0x433   :  { %v5032_v10 = vmul.f32 %v5012_v49, %v7034_v27  ;;  %4848 = vmatpush.msra.mxu2 %v3495_v35  ;;  %4910 = vmatpush.msrb.mxu1 %v3725_v23  ;;  %v5150_v35 = vld [vmem:[#allocation8 + $0x78] sm:$0xff] }
 0x434   :  { %5376 = vmatpush.msra.mxu0 %v5177_v36  ;;  %4711 = vmatpush.msra.mxu3 %v3719_v1  ;;  %v7484_v23 = vld [vmem:[#allocation17] sm:$0x1f]  ;;  %v5204_v36 = vld [vmem:[#allocation8 + $0x228] sm:$0xff]  ;;  %v3270_v1 = vld [vmem:[#allocation7 + $0x390] sm:$0xff] }
 0x435   :  { %v7456_v54 = vadd.f32 1e-05, %v5032_v10  ;;  %4849 = vmatpush.msra.mxu2 %v3490_v8  ;;  %4911 = vmatpush.msrb.mxu1 %v3720_v47  ;;  %v5201_v47 = vld [vmem:[#allocation8 + $0x210] sm:$0xff]  ;;  %v3265_v10 = vld [vmem:[#allocation7 + $0x368] sm:$0xff] }
 0x436   :  { %4712 = vmatmul.f32.vlgmr.msra.gmra.mxu3 %v7343_v6  ;;  %4912 = vmatmul.f32.vlgmr.msrb.gmra.mxu1 %v7343_v6  ;;  %v3300_v6 = vld [vmem:[#allocation7 + $0x480] sm:$0xff] }
 0x437   :  { %6227 = vrsqrt.f32 %v7456_v54  ;;  %4776 = vmatpush.msrb.mxu3 %v3315_v22  ;;  %5377 = vmatpush.msra.mxu0 %v5174_v50  ;;  %vm5057_vm3 = vweird.f32 %v7456_v54  ;;  %v5108_v22 = vmul.f32 %v5098_v42, %v5091_v25  ;;  %v5115_v50 = vperm.slane %v7484_v23, 0  ;;  %v5169_v42 = vld [vmem:[#allocation8 + $0x110] sm:$0xff] }
 0x438   :  { %5395 = vmatpush.msra.mxu1 %v5228_v0  ;;  %4850 = vmatpush.msra.mxu2 %v3485_v45  ;;  %v5099_v0 = vperm.slane %v7479_v46, 1  ;;  %v3835_v45 = vld [vmem:[#allocation7 + $0x1538] sm:$0xff] }
 0x439   :  { %4777 = vmatpush.msrb.mxu3 %v3310_v19  ;;  %5378 = vmatpush.msra.mxu0 %v5171_v58  ;;  %v5198_v19 = vld [vmem:[#allocation8 + $0x1f8] sm:$0xff]  ;;  %v3260_v58 = vld [vmem:[#allocation7 + $0x340] sm:$0xff] }
 0x43a   :  { %5396 = vmatpush.msra.mxu1 %v5225_v32  ;;  %4851 = vmatpush.msra.mxu2 %v3480_v24  ;;  %v3830_v32 = vld [vmem:[#allocation7 + $0x1510] sm:$0xff] }
 0x43b   :  { %4778 = vmatpush.msrb.mxu3 %v3305_v31  ;;  %4852 = vmatmul.f32.vlgmr.msra.gmra.mxu2 %v7315_v13  ;;  %v5216_v13 = vld [vmem:[#allocation8 + $0x288] sm:$0xff]  ;;  %v5141_v24 = vld [vmem:[#allocation8 + $0x30] sm:$0xff]  ;;  %v5195_v31 = vld [vmem:[#allocation8 + $0x1e0] sm:$0xff] }
 0x43c   :  { %4916 = vmatpush.msrb.mxu2 %v3875_v26  ;;  %5379 = vmatpush.msra.mxu0 %v5168_v62  ;;  %v3255_v26 = vld [vmem:[#allocation7 + $0x318] sm:$0xff]  ;;  %v5125_v62 = vadd.f32 %v5115_v50, %v5108_v22 }
 0x43d   :  { %v7462_v61 = vpop.eup %6227  ;;  %5397 = vmatpush.msra.mxu1 %v5222_v15  ;;  %4779 = vmatpush.msrb.mxu3 %v3300_v6  ;;  %v5138_v15 = vld [vmem:[#allocation8 + $0x18] sm:$0xff]  ;;  %v5116_v6 = vperm.slane %v7484_v23, 1 }
 0x43e   :  { %v5052_v60 = vmul.f32 %v7462_v61, %v7456_v54  ;;  %4917 = vmatpush.msrb.mxu2 %v3870_v9  ;;  %5380 = vmatpush.msra.mxu0 %v5165_v43  ;;  %vm5058_vm2 = vweird.f32 %v7462_v61  ;;  %v5192_v9 = vld [vmem:[#allocation8 + $0x1c8] sm:$0xff]  ;;  %v3250_v43 = vld [vmem:[#allocation7 + $0x2f0] sm:$0xff] }
 0x43f   :  { %5398 = vmatpush.msra.mxu1 %v5219_v57  ;;  %4780 = vmatpush.msrb.mxu3 %v3295_v34  ;;  %vm5059_vm4 = vmor %vm5057_vm3, %vm5058_vm2  ;;  %v3820_v57 = vld [vmem:[#allocation7 + $0x14c0] sm:$0xff] }
 0x440   :  { %v5053_v5 = vmul.f32 %v7462_v61, %v5052_v60  ;;  %4918 = vmatpush.msrb.mxu2 %v3865_v53  ;;  %5381 = vmatpush.msra.mxu0 %v5162_v51  ;;  %v5135_v34 = vld [vmem:[#allocation8] sm:$0xff]  ;;  %v7495_v53 = vmax.f32 %v5125_v62, 0.0  ;;  %v3245_v51 = vld [vmem:[#allocation7 + $0x2c8] sm:$0xff] }
 0x441   :  { %5399 = vmatpush.msra.mxu1 %v5216_v13  ;;  %4781 = vmatpush.msrb.mxu3 %v3290_v40  ;;  %v5186_v13 = vld [vmem:[#allocation8 + $0x198] sm:$0xff]  ;;  %v3240_v40 = vld [vmem:[#allocation7 + $0x2a0] sm:$0xff] }
 0x442   :  { %v5054_v37 = vmul.f32 0.5, %v5053_v5  ;;  %4919 = vmatpush.msrb.mxu2 %v3860_v63  ;;  %5382 = vmatpush.msra.mxu0 %v5159_v39  ;;  %v3810_v63 = vld [vmem:[#allocation7 + $0x1470] sm:$0xff]  ;;  %v5183_v39 = vld [vmem:[#allocation8 + $0x180] sm:$0xff]  ;;  %v3635_v5 = vld [vmem:[#allocation7 + $0xef8] sm:$0xff] }
 0x443   :  { %5400 = vmatpush.msra.mxu1 %v5213_v18  ;;  %4782 = vmatpush.msrb.mxu3 %v3285_v2  ;;  %v5181_v18 = vld [vmem:[#allocation8 + $0x170] sm:$0xff]  ;;  %v5151_v62 = vld [vmem:[#allocation8 + $0x80] sm:$0xff] }
 0x444   :  { %v5055_v55 = vsub.f32 1.5, %v5054_v37  ;;  %4920 = vmatpush.msrb.mxu2 %v3855_v16  ;;  %5383 = vmatpush.msra.mxu0 %v5156_v17  ;;  %v4393_v16 = vpop.f32.mrf.mxu3  ;;  %v3630_v17 = vld [vmem:[#allocation7 + $0xed0] sm:$0xff]  ;;  %v3800_v37 = vld [vmem:[#allocation7 + $0x1420] sm:$0xff] }
 0x445   :  { %5401 = vmatpush.msra.mxu1 %v5210_v7  ;;  %4783 = vmatpush.msrb.mxu3 %v3280_v56  ;;  %v4373_v7 = vpop.f32.mrf.mxu2  ;;  %v3625_v56 = vld [vmem:[#allocation7 + $0xea8] sm:$0xff] }
 0x446   :  { %v5056_v49 = vmul.f32 %v7462_v61, %v5055_v55  ;;  %4921 = vmatpush.msrb.mxu2 %v3850_v38  ;;  %5384 = vmatpush.msra.mxu0 %v5153_v29  ;;  %v4394_v38 = vadd.f32 %v4393_v16, %v4373_v7  ;;  %v5175_v29 = vld [vmem:[#allocation8 + $0x140] sm:$0xff]  ;;  %v5136_v16 = vld [vmem:[#allocation8 + $0x8] sm:$0xff] }
 0x447   :  { %5402 = vmatpush.msra.mxu1 %v5207_v41  ;;  %4784 = vmatpush.msrb.mxu3 %v3275_v52  ;;  %v3620_v55 = vld [vmem:[#allocation7 + $0xe80] sm:$0xff]  ;;  %v4413_v41 = vpop.f32.mrf.mxu0  ;;  %v3615_v52 = vld [vmem:[#allocation7 + $0xe58] sm:$0xff] }
 0x448   :  { %v5060_v8 = vsel %vm5059_vm4, %v7462_v61, %v5056_v49  ;;  %4922 = vmatpush.msrb.mxu2 %v3845_v48  ;;  %5385 = vmatpush.msra.mxu0 %v5150_v35  ;;  %v5189_v61 = vld [vmem:[#allocation8 + $0x1b0] sm:$0xff]  ;;  %v4414_v25 = vadd.f32 %v4413_v41, %v4394_v38  ;;  %v5276_v35 = vld [vmem:[#allocation8 + $0x468] sm:$0xff]  ;;  %v5166_v49 = vld [vmem:[#allocation8 + $0xf8] sm:$0xff] }
 0x449   :  { %v5092_v54 = vmul.f32 %v5060_v8, %v7444_v30  ;;  %5403 = vmatpush.msra.mxu1 %v5204_v36  ;;  %4785 = vmatpush.msrb.mxu3 %v3270_v1  ;;  %v3610_v48 = vld [vmem:[#allocation7 + $0xe30] sm:$0xff]  ;;  %v4433_v36 = vpop.f32.mrf.mxu1  ;;  %v3605_v1 = vld [vmem:[#allocation7 + $0xe08] sm:$0xff]  ;;  %v3600_v8 = vld [vmem:[#allocation7 + $0xde0] sm:$0xff] }
 0x44a   :  { %4923 = vmatpush.msrb.mxu2 %v3840_v33  ;;  %5386 = vmatpush.msra.mxu0 %v5147_v44  ;;  %v5273_v33 = vld [vmem:[#allocation8 + $0x450] sm:$0xff]  ;;  %v4434_v44 = vadd.f32 %v4433_v36, %v4414_v25  ;;  %v5243_v7 = vld [vmem:[#allocation8 + $0x360] sm:$0xff] }
 0x44b   :  { %5404 = vmatpush.msra.mxu1 %v5201_v47  ;;  %4786 = vmatpush.msrb.mxu3 %v3265_v10  ;;  %v5109_v30 = vmul.f32 %v5099_v0, %v5092_v54  ;;  %v5270_v47 = vld [vmem:[#allocation8 + $0x438] sm:$0xff]  ;;  %v5160_v10 = vld [vmem:[#allocation8 + $0xc8] sm:$0xff]  ;;  %v5267_v0 = vld [vmem:[#allocation8 + $0x420] sm:$0xff] }
 0x44c   :  { %4924 = vmatpush.msrb.mxu2 %v3835_v45  ;;  %5387 = vmatpush.msra.mxu0 %v5144_v59  ;;  %v3595_v54 = vld [vmem:[#allocation7 + $0xdb8] sm:$0xff]  ;;  %v5157_v59 = vld [vmem:[#allocation8 + $0xb0] sm:$0xff]  ;;  %v3940_v25 = vld [vmem:[#allocation7 + $0x1880] sm:$0xff] }
 0x44d   :  { %5405 = vmatpush.msra.mxu1 %v5198_v19  ;;  %4787 = vmatpush.msrb.mxu3 %v3260_v58  ;;  %v5126_v60 = vadd.f32 %v5116_v6, %v5109_v30  ;;  %v4453_v22 = vpop.f32.mrf.mxu2  ;;  %v3590_v19 = vld [vmem:[#allocation7 + $0xd90] sm:$0xff]  ;;  %v5264_v58 = vld [vmem:[#allocation8 + $0x408] sm:$0xff] }
 0x44e   :  { %4925 = vmatpush.msrb.mxu2 %v3830_v32  ;;  %5388 = vmatpush.msra.mxu0 %v5141_v24  ;;  %v4454_v45 = vadd.f32 %v4453_v22, %v4434_v44  ;;  %v5154_v24 = vld [vmem:[#allocation8 + $0x98] sm:$0xff]  ;;  %v3950_v38 = vld [vmem:[#allocation7 + $0x18d0] sm:$0xff] }
 0x44f   :  { %5406 = vmatpush.msra.mxu1 %v5195_v31  ;;  %4788 = vmatpush.msrb.mxu3 %v3255_v26  ;;  %v7498_v2 = vmax.f32 %v5126_v60, 0.0  ;;  %v3585_v31 = vld [vmem:[#allocation7 + $0xd68] sm:$0xff]  ;;  %v5261_v26 = vld [vmem:[#allocation8 + $0x3f0] sm:$0xff]  ;;  %v4493_v30 = vpop.f32.mrf.mxu0  ;;  %v5142_v60 = vld [vmem:[#allocation8 + $0x38] sm:$0xff] }
 0x450   :  { %4926 = vmatpush.msrb.mxu2 %v3825_v28  ;;  %5389 = vmatpush.msra.mxu0 %v5138_v15  ;;  %v3580_v28 = vld [vmem:[#allocation7 + $0xd40] sm:$0xff]  ;;  %v5258_v15 = vld [vmem:[#allocation8 + $0x3d8] sm:$0xff]  ;;  %v5237_v41 = vld [vmem:[#allocation8 + $0x330] sm:$0xff] }
 0x451   :  { %5407 = vmatpush.msra.mxu1 %v5192_v9  ;;  %4789 = vmatpush.msrb.mxu3 %v3250_v43  ;;  %v5148_v9 = vld [vmem:[#allocation8 + $0x68] sm:$0xff]  ;;  %v3575_v43 = vld [vmem:[#allocation7 + $0xd18] sm:$0xff]  ;;  %v5229_v36 = vld [vmem:[#allocation8 + $0x2f0] sm:$0xff] }
 0x452   :  { %4927 = vmatpush.msrb.mxu2 %v3820_v57  ;;  %5390 = vmatpush.msra.mxu0 %v5135_v34  ;;  %v5255_v57 = vld [vmem:[#allocation8 + $0x3c0] sm:$0xff]  ;;  %v5145_v34 = vld [vmem:[#allocation8 + $0x50] sm:$0xff]  ;;  %v5226_v44 = vld [vmem:[#allocation8 + $0x2d8] sm:$0xff] }
 0x453   :  { %5408 = vmatpush.msra.mxu1 %v5189_v61  ;;  %5391 = vmatmul.f32.vlgmr.msra.gmra.mxu0 %v7495_v53  ;;  %v4473_v50 = vpop.f32.mrf.mxu3  ;;  %v4513_v61 = vpop.f32.mrf.mxu1 }
 0x454   :  { %4790 = vmatpush.msrb.mxu3 %v3245_v51  ;;  %4928 = vmatpush.msrb.mxu2 %v3815_v4  ;;  %v4474_v32 = vadd.f32 %v4473_v50, %v4454_v45  ;;  %v3570_v51 = vld [vmem:[#allocation7 + $0xcf0] sm:$0xff]  ;;  %v5252_v4 = vld [vmem:[#allocation8 + $0x3a8] sm:$0xff] }
 0x455   :  { %5409 = vmatpush.msra.mxu1 %v5186_v13  ;;  %v5220_v50 = vld [vmem:[#allocation8 + $0x2a8] sm:$0xff]  ;;  %v5217_v45 = vld [vmem:[#allocation8 + $0x290] sm:$0xff] }
 0x456   :  { %4791 = vmatpush.msrb.mxu3 %v3240_v40  ;;  %4929 = vmatpush.msrb.mxu2 %v3810_v63  ;;  %v4494_v6 = vadd.f32 %v4493_v30, %v4474_v32  ;;  %v3565_v40 = vld [vmem:[#allocation7 + $0xcc8] sm:$0xff]  ;;  %v5249_v63 = vld [vmem:[#allocation8 + $0x390] sm:$0xff] }
 0x457   :  { %5410 = vmatpush.msra.mxu1 %v5183_v39  ;;  %4792 = vmatmul.f32.vlgmr.msrb.gmra.mxu3 %v7218_v11  ;;  %v5172_v11 = vld [vmem:[#allocation8 + $0x128] sm:$0xff]  ;;  %v5139_v39 = vld [vmem:[#allocation8 + $0x20] sm:$0xff] }
 0x458   :  { %4856 = vmatpush.msra.mxu3 %v3635_v5  ;;  %4930 = vmatpush.msrb.mxu2 %v3805_v14  ;;  %v4514_v13 = vadd.f32 %v4513_v61, %v4494_v6  ;;  %v4533_v5 = vpop.f32.mrf.mxu2  ;;  %v5246_v14 = vld [vmem:[#allocation8 + $0x378] sm:$0xff]  ;;  %v3905_v32 = vld [vmem:[#allocation7 + $0x1768] sm:$0xff]  ;;  %v5205_v6 = vld [vmem:[#allocation8 + $0x230] sm:$0xff] }
 0x459   :  { %5475 = vmatpush.msrb.mxu1 %v5181_v18  ;;  %v3560_v18 = vld [vmem:[#allocation7 + $0xca0] sm:$0xff]  ;;  %v5208_v30 = vld [vmem:[#allocation8 + $0x248] sm:$0xff] }
 0x45a   :  { %5411 = vmatmul.f32.vlgmr.msra.gmra.mxu1 %v7498_v2  ;;  %4857 = vmatpush.msra.mxu3 %v3630_v17  ;;  %v4534_v17 = vadd.f32 %v4533_v5, %v4514_v13 }
 0x45b   :  { %5476 = vmatpush.msrb.mxu1 %v5178_v21  ;;  %4931 = vmatpush.msrb.mxu2 %v3800_v37  ;;  %v3955_v21 = vld [vmem:[#allocation7 + $0x18f8] sm:$0xff] }
 0x45c   :  { %4858 = vmatpush.msra.mxu3 %v3625_v56  ;;  %4932 = vmatmul.f32.vlgmr.msrb.gmra.mxu2 %v7370_v12  ;;  %v5163_v12 = vld [vmem:[#allocation8 + $0xe0] sm:$0xff] }
 0x45d   :  { %5477 = vmatpush.msrb.mxu1 %v5175_v29  ;;  %5415 = vmatpush.msra.mxu2 %v5276_v35  ;;  %v5240_v29 = vld [vmem:[#allocation8 + $0x348] sm:$0xff]  ;;  %v3935_v35 = vld [vmem:[#allocation7 + $0x1858] sm:$0xff] }
 0x45e   :  { %4859 = vmatpush.msra.mxu3 %v3620_v55 }
 0x45f   :  { %5478 = vmatpush.msrb.mxu1 %v5172_v11  ;;  %5416 = vmatpush.msra.mxu2 %v5273_v33  ;;  %v3945_v11 = vld [vmem:[#allocation7 + $0x18a8] sm:$0xff] }
 0x460   :  { %4860 = vmatpush.msra.mxu3 %v3615_v52 }
 0x461   :  { %5479 = vmatpush.msrb.mxu1 %v5169_v42  ;;  %5417 = vmatpush.msra.mxu2 %v5270_v47  ;;  %v5234_v42 = vld [vmem:[#allocation8 + $0x318] sm:$0xff]  ;;  %v5223_v47 = vld [vmem:[#allocation8 + $0x2c0] sm:$0xff] }
 0x462   :  { %4861 = vmatpush.msra.mxu3 %v3610_v48 }
 0x463   :  { %5480 = vmatpush.msrb.mxu1 %v5166_v49  ;;  %5418 = vmatpush.msra.mxu2 %v5267_v0  ;;  %v5231_v49 = vld [vmem:[#allocation8 + $0x300] sm:$0xff] }
 0x464   :  { %4862 = vmatpush.msra.mxu3 %v3605_v1  ;;  %v3930_v1 = vld [vmem:[#allocation7 + $0x1830] sm:$0xff] }
 0x465   :  { %5481 = vmatpush.msrb.mxu1 %v5163_v12  ;;  %5419 = vmatpush.msra.mxu2 %v5264_v58  ;;  %v3925_v12 = vld [vmem:[#allocation7 + $0x1808] sm:$0xff]  ;;  %v5214_v58 = vld [vmem:[#allocation8 + $0x278] sm:$0xff] }
 0x466   :  { %4863 = vmatpush.msra.mxu3 %v3600_v8 }
 0x467   :  { %5482 = vmatpush.msrb.mxu1 %v5160_v10  ;;  %5420 = vmatpush.msra.mxu2 %v5261_v26  ;;  %v3920_v10 = vld [vmem:[#allocation7 + $0x17e0] sm:$0xff] }
 0x468   :  { %4864 = vmatpush.msra.mxu3 %v3595_v54  ;;  %v3915_v54 = vld [vmem:[#allocation7 + $0x17b8] sm:$0xff]  ;;  %v3900_v26 = vld [vmem:[#allocation7 + $0x1740] sm:$0xff] }
 0x469   :  { %5483 = vmatpush.msrb.mxu1 %v5157_v59  ;;  %5421 = vmatpush.msra.mxu2 %v5258_v15  ;;  %v3910_v59 = vld [vmem:[#allocation7 + $0x1790] sm:$0xff] }
 0x46a   :  { %4865 = vmatpush.msra.mxu3 %v3590_v19 }
 0x46b   :  { %5484 = vmatpush.msrb.mxu1 %v5154_v24  ;;  %5422 = vmatpush.msra.mxu2 %v5255_v57  ;;  %v5202_v57 = vld [vmem:[#allocation8 + $0x218] sm:$0xff] }
 0x46c   :  { %4866 = vmatpush.msra.mxu3 %v3585_v31  ;;  %v5211_v31 = vld [vmem:[#allocation8 + $0x260] sm:$0xff] }
 0x46d   :  { %5485 = vmatpush.msrb.mxu1 %v5151_v62  ;;  %5423 = vmatpush.msra.mxu2 %v5252_v4  ;;  %v3880_v4 = vld [vmem:[#allocation7 + $0x16a0] sm:$0xff] }
 0x46e   :  { %4867 = vmatpush.msra.mxu3 %v3580_v28  ;;  %v3895_v28 = vld [vmem:[#allocation7 + $0x1718] sm:$0xff] }
 0x46f   :  { %5486 = vmatpush.msrb.mxu1 %v5148_v9  ;;  %5424 = vmatpush.msra.mxu2 %v5249_v63  ;;  %v3890_v9 = vld [vmem:[#allocation7 + $0x16f0] sm:$0xff] }
 0x470   :  { %4868 = vmatpush.msra.mxu3 %v3575_v43 }
 0x471   :  { %5487 = vmatpush.msrb.mxu1 %v5145_v34  ;;  %5425 = vmatpush.msra.mxu2 %v5246_v14  ;;  %v3885_v34 = vld [vmem:[#allocation7 + $0x16c8] sm:$0xff] }
 0x472   :  { %4869 = vmatpush.msra.mxu3 %v3570_v51  ;;  %v5199_v51 = vld [vmem:[#allocation8 + $0x200] sm:$0xff]  ;;  %v5184_v14 = vld [vmem:[#allocation8 + $0x188] sm:$0xff] }
 0x473   :  { %5488 = vmatpush.msrb.mxu1 %v5142_v60  ;;  %5426 = vmatpush.msra.mxu2 %v5243_v7  ;;  %v5196_v60 = vld [vmem:[#allocation8 + $0x1e8] sm:$0xff]  ;;  %v5321_v7 = vld [vmem:[#allocation8 + $0x5d0] sm:$0xff] }
 0x474   :  { %4870 = vmatpush.msra.mxu3 %v3565_v40  ;;  %v5193_v40 = vld [vmem:[#allocation8 + $0x1d0] sm:$0xff] }
 0x475   :  { %5489 = vmatpush.msrb.mxu1 %v5139_v39  ;;  %v4553_v37 = vpop.f32.mrf.mxu3  ;;  %5427 = vmatpush.msra.mxu2 %v5240_v29  ;;  %v5190_v39 = vld [vmem:[#allocation8 + $0x1b8] sm:$0xff] }
 0x476   :  { %4871 = vmatpush.msra.mxu3 %v3560_v18  ;;  %v4554_v56 = vadd.f32 %v4553_v37, %v4534_v17  ;;  %v5187_v18 = vld [vmem:[#allocation8 + $0x1a0] sm:$0xff]  ;;  %v5318_v29 = vld [vmem:[#allocation8 + $0x5b8] sm:$0xff] }
 0x477   :  { %5490 = vmatpush.msrb.mxu1 %v5136_v16  ;;  %4872 = vmatmul.f32.vlgmr.msra.gmra.mxu3 %v7317_v20 }
 0x478   :  { %4936 = vmatpush.msrb.mxu3 %v3955_v21  ;;  %5491 = vmatmul.f32.vlgmr.msrb.gmra.mxu1 %v7495_v53  ;;  %v4968_v55 = vrot.slane %v4554_v56, 4  ;;  %v5324_v21 = vld [vmem:[#allocation8 + $0x5e8] sm:$0xff] }
 0x479   :  { %5428 = vmatpush.msra.mxu2 %v5237_v41  ;;  %v5315_v41 = vld [vmem:[#allocation8 + $0x5a0] sm:$0xff] }
 0x47a   :  { %4937 = vmatpush.msrb.mxu3 %v3950_v38  ;;  %v4969_v52 = vadd.f32 %v4968_v55, %v4554_v56  ;;  %v4613_v55 = vpop.f32.mrf.mxu2 }
 0x47b   :  { %5429 = vmatpush.msra.mxu2 %v5234_v42 }
 0x47c   :  { %4938 = vmatpush.msrb.mxu3 %v3945_v11  ;;  %v4970_v48 = vrot.slane %v4969_v52, 2 }
 0x47d   :  { %5430 = vmatpush.msra.mxu2 %v5231_v49  ;;  %v5100_v49 = vperm.slane %v7479_v46, 2 }
 0x47e   :  { %4939 = vmatpush.msrb.mxu3 %v3940_v25  ;;  %v4971_v20 = vadd.f32 %v4970_v48, %v4969_v52  ;;  %v5312_v48 = vld [vmem:[#allocation8 + $0x588] sm:$0xff] }
 0x47f   :  { %5495 = vmatpush.msrb.mxu2 %v5229_v36  ;;  %v5309_v36 = vld [vmem:[#allocation8 + $0x570] sm:$0xff] }
 0x480   :  { %v4972_v33 = vrot.slane %v4971_v20, 1  ;;  %4940 = vmatpush.msrb.mxu3 %v3935_v35 }
 0x481   :  { %5496 = vmatpush.msrb.mxu2 %v5226_v44 }
 0x482   :  { %v4973_v8 = vadd.f32 %v4972_v33, %v4971_v20  ;;  %4941 = vmatpush.msrb.mxu3 %v3930_v1  ;;  %v5117_v33 = vperm.slane %v7484_v23, 2 }
 0x483   :  { %5497 = vmatpush.msrb.mxu2 %v5223_v47 }
 0x484   :  { %v4988_v22 = vmul.f32 %v4973_v8, %v7034_v27  ;;  %4942 = vmatpush.msrb.mxu3 %v3925_v12  ;;  %v5306_v12 = vld [vmem:[#allocation8 + $0x558] sm:$0xff] }
 0x485   :  { %5498 = vmatpush.msrb.mxu2 %v5220_v50 }
 0x486   :  { %v7506_v0 = vsub.f32 %v4554_v56, %v4988_v22  ;;  %4943 = vmatpush.msrb.mxu3 %v3920_v10  ;;  %v4593_v56 = vpop.f32.mrf.mxu1  ;;  %v5303_v10 = vld [vmem:[#allocation8 + $0x540] sm:$0xff] }
 0x487   :  { %5499 = vmatpush.msrb.mxu2 %v5217_v45 }
 0x488   :  { %v4998_v19 = vmul.f32 %v7506_v0, %v7506_v0  ;;  %4944 = vmatpush.msrb.mxu3 %v3915_v54  ;;  %v5300_v54 = vld [vmem:[#allocation8 + $0x528] sm:$0xff] }
 0x489   :  { %5500 = vmatpush.msrb.mxu2 %v5214_v58  ;;  %v5297_v58 = vld [vmem:[#allocation8 + $0x510] sm:$0xff] }
 0x48a   :  { %v5013_v24 = vrot.slane %v4998_v19, 4  ;;  %4945 = vmatpush.msrb.mxu3 %v3910_v59  ;;  %v5182_v59 = vld [vmem:[#allocation8 + $0x178] sm:$0xff] }
 0x48b   :  { %5501 = vmatpush.msrb.mxu2 %v5211_v31  ;;  %v5176_v31 = vld [vmem:[#allocation8 + $0x148] sm:$0xff] }
 0x48c   :  { %v5014_v62 = vadd.f32 %v5013_v24, %v4998_v19  ;;  %4946 = vmatpush.msrb.mxu3 %v3905_v32  ;;  %v5179_v32 = vld [vmem:[#allocation8 + $0x160] sm:$0xff]  ;;  %v5294_v24 = vld [vmem:[#allocation8 + $0x4f8] sm:$0xff] }
 0x48d   :  { %5502 = vmatpush.msrb.mxu2 %v5208_v30 }
 0x48e   :  { %v5015_v15 = vrot.slane %v5014_v62, 2  ;;  %4947 = vmatpush.msrb.mxu3 %v3900_v26  ;;  %v4673_v19 = vpop.f32.mrf.mxu1  ;;  %v4693_v26 = vpop.f32.mrf.mxu2 }
 0x48f   :  { %5503 = vmatpush.msrb.mxu2 %v5205_v6  ;;  %v5288_v6 = vld [vmem:[#allocation8 + $0x4c8] sm:$0xff] }
 0x490   :  { %v5016_v43 = vadd.f32 %v5015_v15, %v5014_v62  ;;  %4948 = vmatpush.msrb.mxu3 %v3895_v28  ;;  %v5291_v62 = vld [vmem:[#allocation8 + $0x4e0] sm:$0xff]  ;;  %v5173_v28 = vld [vmem:[#allocation8 + $0x130] sm:$0xff] }
 0x491   :  { %5504 = vmatpush.msrb.mxu2 %v5202_v57 }
 0x492   :  { %v5017_v61 = vrot.slane %v5016_v43, 1  ;;  %4949 = vmatpush.msrb.mxu3 %v3890_v9 }
 0x493   :  { %5505 = vmatpush.msrb.mxu2 %v5199_v51  ;;  %v5167_v51 = vld [vmem:[#allocation8 + $0x100] sm:$0xff] }
 0x494   :  { %v5018_v13 = vadd.f32 %v5017_v61, %v5016_v43  ;;  %4950 = vmatpush.msrb.mxu3 %v3885_v34  ;;  %v5170_v43 = vld [vmem:[#allocation8 + $0x118] sm:$0xff]  ;;  %v5285_v34 = vld [vmem:[#allocation8 + $0x4b0] sm:$0xff] }
 0x495   :  { %5506 = vmatpush.msrb.mxu2 %v5196_v60  ;;  %v5282_v60 = vld [vmem:[#allocation8 + $0x498] sm:$0xff] }
 0x496   :  { %v5033_v63 = vmul.f32 %v5018_v13, %v7034_v27  ;;  %4951 = vmatpush.msrb.mxu3 %v3880_v4  ;;  %v4753_v4 = vpop.f32.mrf.mxu1 }
 0x497   :  { %4952 = vmatmul.f32.vlgmr.msrb.gmra.mxu3 %v7397_v3  ;;  %5507 = vmatpush.msrb.mxu2 %v5193_v40  ;;  %v4573_v3 = vpop.f32.mrf.mxu0  ;;  %v4633_v42 = vpop.f32.mrf.mxu3  ;;  %v5164_v40 = vld [vmem:[#allocation8 + $0xe8] sm:$0xff] }
 0x498   :  { %v5038_v5 = vadd.f32 1e-05, %v5033_v63  ;;  %5435 = vmatpush.msra.mxu3 %v5324_v21  ;;  %v4594_v52 = vadd.f32 %v4593_v56, %v4573_v3  ;;  %v5279_v63 = vld [vmem:[#allocation8 + $0x480] sm:$0xff] }
 0x499   :  { %5508 = vmatpush.msrb.mxu2 %v5190_v39 }
 0x49a   :  { %6229 = vrsqrt.f32 %v5038_v5  ;;  %5436 = vmatpush.msra.mxu3 %v5321_v7  ;;  %vm5067_vm6 = vweird.f32 %v5038_v5  ;;  %v4614_v35 = vadd.f32 %v4613_v55, %v4594_v52  ;;  %v5271_v7 = vld [vmem:[#allocation8 + $0x440] sm:$0xff]  ;;  %v5149_v55 = vld [vmem:[#allocation8 + $0x70] sm:$0xff]  ;;  %v5146_v52 = vld [vmem:[#allocation8 + $0x58] sm:$0xff] }
 0x49b   :  { %5509 = vmatpush.msrb.mxu2 %v5187_v18  ;;  %v5277_v18 = vld [vmem:[#allocation8 + $0x470] sm:$0xff] }
 0x49c   :  { %5437 = vmatpush.msra.mxu3 %v5318_v29  ;;  %v4634_v44 = vadd.f32 %v4633_v42, %v4614_v35  ;;  %v5268_v29 = vld [vmem:[#allocation8 + $0x428] sm:$0xff]  ;;  %v5259_v35 = vld [vmem:[#allocation8 + $0x3e0] sm:$0xff] }
 0x49d   :  { %5510 = vmatpush.msrb.mxu2 %v5184_v14 }
 0x49e   :  { %5438 = vmatpush.msra.mxu3 %v5315_v41 }
 0x49f   :  { %v4653_v47 = vpop.f32.mrf.mxu0 }
 0x4a0   :  { %v6230_v16 = vpop.eup %6229  ;;  %5439 = vmatpush.msra.mxu3 %v5312_v48  ;;  %v4654_v50 = vadd.f32 %v4653_v47, %v4634_v44  ;;  %v5143_v48 = vld [vmem:[#allocation8 + $0x40] sm:$0xff]  ;;  %v5253_v44 = vld [vmem:[#allocation8 + $0x3b0] sm:$0xff] }
 0x4a1   :  { %v5062_v17 = vmul.f32 %v6230_v16, %v5038_v5  ;;  %vm5068_vm5 = vweird.f32 %v6230_v16  ;;  %v5161_v5 = vld [vmem:[#allocation8 + $0xd0] sm:$0xff] }
 0x4a2   :  { %vm5069_vm7 = vmor %vm5067_vm6, %vm5068_vm5  ;;  %5440 = vmatpush.msra.mxu3 %v5309_v36  ;;  %v5256_v36 = vld [vmem:[#allocation8 + $0x3c8] sm:$0xff] }
 0x4a3   :  { %v5063_v37 = vmul.f32 %v6230_v16, %v5062_v17  ;;  %v5274_v17 = vld [vmem:[#allocation8 + $0x458] sm:$0xff] }
 0x4a4   :  { %5441 = vmatpush.msra.mxu3 %v5306_v12 }
 0x4a5   :  { %v5064_v38 = vmul.f32 0.5, %v5063_v37  ;;  %v5155_v37 = vld [vmem:[#allocation8 + $0xa0] sm:$0xff] }
 0x4a6   :  { %5442 = vmatpush.msra.mxu3 %v5303_v10  ;;  %v5247_v10 = vld [vmem:[#allocation8 + $0x380] sm:$0xff] }
 0x4a7   :  { %v5065_v11 = vsub.f32 1.5, %v5064_v38  ;;  %v4733_v57 = vpop.f32.mrf.mxu0  ;;  %v5152_v38 = vld [vmem:[#allocation8 + $0x88] sm:$0xff] }
 0x4a8   :  { %5443 = vmatpush.msra.mxu3 %v5300_v54  ;;  %v5241_v54 = vld [vmem:[#allocation8 + $0x350] sm:$0xff] }
 0x4a9   :  { %v5066_v25 = vmul.f32 %v6230_v16, %v5065_v11  ;;  %v5265_v11 = vld [vmem:[#allocation8 + $0x410] sm:$0xff] }
 0x4aa   :  { %5444 = vmatpush.msra.mxu3 %v5297_v58  ;;  %v5238_v58 = vld [vmem:[#allocation8 + $0x338] sm:$0xff] }
 0x4ab   :  { %v5070_v20 = vsel %vm5069_vm7, %v6230_v16, %v5066_v25  ;;  %v5158_v16 = vld [vmem:[#allocation8 + $0xb8] sm:$0xff] }
 0x4ac   :  { %v5093_v1 = vmul.f32 %v5070_v20, %v7506_v0  ;;  %v4674_v0 = vadd.f32 %v4673_v19, %v4654_v50  ;;  %5445 = vmatpush.msra.mxu3 %v5294_v24  ;;  %v5262_v25 = vld [vmem:[#allocation8 + $0x3f8] sm:$0xff]  ;;  %v5140_v20 = vld [vmem:[#allocation8 + $0x28] sm:$0xff] }
 0x4ad   :  { %v5244_v50 = vld [vmem:[#allocation8 + $0x368] sm:$0xff] }
 0x4ae   :  { %v5110_v8 = vmul.f32 %v5100_v49, %v5093_v1  ;;  %v4694_v30 = vadd.f32 %v4693_v26, %v4674_v0  ;;  %5446 = vmatpush.msra.mxu3 %v5291_v62  ;;  %v5232_v24 = vld [vmem:[#allocation8 + $0x308] sm:$0xff] }
 0x4b0   :  { %v5127_v22 = vadd.f32 %v5117_v33, %v5110_v8  ;;  %5447 = vmatpush.msra.mxu3 %v5288_v6  ;;  %v5137_v33 = vld [vmem:[#allocation8 + $0x10] sm:$0xff]  ;;  %v5250_v8 = vld [vmem:[#allocation8 + $0x398] sm:$0xff] }
 0x4b2   :  { %v7515_v45 = vmax.f32 %v5127_v22, 0.0  ;;  %5448 = vmatpush.msra.mxu3 %v5285_v34  ;;  %v5118_v34 = vperm.slane %v7484_v23, 3  ;;  %v5221_v23 = vld [vmem:[#allocation8 + $0x2b0] sm:$0xff] }
 0x4b4   :  { %5431 = vmatmul.f32.vlgmr.msra.gmra.mxu2 %v7515_v45  ;;  %5449 = vmatpush.msra.mxu3 %v5282_v60  ;;  %v5230_v60 = vld [vmem:[#allocation8 + $0x2f8] sm:$0xff] }
 0x4b5   :  { %5575 = vmatpush.msra.mxu2 %v5182_v59 }
 0x4b6   :  { %5450 = vmatpush.msra.mxu3 %v5279_v63  ;;  %v5227_v63 = vld [vmem:[#allocation8 + $0x2e0] sm:$0xff] }
 0x4b7   :  { %5576 = vmatpush.msra.mxu2 %v5179_v32  ;;  %v5235_v32 = vld [vmem:[#allocation8 + $0x320] sm:$0xff] }
 0x4b8   :  { %5515 = vmatpush.msrb.mxu3 %v5277_v18  ;;  %v5366_v18 = vld [vmem:[#allocation8 + $0x738] sm:$0xff] }
 0x4b9   :  { %v4713_v15 = vpop.f32.mrf.mxu3  ;;  %5577 = vmatpush.msra.mxu2 %v5176_v31 }
 0x4ba   :  { %v4714_v9 = vadd.f32 %v4713_v15, %v4694_v30  ;;  %5516 = vmatpush.msrb.mxu3 %v5274_v17  ;;  %v4813_v17 = vpop.f32.mrf.mxu0 }
 0x4bb   :  { %5578 = vmatpush.msra.mxu2 %v5173_v28 }
 0x4bc   :  { %v4734_v61 = vadd.f32 %v4733_v57, %v4714_v9  ;;  %5511 = vmatmul.f32.vlgmr.msrb.gmra.mxu2 %v7498_v2  ;;  %5517 = vmatpush.msrb.mxu3 %v5271_v7  ;;  %v5101_v9 = vperm.slane %v7479_v46, 3  ;;  %v5224_v46 = vld [vmem:[#allocation8 + $0x2c8] sm:$0xff]  ;;  %v5373_v7 = vld [vmem:[#allocation8 + $0x770] sm:$0xff] }
 0x4bd   :  { %5579 = vmatpush.msra.mxu2 %v5170_v43  ;;  %5555 = vmatpush.msra.mxu1 %v5373_v7  ;;  %v5316_v7 = vld [vmem:[#allocation8 + $0x5a8] sm:$0xff] }
 0x4be   :  { %v4754_v13 = vadd.f32 %v4753_v4, %v4734_v61  ;;  %5518 = vmatpush.msrb.mxu3 %v5268_v29  ;;  %v5357_v29 = vld [vmem:[#allocation8 + $0x6f0] sm:$0xff] }
 0x4bf   :  { %5580 = vmatpush.msra.mxu2 %v5167_v51 }
 0x4c0   :  { %v4974_v39 = vrot.slane %v4754_v13, 4  ;;  %5519 = vmatpush.msrb.mxu3 %v5265_v11  ;;  %v5212_v11 = vld [vmem:[#allocation8 + $0x268] sm:$0xff] }
 0x4c1   :  { %5581 = vmatpush.msra.mxu2 %v5164_v40 }
 0x4c2   :  { %v4975_v14 = vadd.f32 %v4974_v39, %v4754_v13  ;;  %5520 = vmatpush.msrb.mxu3 %v5262_v25  ;;  %v5369_v39 = vld [vmem:[#allocation8 + $0x750] sm:$0xff] }
 0x4c3   :  { %5582 = vmatpush.msra.mxu2 %v5161_v5  ;;  %v4773_v5 = vpop.f32.mrf.mxu2 }
 0x4c4   :  { %v4976_v21 = vrot.slane %v4975_v14, 2  ;;  %5521 = vmatpush.msrb.mxu3 %v5259_v35  ;;  %v5364_v35 = vld [vmem:[#allocation8 + $0x728] sm:$0xff] }
 0x4c5   :  { %5583 = vmatpush.msra.mxu2 %v5158_v16  ;;  %v5363_v16 = vld [vmem:[#allocation8 + $0x720] sm:$0xff] }
 0x4c6   :  { %v4977_v56 = vadd.f32 %v4976_v21, %v4975_v14  ;;  %5522 = vmatpush.msrb.mxu3 %v5256_v36  ;;  %v5218_v21 = vld [vmem:[#allocation8 + $0x298] sm:$0xff] }
 0x4c7   :  { %5584 = vmatpush.msra.mxu2 %v5155_v37  ;;  %v5360_v37 = vld [vmem:[#allocation8 + $0x708] sm:$0xff]  ;;  %v5206_v36 = vld [vmem:[#allocation8 + $0x238] sm:$0xff] }
 0x4c8   :  { %v4978_v3 = vrot.slane %v4977_v56, 1  ;;  %5523 = vmatpush.msrb.mxu3 %v5253_v44 }
 0x4c9   :  { %5585 = vmatpush.msra.mxu2 %v5152_v38  ;;  %v5215_v38 = vld [vmem:[#allocation8 + $0x280] sm:$0xff] }
 0x4ca   :  { %v4979_v41 = vadd.f32 %v4978_v3, %v4977_v56  ;;  %5524 = vmatpush.msrb.mxu3 %v5250_v8  ;;  %v5370_v3 = vld [vmem:[#allocation8 + $0x758] sm:$0xff]  ;;  %v5345_v8 = vld [vmem:[#allocation8 + $0x690] sm:$0xff] }
 0x4cb   :  { %5586 = vmatpush.msra.mxu2 %v5149_v55  ;;  %v4833_v55 = vpop.f32.mrf.mxu1  ;;  %5556 = vmatpush.msra.mxu1 %v5370_v3  ;;  %v5326_v3 = vld [vmem:[#allocation8 + $0x5f8] sm:$0xff] }
 0x4cc   :  { %v4989_v42 = vmul.f32 %v4979_v41, %v7034_v27  ;;  %5525 = vmatpush.msrb.mxu3 %v5247_v10  ;;  %v5354_v41 = vld [vmem:[#allocation8 + $0x6d8] sm:$0xff] }
 0x4cd   :  { %5587 = vmatpush.msra.mxu2 %v5146_v52  ;;  %v5367_v52 = vld [vmem:[#allocation8 + $0x740] sm:$0xff] }
 0x4ce   :  { %v4994_v49 = vsub.f32 %v4754_v13, %v4989_v42  ;;  %5526 = vmatpush.msrb.mxu3 %v5244_v50  ;;  %v5372_v13 = vld [vmem:[#allocation8 + $0x768] sm:$0xff]  ;;  %v5209_v42 = vld [vmem:[#allocation8 + $0x250] sm:$0xff]  ;;  %5557 = vmatpush.msra.mxu1 %v5367_v52  ;;  %v5342_v50 = vld [vmem:[#allocation8 + $0x678] sm:$0xff] }
 0x4cf   :  { %5588 = vmatpush.msra.mxu2 %v5143_v48  ;;  %5455 = vmatpush.msrb.mxu0 %v5372_v13  ;;  %v5351_v48 = vld [vmem:[#allocation8 + $0x6c0] sm:$0xff]  ;;  %v5325_v13 = vld [vmem:[#allocation8 + $0x5f0] sm:$0xff] }
 0x4d0   :  { %v4999_v1 = vmul.f32 %v4994_v49, %v4994_v49  ;;  %5527 = vmatpush.msrb.mxu3 %v5241_v54  ;;  %5558 = vmatpush.msra.mxu1 %v5364_v35  ;;  %v5355_v54 = vld [vmem:[#allocation8 + $0x6e0] sm:$0xff]  ;;  %v5320_v35 = vld [vmem:[#allocation8 + $0x5c8] sm:$0xff] }
 0x4d1   :  { %5589 = vmatpush.msra.mxu2 %v5140_v20  ;;  %5456 = vmatpush.msrb.mxu0 %v5369_v39  ;;  %v5337_v39 = vld [vmem:[#allocation8 + $0x650] sm:$0xff]  ;;  %v5323_v52 = vld [vmem:[#allocation8 + $0x5e0] sm:$0xff] }
 0x4d2   :  { %v5019_v12 = vrot.slane %v4999_v1, 4  ;;  %5528 = vmatpush.msrb.mxu3 %v5238_v58  ;;  %v5339_v58 = vld [vmem:[#allocation8 + $0x660] sm:$0xff] }
 0x4d3   :  { %5590 = vmatpush.msra.mxu2 %v5137_v33  ;;  %5457 = vmatpush.msrb.mxu0 %v5366_v18  ;;  %v5361_v33 = vld [vmem:[#allocation8 + $0x710] sm:$0xff]  ;;  %v5371_v18 = vld [vmem:[#allocation8 + $0x760] sm:$0xff] }
 0x4d4   :  { %v5020_v47 = vadd.f32 %v5019_v12, %v4999_v1  ;;  %5591 = vmatmul.f32.vlgmr.msra.gmra.mxu2 %v7495_v53  ;;  %5529 = vmatpush.msrb.mxu3 %v5235_v32  ;;  %v5348_v1 = vld [vmem:[#allocation8 + $0x6a8] sm:$0xff]  ;;  %v5203_v12 = vld [vmem:[#allocation8 + $0x220] sm:$0xff] }
 0x4d5   :  { %5458 = vmatpush.msrb.mxu0 %v5363_v16  ;;  %5559 = vmatpush.msra.mxu1 %v5361_v33  ;;  %v5319_v16 = vld [vmem:[#allocation8 + $0x5c0] sm:$0xff]  ;;  %v5353_v33 = vld [vmem:[#allocation8 + $0x6d0] sm:$0xff] }
 0x4d6   :  { %v5021_v22 = vrot.slane %v5020_v47, 2  ;;  %5530 = vmatpush.msrb.mxu3 %v5232_v24  ;;  %v5194_v24 = vld [vmem:[#allocation8 + $0x1d8] sm:$0xff] }
 0x4d7   :  { %5459 = vmatpush.msrb.mxu0 %v5360_v37 }
 0x4d8   :  { %v5022_v59 = vadd.f32 %v5021_v22, %v5020_v47  ;;  %v5358_v47 = vld [vmem:[#allocation8 + $0x6f8] sm:$0xff]  ;;  %v5200_v22 = vld [vmem:[#allocation8 + $0x208] sm:$0xff] }
 0x4d9   :  { %5460 = vmatpush.msrb.mxu0 %v5357_v29  ;;  %5560 = vmatpush.msra.mxu1 %v5358_v47  ;;  %v5350_v47 = vld [vmem:[#allocation8 + $0x6b8] sm:$0xff] }
 0x4da   :  { %v5023_v19 = vrot.slane %v5022_v59, 1  ;;  %v4793_v40 = vpop.f32.mrf.mxu3 }
 0x4db   :  { %v4794_v14 = vadd.f32 %v4793_v40, %v4773_v5  ;;  %5461 = vmatpush.msrb.mxu0 %v5354_v41  ;;  %5561 = vmatpush.msra.mxu1 %v5355_v54  ;;  %v5374_v40 = vld [vmem:[#allocation8 + $0x778] sm:$0xff]  ;;  %v5347_v54 = vld [vmem:[#allocation8 + $0x6a0] sm:$0xff] }
 0x4dc   :  { %v5024_v0 = vadd.f32 %v5023_v19, %v5022_v59  ;;  %v4893_v59 = vpop.f32.mrf.mxu0  ;;  %v5197_v19 = vld [vmem:[#allocation8 + $0x1f0] sm:$0xff]  ;;  %5655 = vmatpush.msrb.mxu2 %v5374_v40  ;;  %v5310_v41 = vld [vmem:[#allocation8 + $0x578] sm:$0xff] }
 0x4dd   :  { %v4814_v56 = vadd.f32 %v4813_v17, %v4794_v14  ;;  %5462 = vmatpush.msrb.mxu0 %v5351_v48  ;;  %v5334_v14 = vld [vmem:[#allocation8 + $0x638] sm:$0xff]  ;;  %v5368_v17 = vld [vmem:[#allocation8 + $0x748] sm:$0xff]  ;;  %v5307_v48 = vld [vmem:[#allocation8 + $0x560] sm:$0xff] }
 0x4de   :  { %v5034_v31 = vmul.f32 %v5024_v0, %v7034_v27  ;;  %v5352_v0 = vld [vmem:[#allocation8 + $0x6c8] sm:$0xff]  ;;  %5656 = vmatpush.msrb.mxu2 %v5371_v18  ;;  %v5293_v40 = vld [vmem:[#allocation8 + $0x4f0] sm:$0xff]  ;;  %v5287_v18 = vld [vmem:[#allocation8 + $0x4c0] sm:$0xff] }
 0x4df   :  { %v4834_v25 = vadd.f32 %v4833_v55, %v4814_v56  ;;  %5463 = vmatpush.msrb.mxu0 %v5348_v1  ;;  %5562 = vmatpush.msra.mxu1 %v5352_v0  ;;  %v5365_v56 = vld [vmem:[#allocation8 + $0x730] sm:$0xff]  ;;  %v5362_v55 = vld [vmem:[#allocation8 + $0x718] sm:$0xff]  ;;  %v5344_v0 = vld [vmem:[#allocation8 + $0x688] sm:$0xff] }
 0x4e0   :  { %v5039_v26 = vadd.f32 1e-05, %v5034_v31  ;;  %v5336_v31 = vld [vmem:[#allocation8 + $0x648] sm:$0xff]  ;;  %5657 = vmatpush.msrb.mxu2 %v5368_v17  ;;  %v5317_v1 = vld [vmem:[#allocation8 + $0x5b0] sm:$0xff] }
 0x4e1   :  { %5464 = vmatpush.msrb.mxu0 %v5345_v8  ;;  %v5314_v8 = vld [vmem:[#allocation8 + $0x598] sm:$0xff] }
 0x4e2   :  { %6231 = vrsqrt.f32 %v5039_v26  ;;  %vm5077_vm9 = vweird.f32 %v5039_v26  ;;  %5658 = vmatpush.msrb.mxu2 %v5365_v56 }
 0x4e3   :  { %5465 = vmatpush.msrb.mxu0 %v5342_v50  ;;  %v5311_v50 = vld [vmem:[#allocation8 + $0x580] sm:$0xff] }
 0x4e4   :  { %5659 = vmatpush.msrb.mxu2 %v5362_v55 }
 0x4e5   :  { %5466 = vmatpush.msrb.mxu0 %v5339_v58  ;;  %v5308_v58 = vld [vmem:[#allocation8 + $0x568] sm:$0xff] }
 0x4e7   :  { %5467 = vmatpush.msrb.mxu0 %v5336_v31  ;;  %v5305_v31 = vld [vmem:[#allocation8 + $0x550] sm:$0xff] }
 0x4e8   :  { %v6232_v53 = vpop.eup %6231 }
 0x4e9   :  { %v5072_v62 = vmul.f32 %v6232_v53, %v5039_v26  ;;  %vm5078_vm8 = vweird.f32 %v6232_v53  ;;  %v5349_v26 = vld [vmem:[#allocation8 + $0x6b0] sm:$0xff] }
 0x4ea   :  { %vm5079_vm10 = vmor %vm5077_vm9, %vm5078_vm8  ;;  %5563 = vmatpush.msra.mxu1 %v5349_v26  ;;  %v5341_v26 = vld [vmem:[#allocation8 + $0x670] sm:$0xff] }
 0x4eb   :  { %v5073_v30 = vmul.f32 %v6232_v53, %v5072_v62  ;;  %v5191_v62 = vld [vmem:[#allocation8 + $0x1c0] sm:$0xff] }
 0x4ed   :  { %v5074_v28 = vmul.f32 0.5, %v5073_v30  ;;  %v5333_v30 = vld [vmem:[#allocation8 + $0x630] sm:$0xff] }
 0x4ee   :  { %5468 = vmatpush.msrb.mxu0 %v5333_v30  ;;  %v5302_v30 = vld [vmem:[#allocation8 + $0x538] sm:$0xff] }
 0x4ef   :  { %v5075_v15 = vsub.f32 1.5, %v5074_v28  ;;  %v5346_v28 = vld [vmem:[#allocation8 + $0x698] sm:$0xff] }
 0x4f0   :  { %5564 = vmatpush.msra.mxu1 %v5346_v28  ;;  %v5338_v28 = vld [vmem:[#allocation8 + $0x658] sm:$0xff] }
 0x4f1   :  { %v5076_v6 = vmul.f32 %v6232_v53, %v5075_v15 }
 0x4f3   :  { %v5080_v43 = vsel %vm5079_vm10, %v6232_v53, %v5076_v6  ;;  %v4913_v53 = vpop.f32.mrf.mxu1  ;;  %v5188_v6 = vld [vmem:[#allocation8 + $0x1a8] sm:$0xff] }
 0x4f4   :  { %v5094_v57 = vmul.f32 %v5080_v43, %v4994_v49  ;;  %v4853_v49 = vpop.f32.mrf.mxu2  ;;  %v5343_v43 = vld [vmem:[#allocation8 + $0x680] sm:$0xff] }
 0x4f5   :  { %v4854_v44 = vadd.f32 %v4853_v49, %v4834_v25  ;;  %5565 = vmatpush.msra.mxu1 %v5343_v43  ;;  %v5359_v25 = vld [vmem:[#allocation8 + $0x700] sm:$0xff]  ;;  %v5356_v49 = vld [vmem:[#allocation8 + $0x6e8] sm:$0xff] }
 0x4f6   :  { %v5111_v61 = vmul.f32 %v5101_v9, %v5094_v57  ;;  %v5330_v9 = vld [vmem:[#allocation8 + $0x618] sm:$0xff]  ;;  %5660 = vmatpush.msrb.mxu2 %v5359_v25  ;;  %v5335_v43 = vld [vmem:[#allocation8 + $0x640] sm:$0xff] }
 0x4f7   :  { %5469 = vmatpush.msrb.mxu0 %v5330_v9  ;;  %v5299_v9 = vld [vmem:[#allocation8 + $0x520] sm:$0xff] }
 0x4f8   :  { %v5128_v51 = vadd.f32 %v5118_v34, %v5111_v61  ;;  %v5185_v34 = vld [vmem:[#allocation8 + $0x190] sm:$0xff]  ;;  %v5327_v61 = vld [vmem:[#allocation8 + $0x600] sm:$0xff]  ;;  %5661 = vmatpush.msrb.mxu2 %v5356_v49  ;;  %v5272_v49 = vld [vmem:[#allocation8 + $0x448] sm:$0xff] }
 0x4f9   :  { %5470 = vmatpush.msrb.mxu0 %v5327_v61  ;;  %v5296_v61 = vld [vmem:[#allocation8 + $0x508] sm:$0xff] }
 0x4fa   :  { %v7524_v4 = vmax.f32 %v5128_v51, 0.0  ;;  %v4873_v20 = vpop.f32.mrf.mxu3  ;;  %v5340_v51 = vld [vmem:[#allocation8 + $0x668] sm:$0xff]  ;;  %5662 = vmatpush.msrb.mxu2 %v5353_v33 }
 0x4fb   :  { %v4874_v10 = vadd.f32 %v4873_v20, %v4854_v44  ;;  %5566 = vmatpush.msra.mxu1 %v5340_v51  ;;  %5535 = vmatpush.msra.mxu0 %v5325_v13  ;;  %v5332_v51 = vld [vmem:[#allocation8 + $0x628] sm:$0xff] }
 0x4fc   :  { %5451 = vmatmul.f32.vlgmr.msra.gmra.mxu3 %v7524_v4  ;;  %v4933_v57 = vpop.f32.mrf.mxu2  ;;  %5663 = vmatpush.msrb.mxu2 %v5350_v47  ;;  %v5280_v13 = vld [vmem:[#allocation8 + $0x488] sm:$0xff] }
 0x4fd   :  { %5595 = vmatpush.msra.mxu3 %v5230_v60  ;;  %v4894_v32 = vadd.f32 %v4893_v59, %v4874_v10  ;;  %5567 = vmatpush.msra.mxu1 %v5337_v39  ;;  %v5260_v33 = vld [vmem:[#allocation8 + $0x3e8] sm:$0xff] }
 0x4fe   :  { %5664 = vmatpush.msrb.mxu2 %v5347_v54  ;;  %v5248_v47 = vld [vmem:[#allocation8 + $0x388] sm:$0xff] }
 0x4ff   :  { %5596 = vmatpush.msra.mxu3 %v5227_v63  ;;  %v4914_v15 = vadd.f32 %v4913_v53, %v4894_v32  ;;  %5568 = vmatpush.msra.mxu1 %v5334_v14  ;;  %v5236_v54 = vld [vmem:[#allocation8 + $0x328] sm:$0xff] }
 0x500   :  { %5665 = vmatpush.msrb.mxu2 %v5344_v0  ;;  %v5808_v0 = vld [vmem:[#allocation10 + $0xc0] sm:$0xff] }
 0x501   :  { %5597 = vmatpush.msra.mxu3 %v5224_v46  ;;  %v4934_v60 = vadd.f32 %v4933_v57, %v4914_v15  ;;  %v5322_v46 = vld [vmem:[#allocation8 + $0x5d8] sm:$0xff] }
 0x502   :  { %5536 = vmatpush.msra.mxu0 %v5322_v46  ;;  %5666 = vmatpush.msrb.mxu2 %v5341_v26  ;;  %v5802_v26 = vld [vmem:[#allocation10 + $0x90] sm:$0xff] }
 0x503   :  { %5598 = vmatpush.msra.mxu3 %v5221_v23 }
 0x504   :  { %5531 = vmatmul.f32.vlgmr.msrb.gmra.mxu3 %v7515_v45  ;;  %5537 = vmatpush.msra.mxu0 %v5319_v16  ;;  %v5281_v16 = vld [vmem:[#allocation8 + $0x490] sm:$0xff] }
 0x505   :  { %5599 = vmatpush.msra.mxu3 %v5218_v21  ;;  %v5331_v21 = vld [vmem:[#allocation8 + $0x620] sm:$0xff]  ;;  %5667 = vmatpush.msrb.mxu2 %v5338_v28 }
 0x506   :  { %5569 = vmatpush.msra.mxu1 %v5331_v21  ;;  %5538 = vmatpush.msra.mxu0 %v5316_v7 }
 0x507   :  { %5600 = vmatpush.msra.mxu3 %v5215_v38  ;;  %v5328_v38 = vld [vmem:[#allocation8 + $0x608] sm:$0xff]  ;;  %5668 = vmatpush.msrb.mxu2 %v5335_v43 }
 0x508   :  { %5570 = vmatpush.msra.mxu1 %v5328_v38 }
 0x509   :  { %5601 = vmatpush.msra.mxu3 %v5212_v11  ;;  %5669 = vmatpush.msrb.mxu2 %v5332_v51 }
 0x50a   :  { %5635 = vmatpush.msrb.mxu1 %v5326_v3 }
 0x50b   :  { %5602 = vmatpush.msra.mxu3 %v5209_v42 }
 0x50c   :  { %5636 = vmatpush.msrb.mxu1 %v5323_v52 }
 0x50d   :  { %5603 = vmatpush.msra.mxu3 %v5206_v36  ;;  %v5304_v36 = vld [vmem:[#allocation8 + $0x548] sm:$0xff] }
 0x50e   :  { %5637 = vmatpush.msrb.mxu1 %v5320_v35  ;;  %v5275_v35 = vld [vmem:[#allocation8 + $0x460] sm:$0xff] }
 0x50f   :  { %5604 = vmatpush.msra.mxu3 %v5203_v12  ;;  %v5301_v12 = vld [vmem:[#allocation8 + $0x530] sm:$0xff] }
 0x510   :  { %5638 = vmatpush.msrb.mxu1 %v5317_v1  ;;  %v5263_v1 = vld [vmem:[#allocation8 + $0x400] sm:$0xff] }
 0x511   :  { %5605 = vmatpush.msra.mxu3 %v5200_v22  ;;  %v5298_v22 = vld [vmem:[#allocation8 + $0x518] sm:$0xff] }
 0x512   :  { %5639 = vmatpush.msrb.mxu1 %v5314_v8  ;;  %v5251_v8 = vld [vmem:[#allocation8 + $0x3a0] sm:$0xff] }
 0x513   :  { %5606 = vmatpush.msra.mxu3 %v5197_v19  ;;  %v5295_v19 = vld [vmem:[#allocation8 + $0x500] sm:$0xff] }
 0x514   :  { %5640 = vmatpush.msrb.mxu1 %v5311_v50  ;;  %v5239_v50 = vld [vmem:[#allocation8 + $0x340] sm:$0xff] }
 0x515   :  { %5607 = vmatpush.msra.mxu3 %v5194_v24  ;;  %v5292_v24 = vld [vmem:[#allocation8 + $0x4e8] sm:$0xff] }
 0x516   :  { %5641 = vmatpush.msrb.mxu1 %v5308_v58  ;;  %v5810_v58 = vld [vmem:[#allocation10 + $0xd0] sm:$0xff] }
 0x517   :  { %5608 = vmatpush.msra.mxu3 %v5191_v62  ;;  %v5289_v62 = vld [vmem:[#allocation8 + $0x4d0] sm:$0xff] }
 0x518   :  { %5642 = vmatpush.msrb.mxu1 %v5305_v31  ;;  %v5392_v31 = vpop.f32.mrf.mxu0 }
 0x519   :  { %5609 = vmatpush.msra.mxu3 %v5188_v6  ;;  %v5286_v6 = vld [vmem:[#allocation8 + $0x4b8] sm:$0xff] }
 0x51a   :  { %v4953_v63 = vpop.f32.mrf.mxu3  ;;  %5643 = vmatpush.msrb.mxu1 %v5302_v30  ;;  %v5800_v30 = vld [vmem:[#allocation10 + $0x80] sm:$0xff] }
 0x51b   :  { %v4954_v5 = vadd.f32 %v4953_v63, %v4934_v60  ;;  %5610 = vmatpush.msra.mxu3 %v5185_v34  ;;  %v5283_v34 = vld [vmem:[#allocation8 + $0x4a0] sm:$0xff]  ;;  %v5329_v63 = vld [vmem:[#allocation8 + $0x610] sm:$0xff] }
 0x51c   :  { %5611 = vmatmul.f32.vlgmr.msra.gmra.mxu3 %v7498_v2  ;;  %v5313_v2 = vld [vmem:[#allocation8 + $0x590] sm:$0xff]  ;;  %5644 = vmatpush.msrb.mxu1 %v5299_v9  ;;  %v5796_v9 = vld [vmem:[#allocation10 + $0x60] sm:$0xff] }
 0x51d   :  { %v4980_v23 = vrot.slane %v4954_v5, 4  ;;  %5539 = vmatpush.msra.mxu0 %v5313_v2  ;;  %5670 = vmatpush.msrb.mxu2 %v5329_v63  ;;  %v5813_v63 = vld [vmem:[#allocation10 + $0xe8] sm:$0xff] }
 0x51e   :  { %5645 = vmatpush.msrb.mxu1 %v5296_v61  ;;  %v5815_v61 = vld [vmem:[#allocation10 + $0xf8] sm:$0xff] }
 0x51f   :  { %v4981_v37 = vadd.f32 %v4980_v23, %v4954_v5  ;;  %5540 = vmatpush.msra.mxu0 %v5310_v41  ;;  %v5284_v23 = vld [vmem:[#allocation8 + $0x4a8] sm:$0xff]  ;;  %5940 = vmatpush.msra.mxu2 %v5815_v61 }
 0x520   :  { %5646 = vmatpush.msrb.mxu1 %v5293_v40  ;;  %v5833_v61 = vld [vmem:[#allocation10 + $0x188] sm:$0xff] }
 0x521   :  { %v4982_v29 = vrot.slane %v4981_v37, 2  ;;  %5541 = vmatpush.msra.mxu0 %v5307_v48  ;;  %v5278_v48 = vld [vmem:[#allocation8 + $0x478] sm:$0xff]  ;;  %5941 = vmatpush.msra.mxu2 %v5813_v63 }
 0x522   :  { %v5831_v63 = vld [vmem:[#allocation10 + $0x178] sm:$0xff] }
 0x523   :  { %v4983_v11 = vadd.f32 %v4982_v29, %v4981_v37  ;;  %5542 = vmatpush.msra.mxu0 %v5304_v36  ;;  %v6266_v29 = vld [vmem:[#allocation16] sm:$0x1f] }
 0x524   :  { %v5102_v2 = vperm.slane %v6266_v29, 4  ;;  %v5266_v36 = vld [vmem:[#allocation8 + $0x418] sm:$0xff] }
 0x525   :  { %v4984_v42 = vrot.slane %v4983_v11, 1  ;;  %5543 = vmatpush.msra.mxu0 %v5301_v12  ;;  %v5254_v12 = vld [vmem:[#allocation8 + $0x3b8] sm:$0xff] }
 0x527   :  { %v4985_v20 = vadd.f32 %v4984_v42, %v4983_v11  ;;  %5544 = vmatpush.msra.mxu0 %v5298_v22  ;;  %v6267_v11 = vld [vmem:[#allocation17] sm:$0x1f] }
 0x528   :  { %v5119_v41 = vperm.slane %v6267_v11, 4  ;;  %v5242_v22 = vld [vmem:[#allocation8 + $0x358] sm:$0xff] }
 0x529   :  { %v4990_v44 = vmul.f32 %v4985_v20, %v7034_v27  ;;  %5545 = vmatpush.msra.mxu0 %v5295_v19  ;;  %v5269_v20 = vld [vmem:[#allocation8 + $0x430] sm:$0xff]  ;;  %v5812_v19 = vld [vmem:[#allocation10 + $0xe0] sm:$0xff] }
 0x52b   :  { %v7530_v10 = vsub.f32 %v4954_v5, %v4990_v44  ;;  %5546 = vmatpush.msra.mxu0 %v5292_v24  ;;  %v5290_v5 = vld [vmem:[#allocation8 + $0x4d8] sm:$0xff]  ;;  %v5257_v44 = vld [vmem:[#allocation8 + $0x3d0] sm:$0xff]  ;;  %v5804_v24 = vld [vmem:[#allocation10 + $0xa0] sm:$0xff] }
 0x52c   :  { %5647 = vmatpush.msrb.mxu1 %v5290_v5  ;;  %v5790_v5 = vld [vmem:[#allocation10 + $0x30] sm:$0xff] }
 0x52d   :  { %v5000_v59 = vmul.f32 %v7530_v10, %v7530_v10  ;;  %5547 = vmatpush.msra.mxu0 %v5289_v62 }
 0x52e   :  { %5648 = vmatpush.msrb.mxu1 %v5287_v18  ;;  %v5846_v18 = vld [vmem:[#allocation10 + $0x1f0] sm:$0xff] }
 0x52f   :  { %v5025_v32 = vrot.slane %v5000_v59, 4  ;;  %5548 = vmatpush.msra.mxu0 %v5286_v6 }
 0x530   :  { %5649 = vmatpush.msrb.mxu1 %v5284_v23 }
 0x531   :  { %v5026_v53 = vadd.f32 %v5025_v32, %v5000_v59  ;;  %5549 = vmatpush.msra.mxu0 %v5283_v34  ;;  %v5814_v59 = vld [vmem:[#allocation10 + $0xf0] sm:$0xff] }
 0x532   :  { %5650 = vmatpush.msrb.mxu1 %v5281_v16  ;;  %5880 = vmatpush.msrb.mxu3 %v5814_v59  ;;  %v5806_v32 = vld [vmem:[#allocation10 + $0xb0] sm:$0xff] }
 0x533   :  { %v5027_v15 = vrot.slane %v5026_v53, 2  ;;  %5550 = vmatpush.msra.mxu0 %v5280_v13 }
 0x534   :  { %5881 = vmatpush.msrb.mxu3 %v5812_v19 }
 0x535   :  { %v5028_v57 = vadd.f32 %v5027_v15, %v5026_v53  ;;  %v5412_v53 = vpop.f32.mrf.mxu1  ;;  %v5798_v15 = vld [vmem:[#allocation10 + $0x70] sm:$0xff] }
 0x536   :  { %5882 = vmatpush.msrb.mxu3 %v5810_v58  ;;  %v5832_v58 = vld [vmem:[#allocation10 + $0x180] sm:$0xff] }
 0x537   :  { %v5029_v60 = vrot.slane %v5028_v57, 1  ;;  %v5432_v62 = vpop.f32.mrf.mxu2 }
 0x538   :  { %5883 = vmatpush.msrb.mxu3 %v5808_v0  ;;  %v5797_v0 = vld [vmem:[#allocation10 + $0x68] sm:$0xff] }
 0x539   :  { %v5030_v39 = vadd.f32 %v5029_v60, %v5028_v57  ;;  %v5794_v57 = vld [vmem:[#allocation10 + $0x50] sm:$0xff]  ;;  %v5792_v60 = vld [vmem:[#allocation10 + $0x40] sm:$0xff] }
 0x53a   :  { %5884 = vmatpush.msrb.mxu3 %v5806_v32  ;;  %v5839_v32 = vld [vmem:[#allocation10 + $0x1b8] sm:$0xff] }
 0x53b   :  { %v5035_v46 = vmul.f32 %v5030_v39, %v7034_v27 }
 0x53c   :  { %5885 = vmatpush.msrb.mxu3 %v5804_v24 }
 0x53d   :  { %v5040_v14 = vadd.f32 1e-05, %v5035_v46  ;;  %v5492_v13 = vpop.f32.mrf.mxu1 }
 0x53e   :  { %5886 = vmatpush.msrb.mxu3 %v5802_v26  ;;  %v5830_v26 = vld [vmem:[#allocation10 + $0x170] sm:$0xff] }
 0x53f   :  { %6233 = vrsqrt.f32 %v5040_v14  ;;  %vm5087_vm12 = vweird.f32 %v5040_v14  ;;  %v5512_v40 = vpop.f32.mrf.mxu2 }
 0x540   :  { %5887 = vmatpush.msrb.mxu3 %v5800_v30  ;;  %v5513_v23 = vadd.f32 %v5512_v40, %v5492_v13  ;;  %v5824_v13 = vld [vmem:[#allocation10 + $0x140] sm:$0xff]  ;;  %v5789_v40 = vld [vmem:[#allocation10 + $0x28] sm:$0xff] }
 0x542   :  { %5888 = vmatpush.msrb.mxu3 %v5798_v15  ;;  %v5793_v15 = vld [vmem:[#allocation10 + $0x48] sm:$0xff] }
 0x544   :  { %5889 = vmatpush.msrb.mxu3 %v5796_v9 }
 0x545   :  { %v6234_v17 = vpop.eup %6233 }
 0x546   :  { %v5082_v21 = vmul.f32 %v6234_v17, %v5040_v14  ;;  %vm5088_vm11 = vweird.f32 %v6234_v17  ;;  %5890 = vmatpush.msrb.mxu3 %v5794_v57  ;;  %v5811_v14 = vld [vmem:[#allocation10 + $0xd8] sm:$0xff]  ;;  %v5826_v57 = vld [vmem:[#allocation10 + $0x150] sm:$0xff] }
 0x547   :  { %vm5089_vm13 = vmor %vm5087_vm12, %vm5088_vm11  ;;  %5942 = vmatpush.msra.mxu2 %v5811_v14  ;;  %v5822_v14 = vld [vmem:[#allocation10 + $0x130] sm:$0xff] }
 0x548   :  { %v5083_v37 = vmul.f32 %v6234_v17, %v5082_v21  ;;  %5891 = vmatpush.msrb.mxu3 %v5792_v60  ;;  %v5844_v21 = vld [vmem:[#allocation10 + $0x1e0] sm:$0xff] }
 0x54a   :  { %v5084_v7 = vmul.f32 0.5, %v5083_v37  ;;  %5892 = vmatpush.msrb.mxu3 %v5790_v5  ;;  %v5809_v37 = vld [vmem:[#allocation10 + $0xc8] sm:$0xff] }
 0x54b   :  { %5943 = vmatpush.msra.mxu2 %v5809_v37  ;;  %v5820_v37 = vld [vmem:[#allocation10 + $0x120] sm:$0xff] }
 0x54c   :  { %v5085_v56 = vsub.f32 1.5, %v5084_v7 }
 0x54e   :  { %v5086_v38 = vmul.f32 %v6234_v17, %v5085_v56 }
 0x550   :  { %v5090_v3 = vsel %vm5089_vm13, %v6234_v17, %v5086_v38  ;;  %v5788_v17 = vld [vmem:[#allocation10 + $0x20] sm:$0xff]  ;;  %v5786_v38 = vld [vmem:[#allocation10 + $0x10] sm:$0xff] }
 0x551   :  { %v5095_v55 = vmul.f32 %v5090_v3, %v7530_v10  ;;  %v5245_v10 = vld [vmem:[#allocation8 + $0x370] sm:$0xff]  ;;  %5893 = vmatpush.msrb.mxu3 %v5788_v17  ;;  %v5807_v3 = vld [vmem:[#allocation10 + $0xb8] sm:$0xff] }
 0x552   :  { %5944 = vmatpush.msra.mxu2 %v5807_v3 }
 0x553   :  { %v5112_v52 = vmul.f32 %v5102_v2, %v5095_v55  ;;  %5894 = vmatpush.msrb.mxu3 %v5786_v38  ;;  %v5842_v2 = vld [vmem:[#allocation10 + $0x1d0] sm:$0xff] }
 0x555   :  { %v5129_v25 = vadd.f32 %v5119_v41, %v5112_v52  ;;  %v5784_v41 = vld [vmem:[#allocation10] sm:$0xff] }
 0x556   :  { %5895 = vmatpush.msrb.mxu3 %v5784_v41 }
 0x557   :  { %v5134_v42 = vmax.f32 %v5129_v25, 0.0  ;;  %v5840_v25 = vld [vmem:[#allocation10 + $0x1c0] sm:$0xff] }
 0x559   :  { %5471 = vmatmul.f32.vlgmr.msrb.gmra.mxu0 %v5134_v42  ;;  %5571 = vmatmul.f32.vlgmr.msra.gmra.mxu1 %v5134_v42 }
 0x55a   :  { %5615 = vmatpush.msrb.mxu0 %v5278_v48  ;;  %5671 = vmatmul.f32.vlgmr.msrb.gmra.mxu2 %v5134_v42  ;;  %v5805_v42 = vld [vmem:[#allocation10 + $0xa8] sm:$0xff]  ;;  %v5847_v48 = vld [vmem:[#allocation10 + $0x1f8] sm:$0xff] }
 0x55b   :  { %5945 = vmatpush.msra.mxu2 %v5805_v42  ;;  %5960 = vmatpush.msra.mxu3 %v5847_v48  ;;  %v5816_v48 = vld [vmem:[#allocation10 + $0x100] sm:$0xff] }
 0x55c   :  { %5616 = vmatpush.msrb.mxu0 %v5275_v35 }
 0x55e   :  { %5617 = vmatpush.msrb.mxu0 %v5272_v49 }
 0x560   :  { %5618 = vmatpush.msrb.mxu0 %v5269_v20  ;;  %v5838_v20 = vld [vmem:[#allocation10 + $0x1b0] sm:$0xff] }
 0x561   :  { %5551 = vmatmul.f32.vlgmr.msra.gmra.mxu0 %v7524_v4  ;;  %5651 = vmatmul.f32.vlgmr.msrb.gmra.mxu1 %v7524_v4  ;;  %v5233_v4 = vld [vmem:[#allocation8 + $0x310] sm:$0xff] }
 0x562   :  { %5619 = vmatpush.msrb.mxu0 %v5266_v36  ;;  %v5803_v36 = vld [vmem:[#allocation10 + $0x98] sm:$0xff] }
 0x563   :  { %5946 = vmatpush.msra.mxu2 %v5803_v36 }
 0x564   :  { %5620 = vmatpush.msrb.mxu0 %v5263_v1  ;;  %v5845_v1 = vld [vmem:[#allocation10 + $0x1e8] sm:$0xff] }
 0x565   :  { %5961 = vmatpush.msra.mxu3 %v5845_v1  ;;  %v5878_v1 = vld [vmem:[#allocation10 + $0x2f0] sm:$0xff] }
 0x566   :  { %5621 = vmatpush.msrb.mxu0 %v5260_v33  ;;  %5920 = vmatpush.msra.mxu1 %v5878_v1 }
 0x568   :  { %5622 = vmatpush.msrb.mxu0 %v5257_v44 }
 0x56a   :  { %5623 = vmatpush.msrb.mxu0 %v5254_v12  ;;  %v5836_v12 = vld [vmem:[#allocation10 + $0x1a0] sm:$0xff] }
 0x56c   :  { %5624 = vmatpush.msrb.mxu0 %v5251_v8  ;;  %v5801_v8 = vld [vmem:[#allocation10 + $0x88] sm:$0xff] }
 0x56d   :  { %5947 = vmatpush.msra.mxu2 %v5801_v8 }
 0x56e   :  { %5625 = vmatpush.msrb.mxu0 %v5248_v47  ;;  %v5843_v47 = vld [vmem:[#allocation10 + $0x1d8] sm:$0xff] }
 0x56f   :  { %5962 = vmatpush.msra.mxu3 %v5843_v47 }
 0x570   :  { %5626 = vmatpush.msrb.mxu0 %v5245_v10 }
 0x572   :  { %5627 = vmatpush.msrb.mxu0 %v5242_v22 }
 0x574   :  { %5628 = vmatpush.msrb.mxu0 %v5239_v50  ;;  %v5834_v50 = vld [vmem:[#allocation10 + $0x190] sm:$0xff] }
 0x576   :  { %5629 = vmatpush.msrb.mxu0 %v5236_v54  ;;  %v5799_v54 = vld [vmem:[#allocation10 + $0x78] sm:$0xff] }
 0x577   :  { %5948 = vmatpush.msra.mxu2 %v5799_v54 }
 0x578   :  { %5630 = vmatpush.msrb.mxu0 %v5233_v4  ;;  %v5841_v4 = vld [vmem:[#allocation10 + $0x1c8] sm:$0xff] }
 0x579   :  { %5631 = vmatmul.f32.vlgmr.msrb.gmra.mxu0 %v7515_v45  ;;  %v5413_v45 = vadd.f32 %v5412_v53, %v5392_v31  ;;  %5963 = vmatpush.msra.mxu3 %v5841_v4  ;;  %v5795_v53 = vld [vmem:[#allocation10 + $0x58] sm:$0xff] }
 0x57a   :  { %5900 = vmatpush.msra.mxu0 %v5846_v18  ;;  %5949 = vmatpush.msra.mxu2 %v5797_v0  ;;  %v5817_v0 = vld [vmem:[#allocation10 + $0x108] sm:$0xff] }
 0x57b   :  { %v5433_v6 = vadd.f32 %v5432_v62, %v5413_v45  ;;  %5964 = vmatpush.msra.mxu3 %v5839_v32  ;;  %v5837_v62 = vld [vmem:[#allocation10 + $0x1a8] sm:$0xff]  ;;  %v5828_v45 = vld [vmem:[#allocation10 + $0x160] sm:$0xff] }
 0x57c   :  { %5901 = vmatpush.msra.mxu0 %v5844_v21  ;;  %5950 = vmatpush.msra.mxu2 %v5795_v53 }
 0x57d   :  { %5965 = vmatpush.msra.mxu3 %v5837_v62 }
 0x57e   :  { %5902 = vmatpush.msra.mxu0 %v5842_v2  ;;  %5951 = vmatpush.msra.mxu2 %v5793_v15 }
 0x57f   :  { %v5452_v28 = vpop.f32.mrf.mxu3 }
 0x580   :  { %v5453_v43 = vadd.f32 %v5452_v28, %v5433_v6  ;;  %5903 = vmatpush.msra.mxu0 %v5840_v25  ;;  %v5835_v6 = vld [vmem:[#allocation10 + $0x198] sm:$0xff] }
 0x581   :  { %5966 = vmatpush.msra.mxu3 %v5835_v6 }
 0x582   :  { %5904 = vmatpush.msra.mxu0 %v5838_v20 }
 0x583   :  { %5967 = vmatpush.msra.mxu3 %v5833_v61 }
 0x584   :  { %5905 = vmatpush.msra.mxu0 %v5836_v12  ;;  %v5821_v12 = vld [vmem:[#allocation10 + $0x128] sm:$0xff] }
 0x585   :  { %5968 = vmatpush.msra.mxu3 %v5831_v63  ;;  %v5864_v63 = vld [vmem:[#allocation10 + $0x280] sm:$0xff] }
 0x586   :  { %5906 = vmatpush.msra.mxu0 %v5834_v50  ;;  %v5819_v50 = vld [vmem:[#allocation10 + $0x118] sm:$0xff] }
 0x587   :  { %v5532_v46 = vpop.f32.mrf.mxu3 }
 0x588   :  { %v5533_v7 = vadd.f32 %v5532_v46, %v5513_v23  ;;  %5907 = vmatpush.msra.mxu0 %v5832_v58  ;;  %v5592_v46 = vpop.f32.mrf.mxu2  ;;  %v5787_v23 = vld [vmem:[#allocation10 + $0x18] sm:$0xff] }
 0x589   :  { %v5875_v58 = vld [vmem:[#allocation10 + $0x2d8] sm:$0xff] }
 0x58a   :  { %5908 = vmatpush.msra.mxu0 %v5830_v26  ;;  %v5873_v26 = vld [vmem:[#allocation10 + $0x2c8] sm:$0xff] }
 0x58c   :  { %5909 = vmatpush.msra.mxu0 %v5828_v45  ;;  %v5871_v45 = vld [vmem:[#allocation10 + $0x2b8] sm:$0xff] }
 0x58e   :  { %5910 = vmatpush.msra.mxu0 %v5826_v57  ;;  %v5869_v57 = vld [vmem:[#allocation10 + $0x2a8] sm:$0xff] }
 0x590   :  { %5911 = vmatpush.msra.mxu0 %v5824_v13 }
 0x592   :  { %5912 = vmatpush.msra.mxu0 %v5822_v14 }
 0x594   :  { %5913 = vmatpush.msra.mxu0 %v5820_v37 }
 0x59f   :  { %v5612_v18 = vpop.f32.mrf.mxu3 }
 0x5a0   :  { %v5613_v38 = vadd.f32 %v5612_v18, %v5592_v46  ;;  %v7572_v18 = vld [vmem:[#allocation19] sm:$0x7] }
 0x5d6   :  { %v5472_v34 = vpop.f32.mrf.mxu0  ;;  %v5572_v52 = vpop.f32.mrf.mxu1 }
 0x5d7   :  { %v7539_v51 = vadd.f32 %v5472_v34, %v5453_v43  ;;  %v5791_v34 = vld [vmem:[#allocation10 + $0x38] sm:$0xff] }
 0x5d8   :  { %5952 = vmatpush.msra.mxu2 %v5791_v34 }
 0x5d9   :  { %v5675_v39 = vrot.slane %v7539_v51, 4 }
 0x5da   :  { %5953 = vmatpush.msra.mxu2 %v5789_v40 }
 0x5db   :  { %v5676_v16 = vadd.f32 %v5675_v39, %v7539_v51 }
 0x5dc   :  { %5954 = vmatpush.msra.mxu2 %v5787_v23  ;;  %v5862_v23 = vld [vmem:[#allocation10 + $0x270] sm:$0xff] }
 0x5dd   :  { %v5677_v56 = vrot.slane %v5676_v16, 2 }
 0x5de   :  { %v5552_v29 = vpop.f32.mrf.mxu0  ;;  %v5652_v42 = vpop.f32.mrf.mxu1 }
 0x5df   :  { %v5678_v55 = vadd.f32 %v5677_v56, %v5676_v16  ;;  %v5553_v11 = vadd.f32 %v5552_v29, %v5533_v7  ;;  %v5829_v16 = vld [vmem:[#allocation10 + $0x168] sm:$0xff]  ;;  %v5827_v56 = vld [vmem:[#allocation10 + $0x158] sm:$0xff] }
 0x5e0   :  { %5969 = vmatpush.msra.mxu3 %v5829_v16  ;;  %v5785_v7 = vld [vmem:[#allocation10 + $0x8] sm:$0xff]  ;;  %v5863_v16 = vld [vmem:[#allocation10 + $0x278] sm:$0xff] }
 0x5e1   :  { %v5679_v35 = vrot.slane %v5678_v55, 1  ;;  %v7543_v49 = vadd.f32 %v5572_v52, %v5553_v11  ;;  %5955 = vmatpush.msra.mxu2 %v5785_v7  ;;  %v5825_v11 = vld [vmem:[#allocation10 + $0x148] sm:$0xff]  ;;  %v5761_v7 = vperm.slane %v7572_v18, 0 }
 0x5e2   :  { %5970 = vmatpush.msra.mxu3 %v5827_v56 }
 0x5e3   :  { %v5680_v33 = vadd.f32 %v5679_v35, %v5678_v55  ;;  %v5681_v44 = vrot.slane %v7543_v49, 4  ;;  %v5818_v55 = vld [vmem:[#allocation10 + $0x110] sm:$0xff]  ;;  %v5823_v35 = vld [vmem:[#allocation10 + $0x138] sm:$0xff] }
 0x5e4   :  { %5914 = vmatpush.msra.mxu0 %v5818_v55  ;;  %5971 = vmatpush.msra.mxu3 %v5825_v11 }
 0x5e5   :  { %v5693_v10 = vmul.f32 %v5680_v33, %v7034_v27  ;;  %v5682_v22 = vadd.f32 %v5681_v44, %v7543_v49  ;;  %v5879_v33 = vld [vmem:[#allocation10 + $0x2f8] sm:$0xff]  ;;  %v5672_v44 = vpop.f32.mrf.mxu2 }
 0x5e6   :  { %5915 = vmatpush.msra.mxu0 %v5816_v48  ;;  %5972 = vmatpush.msra.mxu3 %v5823_v35 }
 0x5e7   :  { %v7549_v59 = vsub.f32 %v7539_v51, %v5693_v10  ;;  %v5683_v19 = vrot.slane %v5682_v22, 2  ;;  %v5876_v10 = vld [vmem:[#allocation10 + $0x2e0] sm:$0xff] }
 0x5e8   :  { %5980 = vmatpush.msrb.mxu0 %v5879_v33  ;;  %5973 = vmatpush.msra.mxu3 %v5821_v12 }
 0x5e9   :  { %v5699_v24 = vmul.f32 %v7549_v59, %v7549_v59  ;;  %v5684_v31 = vadd.f32 %v5683_v19, %v5682_v22  ;;  %v5877_v22 = vld [vmem:[#allocation10 + $0x2e8] sm:$0xff]  ;;  %5921 = vmatpush.msra.mxu1 %v5876_v10  ;;  %v5874_v19 = vld [vmem:[#allocation10 + $0x2d0] sm:$0xff]  ;;  %v5852_v10 = vld [vmem:[#allocation10 + $0x220] sm:$0xff] }
 0x5ea   :  { %5981 = vmatpush.msrb.mxu0 %v5877_v22  ;;  %5974 = vmatpush.msra.mxu3 %v5819_v50  ;;  %v5853_v22 = vld [vmem:[#allocation10 + $0x228] sm:$0xff]  ;;  %v5850_v50 = vld [vmem:[#allocation10 + $0x210] sm:$0xff] }
 0x5eb   :  { %v5702_v30 = vrot.slane %v5699_v24, 4  ;;  %v5685_v28 = vrot.slane %v5684_v31, 1  ;;  %5922 = vmatpush.msra.mxu1 %v5874_v19 }
 0x5ec   :  { %5982 = vmatpush.msrb.mxu0 %v5875_v58  ;;  %5975 = vmatpush.msra.mxu3 %v5817_v0  ;;  %v5851_v58 = vld [vmem:[#allocation10 + $0x218] sm:$0xff]  ;;  %v5848_v0 = vld [vmem:[#allocation10 + $0x200] sm:$0xff] }
 0x5ed   :  { %v5703_v9 = vadd.f32 %v5702_v30, %v5699_v24  ;;  %v5686_v43 = vadd.f32 %v5685_v28, %v5684_v31  ;;  %v5872_v31 = vld [vmem:[#allocation10 + $0x2c0] sm:$0xff]  ;;  %v5870_v28 = vld [vmem:[#allocation10 + $0x2b0] sm:$0xff] }
 0x5ee   :  { %5923 = vmatpush.msra.mxu1 %v5872_v31  ;;  %5983 = vmatpush.msrb.mxu0 %v5873_v26 }
 0x5ef   :  { %v5704_v51 = vrot.slane %v5703_v9, 2  ;;  %v5694_v60 = vmul.f32 %v5686_v43, %v7034_v27  ;;  %v5868_v43 = vld [vmem:[#allocation10 + $0x2a0] sm:$0xff] }
 0x5f0   :  { %5924 = vmatpush.msra.mxu1 %v5870_v28  ;;  %5984 = vmatpush.msrb.mxu0 %v5871_v45 }
 0x5f1   :  { %v5705_v39 = vadd.f32 %v5704_v51, %v5703_v9  ;;  %v7555_v5 = vsub.f32 %v7543_v49, %v5694_v60  ;;  %v5866_v51 = vld [vmem:[#allocation10 + $0x290] sm:$0xff]  ;;  %v5867_v60 = vld [vmem:[#allocation10 + $0x298] sm:$0xff] }
 0x5f2   :  { %5925 = vmatpush.msra.mxu1 %v5868_v43  ;;  %5985 = vmatpush.msrb.mxu0 %v5869_v57 }
 0x5f3   :  { %v5706_v17 = vrot.slane %v5705_v39, 1  ;;  %v5700_v21 = vmul.f32 %v7555_v5, %v7555_v5 }
 0x5f4   :  { %5926 = vmatpush.msra.mxu1 %v5866_v51  ;;  %5986 = vmatpush.msrb.mxu0 %v5867_v60  ;;  %v5763_v51 = vperm.slane %v7572_v18, 2 }
 0x5f5   :  { %v5707_v29 = vadd.f32 %v5706_v17, %v5705_v39  ;;  %v5708_v2 = vrot.slane %v5700_v21, 4  ;;  %v5865_v39 = vld [vmem:[#allocation10 + $0x288] sm:$0xff] }
 0x5f6   :  { %v5632_v3 = vpop.f32.mrf.mxu0  ;;  %5927 = vmatpush.msra.mxu1 %v5864_v63  ;;  %5987 = vmatpush.msrb.mxu0 %v5865_v39 }
 0x5f7   :  { %v5720_v41 = vmul.f32 %v5707_v29, %v7034_v27  ;;  %v5709_v52 = vadd.f32 %v5708_v2, %v5700_v21  ;;  %v5633_v25 = vadd.f32 %v5632_v3, %v5613_v38  ;;  %v7576_v21 = vld [vmem:[#allocation20] sm:$0x7]  ;;  %v5861_v29 = vld [vmem:[#allocation10 + $0x268] sm:$0xff] }
 0x5f8   :  { %5928 = vmatpush.msra.mxu1 %v5862_v23  ;;  %5988 = vmatpush.msrb.mxu0 %v5863_v16  ;;  %v5860_v38 = vld [vmem:[#allocation10 + $0x260] sm:$0xff]  ;;  %v5772_v11 = vperm.slane %v7576_v21, 0  ;;  %v5773_v26 = vperm.slane %v7576_v21, 1 }
 0x5f9   :  { %v7560_v49 = vadd.f32 1e-05, %v5720_v41  ;;  %v5710_v20 = vrot.slane %v5709_v52, 2  ;;  %v5653_v36 = vadd.f32 %v5652_v42, %v5633_v25  ;;  %v5859_v25 = vld [vmem:[#allocation10 + $0x258] sm:$0xff] }
 0x5fa   :  { %5929 = vmatpush.msra.mxu1 %v5860_v38  ;;  %5989 = vmatpush.msrb.mxu0 %v5861_v29 }
 0x5fb   :  { %6235 = vrsqrt.f32 %v7560_v49  ;;  %v5711_v8 = vadd.f32 %v5710_v20, %v5709_v52  ;;  %v7563_v47 = vadd.f32 %v5672_v44, %v5653_v36  ;;  %vm5732_vm15 = vweird.f32 %v7560_v49  ;;  %v5858_v52 = vld [vmem:[#allocation10 + $0x250] sm:$0xff]  ;;  %v5857_v20 = vld [vmem:[#allocation10 + $0x248] sm:$0xff]  ;;  %v5855_v44 = vld [vmem:[#allocation10 + $0x238] sm:$0xff] }
 0x5fc   :  { %5930 = vmatpush.msra.mxu1 %v5858_v52  ;;  %5990 = vmatpush.msrb.mxu0 %v5859_v25  ;;  %v6087_v52 = vld [vmem:[#allocation11 + $0x68] sm:$0xff] }
 0x5fd   :  { %v5712_v54 = vrot.slane %v5711_v8, 1  ;;  %v5687_v4 = vrot.slane %v7563_v47, 4  ;;  %v6103_v25 = vld [vmem:[#allocation11 + $0xe8] sm:$0xff] }
 0x5fe   :  { %5991 = vmatpush.msrb.mxu0 %v5857_v20 }
 0x5ff   :  { %v5713_v32 = vadd.f32 %v5712_v54, %v5711_v8  ;;  %v5688_v24 = vadd.f32 %v5687_v4, %v7563_v47  ;;  %v5762_v4 = vperm.slane %v7572_v18, 1  ;;  %v6105_v18 = vld [vmem:[#allocation11 + $0xf8] sm:$0xff] }
 0x600   :  { %5992 = vmatpush.msrb.mxu0 %v5855_v44  ;;  %6130 = vmatpush.msrb.mxu2 %v6105_v18 }
 0x601   :  { %v6236_v53 = vpop.eup %6235  ;;  %v5721_v62 = vmul.f32 %v5713_v32, %v7034_v27  ;;  %v5689_v30 = vrot.slane %v5688_v24, 2 }
 0x602   :  { %v5727_v15 = vmul.f32 %v6236_v53, %v7560_v49  ;;  %vm5733_vm14 = vweird.f32 %v6236_v53  ;;  %v5856_v49 = vld [vmem:[#allocation10 + $0x240] sm:$0xff]  ;;  %5993 = vmatpush.msrb.mxu0 %v5853_v22  ;;  %v6083_v22 = vld [vmem:[#allocation11 + $0x48] sm:$0xff] }
 0x603   :  { %v7569_v6 = vadd.f32 1e-05, %v5721_v62  ;;  %v5690_v9 = vadd.f32 %v5689_v30, %v5688_v24  ;;  %vm5734_vm0 = vmor %vm5732_vm15, %vm5733_vm14  ;;  %5931 = vmatpush.msra.mxu1 %v5856_v49  ;;  %v6102_v49 = vld [vmem:[#allocation11 + $0xe0] sm:$0xff] }
 0x604   :  { %v5728_v34 = vmul.f32 %v6236_v53, %v5727_v15  ;;  %5994 = vmatpush.msrb.mxu0 %v5851_v58  ;;  %v6098_v58 = vld [vmem:[#allocation11 + $0xc0] sm:$0xff] }
 0x605   :  { %6237 = vrsqrt.f32 %v7569_v6  ;;  %v5691_v61 = vrot.slane %v5690_v9, 1  ;;  %vm5742_vm2 = vweird.f32 %v7569_v6 }
 0x606   :  { %v5729_v13 = vmul.f32 0.5, %v5728_v34 }
 0x607   :  { %v5692_v40 = vadd.f32 %v5691_v61, %v5690_v9 }
 0x608   :  { %v5730_v46 = vsub.f32 1.5, %v5729_v13 }
 0x609   :  { %v5695_v14 = vmul.f32 %v5692_v40, %v7034_v27  ;;  %v5774_v40 = vperm.slane %v7576_v21, 2  ;;  %v6088_v21 = vld [vmem:[#allocation11 + $0x70] sm:$0xff] }
 0x60a   :  { %v5731_v17 = vmul.f32 %v6236_v53, %v5730_v46 }
 0x60b   :  { %v6238_v37 = vpop.eup %6237  ;;  %v7580_v56 = vsub.f32 %v7563_v47, %v5695_v14 }
 0x60c   :  { %v5735_v2 = vsel %vm5734_vm0, %v6236_v53, %v5731_v17  ;;  %v5737_v3 = vmul.f32 %v6238_v37, %v7569_v6  ;;  %vm5743_vm1 = vweird.f32 %v6238_v37  ;;  %v5849_v53 = vld [vmem:[#allocation10 + $0x208] sm:$0xff] }
 0x60d   :  { %v5756_v55 = vmul.f32 %v5735_v2, %v7549_v59  ;;  %v5701_v41 = vmul.f32 %v7580_v56, %v7580_v56  ;;  %v5854_v59 = vld [vmem:[#allocation10 + $0x230] sm:$0xff]  ;;  %vm5744_vm3 = vmor %vm5742_vm2, %vm5743_vm1  ;;  %5995 = vmatpush.msrb.mxu0 %v5849_v53  ;;  %v6089_v2 = vld [vmem:[#allocation11 + $0x78] sm:$0xff] }
 0x60e   :  { %v5738_v42 = vmul.f32 %v6238_v37, %v5737_v3  ;;  %5932 = vmatpush.msra.mxu1 %v5854_v59 }
 0x60f   :  { %v5767_v48 = vmul.f32 %v5761_v7, %v5756_v55  ;;  %v5714_v35 = vrot.slane %v5701_v41, 4 }
 0x610   :  { %v5739_v36 = vmul.f32 0.5, %v5738_v42  ;;  %5933 = vmatpush.msra.mxu1 %v5852_v10 }
 0x611   :  { %v5778_v1 = vadd.f32 %v5772_v11, %v5767_v48  ;;  %v5715_v33 = vadd.f32 %v5714_v35, %v5701_v41  ;;  %v6086_v35 = vld [vmem:[#allocation11 + $0x60] sm:$0xff] }
 0x612   :  { %v5740_v12 = vsub.f32 1.5, %v5739_v36  ;;  %5934 = vmatpush.msra.mxu1 %v5850_v50  ;;  %v6099_v50 = vld [vmem:[#allocation11 + $0xc8] sm:$0xff] }
 0x613   :  { %v5781_v8 = vmax.f32 %v5778_v1, 0.0  ;;  %v5716_v47 = vrot.slane %v5715_v33, 2  ;;  %v6085_v1 = vld [vmem:[#allocation11 + $0x58] sm:$0xff] }
 0x614   :  { %v5741_v54 = vmul.f32 %v6238_v37, %v5740_v12  ;;  %5935 = vmatpush.msra.mxu1 %v5848_v0  ;;  %v6084_v12 = vld [vmem:[#allocation11 + $0x50] sm:$0xff] }
 0x615   :  { %v5717_v19 = vadd.f32 %v5716_v47, %v5715_v33  ;;  %5896 = vmatmul.f32.vlgmr.msrb.gmra.mxu3 %v5781_v8  ;;  %5956 = vmatmul.f32.vlgmr.msra.gmra.mxu2 %v5781_v8  ;;  %v6101_v33 = vld [vmem:[#allocation11 + $0xd8] sm:$0xff]  ;;  %v6100_v8 = vld [vmem:[#allocation11 + $0xd0] sm:$0xff] }
 0x616   :  { %v5745_v32 = vsel %vm5744_vm3, %v6238_v37, %v5741_v54  ;;  %6110 = vmatpush.msrb.mxu1 %v6089_v2 }
 0x617   :  { %v5757_v24 = vmul.f32 %v5745_v32, %v7555_v5  ;;  %v5718_v31 = vrot.slane %v5717_v19, 1 }
 0x618   :  { %6111 = vmatpush.msrb.mxu1 %v6088_v21 }
 0x619   :  { %v5768_v62 = vmul.f32 %v5762_v4, %v5757_v24  ;;  %v5719_v30 = vadd.f32 %v5718_v31, %v5717_v19  ;;  %v6082_v19 = vld [vmem:[#allocation11 + $0x40] sm:$0xff]  ;;  %v6081_v24 = vld [vmem:[#allocation11 + $0x38] sm:$0xff] }
 0x61a   :  { %6112 = vmatpush.msrb.mxu1 %v6087_v52  ;;  %v6097_v31 = vld [vmem:[#allocation11 + $0xb8] sm:$0xff] }
 0x61b   :  { %v5722_v28 = vmul.f32 %v5719_v30, %v7034_v27  ;;  %v5779_v45 = vadd.f32 %v5773_v26, %v5768_v62  ;;  %v6080_v62 = vld [vmem:[#allocation11 + $0x30] sm:$0xff] }
 0x61c   :  { %6113 = vmatpush.msrb.mxu1 %v6086_v35  ;;  %v6096_v30 = vld [vmem:[#allocation11 + $0xb0] sm:$0xff] }
 0x61d   :  { %v5725_v15 = vadd.f32 1e-05, %v5722_v28  ;;  %v5782_v6 = vmax.f32 %v5779_v45, 0.0 }
 0x61e   :  { %6114 = vmatpush.msrb.mxu1 %v6085_v1 }
 0x61f   :  { %6239 = vrsqrt.f32 %v5725_v15  ;;  %5916 = vmatmul.f32.vlgmr.msra.gmra.mxu0 %v5782_v6  ;;  %5976 = vmatmul.f32.vlgmr.msra.gmra.mxu3 %v5782_v6  ;;  %vm5752_vm5 = vweird.f32 %v5725_v15  ;;  %v6095_v6 = vld [vmem:[#allocation11 + $0xa8] sm:$0xff] }
 0x620   :  { %6115 = vmatpush.msrb.mxu1 %v6084_v12 }
 0x622   :  { %6116 = vmatpush.msrb.mxu1 %v6083_v22 }
 0x624   :  { %6117 = vmatpush.msrb.mxu1 %v6082_v19 }
 0x625   :  { %v6240_v9 = vpop.eup %6239 }
 0x626   :  { %v5747_v43 = vmul.f32 %v6240_v9, %v5725_v15  ;;  %vm5753_vm4 = vweird.f32 %v6240_v9  ;;  %6118 = vmatpush.msrb.mxu1 %v6081_v24  ;;  %v6079_v15 = vld [vmem:[#allocation11 + $0x28] sm:$0xff] }
 0x627   :  { %vm5754_vm6 = vmor %vm5752_vm5, %vm5753_vm4  ;;  %v6202_v24 = vld [vmem:[#allocation25] ss:$0 sm:$0xff] }
 0x628   :  { %v5748_v5 = vmul.f32 %v6240_v9, %v5747_v43  ;;  %6119 = vmatpush.msrb.mxu1 %v6080_v62 }
 0x62a   :  { %v5749_v57 = vmul.f32 0.5, %v5748_v5  ;;  %6120 = vmatpush.msrb.mxu1 %v6079_v15  ;;  %v6078_v5 = vld [vmem:[#allocation11 + $0x20] sm:$0xff] }
 0x62c   :  { %v5750_v34 = vsub.f32 1.5, %v5749_v57  ;;  %v6094_v57 = vld [vmem:[#allocation11 + $0xa0] sm:$0xff]  ;;  %6121 = vmatpush.msrb.mxu1 %v6078_v5 }
 0x62e   :  { %v5751_v61 = vmul.f32 %v6240_v9, %v5750_v34 }
 0x630   :  { %v5755_v60 = vsel %vm5754_vm6, %v6240_v9, %v5751_v61 }
 0x631   :  { %v5758_v13 = vmul.f32 %v5755_v60, %v7580_v56  ;;  %v6104_v56 = vld [vmem:[#allocation11 + $0xf0] sm:$0xff]  ;;  %v6093_v60 = vld [vmem:[#allocation11 + $0x98] sm:$0xff] }
 0x632   :  { %6131 = vmatpush.msrb.mxu2 %v6104_v56 }
 0x633   :  { %v5769_v63 = vmul.f32 %v5763_v51, %v5758_v13  ;;  %v6077_v51 = vld [vmem:[#allocation11 + $0x18] sm:$0xff] }
 0x634   :  { %6132 = vmatpush.msrb.mxu2 %v6103_v25  ;;  %6122 = vmatpush.msrb.mxu1 %v6077_v51 }
 0x635   :  { %v5780_v39 = vadd.f32 %v5774_v40, %v5769_v63  ;;  %v6076_v63 = vld [vmem:[#allocation11 + $0x10] sm:$0xff] }
 0x636   :  { %6133 = vmatpush.msrb.mxu2 %v6102_v49  ;;  %6123 = vmatpush.msrb.mxu1 %v6076_v63 }
 0x637   :  { %v5783_v46 = vmax.f32 %v5780_v39, 0.0  ;;  %v6092_v39 = vld [vmem:[#allocation11 + $0x90] sm:$0xff] }
 0x638   :  { %6134 = vmatpush.msrb.mxu2 %v6101_v33 }
 0x639   :  { %5936 = vmatmul.f32.vlgmr.msra.gmra.mxu1 %v5783_v46  ;;  %5996 = vmatmul.f32.vlgmr.msrb.gmra.mxu0 %v5783_v46 }
 0x63a   :  { %6135 = vmatpush.msrb.mxu2 %v6100_v8 }
 0x63c   :  { %6136 = vmatpush.msrb.mxu2 %v6099_v50 }
 0x63e   :  { %6137 = vmatpush.msrb.mxu2 %v6098_v58 }
 0x640   :  { %6138 = vmatpush.msrb.mxu2 %v6097_v31 }
 0x642   :  { %6139 = vmatpush.msrb.mxu2 %v6096_v30 }
 0x644   :  { %6140 = vmatpush.msrb.mxu2 %v6095_v6 }
 0x646   :  { %6141 = vmatpush.msrb.mxu2 %v6094_v57 }
 0x648   :  { %6142 = vmatpush.msrb.mxu2 %v6093_v60 }
 0x64a   :  { %6143 = vmatpush.msrb.mxu2 %v6092_v39 }
 0x698   :  { %v5897_v14 = vpop.f32.mrf.mxu3  ;;  %v5957_v17 = vpop.f32.mrf.mxu2 }
 0x69c   :  { %v5917_v23 = vpop.f32.mrf.mxu0 }
 0x69d   :  { %v5918_v37 = vadd.f32 %v5917_v23, %v5897_v14  ;;  %v6075_v23 = vld [vmem:[#allocation11 + $0x8] sm:$0xff] }
 0x69e   :  { %6124 = vmatpush.msrb.mxu1 %v6075_v23 }
 0x6a2   :  { %v5977_v16 = vpop.f32.mrf.mxu3 }
 0x6a3   :  { %v5978_v7 = vadd.f32 %v5977_v16, %v5957_v17  ;;  %v6091_v16 = vld [vmem:[#allocation11 + $0x88] sm:$0xff] }
 0x6a4   :  { %6144 = vmatpush.msrb.mxu2 %v6091_v16 }
 0x6b6   :  { %v5937_v38 = vpop.f32.mrf.mxu1  ;;  %v5997_v29 = vpop.f32.mrf.mxu0 }
 0x6b7   :  { %v5938_v3 = vadd.f32 %v5937_v38, %v5918_v37  ;;  %v5998_v55 = vadd.f32 %v5997_v29, %v5978_v7  ;;  %v6074_v7 = vld [vmem:[#allocation11] sm:$0xff] }
 0x6b8   :  { %v6090_v38 = vld [vmem:[#allocation11 + $0x80] sm:$0xff]  ;;  %6125 = vmatpush.msrb.mxu1 %v6074_v7 }
 0x6b9   :  { %v6000_v11 = vrot.slane %v5938_v3, 4  ;;  %v6006_v41 = vrot.slane %v5998_v55, 4  ;;  %6145 = vmatpush.msrb.mxu2 %v6090_v38 }
 0x6bb   :  { %v6001_v42 = vadd.f32 %v6000_v11, %v5938_v3  ;;  %v6007_v48 = vadd.f32 %v6006_v41, %v5998_v55 }
 0x6bd   :  { %v6002_v20 = vrot.slane %v6001_v42, 2  ;;  %v6008_v36 = vrot.slane %v6007_v48, 2 }
 0x6bf   :  { %v6003_v59 = vadd.f32 %v6002_v20, %v6001_v42  ;;  %v6009_v44 = vadd.f32 %v6008_v36, %v6007_v48  ;;  %v6056_v20 = vld [vmem:[#allocation22] sm:$0x3] }
 0x6c0   :  { %v6058_v33 = vperm.slane %v6056_v20, 0  ;;  %v6059_v12 = vperm.slane %v6056_v20, 1 }
 0x6c1   :  { %v6004_v47 = vrot.slane %v6003_v59, 1  ;;  %v6010_v10 = vrot.slane %v6009_v44, 1 }
 0x6c3   :  { %v6005_v54 = vadd.f32 %v6004_v47, %v6003_v59  ;;  %v6011_v4 = vadd.f32 %v6010_v10, %v6009_v44 }
 0x6c5   :  { %v6012_v0 = vmul.f32 %v6005_v54, %v7034_v27  ;;  %v6013_v32 = vmul.f32 %v6011_v4, %v7034_v27 }
 0x6c7   :  { %v7597_v26 = vsub.f32 %v5938_v3, %v6012_v0  ;;  %v7599_v53 = vsub.f32 %v5998_v55, %v6013_v32 }
 0x6c9   :  { %v6016_v28 = vmul.f32 %v7597_v26, %v7597_v26  ;;  %v6017_v45 = vmul.f32 %v7599_v53, %v7599_v53 }
 0x6cb   :  { %v6018_v9 = vrot.slane %v6016_v28, 4  ;;  %v6024_v43 = vrot.slane %v6017_v45, 4 }
 0x6cd   :  { %v6019_v34 = vadd.f32 %v6018_v9, %v6016_v28  ;;  %v6025_v61 = vadd.f32 %v6024_v43, %v6017_v45 }
 0x6cf   :  { %v6020_v13 = vrot.slane %v6019_v34, 2  ;;  %v6026_v40 = vrot.slane %v6025_v61, 2 }
 0x6d1   :  { %v6021_v46 = vadd.f32 %v6020_v13, %v6019_v34  ;;  %v6027_v14 = vadd.f32 %v6026_v40, %v6025_v61 }
 0x6d3   :  { %v6022_v17 = vrot.slane %v6021_v46, 1  ;;  %v6028_v37 = vrot.slane %v6027_v14, 1 }
 0x6d5   :  { %v6023_v29 = vadd.f32 %v6022_v17, %v6021_v46  ;;  %v6029_v2 = vadd.f32 %v6028_v37, %v6027_v14 }
 0x6d7   :  { %v6030_v18 = vmul.f32 %v6023_v29, %v7034_v27  ;;  %v6031_v3 = vmul.f32 %v6029_v2, %v7034_v27  ;;  %v6064_v27 = vld [vmem:[#allocation23] sm:$0x3] }
 0x6d8   :  { %v6066_v47 = vperm.slane %v6064_v27, 0  ;;  %v6067_v50 = vperm.slane %v6064_v27, 1 }
 0x6d9   :  { %v6032_v55 = vadd.f32 1e-05, %v6030_v18  ;;  %v6033_v21 = vadd.f32 1e-05, %v6031_v3 }
 0x6db   :  { %6241 = vrsqrt.f32 %v6032_v55  ;;  %vm6040_vm9 = vweird.f32 %v6032_v55  ;;  %vm6050_vm11 = vweird.f32 %v6033_v21 }
 0x6dc   :  { %6243 = vrsqrt.f32 %v6033_v21 }
 0x6e1   :  { %v6242_v56 = vpop.eup %6241 }
 0x6e2   :  { %v6244_v11 = vpop.eup %6243  ;;  %v6035_v41 = vmul.f32 %v6242_v56, %v6032_v55  ;;  %vm6041_vm7 = vweird.f32 %v6242_v56 }
 0x6e3   :  { %v6045_v52 = vmul.f32 %v6244_v11, %v6033_v21  ;;  %vm6051_vm8 = vweird.f32 %v6244_v11  ;;  %vm6042_vm10 = vmor %vm6040_vm9, %vm6041_vm7 }
 0x6e4   :  { %v6036_v25 = vmul.f32 %v6242_v56, %v6035_v41  ;;  %vm6052_vm12 = vmor %vm6050_vm11, %vm6051_vm8 }
 0x6e5   :  { %v6046_v42 = vmul.f32 %v6244_v11, %v6045_v52 }
 0x6e6   :  { %v6037_v48 = vmul.f32 0.5, %v6036_v25 }
 0x6e7   :  { %v6047_v35 = vmul.f32 0.5, %v6046_v42 }
 0x6e8   :  { %v6038_v49 = vsub.f32 1.5, %v6037_v48 }
 0x6e9   :  { %v6048_v36 = vsub.f32 1.5, %v6047_v35 }
 0x6ea   :  { %v6039_v1 = vmul.f32 %v6242_v56, %v6038_v49 }
 0x6eb   :  { %v6049_v59 = vmul.f32 %v6244_v11, %v6048_v36 }
 0x6ec   :  { %v6043_v44 = vsel %vm6042_vm10, %v6242_v56, %v6039_v1 }
 0x6ed   :  { %v6054_v8 = vmul.f32 %v6043_v44, %v7597_v26  ;;  %v6053_v10 = vsel %vm6052_vm12, %v6244_v11, %v6049_v59 }
 0x6ee   :  { %v6055_v22 = vmul.f32 %v6053_v10, %v7599_v53 }
 0x6ef   :  { %v6062_v54 = vmul.f32 %v6058_v33, %v6054_v8 }
 0x6f0   :  { %v6063_v4 = vmul.f32 %v6059_v12, %v6055_v22 }
 0x6f1   :  { %v6070_v19 = vadd.f32 %v6066_v47, %v6062_v54 }
 0x6f2   :  { %v6071_v58 = vadd.f32 %v6067_v50, %v6063_v4 }
 0x6f3   :  { %v6072_v0 = vmax.f32 %v6070_v19, 0.0 }
 0x6f4   :  { %v6073_v32 = vmax.f32 %v6071_v58, 0.0 }
 0x6f5   :  { %6126 = vmatmul.f32.vlgmr.msrb.gmra.mxu1 %v6072_v0 }
 0x6f6   :  { %6146 = vmatmul.f32.vlgmr.msrb.gmra.mxu2 %v6073_v32 }
 0x772   :  { %v6127_v31 = vpop.f32.mrf.mxu1 }
 0x773   :  { %v6128_v26 = vadd.f32 %v6202_v24, %v6127_v31 }
 0x779   :  { %v6147_v62 = vpop.f32.mrf.mxu2 }
 0x77a   :  { %v6148_v53 = vadd.f32 %v6147_v62, %v6128_v26 }
 0x77c   :  { %6150 = vst [vmem:[#allocation26] sm:$0xff] %v6148_v53 }
 0x77d   :  { %6161 = dma.vmem_to_hbm [thread:$0]  %s6157_s14, 128, %s6159_s19, [#allocation4]  }
 0x77e   :  { %6668 = dma.done.wait [#allocation4], 128  }
 0x77f   :  { %6669 = vsyncadd [#allocation4], 4294967168 }
 0x780   :  { %6166 = vsyncpa [#allocation3], 1 }
 0x781   :  { %6167 = vsyncpa [#allocation6], 1 }
 0x782   :  { %6168 = vsyncpa [#allocation9], 1 }
 0x783   :  { %6169 = vsyncpa [#allocation12], 1 }
 0x784   :  { %6170 = vsyncpa [#allocation15], 1 }
 0x785   :  { %6171 = vsyncpa [#allocation18], 1 }
 0x786   :  { %6172 = vsyncpa [#allocation21], 1 }
 0x787   :  { %6173 = vsyncpa [#allocation24], 1 }
 0x788   :  { %6174 = vsyncpa [#allocation4], 1 }

</bundles_post_ra>
